<compile_context>
chip_gen: v6e
topology: v6e:2x2x1
jax: 0.10.0
libtpu: 0.0.40
codegen_flags: <defaults>
</compile_context>

<pallas_src>
import jax
import jax.numpy as jnp
from jax.experimental import pallas as pl
from jax.experimental.pallas import tpu as pltpu


# ------------------------- layer geometry -------------------------

# Logical (PyTorch) dims and lane-aligned (multiple-of-128) padded dims.
_LAYER_DIMS = [(600, 1504), (1504, 1760), (1760, 736), (736, 1)]
_PAD_IN = [640, 1536, 1792, 768]
_PAD_OUT = [1536, 1792, 768, 128]


def _round_up(v, m):
    return (v + m - 1) // m * m


# ------------------------- fused Pallas kernel -------------------------

def _fused_mlp_kernel(alphas_ref,                     # SMEM (3,) f32 PReLU slopes
                      x_ref,                          # VMEM (TM, 640) bf16, per-tile
                      w1_ref, b1_ref,                 # VMEM residents (whole arrays)
                      w2_ref, b2_ref,
                      w3_ref, b3_ref,
                      w4_ref, b4_ref,
                      o_ref):                         # VMEM (TM, 128) f32
    """Whole 4-layer MLP on one batch tile.

    y_l = h @ W_l + b_l ; PReLU(y_l) with scalar alpha (layers 1..3).
    Weights are bf16, accumulation is f32 on the MXU; activations stay in
    VMEM/vregs between layers (bf16 between layers). Dropout = identity.
    """
    h = x_ref[...]                                    # bf16 (TM, 640)
    layers = ((w1_ref, b1_ref), (w2_ref, b2_ref), (w3_ref, b3_ref))
    for idx, (w_ref, b_ref) in enumerate(layers):
        y = jnp.dot(h, w_ref[...], preferred_element_type=jnp.float32)
        y = y + b_ref[...]                            # (1, out) broadcasts over batch
        a = alphas_ref[idx]                           # scalar PReLU slope from SMEM
        h = jnp.where(y > 0, y, a * y).astype(jnp.bfloat16)

    # Final layer: lane-dense (TM, 128) output; only column 0 is meaningful.
    y = jnp.dot(h, w4_ref[...], preferred_element_type=jnp.float32)
    o_ref[...] = y + b4_ref[...]


# ------------------------- parameters -------------------------

def init_params(key):
    """Deterministic init mirroring nn.Linear shapes; weights stored transposed
    (in, out), zero-padded to lane-aligned dims, and cast to bf16."""
    ws, bs = [], []
    for li, (d_in, d_out) in enumerate(_LAYER_DIMS):
        key, k_w, k_b = jax.random.split(key, 3)
        bound = 1.0 / (d_in ** 0.5)
        w = jax.random.uniform(k_w, (d_in, d_out), jnp.float32, -bound, bound)
        b = jax.random.uniform(k_b, (1, d_out), jnp.float32, -bound, bound)
        w_p = jnp.zeros((_PAD_IN[li], _PAD_OUT[li]), jnp.float32)
        w_p = w_p.at[:d_in, :d_out].set(w)
        b_p = jnp.zeros((1, _PAD_OUT[li]), jnp.float32)
        b_p = b_p.at[:, :d_out].set(b)
        ws.append(w_p.astype(jnp.bfloat16))           # bf16 weights (halve HBM bytes)
        bs.append(b_p)                                # f32 biases (added post-accum)
    alphas = jnp.full((3,), 0.25, jnp.float32)        # PyTorch PReLU default init
    return {"w": ws, "b": bs, "alphas": alphas}


# ------------------------- forward -------------------------

def _choose_tile_m(batch):
    """Batch tile: multiple of 16 (bf16 sublane pack), <=256 rows, and split
    into >=2 tiles when the batch allows so v7x's second TensorCore is used."""
    b16 = _round_up(batch, 16)
    if b16 <= 16:
        return b16
    half = _round_up((b16 + 1) // 2, 16)
    return min(256, half)


@jax.jit
def mtmodel_forward(x, params):
    """x: (B, 600) float32 -> (B, 1) float32."""
    B, d_in = x.shape
    tile_m = _choose_tile_m(B)
    b_pad = _round_up(B, tile_m)

    # Pad batch + features, stream x in bf16 (halves activation HBM read).
    x_p = jnp.pad(x.astype(jnp.float32),
                  ((0, b_pad - B), (0, _PAD_IN[0] - d_in))).astype(jnp.bfloat16)

    ws, bs, alphas = params["w"], params["b"], params["alphas"]
    grid = (b_pad // tile_m,)

    # Grid-invariant weights/biases: whole-array VMEM residents -> copied into
    # VMEM once, single-buffered (no 2x pipeline copies).
    vmem_resident = pl.BlockSpec(memory_space=pltpu.MemorySpace.VMEM)

    in_specs = [
        pl.BlockSpec(memory_space=pltpu.MemorySpace.SMEM),          # alphas (3,)
        pl.BlockSpec((tile_m, _PAD_IN[0]), lambda i: (i, 0)),       # x tile (bf16)
    ]
    for _ in range(4):
        in_specs.append(vmem_resident)                              # W_l
        in_specs.append(vmem_resident)                              # b_l

    out = pl.pallas_call(
        _fused_mlp_kernel,
        out_shape=jax.ShapeDtypeStruct((b_pad, _PAD_OUT[-1]), jnp.float32),
        grid=grid,
        in_specs=in_specs,
        out_specs=pl.BlockSpec((tile_m, _PAD_OUT[-1]), lambda i: (i, 0)),
        compiler_params=pltpu.CompilerParams(
            dimension_semantics=("parallel",),        # batch tiles are independent
            vmem_limit_bytes=32 * 1024 * 1024,        # ~13-14 MB actual footprint
        ),
    )(alphas, x_p,
      ws[0], bs[0], ws[1], bs[1], ws[2], bs[2], ws[3], bs[3])

    return out[:B, 0:1]                               # valid rows, valid column 0


# ------------------------- plain-JAX reference -------------------------

def _reference_forward(x, params):
    """Same math (bf16 weights/activations, f32 accumulation) in plain JAX."""
    h = jnp.pad(x.astype(jnp.float32),
                ((0, 0), (0, _PAD_IN[0] - x.shape[1]))).astype(jnp.bfloat16)
    for li in range(4):
        y = jnp.dot(h, params["w"][li],
                    preferred_element_type=jnp.float32) + params["b"][li]
        if li < 3:
            a = params["alphas"][li]
            h = jnp.where(y > 0, y, a * y).astype(jnp.bfloat16)
        else:
            h = y
    return h[:, 0:1]


if __name__ == "__main__":
    key = jax.random.PRNGKey(0)
    k_x, k_p = jax.random.split(key)

    batch = 8
    x = jax.random.normal(k_x, (batch, 600), jnp.float32)
    params = init_params(k_p)

    out = mtmodel_forward(x, params)
    out = jax.block_until_ready(out)

    ref = _reference_forward(x, params)
    assert out.shape == (batch, 1), out.shape
    assert jnp.allclose(out, ref, atol=2e-2, rtol=2e-2), "mismatch vs JAX reference"

    print("KERNEL_OK")
</pallas_src>

<mosaic_0001>
module attributes {stable_mosaic.version = 11 : i64} {
  func.func @_fused_mlp_kernel(%arg0: i32, %arg1: memref<3xf32, #tpu.memory_space<smem>>, %arg2: memref<16x640xbf16, #tpu.memory_space<vmem>>, %arg3: memref<640x1536xbf16, #tpu.memory_space<vmem>>, %arg4: memref<1x1536xf32, #tpu.memory_space<vmem>>, %arg5: memref<1536x1792xbf16, #tpu.memory_space<vmem>>, %arg6: memref<1x1792xf32, #tpu.memory_space<vmem>>, %arg7: memref<1792x768xbf16, #tpu.memory_space<vmem>>, %arg8: memref<1x768xf32, #tpu.memory_space<vmem>>, %arg9: memref<768x128xbf16, #tpu.memory_space<vmem>>, %arg10: memref<1x128xf32, #tpu.memory_space<vmem>>, %arg11: memref<16x128xf32, #tpu.memory_space<vmem>>) attributes {dimension_semantics = [#tpu.dimension_semantics<parallel>], iteration_bounds = array<i64: 1>, scalar_prefetch = 0 : i64, scratch_operands = 0 : i64, tpu.core_type = #tpu.core_type<tc>, window_params = [{transform_indices = @transform_0, window_bounds = array<i64: 3>}, {transform_indices = @transform_1, window_bounds = array<i64: 16, 640>}, {pipeline_mode = #tpu.pipeline_mode<synchronous>, transform_indices = @transform_2, window_bounds = array<i64: 640, 1536>}, {pipeline_mode = #tpu.pipeline_mode<synchronous>, transform_indices = @transform_3, window_bounds = array<i64: 1, 1536>}, {pipeline_mode = #tpu.pipeline_mode<synchronous>, transform_indices = @transform_4, window_bounds = array<i64: 1536, 1792>}, {pipeline_mode = #tpu.pipeline_mode<synchronous>, transform_indices = @transform_5, window_bounds = array<i64: 1, 1792>}, {pipeline_mode = #tpu.pipeline_mode<synchronous>, transform_indices = @transform_6, window_bounds = array<i64: 1792, 768>}, {pipeline_mode = #tpu.pipeline_mode<synchronous>, transform_indices = @transform_7, window_bounds = array<i64: 1, 768>}, {pipeline_mode = #tpu.pipeline_mode<synchronous>, transform_indices = @transform_8, window_bounds = array<i64: 768, 128>}, {pipeline_mode = #tpu.pipeline_mode<synchronous>, transform_indices = @transform_9, window_bounds = array<i64: 1, 128>}, {transform_indices = @transform_10, window_bounds = array<i64: 16, 128>}]} {
    %c0 = arith.constant 0 : index
    %c0_0 = arith.constant 0 : index
    %0 = vector.load %arg2[%c0, %c0_0] : memref<16x640xbf16, #tpu.memory_space<vmem>>, vector<16x640xbf16>
    %c0_1 = arith.constant 0 : index
    %c0_2 = arith.constant 0 : index
    %1 = vector.load %arg3[%c0_1, %c0_2] : memref<640x1536xbf16, #tpu.memory_space<vmem>>, vector<640x1536xbf16>
    %cst = arith.constant dense<0.000000e+00> : vector<16x1536xf32>
    %2 = tpu.matmul %0, %1, %cst {dimension_numbers = #tpu.dot_dimension_numbers<[1], [0], [0], [1], [0, 0, 1, 1], [], []>} : vector<16x640xbf16>, vector<640x1536xbf16>, vector<16x1536xf32> -> vector<16x1536xf32>
    %c0_3 = arith.constant 0 : index
    %c0_4 = arith.constant 0 : index
    %3 = vector.load %arg4[%c0_3, %c0_4] : memref<1x1536xf32, #tpu.memory_space<vmem>>, vector<1x1536xf32>
    %4 = vector.broadcast %3 : vector<1x1536xf32> to vector<16x1536xf32>
    %5 = arith.addf %2, %4 : vector<16x1536xf32>
    %c0_5 = arith.constant 0 : index
    %6 = memref.load %arg1[%c0_5] : memref<3xf32, #tpu.memory_space<smem>>
    %cst_6 = arith.constant 0.000000e+00 : f32
    %7 = vector.broadcast %cst_6 : f32 to vector<16x1536xf32>
    %8 = arith.cmpf ogt, %5, %7 : vector<16x1536xf32>
    %9 = vector.broadcast %6 : f32 to vector<16x1536xf32>
    %10 = arith.mulf %9, %5 : vector<16x1536xf32>
    %11 = arith.select %8, %5, %10 : vector<16x1536xi1>, vector<16x1536xf32>
    %12 = arith.truncf %11 : vector<16x1536xf32> to vector<16x1536xbf16>
    %c0_7 = arith.constant 0 : index
    %c0_8 = arith.constant 0 : index
    %13 = vector.load %arg5[%c0_7, %c0_8] : memref<1536x1792xbf16, #tpu.memory_space<vmem>>, vector<1536x1792xbf16>
    %cst_9 = arith.constant dense<0.000000e+00> : vector<16x1792xf32>
    %14 = tpu.matmul %12, %13, %cst_9 {dimension_numbers = #tpu.dot_dimension_numbers<[1], [0], [0], [1], [0, 0, 1, 1], [], []>} : vector<16x1536xbf16>, vector<1536x1792xbf16>, vector<16x1792xf32> -> vector<16x1792xf32>
    %c0_10 = arith.constant 0 : index
    %c0_11 = arith.constant 0 : index
    %15 = vector.load %arg6[%c0_10, %c0_11] : memref<1x1792xf32, #tpu.memory_space<vmem>>, vector<1x1792xf32>
    %16 = vector.broadcast %15 : vector<1x1792xf32> to vector<16x1792xf32>
    %17 = arith.addf %14, %16 : vector<16x1792xf32>
    %c1 = arith.constant 1 : index
    %18 = memref.load %arg1[%c1] : memref<3xf32, #tpu.memory_space<smem>>
    %cst_12 = arith.constant 0.000000e+00 : f32
    %19 = vector.broadcast %cst_12 : f32 to vector<16x1792xf32>
    %20 = arith.cmpf ogt, %17, %19 : vector<16x1792xf32>
    %21 = vector.broadcast %18 : f32 to vector<16x1792xf32>
    %22 = arith.mulf %21, %17 : vector<16x1792xf32>
    %23 = arith.select %20, %17, %22 : vector<16x1792xi1>, vector<16x1792xf32>
    %24 = arith.truncf %23 : vector<16x1792xf32> to vector<16x1792xbf16>
    %c0_13 = arith.constant 0 : index
    %c0_14 = arith.constant 0 : index
    %25 = vector.load %arg7[%c0_13, %c0_14] : memref<1792x768xbf16, #tpu.memory_space<vmem>>, vector<1792x768xbf16>
    %cst_15 = arith.constant dense<0.000000e+00> : vector<16x768xf32>
    %26 = tpu.matmul %24, %25, %cst_15 {dimension_numbers = #tpu.dot_dimension_numbers<[1], [0], [0], [1], [0, 0, 1, 1], [], []>} : vector<16x1792xbf16>, vector<1792x768xbf16>, vector<16x768xf32> -> vector<16x768xf32>
    %c0_16 = arith.constant 0 : index
    %c0_17 = arith.constant 0 : index
    %27 = vector.load %arg8[%c0_16, %c0_17] : memref<1x768xf32, #tpu.memory_space<vmem>>, vector<1x768xf32>
    %28 = vector.broadcast %27 : vector<1x768xf32> to vector<16x768xf32>
    %29 = arith.addf %26, %28 : vector<16x768xf32>
    %c2 = arith.constant 2 : index
    %30 = memref.load %arg1[%c2] : memref<3xf32, #tpu.memory_space<smem>>
    %cst_18 = arith.constant 0.000000e+00 : f32
    %31 = vector.broadcast %cst_18 : f32 to vector<16x768xf32>
    %32 = arith.cmpf ogt, %29, %31 : vector<16x768xf32>
    %33 = vector.broadcast %30 : f32 to vector<16x768xf32>
    %34 = arith.mulf %33, %29 : vector<16x768xf32>
    %35 = arith.select %32, %29, %34 : vector<16x768xi1>, vector<16x768xf32>
    %36 = arith.truncf %35 : vector<16x768xf32> to vector<16x768xbf16>
    %c0_19 = arith.constant 0 : index
    %c0_20 = arith.constant 0 : index
    %37 = vector.load %arg9[%c0_19, %c0_20] : memref<768x128xbf16, #tpu.memory_space<vmem>>, vector<768x128xbf16>
    %cst_21 = arith.constant dense<0.000000e+00> : vector<16x128xf32>
    %38 = tpu.matmul %36, %37, %cst_21 {dimension_numbers = #tpu.dot_dimension_numbers<[1], [0], [0], [1], [0, 0, 1, 1], [], []>} : vector<16x768xbf16>, vector<768x128xbf16>, vector<16x128xf32> -> vector<16x128xf32>
    %c0_22 = arith.constant 0 : index
    %c0_23 = arith.constant 0 : index
    %39 = vector.load %arg10[%c0_22, %c0_23] : memref<1x128xf32, #tpu.memory_space<vmem>>, vector<1x128xf32>
    %40 = vector.broadcast %39 : vector<1x128xf32> to vector<16x128xf32>
    %41 = arith.addf %38, %40 : vector<16x128xf32>
    %c0_24 = arith.constant 0 : index
    %c0_25 = arith.constant 0 : index
    %42 = vector.load %arg11[%c0_24, %c0_25] : memref<16x128xf32, #tpu.memory_space<vmem>>, vector<16x128xf32>
    tpu.vector_store %arg11[%c0_24, %c0_25], %41 {strides = array<i32>} : memref<16x128xf32, #tpu.memory_space<vmem>>, vector<16x128xf32>,
    return
  }
  func.func @transform_0(%arg0: i32) -> i32 {
    %c0_i32 = arith.constant 0 : i32
    %c0_i32_0 = arith.constant 0 : i32
    return %c0_i32 : i32
  }
  func.func @transform_1(%arg0: i32) -> (i32, i32) {
    %c0_i32 = arith.constant 0 : i32
    %c0_i32_0 = arith.constant 0 : i32
    return %arg0, %c0_i32 : i32, i32
  }
  func.func @transform_2(%arg0: i32) -> (i32, i32) {
    %c0_i32 = arith.constant 0 : i32
    %c0_i32_0 = arith.constant 0 : i32
    %c0_i32_1 = arith.constant 0 : i32
    return %c0_i32, %c0_i32_0 : i32, i32
  }
  func.func @transform_3(%arg0: i32) -> (i32, i32) {
    %c0_i32 = arith.constant 0 : i32
    %c0_i32_0 = arith.constant 0 : i32
    %c0_i32_1 = arith.constant 0 : i32
    return %c0_i32, %c0_i32_0 : i32, i32
  }
  func.func @transform_4(%arg0: i32) -> (i32, i32) {
    %c0_i32 = arith.constant 0 : i32
    %c0_i32_0 = arith.constant 0 : i32
    %c0_i32_1 = arith.constant 0 : i32
    return %c0_i32, %c0_i32_0 : i32, i32
  }
  func.func @transform_5(%arg0: i32) -> (i32, i32) {
    %c0_i32 = arith.constant 0 : i32
    %c0_i32_0 = arith.constant 0 : i32
    %c0_i32_1 = arith.constant 0 : i32
    return %c0_i32, %c0_i32_0 : i32, i32
  }
  func.func @transform_6(%arg0: i32) -> (i32, i32) {
    %c0_i32 = arith.constant 0 : i32
    %c0_i32_0 = arith.constant 0 : i32
    %c0_i32_1 = arith.constant 0 : i32
    return %c0_i32, %c0_i32_0 : i32, i32
  }
  func.func @transform_7(%arg0: i32) -> (i32, i32) {
    %c0_i32 = arith.constant 0 : i32
    %c0_i32_0 = arith.constant 0 : i32
    %c0_i32_1 = arith.constant 0 : i32
    return %c0_i32, %c0_i32_0 : i32, i32
  }
  func.func @transform_8(%arg0: i32) -> (i32, i32) {
    %c0_i32 = arith.constant 0 : i32
    %c0_i32_0 = arith.constant 0 : i32
    %c0_i32_1 = arith.constant 0 : i32
    return %c0_i32, %c0_i32_0 : i32, i32
  }
  func.func @transform_9(%arg0: i32) -> (i32, i32) {
    %c0_i32 = arith.constant 0 : i32
    %c0_i32_0 = arith.constant 0 : i32
    %c0_i32_1 = arith.constant 0 : i32
    return %c0_i32, %c0_i32_0 : i32, i32
  }
  func.func @transform_10(%arg0: i32) -> (i32, i32) {
    %c0_i32 = arith.constant 0 : i32
    %c0_i32_0 = arith.constant 0 : i32
    return %arg0, %c0_i32 : i32, i32
  }
}

</mosaic_0001>

<bundles_post_ra>
// kernel: mtmodel_forward.1
= control target key start
LH: loop header
LB: loop body
LE: loop exit
PB: predicated region body
PF: predicated region fallthrough
CT: control target
= control target key end

     0   :  { %15 = vsyncpa [#allocation4], 0  ;;  %s27318_s0 = inlined_call_operand.hbm [shape: f32[3], index: 0, kind: input, shape index: {}]   ;;  %s27319_s1 = inlined_call_operand.vmem [shape: bf16[16,640], index: 1, kind: input, shape index: {}]   ;;  %s27320_s2 = inlined_call_operand.hbm [shape: bf16[640,1536], index: 2, kind: input, shape index: {}]   ;;  %s27321_s3 = inlined_call_operand.hbm [shape: f32[1,1536], index: 3, kind: input, shape index: {}]   ;;  %s27322_s4 = inlined_call_operand.hbm [shape: bf16[1536,1792], index: 4, kind: input, shape index: {}]   ;;  %s27323_s5 = inlined_call_operand.hbm [shape: f32[1,1792], index: 5, kind: input, shape index: {}]   ;;  %s27324_s6 = inlined_call_operand.hbm [shape: bf16[1792,768], index: 6, kind: input, shape index: {}]   ;;  %s27325_s7 = inlined_call_operand.hbm [shape: f32[1,768], index: 7, kind: input, shape index: {}]   ;;  %s27326_s8 = inlined_call_operand.hbm [shape: bf16[768,128], index: 8, kind: input, shape index: {}]   ;;  %s27327_s9 = inlined_call_operand.hbm [shape: f32[1,128], index: 9, kind: input, shape index: {}]   ;;  %s27328_s10 = inlined_call_operand.vmem [shape: f32[16,128], index: 10, kind: output, shape index: {}]  }
   0x1   :  { %16 = vsyncpa [#allocation3], 0 }
   0x2   :  { %17 = vsyncpa [#allocation7], 0 }
   0x3   :  { %18 = vsyncpa [#allocation10], 0 }
   0x4   :  { %19 = vsyncpa [#allocation13], 0 }
   0x5   :  { %20 = vsyncpa [#allocation16], 0  ;;  %s26197_s13 = smov [#allocation6]   ;;  %s26198_s15 = smov [#allocation9]  }
   0x6   :  { %s49_s14 = sshll.u32 %s26197_s13, 4  ;;  %s71_s16 = sshll.u32 %s26198_s15, 4  ;;  %s50_s14 = int_to_ptr.vmem [resolvable:$true] %s49_s14  ;;  %s72_s16 = int_to_ptr.vmem [resolvable:$true] %s71_s16 }
   0x7   :  { %s26025_s17 = scalar_lea.vmem %s50_s14, 192  ;;  %p26030_p1 = scmp.lt.s32.totalorder %s50_s14, %s50_s14 }
   0x8   :  { %p26026_p0 = scmp.ne.s32.totalorder %s50_s14, %s26025_s17  ;;  %p26031_p2 = scmp.lt.s32.totalorder %s26025_s17, %s26025_s17 }
   0xa   :  { %p26032_p3 = por %p26031_p2, %p26030_p1 }
   0xc   :  { %p26033_p4 = pnand %p26032_p3, %p26026_p0 }
   0xe   :  { %26036 = shalt.err (!%p26033_p4)
}
   0xf   :  { %52 = dma.hbm_to_vmem [thread:$0]  %s27321_s3, 192, %s50_s14, [#allocation7]  }
  0x10   :  { %s26045_s20 = scalar_lea.vmem %s72_s16, 224  ;;  %p26050_p6 = scmp.lt.s32.totalorder %s72_s16, %s72_s16 }
  0x11   :  { %p26046_p5 = scmp.ne.s32.totalorder %s72_s16, %s26045_s20  ;;  %p26051_p7 = scmp.lt.s32.totalorder %s26045_s20, %s26045_s20 }
  0x13   :  { %p26052_p8 = por %p26051_p7, %p26050_p6 }
  0x15   :  { %p26053_p9 = pnand %p26052_p8, %p26046_p5 }
  0x17   :  { %26056 = shalt.err (!%p26053_p9)
}
  0x18   :  { %74 = dma.hbm_to_vmem [thread:$0]  %s27323_s5, 224, %s72_s16, [#allocation10]  }
  0x19   :  { %s26199_s23 = smov [#allocation12]   ;;  %s26200_s25 = smov [#allocation5]  }
  0x1a   :  { %s93_s24 = sshll.u32 %s26199_s23, 4  ;;  %s36_s26 = sshll.u32 %s26200_s25, 4  ;;  %s94_s24 = int_to_ptr.vmem [resolvable:$true] %s93_s24  ;;  %s37_s26 = int_to_ptr.vmem [resolvable:$true] %s36_s26 }
  0x1b   :  { %s26065_s27 = scalar_lea.vmem %s94_s24, 96  ;;  %p26070_p11 = scmp.lt.s32.totalorder %s94_s24, %s94_s24 }
  0x1c   :  { %p26066_p10 = scmp.ne.s32.totalorder %s94_s24, %s26065_s27  ;;  %p26071_p12 = scmp.lt.s32.totalorder %s26065_s27, %s26065_s27 }
  0x1e   :  { %p26072_p13 = por %p26071_p12, %p26070_p11 }
  0x20   :  { %p26073_p0 = pnand %p26072_p13, %p26066_p10 }
  0x22   :  { %26076 = shalt.err (!%p26073_p0)
}
  0x23   :  { %96 = dma.hbm_to_vmem [thread:$0]  %s27325_s7, 96, %s94_s24, [#allocation13]  }
  0x24   :  { %s26201_s29 = smov [#allocation2]   ;;  %s26093_s5 = scalar_lea.vmem %s37_s26, 61440 }
  0x25   :  { %28 = dma.hbm_to_smem %s27318_s0, 16, %s26201_s29, [#allocation4]  }
  0x26   :  { %p26094_p1 = scmp.ne.s32.totalorder %s37_s26, %s26093_s5  ;;  %p26098_p2 = scmp.lt.s32.totalorder %s37_s26, %s37_s26 }
  0x27   :  { %p26099_p3 = scmp.lt.s32.totalorder %s26093_s5, %s26093_s5 }
  0x29   :  { %p26100_p4 = por %p26099_p3, %p26098_p2 }
  0x2b   :  { %p26101_p5 = pnand %p26100_p4, %p26094_p1 }
  0x2d   :  { %26104 = shalt.err (!%p26101_p5)
}
  0x2e   :  { %s26202_s12 = smov 768   ;;  %s26203_s13 = smov 48  }
  0x2f   :  { %42 = dma.hbm_to_vmem [thread:$0]  %s27320_s2, 61440, %s37_s26, [#allocation3], %s26202_s12, %s26202_s12, %s26203_s13  }
  0x30   :  { %s26204_s7 = smov [#allocation8]  }
  0x31   :  { %s58_s16 = sshll.u32 %s26204_s7, 4  ;;  %s59_s16 = int_to_ptr.vmem [resolvable:$true] %s58_s16 }
  0x32   :  { %s26113_s17 = scalar_lea.vmem %s59_s16, 172032  ;;  %p26118_p7 = scmp.lt.s32.totalorder %s59_s16, %s59_s16 }
  0x33   :  { %p26114_p6 = scmp.ne.s32.totalorder %s59_s16, %s26113_s17  ;;  %p26119_p8 = scmp.lt.s32.totalorder %s26113_s17, %s26113_s17 }
  0x35   :  { %p26120_p9 = por %p26119_p8, %p26118_p7 }
  0x37   :  { %p26121_p10 = pnand %p26120_p9, %p26114_p6 }
  0x39   :  { %26124 = shalt.err (!%p26121_p10)
}
  0x3a   :  { %s26205_s0 = smov 896   ;;  %s26206_s18 = smov 56  }
  0x3b   :  { %64 = dma.hbm_to_vmem [thread:$0]  %s27322_s4, 172032, %s59_s16, [#allocation7], %s26205_s0, %s26205_s0, %s26206_s18  }
  0x3c   :  { %s26207_s21 = smov [#allocation11]  }
  0x3d   :  { %s80_s22 = sshll.u32 %s26207_s21, 4  ;;  %s81_s22 = int_to_ptr.vmem [resolvable:$true] %s80_s22 }
  0x3e   :  { %s26133_s2 = scalar_lea.vmem %s81_s22, 86016  ;;  %p26138_p12 = scmp.lt.s32.totalorder %s81_s22, %s81_s22 }
  0x3f   :  { %p26134_p11 = scmp.ne.s32.totalorder %s81_s22, %s26133_s2  ;;  %p26139_p13 = scmp.lt.s32.totalorder %s26133_s2, %s26133_s2 }
  0x41   :  { %p26140_p0 = por %p26139_p13, %p26138_p12 }
  0x43   :  { %p26141_p1 = pnand %p26140_p0, %p26134_p11 }
  0x45   :  { %26144 = shalt.err (!%p26141_p1)
}
  0x46   :  { %s26208_s23 = smov 384   ;;  %s26209_s24 = smov 24  }
  0x47   :  { %86 = dma.hbm_to_vmem [thread:$0]  %s27324_s6, 86016, %s81_s22, [#allocation10], %s26208_s23, %s26208_s23, %s26209_s24  }
  0x48   :  { %s26210_s27 = smov [#allocation14]  }
  0x49   :  { %s102_s3 = sshll.u32 %s26210_s27, 4  ;;  %s103_s3 = int_to_ptr.vmem [resolvable:$true] %s102_s3 }
  0x4a   :  { %s26153_s4 = scalar_lea.vmem %s103_s3, 6144  ;;  %p26158_p3 = scmp.lt.s32.totalorder %s103_s3, %s103_s3 }
  0x4b   :  { %p26154_p2 = scmp.ne.s32.totalorder %s103_s3, %s26153_s4  ;;  %p26159_p4 = scmp.lt.s32.totalorder %s26153_s4, %s26153_s4 }
  0x4d   :  { %p26160_p5 = por %p26159_p4, %p26158_p3 }
  0x4f   :  { %p26161_p6 = pnand %p26160_p5, %p26154_p2 }
  0x51   :  { %26164 = shalt.err (!%p26161_p6)
}
  0x52   :  { %s26211_s28 = smov 64   ;;  %s26212_s29 = smov 4  }
  0x53   :  { %108 = dma.hbm_to_vmem [thread:$0]  %s27326_s8, 6144, %s103_s3, [#allocation13], %s26211_s28, %s26211_s28, %s26212_s29  }
  0x54   :  { %s26213_s5 = smov [#allocation15]  }
  0x55   :  { %s115_s12 = sshll.u32 %s26213_s5, 4  ;;  %s116_s12 = int_to_ptr.vmem [resolvable:$true] %s115_s12 }
  0x56   :  { %s26173_s6 = scalar_lea.vmem %s116_s12, 16  ;;  %s26177_s13 = scalar_lea.vmem %s116_s12, 32 }
  0x57   :  { %p26174_p7 = scmp.ne.s32.totalorder %s116_s12, %s26173_s6  ;;  %p26178_p8 = scmp.lt.s32.totalorder %s116_s12, %s116_s12 }
  0x58   :  { %p26179_p9 = scmp.lt.s32.totalorder %s26177_s13, %s26173_s6 }
  0x5a   :  { %p26180_p10 = por %p26179_p9, %p26178_p8 }
  0x5c   :  { %p26181_p11 = pnand %p26180_p10, %p26174_p7 }
  0x5e   :  { %26184 = shalt.err (!%p26181_p11)
}
  0x5f   :  { %118 = dma.hbm_to_vmem [thread:$0]  %s27327_s9, 16, %s116_s12, [#allocation16]  }
  0x60   :  { %26185 = dma.done.wait [#allocation4], 16  }
  0x61   :  { %26186 = vsyncadd [#allocation4], 4294967280 }
  0x62   :  { %26187 = dma.done.wait [#allocation3], 61440  }
  0x63   :  { %26188 = vsyncadd [#allocation3], 4294905856 }
  0x64   :  { %26189 = dma.done.wait [#allocation7], 172224  }
  0x65   :  { %26190 = vsyncadd [#allocation7], 4294795072 }
  0x66   :  { %26191 = dma.done.wait [#allocation10], 86240  }
  0x67   :  { %26192 = vsyncadd [#allocation10], 4294881056 }
  0x68   :  { %26193 = dma.done.wait [#allocation13], 6240  }
  0x69   :  { %26194 = vsyncadd [#allocation13], 4294961056 }
  0x6a   :  { %26195 = dma.done.wait [#allocation16], 16  }
  0x6b   :  { %26196 = vsyncadd [#allocation16], 4294967280 }
  0x6c   :  { %146 = sfence }
  0x6d   :  { %v22201_v0 = vld [vmem:[#allocation5 + $0x2a4] ss:$48 sps:$4 sm:$0xff]   ;;  %v22205_v2 = vld [vmem:[#allocation5 + $0x2a0] ss:$48 sps:$4 sm:$0xff]   ;;  %s3898_s29 = sld [smem:[#allocation2]] }
  0x6e   :  { %v22203_v1 = vld [vmem:[#allocation5 + $0x8a4] ss:$48 sps:$4 sm:$0xff]   ;;  %3124 = vmatprep.subr.bf16.mxu0 %v22201_v0  ;;  %v22206_v3 = vld [vmem:[#allocation5 + $0x8a0] ss:$48 sps:$4 sm:$0xff]   ;;  %s27211_s7 = sld [smem:[#allocation2 + $0x2]] }
  0x6f   :  { %3167 = vmatprep.subr.bf16.mxu1 %v22203_v1  ;;  %v22207_v4 = vld [vmem:[#allocation5 + $0x244] ss:$48 sps:$4 sm:$0xff]   ;;  %3125 = vmatpush1.bf16.msra.mxu0 %v22205_v2  ;;  %v22211_v6 = vld [vmem:[#allocation5 + $0x240] ss:$48 sps:$4 sm:$0xff]  }
  0x70   :  { %3168 = vmatpush1.bf16.msra.mxu1 %v22206_v3  ;;  %v22209_v5 = vld [vmem:[#allocation5 + $0x844] ss:$48 sps:$4 sm:$0xff]   ;;  %3126 = vmatprep.subr.bf16.mxu0 %v22207_v4  ;;  %v22212_v7 = vld [vmem:[#allocation5 + $0x840] ss:$48 sps:$4 sm:$0xff]   ;;  %v22307_v3 = vld [vmem:[#allocation5 + $0x2ac] ss:$48 sps:$4 sm:$0xff]  }
  0x71   :  { %3169 = vmatprep.subr.bf16.mxu1 %v22209_v5  ;;  %v22213_v8 = vld [vmem:[#allocation5 + $0x1e4] ss:$48 sps:$4 sm:$0xff]   ;;  %v22217_v10 = vld [vmem:[#allocation5 + $0x1e0] ss:$48 sps:$4 sm:$0xff]  }
  0x72   :  { %v22215_v9 = vld [vmem:[#allocation5 + $0x7e4] ss:$48 sps:$4 sm:$0xff]   ;;  %v22218_v11 = vld [vmem:[#allocation5 + $0x7e0] ss:$48 sps:$4 sm:$0xff]  }
  0x73   :  { %3127 = vmatpush1.bf16.msra.mxu0 %v22211_v6  ;;  %v22219_v12 = vld [vmem:[#allocation5 + $0x184] ss:$48 sps:$4 sm:$0xff]   ;;  %v22223_v14 = vld [vmem:[#allocation5 + $0x180] ss:$48 sps:$4 sm:$0xff]   ;;  %v22305_v6 = vld [vmem:[#allocation5 + $0x2a8] ss:$48 sps:$4 sm:$0xff]  }
  0x74   :  { %3170 = vmatpush1.bf16.msra.mxu1 %v22212_v7  ;;  %3128 = vmatprep.subr.bf16.mxu0 %v22213_v8  ;;  %v22221_v13 = vld [vmem:[#allocation5 + $0x784] ss:$48 sps:$4 sm:$0xff]   ;;  %v22224_v15 = vld [vmem:[#allocation5 + $0x780] ss:$48 sps:$4 sm:$0xff]   ;;  %v26317_v7 = vld [vmem:[%s27319_s1 + $0x8] ss:$20 sps:$4 sm:$0xff]  }
  0x75   :  { %3171 = vmatprep.subr.bf16.mxu1 %v22215_v9  ;;  %v22225_v16 = vld [vmem:[#allocation5 + $0x124] ss:$48 sps:$4 sm:$0xff]   ;;  %v22229_v18 = vld [vmem:[#allocation5 + $0x120] ss:$48 sps:$4 sm:$0xff]   ;;  %v22314_v9 = vld [vmem:[#allocation5 + $0x24c] ss:$48 sps:$4 sm:$0xff]  }
  0x76   :  { %v22227_v17 = vld [vmem:[#allocation5 + $0x724] ss:$48 sps:$4 sm:$0xff]   ;;  %v22230_v19 = vld [vmem:[#allocation5 + $0x720] ss:$48 sps:$4 sm:$0xff]  }
  0x77   :  { %3129 = vmatpush1.bf16.msra.mxu0 %v22217_v10  ;;  %v22231_v20 = vld [vmem:[#allocation5 + $0xc4] ss:$48 sps:$4 sm:$0xff]   ;;  %v22235_v22 = vld [vmem:[#allocation5 + $0xc0] ss:$48 sps:$4 sm:$0xff]  }
  0x78   :  { %3172 = vmatpush1.bf16.msra.mxu1 %v22218_v11  ;;  %3130 = vmatprep.subr.bf16.mxu0 %v22219_v12  ;;  %v22233_v21 = vld [vmem:[#allocation5 + $0x6c4] ss:$48 sps:$4 sm:$0xff]   ;;  %v22236_v23 = vld [vmem:[#allocation5 + $0x6c0] ss:$48 sps:$4 sm:$0xff]   ;;  %v22312_v11 = vld [vmem:[#allocation5 + $0x248] ss:$48 sps:$4 sm:$0xff]  }
  0x79   :  { %3173 = vmatprep.subr.bf16.mxu1 %v22221_v13  ;;  %v22237_v24 = vld [vmem:[#allocation5 + $0x64] ss:$48 sps:$4 sm:$0xff]   ;;  %v22241_v26 = vld [vmem:[#allocation5 + $0x60] ss:$48 sps:$4 sm:$0xff]   ;;  %v22320_v13 = vld [vmem:[#allocation5 + $0x1ec] ss:$48 sps:$4 sm:$0xff]  }
  0x7a   :  { %v22239_v25 = vld [vmem:[#allocation5 + $0x664] ss:$48 sps:$4 sm:$0xff]   ;;  %v22242_v27 = vld [vmem:[#allocation5 + $0x660] ss:$48 sps:$4 sm:$0xff]  }
  0x7b   :  { %3131 = vmatpush1.bf16.msra.mxu0 %v22223_v14  ;;  %v22243_v28 = vld [vmem:[#allocation5 + $0x4] ss:$48 sps:$4 sm:$0xff]   ;;  %v22247_v30 = vld [vmem:[#allocation5] ss:$48 sps:$4 sm:$0xff]   ;;  %v26214_v14 = vmov 0  }
  0x7c   :  { %3174 = vmatpush1.bf16.msra.mxu1 %v22224_v15  ;;  %3132 = vmatprep.subr.bf16.mxu0 %v22225_v16  ;;  %v22245_v29 = vld [vmem:[#allocation5 + $0x604] ss:$48 sps:$4 sm:$0xff]   ;;  %v22248_v31 = vld [vmem:[#allocation5 + $0x600] ss:$48 sps:$4 sm:$0xff]   ;;  %v22318_v16 = vld [vmem:[#allocation5 + $0x1e8] ss:$48 sps:$4 sm:$0xff]  }
  0x7d   :  { %3175 = vmatprep.subr.bf16.mxu1 %v22227_v17  ;;  %v22249_v32 = vld [vmem:[#allocation5 + $0x5a4] ss:$48 sps:$4 sm:$0xff]   ;;  %v22253_v34 = vld [vmem:[#allocation5 + $0x5a0] ss:$48 sps:$4 sm:$0xff]  }
  0x7e   :  { %v22251_v33 = vld [vmem:[#allocation5 + $0xba4] ss:$48 sps:$4 sm:$0xff]   ;;  %v22254_v35 = vld [vmem:[#allocation5 + $0xba0] ss:$48 sps:$4 sm:$0xff]  }
  0x7f   :  { %3133 = vmatpush1.bf16.msra.mxu0 %v22229_v18  ;;  %v22255_v36 = vld [vmem:[#allocation5 + $0x544] ss:$48 sps:$4 sm:$0xff]   ;;  %v22259_v38 = vld [vmem:[#allocation5 + $0x540] ss:$48 sps:$4 sm:$0xff]   ;;  %v22326_v18 = vld [vmem:[#allocation5 + $0x18c] ss:$48 sps:$4 sm:$0xff]  }
  0x80   :  { %3176 = vmatpush1.bf16.msra.mxu1 %v22230_v19  ;;  %3134 = vmatprep.subr.bf16.mxu0 %v22231_v20  ;;  %v22257_v37 = vld [vmem:[#allocation5 + $0xb44] ss:$48 sps:$4 sm:$0xff]   ;;  %v22260_v39 = vld [vmem:[#allocation5 + $0xb40] ss:$48 sps:$4 sm:$0xff]   ;;  %v22324_v20 = vld [vmem:[#allocation5 + $0x188] ss:$48 sps:$4 sm:$0xff]  }
  0x81   :  { %3177 = vmatprep.subr.bf16.mxu1 %v22233_v21  ;;  %v22261_v40 = vld [vmem:[#allocation5 + $0x4e4] ss:$48 sps:$4 sm:$0xff]   ;;  %v22265_v42 = vld [vmem:[#allocation5 + $0x4e0] ss:$48 sps:$4 sm:$0xff]  }
  0x82   :  { %v22263_v41 = vld [vmem:[#allocation5 + $0xae4] ss:$48 sps:$4 sm:$0xff]   ;;  %v22266_v43 = vld [vmem:[#allocation5 + $0xae0] ss:$48 sps:$4 sm:$0xff]  }
  0x83   :  { %3135 = vmatpush1.bf16.msra.mxu0 %v22235_v22  ;;  %v22267_v44 = vld [vmem:[#allocation5 + $0x484] ss:$48 sps:$4 sm:$0xff]   ;;  %v22271_v46 = vld [vmem:[#allocation5 + $0x480] ss:$48 sps:$4 sm:$0xff]   ;;  %v22332_v22 = vld [vmem:[#allocation5 + $0x12c] ss:$48 sps:$4 sm:$0xff]  }
  0x84   :  { %3178 = vmatpush1.bf16.msra.mxu1 %v22236_v23  ;;  %3136 = vmatprep.subr.bf16.mxu0 %v22237_v24  ;;  %v22269_v45 = vld [vmem:[#allocation5 + $0xa84] ss:$48 sps:$4 sm:$0xff]   ;;  %v22272_v47 = vld [vmem:[#allocation5 + $0xa80] ss:$48 sps:$4 sm:$0xff]   ;;  %v22330_v24 = vld [vmem:[#allocation5 + $0x128] ss:$48 sps:$4 sm:$0xff]  }
  0x85   :  { %3179 = vmatprep.subr.bf16.mxu1 %v22239_v25  ;;  %v22273_v48 = vld [vmem:[#allocation5 + $0x424] ss:$48 sps:$4 sm:$0xff]   ;;  %v26305_v50 = vld [vmem:[%s27319_s1 + $0xc] ss:$20 sps:$4 sm:$0xff]  }
  0x86   :  { %v26300_v49 = vld [vmem:[%s27319_s1 + $0x4] ss:$20 sps:$4 sm:$0xff]   ;;  %3199 = vmatprep.mubr.bf16.mxu1 %v26305_v50  ;;  %v22277_v52 = vld [vmem:[#allocation5 + $0x420] ss:$48 sps:$4 sm:$0xff]  }
  0x87   :  { %3137 = vmatpush1.bf16.msra.mxu0 %v22241_v26  ;;  %v22275_v51 = vld [vmem:[#allocation5 + $0xa24] ss:$48 sps:$4 sm:$0xff]   ;;  %3156 = vmatprep.mubr.bf16.mxu0 %v26300_v49  ;;  %v22278_v53 = vld [vmem:[#allocation5 + $0xa20] ss:$48 sps:$4 sm:$0xff]   ;;  %v22338_v26 = vld [vmem:[#allocation5 + $0xcc] ss:$48 sps:$4 sm:$0xff]  }
  0x88   :  { %3180 = vmatpush1.bf16.msra.mxu1 %v22242_v27  ;;  %3138 = vmatprep.subr.bf16.mxu0 %v22243_v28  ;;  %v22279_v54 = vld [vmem:[#allocation5 + $0x3c4] ss:$48 sps:$4 sm:$0xff]   ;;  %v22283_v56 = vld [vmem:[#allocation5 + $0x3c0] ss:$48 sps:$4 sm:$0xff]   ;;  %v22336_v28 = vld [vmem:[#allocation5 + $0xc8] ss:$48 sps:$4 sm:$0xff]  }
  0x89   :  { %3181 = vmatprep.subr.bf16.mxu1 %v22245_v29  ;;  %v22281_v55 = vld [vmem:[#allocation5 + $0x9c4] ss:$48 sps:$4 sm:$0xff]   ;;  %v22284_v57 = vld [vmem:[#allocation5 + $0x9c0] ss:$48 sps:$4 sm:$0xff]  }
  0x8a   :  { %v22285_v58 = vld [vmem:[#allocation5 + $0x364] ss:$48 sps:$4 sm:$0xff]   ;;  %v22289_v60 = vld [vmem:[#allocation5 + $0x360] ss:$48 sps:$4 sm:$0xff]  }
  0x8b   :  { %3139 = vmatpush1.bf16.msra.mxu0 %v22247_v30  ;;  %v22287_v59 = vld [vmem:[#allocation5 + $0x964] ss:$48 sps:$4 sm:$0xff]   ;;  %v22290_v61 = vld [vmem:[#allocation5 + $0x960] ss:$48 sps:$4 sm:$0xff]   ;;  %v22344_v30 = vld [vmem:[#allocation5 + $0x6c] ss:$48 sps:$4 sm:$0xff]  }
  0x8c   :  { %3182 = vmatpush1.bf16.msra.mxu1 %v22248_v31  ;;  %3140 = vmatprep.subr.bf16.mxu0 %v22249_v32  ;;  %v22291_v62 = vld [vmem:[#allocation5 + $0x304] ss:$48 sps:$4 sm:$0xff]   ;;  %v22295_v0 = vld [vmem:[#allocation5 + $0x300] ss:$48 sps:$4 sm:$0xff]   ;;  %v22342_v32 = vld [vmem:[#allocation5 + $0x68] ss:$48 sps:$4 sm:$0xff]  }
  0x8d   :  { %3183 = vmatprep.subr.bf16.mxu1 %v22251_v33  ;;  %v22293_v63 = vld [vmem:[#allocation5 + $0x904] ss:$48 sps:$4 sm:$0xff]   ;;  %v22296_v1 = vld [vmem:[#allocation5 + $0x900] ss:$48 sps:$4 sm:$0xff]  }
  0x8e   :  { %v22304_v2 = vld [vmem:[#allocation5 + $0xea4] ss:$48 sps:$4 sm:$0xff]   ;;  %v22302_v5 = vld [vmem:[#allocation5 + $0xea0] ss:$48 sps:$4 sm:$0xff]  }
  0x8f   :  { %3141 = vmatpush2.bf16.msra.mxu0 %v22253_v34  ;;  %v26312_v4 = vld [vmem:[%s27319_s1] ss:$20 sps:$4 sm:$0xff]   ;;  %v22350_v34 = vld [vmem:[#allocation5 + $0xc] ss:$48 sps:$4 sm:$0xff]  }
  0x90   :  { %3184 = vmatpush2.bf16.msra.mxu1 %v22254_v35  ;;  %3142 = vmatprep.subr.bf16.mxu0 %v22255_v36  ;;  %v22311_v8 = vld [vmem:[#allocation5 + $0xe44] ss:$48 sps:$4 sm:$0xff]   ;;  %v22309_v10 = vld [vmem:[#allocation5 + $0xe40] ss:$48 sps:$4 sm:$0xff]   ;;  %v22348_v36 = vld [vmem:[#allocation5 + $0x8] ss:$48 sps:$4 sm:$0xff]  }
  0x91   :  { %3185 = vmatprep.subr.bf16.mxu1 %v22257_v37  ;;  %v22317_v12 = vld [vmem:[#allocation5 + $0xde4] ss:$48 sps:$4 sm:$0xff]   ;;  %v22315_v15 = vld [vmem:[#allocation5 + $0xde0] ss:$48 sps:$4 sm:$0xff]   ;;  %v22354_v37 = vld [vmem:[#allocation5 + $0x5ac] ss:$48 sps:$4 sm:$0xff]  }
  0x92   :  { %v22323_v17 = vld [vmem:[#allocation5 + $0xd84] ss:$48 sps:$4 sm:$0xff]   ;;  %v22321_v19 = vld [vmem:[#allocation5 + $0xd80] ss:$48 sps:$4 sm:$0xff]  }
  0x93   :  { %3143 = vmatpush2.bf16.msra.mxu0 %v22259_v38  ;;  %v22329_v21 = vld [vmem:[#allocation5 + $0xd24] ss:$48 sps:$4 sm:$0xff]   ;;  %v22327_v23 = vld [vmem:[#allocation5 + $0xd20] ss:$48 sps:$4 sm:$0xff]   ;;  %v22357_v38 = vld [vmem:[#allocation5 + $0x8ac] ss:$48 sps:$4 sm:$0xff]  }
  0x94   :  { %3186 = vmatpush2.bf16.msra.mxu1 %v22260_v39  ;;  %3144 = vmatprep.subr.bf16.mxu0 %v22261_v40  ;;  %v22335_v25 = vld [vmem:[#allocation5 + $0xcc4] ss:$48 sps:$4 sm:$0xff]   ;;  %v22333_v27 = vld [vmem:[#allocation5 + $0xcc0] ss:$48 sps:$4 sm:$0xff]   ;;  %v22352_v40 = vld [vmem:[#allocation5 + $0x5a8] ss:$48 sps:$4 sm:$0xff]  }
  0x95   :  { %3187 = vmatprep.subr.bf16.mxu1 %v22263_v41  ;;  %v22341_v29 = vld [vmem:[#allocation5 + $0xc64] ss:$48 sps:$4 sm:$0xff]   ;;  %v22339_v31 = vld [vmem:[#allocation5 + $0xc60] ss:$48 sps:$4 sm:$0xff]   ;;  %v22355_v41 = vld [vmem:[#allocation5 + $0x8a8] ss:$48 sps:$4 sm:$0xff]  }
  0x96   :  { %v22347_v33 = vld [vmem:[#allocation5 + $0xc04] ss:$48 sps:$4 sm:$0xff]   ;;  %v22345_v35 = vld [vmem:[#allocation5 + $0xc00] ss:$48 sps:$4 sm:$0xff]  }
  0x97   :  { %3145 = vmatpush2.bf16.msra.mxu0 %v22265_v42  ;;  %v26326_v39 = vld [vmem:[%s27319_s1 + $0x10] ss:$20 sps:$4 sm:$0xff]   ;;  %v22360_v42 = vld [vmem:[#allocation5 + $0x54c] ss:$48 sps:$4 sm:$0xff]  }
  0x98   :  { %3188 = vmatpush2.bf16.msra.mxu1 %v22266_v43  ;;  %3146 = vmatprep.subr.bf16.mxu0 %v22267_v44  ;;  %v22363_v43 = vld [vmem:[#allocation5 + $0x84c] ss:$48 sps:$4 sm:$0xff]   ;;  %v22358_v44 = vld [vmem:[#allocation5 + $0x548] ss:$48 sps:$4 sm:$0xff]  }
  0x99   :  { %3189 = vmatprep.subr.bf16.mxu1 %v22269_v45  ;;  %v22361_v45 = vld [vmem:[#allocation5 + $0x848] ss:$48 sps:$4 sm:$0xff]  }
  0x9b   :  { %3147 = vmatpush2.bf16.msra.mxu0 %v22271_v46  ;;  %v22366_v46 = vld [vmem:[#allocation5 + $0x4ec] ss:$48 sps:$4 sm:$0xff]  }
  0x9c   :  { %3190 = vmatpush2.bf16.msra.mxu1 %v22272_v47  ;;  %3148 = vmatprep.subr.bf16.mxu0 %v22273_v48  ;;  %v22369_v47 = vld [vmem:[#allocation5 + $0x7ec] ss:$48 sps:$4 sm:$0xff]   ;;  %v22364_v48 = vld [vmem:[#allocation5 + $0x4e8] ss:$48 sps:$4 sm:$0xff]  }
  0x9d   :  { %3191 = vmatprep.subr.bf16.mxu1 %v22275_v51  ;;  %v22367_v51 = vld [vmem:[#allocation5 + $0x7e8] ss:$48 sps:$4 sm:$0xff]  }
  0x9f   :  { %3149 = vmatpush2.bf16.msra.mxu0 %v22277_v52  ;;  %v22372_v52 = vld [vmem:[#allocation5 + $0x48c] ss:$48 sps:$4 sm:$0xff]  }
  0xa0   :  { %3192 = vmatpush2.bf16.msra.mxu1 %v22278_v53  ;;  %3150 = vmatprep.subr.bf16.mxu0 %v22279_v54  ;;  %v22375_v53 = vld [vmem:[#allocation5 + $0x78c] ss:$48 sps:$4 sm:$0xff]   ;;  %v22370_v54 = vld [vmem:[#allocation5 + $0x488] ss:$48 sps:$4 sm:$0xff]  }
  0xa1   :  { %3193 = vmatprep.subr.bf16.mxu1 %v22281_v55  ;;  %v22373_v55 = vld [vmem:[#allocation5 + $0x788] ss:$48 sps:$4 sm:$0xff]  }
  0xa3   :  { %3151 = vmatpush2.bf16.msra.mxu0 %v22283_v56  ;;  %v22378_v56 = vld [vmem:[#allocation5 + $0x42c] ss:$48 sps:$4 sm:$0xff]  }
  0xa4   :  { %3194 = vmatpush2.bf16.msra.mxu1 %v22284_v57  ;;  %3152 = vmatprep.subr.bf16.mxu0 %v22285_v58  ;;  %v22381_v57 = vld [vmem:[#allocation5 + $0x72c] ss:$48 sps:$4 sm:$0xff]   ;;  %v22376_v58 = vld [vmem:[#allocation5 + $0x428] ss:$48 sps:$4 sm:$0xff]  }
  0xa5   :  { %3195 = vmatprep.subr.bf16.mxu1 %v22287_v59  ;;  %v22379_v59 = vld [vmem:[#allocation5 + $0x728] ss:$48 sps:$4 sm:$0xff]  }
  0xa7   :  { %3153 = vmatpush2.bf16.msra.mxu0 %v22289_v60  ;;  %v22384_v60 = vld [vmem:[#allocation5 + $0x3cc] ss:$48 sps:$4 sm:$0xff]  }
  0xa8   :  { %3196 = vmatpush2.bf16.msra.mxu1 %v22290_v61  ;;  %3154 = vmatprep.subr.bf16.mxu0 %v22291_v62  ;;  %v22387_v61 = vld [vmem:[#allocation5 + $0x6cc] ss:$48 sps:$4 sm:$0xff]   ;;  %v22382_v62 = vld [vmem:[#allocation5 + $0x3c8] ss:$48 sps:$4 sm:$0xff]  }
  0xa9   :  { %3197 = vmatprep.subr.bf16.mxu1 %v22293_v63  ;;  %v22385_v63 = vld [vmem:[#allocation5 + $0x6c8] ss:$48 sps:$4 sm:$0xff]  }
  0xab   :  { %3155 = vmatpush2.bf16.msra.mxu0 %v22295_v0  ;;  %v22390_v0 = vld [vmem:[#allocation5 + $0x36c] ss:$48 sps:$4 sm:$0xff]  }
  0xac   :  { %3198 = vmatpush2.bf16.msra.mxu1 %v22296_v1  ;;  %3210 = vmatprep.subr.bf16.mxu0 %v22304_v2  ;;  %v22393_v1 = vld [vmem:[#allocation5 + $0x66c] ss:$48 sps:$4 sm:$0xff]   ;;  %v22388_v2 = vld [vmem:[#allocation5 + $0x368] ss:$48 sps:$4 sm:$0xff]  }
  0xad   :  { %3253 = vmatprep.subr.bf16.mxu1 %v22307_v3  ;;  %v22391_v3 = vld [vmem:[#allocation5 + $0x668] ss:$48 sps:$4 sm:$0xff]  }
  0xae   :  { %3157 = vmatmul.mubr.bf16.vlgmr.msra.gmra.mxu0 %v26312_v4 }
  0xaf   :  { %3200 = vmatmul.mubr.bf16.vlgmr.msra.gmra.mxu1 %v26317_v7  ;;  %3211 = vmatpush1.bf16.msra.mxu0 %v22302_v5  ;;  %v22396_v5 = vld [vmem:[#allocation5 + $0x30c] ss:$48 sps:$4 sm:$0xff]  }
  0xb0   :  { %3254 = vmatpush1.bf16.msra.mxu1 %v22305_v6  ;;  %3212 = vmatprep.subr.bf16.mxu0 %v22311_v8  ;;  %v22399_v6 = vld [vmem:[#allocation5 + $0x60c] ss:$48 sps:$4 sm:$0xff]   ;;  %v22394_v8 = vld [vmem:[#allocation5 + $0x308] ss:$48 sps:$4 sm:$0xff]  }
  0xb1   :  { %3255 = vmatprep.subr.bf16.mxu1 %v22314_v9  ;;  %3242 = vmatprep.mubr.bf16.mxu0 %v26214_v14  ;;  %v22397_v9 = vld [vmem:[#allocation5 + $0x608] ss:$48 sps:$4 sm:$0xff]  }
  0xb2   :  { %3285 = vmatprep.mubr.bf16.mxu1 %v26300_v49 }
  0xb3   :  { %3213 = vmatpush1.bf16.msra.mxu0 %v22309_v10  ;;  %v22402_v10 = vld [vmem:[#allocation5 + $0xbac] ss:$48 sps:$4 sm:$0xff]  }
  0xb4   :  { %3256 = vmatpush1.bf16.msra.mxu1 %v22312_v11  ;;  %3214 = vmatprep.subr.bf16.mxu0 %v22317_v12  ;;  %v22405_v11 = vld [vmem:[#allocation5 + $0xeac] ss:$48 sps:$4 sm:$0xff]   ;;  %v22400_v12 = vld [vmem:[#allocation5 + $0xba8] ss:$48 sps:$4 sm:$0xff]  }
  0xb5   :  { %3257 = vmatprep.subr.bf16.mxu1 %v22320_v13  ;;  %v22403_v13 = vld [vmem:[#allocation5 + $0xea8] ss:$48 sps:$4 sm:$0xff]  }
  0xb7   :  { %3215 = vmatpush1.bf16.msra.mxu0 %v22315_v15  ;;  %v22408_v15 = vld [vmem:[#allocation5 + $0xb4c] ss:$48 sps:$4 sm:$0xff]  }
  0xb8   :  { %3258 = vmatpush1.bf16.msra.mxu1 %v22318_v16  ;;  %3216 = vmatprep.subr.bf16.mxu0 %v22323_v17  ;;  %v22411_v16 = vld [vmem:[#allocation5 + $0xe4c] ss:$48 sps:$4 sm:$0xff]   ;;  %v22406_v17 = vld [vmem:[#allocation5 + $0xb48] ss:$48 sps:$4 sm:$0xff]  }
  0xb9   :  { %3259 = vmatprep.subr.bf16.mxu1 %v22326_v18  ;;  %v22409_v18 = vld [vmem:[#allocation5 + $0xe48] ss:$48 sps:$4 sm:$0xff]  }
  0xbb   :  { %3217 = vmatpush1.bf16.msra.mxu0 %v22321_v19  ;;  %v22414_v19 = vld [vmem:[#allocation5 + $0xaec] ss:$48 sps:$4 sm:$0xff]  }
  0xbc   :  { %3260 = vmatpush1.bf16.msra.mxu1 %v22324_v20  ;;  %3218 = vmatprep.subr.bf16.mxu0 %v22329_v21  ;;  %v22417_v20 = vld [vmem:[#allocation5 + $0xdec] ss:$48 sps:$4 sm:$0xff]   ;;  %v22412_v21 = vld [vmem:[#allocation5 + $0xae8] ss:$48 sps:$4 sm:$0xff]  }
  0xbd   :  { %3261 = vmatprep.subr.bf16.mxu1 %v22332_v22  ;;  %v22415_v22 = vld [vmem:[#allocation5 + $0xde8] ss:$48 sps:$4 sm:$0xff]  }
  0xbf   :  { %3219 = vmatpush1.bf16.msra.mxu0 %v22327_v23  ;;  %v22420_v23 = vld [vmem:[#allocation5 + $0xa8c] ss:$48 sps:$4 sm:$0xff]  }
  0xc0   :  { %3262 = vmatpush1.bf16.msra.mxu1 %v22330_v24  ;;  %3220 = vmatprep.subr.bf16.mxu0 %v22335_v25  ;;  %v22423_v24 = vld [vmem:[#allocation5 + $0xd8c] ss:$48 sps:$4 sm:$0xff]   ;;  %v22418_v25 = vld [vmem:[#allocation5 + $0xa88] ss:$48 sps:$4 sm:$0xff]  }
  0xc1   :  { %3263 = vmatprep.subr.bf16.mxu1 %v22338_v26  ;;  %v22426_v26 = vld [vmem:[#allocation5 + $0xa2c] ss:$48 sps:$4 sm:$0xff]  }
  0xc3   :  { %3221 = vmatpush1.bf16.msra.mxu0 %v22333_v27  ;;  %v22429_v27 = vld [vmem:[#allocation5 + $0xd2c] ss:$48 sps:$4 sm:$0xff]  }
  0xc4   :  { %3264 = vmatpush1.bf16.msra.mxu1 %v22336_v28  ;;  %3222 = vmatprep.subr.bf16.mxu0 %v22341_v29  ;;  %v22424_v28 = vld [vmem:[#allocation5 + $0xa28] ss:$48 sps:$4 sm:$0xff]  }
  0xc5   :  { %3265 = vmatprep.subr.bf16.mxu1 %v22344_v30  ;;  %v22427_v29 = vld [vmem:[#allocation5 + $0xd28] ss:$48 sps:$4 sm:$0xff]   ;;  %v22432_v30 = vld [vmem:[#allocation5 + $0x9cc] ss:$48 sps:$4 sm:$0xff]  }
  0xc7   :  { %3223 = vmatpush1.bf16.msra.mxu0 %v22339_v31  ;;  %v22435_v31 = vld [vmem:[#allocation5 + $0xccc] ss:$48 sps:$4 sm:$0xff]  }
  0xc8   :  { %3266 = vmatpush1.bf16.msra.mxu1 %v22342_v32  ;;  %3224 = vmatprep.subr.bf16.mxu0 %v22347_v33  ;;  %v22430_v32 = vld [vmem:[#allocation5 + $0x9c8] ss:$48 sps:$4 sm:$0xff]  }
  0xc9   :  { %3267 = vmatprep.subr.bf16.mxu1 %v22350_v34  ;;  %v22433_v33 = vld [vmem:[#allocation5 + $0xcc8] ss:$48 sps:$4 sm:$0xff]   ;;  %v22438_v34 = vld [vmem:[#allocation5 + $0x96c] ss:$48 sps:$4 sm:$0xff]  }
  0xcb   :  { %3225 = vmatpush1.bf16.msra.mxu0 %v22345_v35  ;;  %v22441_v35 = vld [vmem:[#allocation5 + $0xc6c] ss:$48 sps:$4 sm:$0xff]  }
  0xcc   :  { %3268 = vmatpush1.bf16.msra.mxu1 %v22348_v36  ;;  %3296 = vmatprep.subr.bf16.mxu0 %v22357_v38  ;;  %v22436_v36 = vld [vmem:[#allocation5 + $0x968] ss:$48 sps:$4 sm:$0xff]   ;;  %v22444_v38 = vld [vmem:[#allocation5 + $0x90c] ss:$48 sps:$4 sm:$0xff]  }
  0xcd   :  { %3269 = vmatprep.subr.bf16.mxu1 %v22354_v37  ;;  %v22439_v37 = vld [vmem:[#allocation5 + $0xc68] ss:$48 sps:$4 sm:$0xff]  }
  0xce   :  { %3243 = vmatmul.mubr.bf16.vlgmr.msra.gmra.mxu0 %v26326_v39 }
  0xcf   :  { %3297 = vmatpush1.bf16.msra.mxu0 %v22355_v41  ;;  %3328 = vmatprep.mubr.bf16.mxu0 %v26305_v50  ;;  %v22442_v41 = vld [vmem:[#allocation5 + $0x908] ss:$48 sps:$4 sm:$0xff]  }
  0xd0   :  { %3270 = vmatpush2.bf16.msra.mxu1 %v22352_v40  ;;  %3298 = vmatprep.subr.bf16.mxu0 %v22363_v43  ;;  %v22447_v40 = vld [vmem:[#allocation5 + $0xc0c] ss:$48 sps:$4 sm:$0xff]   ;;  %v22450_v43 = vld [vmem:[#allocation5 + $0x2b4] ss:$48 sps:$4 sm:$0xff]  }
  0xd1   :  { %3271 = vmatprep.subr.bf16.mxu1 %v22360_v42  ;;  %v22445_v42 = vld [vmem:[#allocation5 + $0xc08] ss:$48 sps:$4 sm:$0xff]  }
  0xd3   :  { %3299 = vmatpush1.bf16.msra.mxu0 %v22361_v45  ;;  %v22448_v45 = vld [vmem:[#allocation5 + $0x2b0] ss:$48 sps:$4 sm:$0xff]  }
  0xd4   :  { %3272 = vmatpush2.bf16.msra.mxu1 %v22358_v44  ;;  %3300 = vmatprep.subr.bf16.mxu0 %v22369_v47  ;;  %v22453_v44 = vld [vmem:[#allocation5 + $0x8b4] ss:$48 sps:$4 sm:$0xff]  }
  0xd5   :  { %3273 = vmatprep.subr.bf16.mxu1 %v22366_v46  ;;  %v22451_v46 = vld [vmem:[#allocation5 + $0x8b0] ss:$48 sps:$4 sm:$0xff]   ;;  %v22456_v47 = vld [vmem:[#allocation5 + $0x254] ss:$48 sps:$4 sm:$0xff]  }
  0xd7   :  { %3301 = vmatpush1.bf16.msra.mxu0 %v22367_v51  ;;  %v22454_v51 = vld [vmem:[#allocation5 + $0x250] ss:$48 sps:$4 sm:$0xff]  }
  0xd8   :  { %3274 = vmatpush2.bf16.msra.mxu1 %v22364_v48  ;;  %3302 = vmatprep.subr.bf16.mxu0 %v22375_v53  ;;  %v22459_v48 = vld [vmem:[#allocation5 + $0x854] ss:$48 sps:$4 sm:$0xff]  }
  0xd9   :  { %3275 = vmatprep.subr.bf16.mxu1 %v22372_v52  ;;  %v22457_v52 = vld [vmem:[#allocation5 + $0x850] ss:$48 sps:$4 sm:$0xff]   ;;  %v22462_v53 = vld [vmem:[#allocation5 + $0x1f4] ss:$48 sps:$4 sm:$0xff]  }
  0xdb   :  { %3303 = vmatpush1.bf16.msra.mxu0 %v22373_v55  ;;  %v22460_v55 = vld [vmem:[#allocation5 + $0x1f0] ss:$48 sps:$4 sm:$0xff]  }
  0xdc   :  { %3276 = vmatpush2.bf16.msra.mxu1 %v22370_v54  ;;  %3304 = vmatprep.subr.bf16.mxu0 %v22381_v57  ;;  %v22465_v54 = vld [vmem:[#allocation5 + $0x7f4] ss:$48 sps:$4 sm:$0xff]  }
  0xdd   :  { %3277 = vmatprep.subr.bf16.mxu1 %v22378_v56  ;;  %v22463_v56 = vld [vmem:[#allocation5 + $0x7f0] ss:$48 sps:$4 sm:$0xff]   ;;  %v22468_v57 = vld [vmem:[#allocation5 + $0x194] ss:$48 sps:$4 sm:$0xff]  }
  0xdf   :  { %3305 = vmatpush1.bf16.msra.mxu0 %v22379_v59  ;;  %v22474_v59 = vld [vmem:[#allocation5 + $0x134] ss:$48 sps:$4 sm:$0xff]  }
  0xe0   :  { %3278 = vmatpush2.bf16.msra.mxu1 %v22376_v58  ;;  %3306 = vmatprep.subr.bf16.mxu0 %v22387_v61  ;;  %v22469_v58 = vld [vmem:[#allocation5 + $0x790] ss:$48 sps:$4 sm:$0xff]  }
  0xe1   :  { %3279 = vmatprep.subr.bf16.mxu1 %v22384_v60  ;;  %v22477_v60 = vld [vmem:[#allocation5 + $0x734] ss:$48 sps:$4 sm:$0xff]   ;;  %v22472_v61 = vld [vmem:[#allocation5 + $0x130] ss:$48 sps:$4 sm:$0xff]  }
  0xe3   :  { %3307 = vmatpush1.bf16.msra.mxu0 %v22385_v63  ;;  %v22478_v63 = vld [vmem:[#allocation5 + $0xd0] ss:$48 sps:$4 sm:$0xff]  }
  0xe4   :  { %3280 = vmatpush2.bf16.msra.mxu1 %v22382_v62  ;;  %3308 = vmatprep.subr.bf16.mxu0 %v22393_v1  ;;  %v22483_v62 = vld [vmem:[#allocation5 + $0x6d4] ss:$48 sps:$4 sm:$0xff]  }
  0xe5   :  { %3281 = vmatprep.subr.bf16.mxu1 %v22390_v0  ;;  %v22481_v0 = vld [vmem:[#allocation5 + $0x6d0] ss:$48 sps:$4 sm:$0xff]   ;;  %v22486_v1 = vld [vmem:[#allocation5 + $0x74] ss:$48 sps:$4 sm:$0xff]  }
  0xe7   :  { %3309 = vmatpush1.bf16.msra.mxu0 %v22391_v3  ;;  %v22484_v3 = vld [vmem:[#allocation5 + $0x70] ss:$48 sps:$4 sm:$0xff]  }
  0xe8   :  { %3282 = vmatpush2.bf16.msra.mxu1 %v22388_v2  ;;  %3310 = vmatprep.subr.bf16.mxu0 %v22399_v6  ;;  %v22489_v2 = vld [vmem:[#allocation5 + $0x674] ss:$48 sps:$4 sm:$0xff]  }
  0xe9   :  { %3283 = vmatprep.subr.bf16.mxu1 %v22396_v5  ;;  %v22487_v5 = vld [vmem:[#allocation5 + $0x670] ss:$48 sps:$4 sm:$0xff]   ;;  %v22492_v6 = vld [vmem:[#allocation5 + $0x14] ss:$48 sps:$4 sm:$0xff]  }
  0xeb   :  { %3311 = vmatpush1.bf16.msra.mxu0 %v22397_v9  ;;  %v22490_v9 = vld [vmem:[#allocation5 + $0x10] ss:$48 sps:$4 sm:$0xff]  }
  0xec   :  { %3284 = vmatpush2.bf16.msra.mxu1 %v22394_v8  ;;  %3312 = vmatprep.subr.bf16.mxu0 %v22402_v10  ;;  %v22495_v8 = vld [vmem:[#allocation5 + $0x614] ss:$48 sps:$4 sm:$0xff]   ;;  %v22493_v10 = vld [vmem:[#allocation5 + $0x610] ss:$48 sps:$4 sm:$0xff]  }
  0xed   :  { %3339 = vmatprep.subr.bf16.mxu1 %v22405_v11  ;;  %v22498_v11 = vld [vmem:[#allocation5 + $0x5b4] ss:$48 sps:$4 sm:$0xff]  }
  0xef   :  { %3286 = vmatmul.mubr.bf16.vlgmr.msra.gmra.mxu1 %v26312_v4  ;;  %3313 = vmatpush2.bf16.msra.mxu0 %v22400_v12  ;;  %v22421_v4 = vld [vmem:[#allocation5 + $0xd88] ss:$48 sps:$4 sm:$0xff]   ;;  %v22501_v12 = vld [vmem:[#allocation5 + $0xbb4] ss:$48 sps:$4 sm:$0xff]  }
  0xf0   :  { %3340 = vmatpush1.bf16.msra.mxu1 %v22403_v13  ;;  %3314 = vmatprep.subr.bf16.mxu0 %v22408_v15  ;;  %v22496_v13 = vld [vmem:[#allocation5 + $0x5b0] ss:$48 sps:$4 sm:$0xff]  }
  0xf1   :  { %3341 = vmatprep.subr.bf16.mxu1 %v22411_v16  ;;  %3371 = vmatprep.mubr.bf16.mxu1 %v26214_v14  ;;  %v22499_v15 = vld [vmem:[#allocation5 + $0xbb0] ss:$48 sps:$4 sm:$0xff]   ;;  %v22504_v16 = vld [vmem:[#allocation5 + $0x554] ss:$48 sps:$4 sm:$0xff]  }
  0xf3   :  { %3315 = vmatpush2.bf16.msra.mxu0 %v22406_v17  ;;  %v22507_v17 = vld [vmem:[#allocation5 + $0xb54] ss:$48 sps:$4 sm:$0xff]  }
  0xf4   :  { %3342 = vmatpush1.bf16.msra.mxu1 %v22409_v18  ;;  %3316 = vmatprep.subr.bf16.mxu0 %v22414_v19  ;;  %v22502_v18 = vld [vmem:[#allocation5 + $0x550] ss:$48 sps:$4 sm:$0xff]  }
  0xf5   :  { %3343 = vmatprep.subr.bf16.mxu1 %v22417_v20  ;;  %v22505_v19 = vld [vmem:[#allocation5 + $0xb50] ss:$48 sps:$4 sm:$0xff]   ;;  %v22510_v20 = vld [vmem:[#allocation5 + $0x4f4] ss:$48 sps:$4 sm:$0xff]  }
  0xf7   :  { %3317 = vmatpush2.bf16.msra.mxu0 %v22412_v21  ;;  %v22513_v21 = vld [vmem:[#allocation5 + $0xaf4] ss:$48 sps:$4 sm:$0xff]  }
  0xf8   :  { %3344 = vmatpush1.bf16.msra.mxu1 %v22415_v22  ;;  %3318 = vmatprep.subr.bf16.mxu0 %v22420_v23  ;;  %v22508_v22 = vld [vmem:[#allocation5 + $0x4f0] ss:$48 sps:$4 sm:$0xff]  }
  0xf9   :  { %3345 = vmatprep.subr.bf16.mxu1 %v22423_v24  ;;  %v22511_v23 = vld [vmem:[#allocation5 + $0xaf0] ss:$48 sps:$4 sm:$0xff]   ;;  %v22516_v24 = vld [vmem:[#allocation5 + $0x494] ss:$48 sps:$4 sm:$0xff]  }
  0xfb   :  { %3319 = vmatpush2.bf16.msra.mxu0 %v22418_v25  ;;  %v22519_v25 = vld [vmem:[#allocation5 + $0xa94] ss:$48 sps:$4 sm:$0xff]  }
  0xfc   :  { %3346 = vmatpush1.bf16.msra.mxu1 %v22421_v4  ;;  %3320 = vmatprep.subr.bf16.mxu0 %v22426_v26  ;;  %v22514_v4 = vld [vmem:[#allocation5 + $0x490] ss:$48 sps:$4 sm:$0xff]  }
  0xfd   :  { %3347 = vmatprep.subr.bf16.mxu1 %v22429_v27  ;;  %v22517_v26 = vld [vmem:[#allocation5 + $0xa90] ss:$48 sps:$4 sm:$0xff]   ;;  %v22522_v27 = vld [vmem:[#allocation5 + $0x434] ss:$48 sps:$4 sm:$0xff]  }
  0xff   :  { %3321 = vmatpush2.bf16.msra.mxu0 %v22424_v28  ;;  %v22525_v28 = vld [vmem:[#allocation5 + $0xa34] ss:$48 sps:$4 sm:$0xff]  }
 0x100   :  { %3348 = vmatpush1.bf16.msra.mxu1 %v22427_v29  ;;  %3322 = vmatprep.subr.bf16.mxu0 %v22432_v30  ;;  %v22520_v29 = vld [vmem:[#allocation5 + $0x430] ss:$48 sps:$4 sm:$0xff]  }
 0x101   :  { %3349 = vmatprep.subr.bf16.mxu1 %v22435_v31  ;;  %v22523_v30 = vld [vmem:[#allocation5 + $0xa30] ss:$48 sps:$4 sm:$0xff]   ;;  %v22528_v31 = vld [vmem:[#allocation5 + $0x3d4] ss:$48 sps:$4 sm:$0xff]  }
 0x103   :  { %3323 = vmatpush2.bf16.msra.mxu0 %v22430_v32  ;;  %v22531_v32 = vld [vmem:[#allocation5 + $0x9d4] ss:$48 sps:$4 sm:$0xff]  }
 0x104   :  { %3350 = vmatpush1.bf16.msra.mxu1 %v22433_v33  ;;  %3324 = vmatprep.subr.bf16.mxu0 %v22438_v34  ;;  %v22526_v33 = vld [vmem:[#allocation5 + $0x3d0] ss:$48 sps:$4 sm:$0xff]  }
 0x105   :  { %3351 = vmatprep.subr.bf16.mxu1 %v22441_v35  ;;  %v22529_v34 = vld [vmem:[#allocation5 + $0x9d0] ss:$48 sps:$4 sm:$0xff]   ;;  %v22534_v35 = vld [vmem:[#allocation5 + $0x374] ss:$48 sps:$4 sm:$0xff]  }
 0x107   :  { %3325 = vmatpush2.bf16.msra.mxu0 %v22436_v36  ;;  %v22537_v36 = vld [vmem:[#allocation5 + $0x974] ss:$48 sps:$4 sm:$0xff]  }
 0x108   :  { %3352 = vmatpush1.bf16.msra.mxu1 %v22439_v37  ;;  %3326 = vmatprep.subr.bf16.mxu0 %v22444_v38  ;;  %v22532_v37 = vld [vmem:[#allocation5 + $0x370] ss:$48 sps:$4 sm:$0xff]  }
 0x109   :  { %3353 = vmatprep.subr.bf16.mxu1 %v22447_v40  ;;  %v22535_v38 = vld [vmem:[#allocation5 + $0x970] ss:$48 sps:$4 sm:$0xff]   ;;  %v22540_v40 = vld [vmem:[#allocation5 + $0x314] ss:$48 sps:$4 sm:$0xff]  }
 0x10b   :  { %3327 = vmatpush2.bf16.msra.mxu0 %v22442_v41  ;;  %v22543_v41 = vld [vmem:[#allocation5 + $0x914] ss:$48 sps:$4 sm:$0xff]  }
 0x10c   :  { %3354 = vmatpush1.bf16.msra.mxu1 %v22445_v42  ;;  %3382 = vmatprep.subr.bf16.mxu0 %v22450_v43  ;;  %v22538_v42 = vld [vmem:[#allocation5 + $0x310] ss:$48 sps:$4 sm:$0xff]  }
 0x10d   :  { %3425 = vmatprep.subr.bf16.mxu1 %v22453_v44  ;;  %v22541_v43 = vld [vmem:[#allocation5 + $0x910] ss:$48 sps:$4 sm:$0xff]   ;;  %v22546_v44 = vld [vmem:[#allocation5 + $0xeb4] ss:$48 sps:$4 sm:$0xff]  }
 0x10e   :  { %3329 = vmatmul.mubr.bf16.vlgmr.msra.gmra.mxu0 %v26317_v7  ;;  %v22471_v7 = vld [vmem:[#allocation5 + $0x794] ss:$48 sps:$4 sm:$0xff]  }
 0x10f   :  { %3372 = vmatmul.mubr.bf16.vlgmr.msra.gmra.mxu1 %v26326_v39  ;;  %3383 = vmatpush1.bf16.msra.mxu0 %v22448_v45  ;;  %v22466_v39 = vld [vmem:[#allocation5 + $0x190] ss:$48 sps:$4 sm:$0xff]   ;;  %v22549_v45 = vld [vmem:[#allocation5 + $0x2bc] ss:$48 sps:$4 sm:$0xff]  }
 0x110   :  { %3426 = vmatpush1.bf16.msra.mxu1 %v22451_v46  ;;  %3384 = vmatprep.subr.bf16.mxu0 %v22456_v47  ;;  %v22544_v46 = vld [vmem:[#allocation5 + $0xeb0] ss:$48 sps:$4 sm:$0xff]   ;;  %v22547_v47 = vld [vmem:[#allocation5 + $0x2b8] ss:$48 sps:$4 sm:$0xff]  }
 0x111   :  { %3427 = vmatprep.subr.bf16.mxu1 %v22459_v48  ;;  %3414 = vmatprep.mubr.bf16.mxu0 %v26300_v49  ;;  %v22475_v49 = vld [vmem:[#allocation5 + $0x730] ss:$48 sps:$4 sm:$0xff]   ;;  %v22552_v48 = vld [vmem:[#allocation5 + $0xe54] ss:$48 sps:$4 sm:$0xff]  }
 0x112   :  { %3457 = vmatprep.mubr.bf16.mxu1 %v26305_v50  ;;  %v22480_v50 = vld [vmem:[#allocation5 + $0xd4] ss:$48 sps:$4 sm:$0xff]  }
 0x113   :  { %3385 = vmatpush1.bf16.msra.mxu0 %v22454_v51  ;;  %v22555_v51 = vld [vmem:[#allocation5 + $0x25c] ss:$48 sps:$4 sm:$0xff]  }
 0x114   :  { %3428 = vmatpush1.bf16.msra.mxu1 %v22457_v52  ;;  %3386 = vmatprep.subr.bf16.mxu0 %v22462_v53  ;;  %v26339_v52 = vld [vmem:[%s27319_s1] ss:$20 sps:$4 sm:$0xff]   ;;  %v26345_v53 = vld [vmem:[%s27319_s1 + $0x8] ss:$20 sps:$4 sm:$0xff]  }
 0x115   :  { %3429 = vmatprep.subr.bf16.mxu1 %v22465_v54  ;;  %v22550_v54 = vld [vmem:[#allocation5 + $0xe50] ss:$48 sps:$4 sm:$0xff]  }
 0x117   :  { %3387 = vmatpush1.bf16.msra.mxu0 %v22460_v55  ;;  %v22553_v55 = vld [vmem:[#allocation5 + $0x258] ss:$48 sps:$4 sm:$0xff]  }
 0x118   :  { %3430 = vmatpush1.bf16.msra.mxu1 %v22463_v56  ;;  %3388 = vmatprep.subr.bf16.mxu0 %v22468_v57  ;;  %v22558_v56 = vld [vmem:[#allocation5 + $0xdf4] ss:$48 sps:$4 sm:$0xff]   ;;  %v22561_v57 = vld [vmem:[#allocation5 + $0x1fc] ss:$48 sps:$4 sm:$0xff]  }
 0x119   :  { %3431 = vmatprep.subr.bf16.mxu1 %v22471_v7  ;;  %v26352_v7 = vld [vmem:[%s27319_s1 + $0x4] ss:$20 sps:$4 sm:$0xff]  }
 0x11b   :  { %3389 = vmatpush1.bf16.msra.mxu0 %v22466_v39  ;;  %v22556_v39 = vld [vmem:[#allocation5 + $0xdf0] ss:$48 sps:$4 sm:$0xff]  }
 0x11c   :  { %3432 = vmatpush1.bf16.msra.mxu1 %v22469_v58  ;;  %3390 = vmatprep.subr.bf16.mxu0 %v22474_v59  ;;  %v22559_v58 = vld [vmem:[#allocation5 + $0x1f8] ss:$48 sps:$4 sm:$0xff]   ;;  %v22564_v59 = vld [vmem:[#allocation5 + $0xd94] ss:$48 sps:$4 sm:$0xff]  }
 0x11d   :  { %3433 = vmatprep.subr.bf16.mxu1 %v22477_v60  ;;  %v22567_v60 = vld [vmem:[#allocation5 + $0x19c] ss:$48 sps:$4 sm:$0xff]  }
 0x11f   :  { %3391 = vmatpush1.bf16.msra.mxu0 %v22472_v61  ;;  %v22562_v61 = vld [vmem:[#allocation5 + $0xd90] ss:$48 sps:$4 sm:$0xff]  }
 0x120   :  { %3434 = vmatpush1.bf16.msra.mxu1 %v22475_v49  ;;  %3392 = vmatprep.subr.bf16.mxu0 %v22480_v50  ;;  %v22565_v49 = vld [vmem:[#allocation5 + $0x198] ss:$48 sps:$4 sm:$0xff]   ;;  %v22570_v50 = vld [vmem:[#allocation5 + $0xd34] ss:$48 sps:$4 sm:$0xff]  }
 0x121   :  { %3435 = vmatprep.subr.bf16.mxu1 %v22483_v62  ;;  %v22573_v62 = vld [vmem:[#allocation5 + $0x13c] ss:$48 sps:$4 sm:$0xff]  }
 0x123   :  { %3393 = vmatpush1.bf16.msra.mxu0 %v22478_v63  ;;  %v22568_v63 = vld [vmem:[#allocation5 + $0xd30] ss:$48 sps:$4 sm:$0xff]  }
 0x124   :  { %3436 = vmatpush1.bf16.msra.mxu1 %v22481_v0  ;;  %3394 = vmatprep.subr.bf16.mxu0 %v22486_v1  ;;  %v22571_v0 = vld [vmem:[#allocation5 + $0x138] ss:$48 sps:$4 sm:$0xff]   ;;  %v22576_v1 = vld [vmem:[#allocation5 + $0xcd4] ss:$48 sps:$4 sm:$0xff]  }
 0x125   :  { %3437 = vmatprep.subr.bf16.mxu1 %v22489_v2  ;;  %v22579_v2 = vld [vmem:[#allocation5 + $0xdc] ss:$48 sps:$4 sm:$0xff]  }
 0x127   :  { %3395 = vmatpush1.bf16.msra.mxu0 %v22484_v3  ;;  %v22574_v3 = vld [vmem:[#allocation5 + $0xcd0] ss:$48 sps:$4 sm:$0xff]  }
 0x128   :  { %3438 = vmatpush1.bf16.msra.mxu1 %v22487_v5  ;;  %3396 = vmatprep.subr.bf16.mxu0 %v22492_v6  ;;  %v22577_v5 = vld [vmem:[#allocation5 + $0xd8] ss:$48 sps:$4 sm:$0xff]   ;;  %v22582_v6 = vld [vmem:[#allocation5 + $0xc74] ss:$48 sps:$4 sm:$0xff]  }
 0x129   :  { %3439 = vmatprep.subr.bf16.mxu1 %v22495_v8  ;;  %v638_v8 = vlaneseq }
 0x12b   :  { %3397 = vmatpush1.bf16.msra.mxu0 %v22490_v9  ;;  %v22585_v9 = vld [vmem:[#allocation5 + $0x7c] ss:$48 sps:$4 sm:$0xff]  }
 0x12c   :  { %3440 = vmatpush1.bf16.msra.mxu1 %v22493_v10  ;;  %3398 = vmatprep.subr.bf16.mxu0 %v22498_v11  ;;  %v22580_v10 = vld [vmem:[#allocation5 + $0xc70] ss:$48 sps:$4 sm:$0xff]   ;;  %v22583_v11 = vld [vmem:[#allocation5 + $0x78] ss:$48 sps:$4 sm:$0xff]  }
 0x12d   :  { %3441 = vmatprep.subr.bf16.mxu1 %v22501_v12  ;;  %v22588_v12 = vld [vmem:[#allocation5 + $0xc14] ss:$48 sps:$4 sm:$0xff]  }
 0x12f   :  { %3399 = vmatpush2.bf16.msra.mxu0 %v22496_v13  ;;  %v26355_v13 = vshrl.u32 %v638_v8, 7  ;;  %v22648_v8 = vld [vmem:[#allocation5 + $0xb5c] ss:$48 sps:$4 sm:$0xff]  }
 0x130   :  { %3442 = vmatpush2.bf16.msra.mxu1 %v22499_v15  ;;  %3400 = vmatprep.subr.bf16.mxu0 %v22504_v16  ;;  %v22591_v15 = vld [vmem:[#allocation5 + $0x1c] ss:$48 sps:$4 sm:$0xff]   ;;  %v22586_v16 = vld [vmem:[#allocation5 + $0xc10] ss:$48 sps:$4 sm:$0xff]  }
 0x131   :  { %3443 = vmatprep.subr.bf16.mxu1 %v22507_v17  ;;  %27339 = vst [vmem:[#allocation23_spill] sm:$0xff] %v26355_v13  ;;  %v22589_v17 = vld [vmem:[#allocation5 + $0x18] ss:$48 sps:$4 sm:$0xff]  }
 0x133   :  { %3401 = vmatpush2.bf16.msra.mxu0 %v22502_v18  ;;  %v26357_v18 = vld [vmem:[#allocation6] sm:$0xff] }
 0x134   :  { %3444 = vmatpush2.bf16.msra.mxu1 %v22505_v19  ;;  %3402 = vmatprep.subr.bf16.mxu0 %v22510_v20  ;;  %v26360_v19 = vsub.s32 0, %v26355_v13  ;;  %v22594_v20 = vld [vmem:[#allocation5 + $0x5bc] ss:$48 sps:$4 sm:$0xff]  }
 0x135   :  { %3445 = vmatprep.subr.bf16.mxu1 %v22513_v21  ;;  %v22597_v21 = vld [vmem:[#allocation5 + $0x8bc] ss:$48 sps:$4 sm:$0xff]  }
 0x136   :  { %27340 = vst [vmem:[#allocation24_spill] sm:$0xff] %v26360_v19 }
 0x137   :  { %3403 = vmatpush2.bf16.msra.mxu0 %v22508_v22  ;;  %v22592_v22 = vld [vmem:[#allocation5 + $0x5b8] ss:$48 sps:$4 sm:$0xff]  }
 0x138   :  { %3446 = vmatpush2.bf16.msra.mxu1 %v22511_v23  ;;  %3404 = vmatprep.subr.bf16.mxu0 %v22516_v24  ;;  %v22595_v23 = vld [vmem:[#allocation5 + $0x8b8] ss:$48 sps:$4 sm:$0xff]   ;;  %v641_v24 = vrot.slane %v26357_v18, %v26360_v19 }
 0x139   :  { %3447 = vmatprep.subr.bf16.mxu1 %v22519_v25  ;;  %v22600_v25 = vld [vmem:[#allocation5 + $0x55c] ss:$48 sps:$4 sm:$0xff]  }
 0x13b   :  { %3405 = vmatpush2.bf16.msra.mxu0 %v22514_v4  ;;  %v22603_v4 = vld [vmem:[#allocation5 + $0x85c] ss:$48 sps:$4 sm:$0xff]  }
 0x13c   :  { %3448 = vmatpush2.bf16.msra.mxu1 %v22517_v26  ;;  %3406 = vmatprep.subr.bf16.mxu0 %v22522_v27  ;;  %v26367_v27 = vld [vmem:[%s27319_s1 + $0x10] ss:$20 sps:$4 sm:$0xff]  }
 0x13d   :  { %3449 = vmatprep.subr.bf16.mxu1 %v22525_v28 }
 0x13f   :  { %3407 = vmatpush2.bf16.msra.mxu0 %v22520_v29  ;;  %v22598_v29 = vld [vmem:[#allocation5 + $0x558] ss:$48 sps:$4 sm:$0xff]  }
 0x140   :  { %3450 = vmatpush2.bf16.msra.mxu1 %v22523_v30  ;;  %3408 = vmatprep.subr.bf16.mxu0 %v22528_v31  ;;  %v22601_v30 = vld [vmem:[#allocation5 + $0x858] ss:$48 sps:$4 sm:$0xff]  }
 0x141   :  { %3451 = vmatprep.subr.bf16.mxu1 %v22531_v32  ;;  %v22606_v32 = vld [vmem:[#allocation5 + $0x4fc] ss:$48 sps:$4 sm:$0xff]  }
 0x143   :  { %3409 = vmatpush2.bf16.msra.mxu0 %v22526_v33 }
 0x144   :  { %3452 = vmatpush2.bf16.msra.mxu1 %v22529_v34  ;;  %3410 = vmatprep.subr.bf16.mxu0 %v22534_v35  ;;  %v22609_v35 = vld [vmem:[#allocation5 + $0x7fc] ss:$48 sps:$4 sm:$0xff]  }
 0x145   :  { %3453 = vmatprep.subr.bf16.mxu1 %v22537_v36 }
 0x147   :  { %3411 = vmatpush2.bf16.msra.mxu0 %v22532_v37  ;;  %v26379_v37 = vld [vmem:[%s27319_s1 + $0xc] ss:$20 sps:$4 sm:$0xff]  }
 0x148   :  { %3454 = vmatpush2.bf16.msra.mxu1 %v22535_v38  ;;  %3412 = vmatprep.subr.bf16.mxu0 %v22540_v40 }
 0x149   :  { %3455 = vmatprep.subr.bf16.mxu1 %v22543_v41  ;;  %v22604_v41 = vld [vmem:[#allocation5 + $0x4f8] ss:$48 sps:$4 sm:$0xff]  }
 0x14b   :  { %3413 = vmatpush2.bf16.msra.mxu0 %v22538_v42  ;;  %v22607_v42 = vld [vmem:[#allocation5 + $0x7f8] ss:$48 sps:$4 sm:$0xff]  }
 0x14c   :  { %3456 = vmatpush2.bf16.msra.mxu1 %v22541_v43  ;;  %3468 = vmatprep.subr.bf16.mxu0 %v22546_v44  ;;  %v22612_v44 = vld [vmem:[#allocation5 + $0x49c] ss:$48 sps:$4 sm:$0xff]  }
 0x14d   :  { %3511 = vmatprep.subr.bf16.mxu1 %v22549_v45  ;;  %v22615_v45 = vld [vmem:[#allocation5 + $0x79c] ss:$48 sps:$4 sm:$0xff]  }
 0x14e   :  { %3415 = vmatmul.mubr.bf16.vlgmr.msra.gmra.mxu0 %v26339_v52 }
 0x14f   :  { %3458 = vmatmul.mubr.bf16.vlgmr.msra.gmra.mxu1 %v26345_v53  ;;  %3469 = vmatpush1.bf16.msra.mxu0 %v22544_v46 }
 0x150   :  { %3512 = vmatpush1.bf16.msra.mxu1 %v22547_v47  ;;  %3470 = vmatprep.subr.bf16.mxu0 %v22552_v48  ;;  %v22610_v47 = vld [vmem:[#allocation5 + $0x498] ss:$48 sps:$4 sm:$0xff]  }
 0x151   :  { %3513 = vmatprep.subr.bf16.mxu1 %v22555_v51  ;;  %3500 = vmatprep.mubr.bf16.mxu0 %v26214_v14  ;;  %v22613_v48 = vld [vmem:[#allocation5 + $0x798] ss:$48 sps:$4 sm:$0xff]   ;;  %v22618_v51 = vld [vmem:[#allocation5 + $0x43c] ss:$48 sps:$4 sm:$0xff]  }
 0x152   :  { %3543 = vmatprep.mubr.bf16.mxu1 %v26352_v7 }
 0x153   :  { %3471 = vmatpush1.bf16.msra.mxu0 %v22550_v54  ;;  %v22621_v54 = vld [vmem:[#allocation5 + $0x73c] ss:$48 sps:$4 sm:$0xff]  }
 0x154   :  { %3514 = vmatpush1.bf16.msra.mxu1 %v22553_v55  ;;  %3472 = vmatprep.subr.bf16.mxu0 %v22558_v56  ;;  %v22616_v55 = vld [vmem:[#allocation5 + $0x438] ss:$48 sps:$4 sm:$0xff]  }
 0x155   :  { %3515 = vmatprep.subr.bf16.mxu1 %v22561_v57  ;;  %v22619_v56 = vld [vmem:[#allocation5 + $0x738] ss:$48 sps:$4 sm:$0xff]   ;;  %v22624_v57 = vld [vmem:[#allocation5 + $0x3dc] ss:$48 sps:$4 sm:$0xff]  }
 0x157   :  { %3473 = vmatpush1.bf16.msra.mxu0 %v22556_v39  ;;  %v22627_v39 = vld [vmem:[#allocation5 + $0x6dc] ss:$48 sps:$4 sm:$0xff]  }
 0x158   :  { %3516 = vmatpush1.bf16.msra.mxu1 %v22559_v58  ;;  %3474 = vmatprep.subr.bf16.mxu0 %v22564_v59  ;;  %v22622_v58 = vld [vmem:[#allocation5 + $0x3d8] ss:$48 sps:$4 sm:$0xff]  }
 0x159   :  { %3517 = vmatprep.subr.bf16.mxu1 %v22567_v60  ;;  %v22625_v59 = vld [vmem:[#allocation5 + $0x6d8] ss:$48 sps:$4 sm:$0xff]   ;;  %v22630_v60 = vld [vmem:[#allocation5 + $0x37c] ss:$48 sps:$4 sm:$0xff]  }
 0x15b   :  { %3475 = vmatpush1.bf16.msra.mxu0 %v22562_v61  ;;  %v22633_v61 = vld [vmem:[#allocation5 + $0x67c] ss:$48 sps:$4 sm:$0xff]  }
 0x15c   :  { %3518 = vmatpush1.bf16.msra.mxu1 %v22565_v49  ;;  %3476 = vmatprep.subr.bf16.mxu0 %v22570_v50  ;;  %v22628_v49 = vld [vmem:[#allocation5 + $0x378] ss:$48 sps:$4 sm:$0xff]  }
 0x15d   :  { %3519 = vmatprep.subr.bf16.mxu1 %v22573_v62  ;;  %v22631_v50 = vld [vmem:[#allocation5 + $0x678] ss:$48 sps:$4 sm:$0xff]   ;;  %v22636_v62 = vld [vmem:[#allocation5 + $0x31c] ss:$48 sps:$4 sm:$0xff]  }
 0x15f   :  { %3477 = vmatpush1.bf16.msra.mxu0 %v22568_v63  ;;  %v22639_v63 = vld [vmem:[#allocation5 + $0x61c] ss:$48 sps:$4 sm:$0xff]  }
 0x160   :  { %3520 = vmatpush1.bf16.msra.mxu1 %v22571_v0  ;;  %3478 = vmatprep.subr.bf16.mxu0 %v22576_v1  ;;  %v22634_v0 = vld [vmem:[#allocation5 + $0x318] ss:$48 sps:$4 sm:$0xff]  }
 0x161   :  { %3521 = vmatprep.subr.bf16.mxu1 %v22579_v2  ;;  %v22637_v1 = vld [vmem:[#allocation5 + $0x618] ss:$48 sps:$4 sm:$0xff]   ;;  %v22642_v2 = vld [vmem:[#allocation5 + $0xbbc] ss:$48 sps:$4 sm:$0xff]  }
 0x163   :  { %3479 = vmatpush1.bf16.msra.mxu0 %v22574_v3  ;;  %v22645_v3 = vld [vmem:[#allocation5 + $0xebc] ss:$48 sps:$4 sm:$0xff]  }
 0x164   :  { %3522 = vmatpush1.bf16.msra.mxu1 %v22577_v5  ;;  %3480 = vmatprep.subr.bf16.mxu0 %v22582_v6  ;;  %v22640_v5 = vld [vmem:[#allocation5 + $0xbb8] ss:$48 sps:$4 sm:$0xff]  }
 0x165   :  { %3523 = vmatprep.subr.bf16.mxu1 %v22585_v9  ;;  %v22643_v6 = vld [vmem:[#allocation5 + $0xeb8] ss:$48 sps:$4 sm:$0xff]   ;;  %v22651_v9 = vld [vmem:[#allocation5 + $0xe5c] ss:$48 sps:$4 sm:$0xff]  }
 0x167   :  { %3481 = vmatpush1.bf16.msra.mxu0 %v22580_v10 }
 0x168   :  { %3524 = vmatpush1.bf16.msra.mxu1 %v22583_v11  ;;  %3482 = vmatprep.subr.bf16.mxu0 %v22588_v12  ;;  %v22646_v11 = vld [vmem:[#allocation5 + $0xb58] ss:$48 sps:$4 sm:$0xff]  }
 0x169   :  { %3525 = vmatprep.subr.bf16.mxu1 %v22591_v15  ;;  %v22649_v12 = vld [vmem:[#allocation5 + $0xe58] ss:$48 sps:$4 sm:$0xff]  }
 0x16b   :  { %3483 = vmatpush1.bf16.msra.mxu0 %v22586_v16  ;;  %v22654_v16 = vld [vmem:[#allocation5 + $0xafc] ss:$48 sps:$4 sm:$0xff]  }
 0x16c   :  { %3526 = vmatpush1.bf16.msra.mxu1 %v22589_v17  ;;  %3554 = vmatprep.subr.bf16.mxu0 %v22597_v21  ;;  %v22657_v17 = vld [vmem:[#allocation5 + $0xdfc] ss:$48 sps:$4 sm:$0xff]   ;;  %v26388_v21 = vstv %s3898_s29 }
 0x16d   :  { %3527 = vmatprep.subr.bf16.mxu1 %v22594_v20 }
 0x16e   :  { %v3158_v26 = vpop.f32.mrf.mxu0  ;;  %3501 = vmatmul.mubr.bf16.vlgmr.msra.gmra.mxu0 %v26367_v27 }
 0x16f   :  { %v3201_v28 = vpop.f32.mrf.mxu1  ;;  %v3159_v31 = vadd.f32 %v3158_v26, %v641_v24  ;;  %3555 = vmatpush1.bf16.msra.mxu0 %v22595_v23  ;;  %3586 = vmatprep.mubr.bf16.mxu0 %v26379_v37  ;;  %v22652_v23 = vld [vmem:[#allocation5 + $0xaf8] ss:$48 sps:$4 sm:$0xff]   ;;  %v22663_v26 = vld [vmem:[#allocation5 + $0xd9c] ss:$48 sps:$4 sm:$0xff]  }
 0x170   :  { %3528 = vmatpush2.bf16.msra.mxu1 %v22592_v22  ;;  %v26370_v33 = vpop.f32.mrf.mxu0  ;;  %3556 = vmatprep.subr.bf16.mxu0 %v22603_v4  ;;  %v22660_v4 = vld [vmem:[#allocation5 + $0xa9c] ss:$48 sps:$4 sm:$0xff]  }
 0x171   :  { %v26372_v34 = vpop.f32.mrf.mxu1  ;;  %3529 = vmatprep.subr.bf16.mxu1 %v22600_v25  ;;  %v26374_v36 = vadd.f32 %v3201_v28, %v3159_v31 }
 0x172   :  { %v3162_v38 = vpop.f32.mrf.mxu0 }
 0x173   :  { %v3205_v40 = vpop.f32.mrf.mxu1  ;;  %v3163_v43 = vadd.f32 %v3162_v38, %v641_v24  ;;  %3557 = vmatpush1.bf16.msra.mxu0 %v22601_v30  ;;  %v22655_v24 = vld [vmem:[#allocation5 + $0xdf8] ss:$48 sps:$4 sm:$0xff]   ;;  %v22666_v38 = vld [vmem:[#allocation5 + $0xa3c] ss:$48 sps:$4 sm:$0xff]  }
 0x174   :  { %3530 = vmatpush2.bf16.msra.mxu1 %v22598_v29  ;;  %3558 = vmatprep.subr.bf16.mxu0 %v22609_v35  ;;  %v26384_v10 = vpop.f32.mrf.mxu0  ;;  %v22661_v35 = vld [vmem:[#allocation5 + $0xd98] ss:$48 sps:$4 sm:$0xff]  }
 0x175   :  { %3531 = vmatprep.subr.bf16.mxu1 %v22606_v32  ;;  %v26382_v46 = vadd.f32 %v3205_v40, %v3163_v43  ;;  %v22658_v32 = vld [vmem:[#allocation5 + $0xa98] ss:$48 sps:$4 sm:$0xff]   ;;  %v22669_v40 = vld [vmem:[#allocation5 + $0xd3c] ss:$48 sps:$4 sm:$0xff]  }
 0x176   :  { %v22672_v43 = vld [vmem:[#allocation5 + $0x9dc] ss:$48 sps:$4 sm:$0xff]  }
 0x177   :  { %3559 = vmatpush1.bf16.msra.mxu0 %v22607_v42  ;;  %v22667_v42 = vld [vmem:[#allocation5 + $0xd38] ss:$48 sps:$4 sm:$0xff]  }
 0x178   :  { %3532 = vmatpush2.bf16.msra.mxu1 %v22604_v41  ;;  %3560 = vmatprep.subr.bf16.mxu0 %v22615_v45  ;;  %v22664_v41 = vld [vmem:[#allocation5 + $0xa38] ss:$48 sps:$4 sm:$0xff]  }
 0x179   :  { %3533 = vmatprep.subr.bf16.mxu1 %v22612_v44  ;;  %v22675_v44 = vld [vmem:[#allocation5 + $0xcdc] ss:$48 sps:$4 sm:$0xff]   ;;  %v22670_v45 = vld [vmem:[#allocation5 + $0x9d8] ss:$48 sps:$4 sm:$0xff]  }
 0x17b   :  { %3561 = vmatpush1.bf16.msra.mxu0 %v22613_v48  ;;  %v22681_v48 = vld [vmem:[#allocation5 + $0xc7c] ss:$48 sps:$4 sm:$0xff]  }
 0x17c   :  { %3534 = vmatpush2.bf16.msra.mxu1 %v22610_v47  ;;  %3562 = vmatprep.subr.bf16.mxu0 %v22621_v54  ;;  %v22678_v47 = vld [vmem:[#allocation5 + $0x97c] ss:$48 sps:$4 sm:$0xff]   ;;  %v22679_v54 = vld [vmem:[#allocation5 + $0xc78] ss:$48 sps:$4 sm:$0xff]  }
 0x17d   :  { %3535 = vmatprep.subr.bf16.mxu1 %v22618_v51  ;;  %v22676_v51 = vld [vmem:[#allocation5 + $0x978] ss:$48 sps:$4 sm:$0xff]  }
 0x17f   :  { %3563 = vmatpush1.bf16.msra.mxu0 %v22619_v56  ;;  %v22687_v56 = vld [vmem:[#allocation5 + $0xc1c] ss:$48 sps:$4 sm:$0xff]  }
 0x180   :  { %3536 = vmatpush2.bf16.msra.mxu1 %v22616_v55  ;;  %3564 = vmatprep.subr.bf16.mxu0 %v22627_v39  ;;  %v22684_v55 = vld [vmem:[#allocation5 + $0x91c] ss:$48 sps:$4 sm:$0xff]   ;;  %v22685_v39 = vld [vmem:[#allocation5 + $0xc18] ss:$48 sps:$4 sm:$0xff]  }
 0x181   :  { %3537 = vmatprep.subr.bf16.mxu1 %v22624_v57  ;;  %v22682_v57 = vld [vmem:[#allocation5 + $0x918] ss:$48 sps:$4 sm:$0xff]  }
 0x183   :  { %3565 = vmatpush1.bf16.msra.mxu0 %v22625_v59  ;;  %v22693_v59 = vld [vmem:[#allocation5 + $0x8c4] ss:$48 sps:$4 sm:$0xff]  }
 0x184   :  { %3538 = vmatpush2.bf16.msra.mxu1 %v22622_v58  ;;  %3566 = vmatprep.subr.bf16.mxu0 %v22633_v61  ;;  %v22690_v58 = vld [vmem:[#allocation5 + $0x2c4] ss:$48 sps:$4 sm:$0xff]   ;;  %v22691_v61 = vld [vmem:[#allocation5 + $0x8c0] ss:$48 sps:$4 sm:$0xff]  }
 0x185   :  { %3539 = vmatprep.subr.bf16.mxu1 %v22630_v60  ;;  %v22688_v60 = vld [vmem:[#allocation5 + $0x2c0] ss:$48 sps:$4 sm:$0xff]  }
 0x187   :  { %3567 = vmatpush1.bf16.msra.mxu0 %v22631_v50  ;;  %v22699_v50 = vld [vmem:[#allocation5 + $0x864] ss:$48 sps:$4 sm:$0xff]  }
 0x188   :  { %3540 = vmatpush2.bf16.msra.mxu1 %v22628_v49  ;;  %3568 = vmatprep.subr.bf16.mxu0 %v22639_v63  ;;  %v22696_v49 = vld [vmem:[#allocation5 + $0x264] ss:$48 sps:$4 sm:$0xff]   ;;  %v22697_v63 = vld [vmem:[#allocation5 + $0x860] ss:$48 sps:$4 sm:$0xff]  }
 0x189   :  { %3541 = vmatprep.subr.bf16.mxu1 %v22636_v62  ;;  %v22694_v62 = vld [vmem:[#allocation5 + $0x260] ss:$48 sps:$4 sm:$0xff]  }
 0x18b   :  { %3569 = vmatpush1.bf16.msra.mxu0 %v22637_v1  ;;  %v22705_v1 = vld [vmem:[#allocation5 + $0x804] ss:$48 sps:$4 sm:$0xff]  }
 0x18c   :  { %3542 = vmatpush2.bf16.msra.mxu1 %v22634_v0  ;;  %3570 = vmatprep.subr.bf16.mxu0 %v22642_v2  ;;  %v22702_v0 = vld [vmem:[#allocation5 + $0x204] ss:$48 sps:$4 sm:$0xff]   ;;  %v22700_v2 = vld [vmem:[#allocation5 + $0x200] ss:$48 sps:$4 sm:$0xff]  }
 0x18d   :  { %3597 = vmatprep.subr.bf16.mxu1 %v22645_v3  ;;  %v22703_v3 = vld [vmem:[#allocation5 + $0x800] ss:$48 sps:$4 sm:$0xff]  }
 0x18e   :  { %v3244_v15 = vpop.f32.mrf.mxu0 }
 0x18f   :  { %3544 = vmatmul.mubr.bf16.vlgmr.msra.gmra.mxu1 %v26339_v52  ;;  %v3245_v20 = vadd.f32 %v3244_v15, %v26374_v36  ;;  %3571 = vmatpush2.bf16.msra.mxu0 %v22640_v5  ;;  %v22708_v5 = vld [vmem:[#allocation5 + $0x1a4] ss:$48 sps:$4 sm:$0xff]  }
 0x190   :  { %3598 = vmatpush1.bf16.msra.mxu1 %v22643_v6  ;;  %v26390_v22 = vpop.f32.mrf.mxu0  ;;  %3572 = vmatprep.subr.bf16.mxu0 %v22648_v8  ;;  %v22711_v6 = vld [vmem:[#allocation5 + $0x7a4] ss:$48 sps:$4 sm:$0xff]  }
 0x191   :  { %3599 = vmatprep.subr.bf16.mxu1 %v22651_v9  ;;  %3629 = vmatprep.mubr.bf16.mxu1 %v26214_v14  ;;  %v3924_v52 = vmul.f32 %v26388_v21, %v3245_v20  ;;  %vm3899_vm0 = vcmp.gt.f32.partialorder %v3245_v20, 0.0  ;;  %v22714_v8 = vld [vmem:[#allocation5 + $0x144] ss:$48 sps:$4 sm:$0xff]  }
 0x192   :  { %v3248_v25 = vpop.f32.mrf.mxu0  ;;  %v22717_v9 = vld [vmem:[#allocation5 + $0x744] ss:$48 sps:$4 sm:$0xff]  }
 0x193   :  { %v3249_v28 = vadd.f32 %v3248_v25, %v26382_v46  ;;  %3573 = vmatpush2.bf16.msra.mxu0 %v22646_v11  ;;  %v3948_v30 = vsel %vm3899_vm0, %v3245_v20, %v3924_v52  ;;  %v22673_v46 = vld [vmem:[#allocation5 + $0xcd8] ss:$48 sps:$4 sm:$0xff]   ;;  %v22712_v11 = vld [vmem:[#allocation5 + $0x140] ss:$48 sps:$4 sm:$0xff]   ;;  %v22723_v15 = vld [vmem:[#allocation5 + $0x6e4] ss:$48 sps:$4 sm:$0xff]  }
 0x194   :  { %3600 = vmatpush1.bf16.msra.mxu1 %v22649_v12  ;;  %3574 = vmatprep.subr.bf16.mxu0 %v22654_v16  ;;  %v26402_v12 = vpop.f32.mrf.mxu1  ;;  %v22721_v20 = vld [vmem:[#allocation5 + $0x6e0] ss:$48 sps:$4 sm:$0xff]   ;;  %v26407_v52 = vsub.s32 2, %v26355_v13 }
 0x195   :  { %3601 = vmatprep.subr.bf16.mxu1 %v22657_v17  ;;  %vm3911_vm1 = vcmp.gt.f32.partialorder %v3249_v28, 0.0  ;;  %v3936_v29 = vmul.f32 %v26388_v21, %v3249_v28  ;;  %v22718_v17 = vld [vmem:[#allocation5 + $0xe0] ss:$48 sps:$4 sm:$0xff]  }
 0x197   :  { %v3960_v31 = vsel %vm3911_vm1, %v3249_v28, %v3936_v29  ;;  %3575 = vmatpush2.bf16.msra.mxu0 %v22652_v23  ;;  %v22726_v23 = vld [vmem:[#allocation5 + $0x84] ss:$48 sps:$4 sm:$0xff]  }
 0x198   :  { %3602 = vmatpush1.bf16.msra.mxu1 %v22655_v24  ;;  %v26396_v36 = vpack.c.bf16 %v3960_v31, %v3948_v30  ;;  %3576 = vmatprep.subr.bf16.mxu0 %v22660_v4  ;;  %v22729_v24 = vld [vmem:[#allocation5 + $0x684] ss:$48 sps:$4 sm:$0xff]   ;;  %v22724_v4 = vld [vmem:[#allocation5 + $0x80] ss:$48 sps:$4 sm:$0xff]   ;;  %v649_v31 = vrot.slane %v26357_v18, %v26407_v52 }
 0x199   :  { %3603 = vmatprep.subr.bf16.mxu1 %v22663_v26  ;;  %v22727_v26 = vld [vmem:[#allocation5 + $0x680] ss:$48 sps:$4 sm:$0xff]   ;;  %v22732_v28 = vld [vmem:[#allocation5 + $0x24] ss:$48 sps:$4 sm:$0xff]  }
 0x19a   :  { %v22735_v29 = vld [vmem:[#allocation5 + $0x624] ss:$48 sps:$4 sm:$0xff]  }
 0x19b   :  { %3577 = vmatpush2.bf16.msra.mxu0 %v22658_v32  ;;  %v22730_v32 = vld [vmem:[#allocation5 + $0x20] ss:$48 sps:$4 sm:$0xff]  }
 0x19c   :  { %3604 = vmatpush1.bf16.msra.mxu1 %v22661_v35  ;;  %3578 = vmatprep.subr.bf16.mxu0 %v22666_v38  ;;  %v22733_v35 = vld [vmem:[#allocation5 + $0x620] ss:$48 sps:$4 sm:$0xff]   ;;  %v22738_v38 = vld [vmem:[#allocation5 + $0x5c4] ss:$48 sps:$4 sm:$0xff]  }
 0x19d   :  { %3605 = vmatprep.subr.bf16.mxu1 %v22669_v40  ;;  %v22741_v40 = vld [vmem:[#allocation5 + $0xbc4] ss:$48 sps:$4 sm:$0xff]  }
 0x19f   :  { %3579 = vmatpush2.bf16.msra.mxu0 %v22664_v41  ;;  %v22736_v41 = vld [vmem:[#allocation5 + $0x5c0] ss:$48 sps:$4 sm:$0xff]  }
 0x1a0   :  { %3606 = vmatpush1.bf16.msra.mxu1 %v22667_v42  ;;  %3580 = vmatprep.subr.bf16.mxu0 %v22672_v43  ;;  %v22739_v42 = vld [vmem:[#allocation5 + $0xbc0] ss:$48 sps:$4 sm:$0xff]  }
 0x1a1   :  { %3607 = vmatprep.subr.bf16.mxu1 %v22675_v44  ;;  %v22744_v44 = vld [vmem:[#allocation5 + $0x564] ss:$48 sps:$4 sm:$0xff]  }
 0x1a3   :  { %3581 = vmatpush2.bf16.msra.mxu0 %v22670_v45  ;;  %v22747_v45 = vld [vmem:[#allocation5 + $0xb64] ss:$48 sps:$4 sm:$0xff]  }
 0x1a4   :  { %3608 = vmatpush1.bf16.msra.mxu1 %v22673_v46  ;;  %3582 = vmatprep.subr.bf16.mxu0 %v22678_v47  ;;  %v26413_v47 = vpop.f32.mrf.mxu0 }
 0x1a5   :  { %3609 = vmatprep.subr.bf16.mxu1 %v22681_v48 }
 0x1a7   :  { %3583 = vmatpush2.bf16.msra.mxu0 %v22676_v51  ;;  %v22742_v51 = vld [vmem:[#allocation5 + $0x560] ss:$48 sps:$4 sm:$0xff]  }
 0x1a8   :  { %3610 = vmatpush1.bf16.msra.mxu1 %v22679_v54  ;;  %3584 = vmatprep.subr.bf16.mxu0 %v22684_v55  ;;  %v22745_v54 = vld [vmem:[#allocation5 + $0xb60] ss:$48 sps:$4 sm:$0xff]  }
 0x1a9   :  { %3611 = vmatprep.subr.bf16.mxu1 %v22687_v56 }
 0x1ab   :  { %3585 = vmatpush2.bf16.msra.mxu0 %v22682_v57 }
 0x1ac   :  { %3612 = vmatpush1.bf16.msra.mxu1 %v22685_v39  ;;  %3640 = vmatprep.subr.bf16.mxu0 %v22690_v58  ;;  %v22750_v58 = vld [vmem:[#allocation5 + $0x504] ss:$48 sps:$4 sm:$0xff]  }
 0x1ad   :  { %3683 = vmatprep.subr.bf16.mxu1 %v22693_v59  ;;  %v22753_v59 = vld [vmem:[#allocation5 + $0xb04] ss:$48 sps:$4 sm:$0xff]  }
 0x1ae   :  { %3587 = vmatmul.mubr.bf16.vlgmr.msra.gmra.mxu0 %v26345_v53  ;;  %v22706_v53 = vld [vmem:[#allocation5 + $0x1a0] ss:$48 sps:$4 sm:$0xff]  }
 0x1af   :  { %3630 = vmatmul.mubr.bf16.vlgmr.msra.gmra.mxu1 %v26367_v27  ;;  %3641 = vmatpush1.bf16.msra.mxu0 %v22688_v60  ;;  %v22709_v27 = vld [vmem:[#allocation5 + $0x7a0] ss:$48 sps:$4 sm:$0xff]   ;;  %v3287_v16 = vpop.f32.mrf.mxu1 }
 0x1b0   :  { %3684 = vmatpush1.bf16.msra.mxu1 %v22691_v61  ;;  %3642 = vmatprep.subr.bf16.mxu0 %v22696_v49  ;;  %v3288_v46 = vadd.f32 %v3287_v16, %v649_v31  ;;  %v22748_v61 = vld [vmem:[#allocation5 + $0x500] ss:$48 sps:$4 sm:$0xff]   ;;  %v22768_v16 = vld [vmem:[#allocation5 + $0x3e4] ss:$48 sps:$4 sm:$0xff]  }
 0x1b1   :  { %3685 = vmatprep.subr.bf16.mxu1 %v22699_v50  ;;  %3672 = vmatprep.mubr.bf16.mxu0 %v26352_v7  ;;  %v22715_v7 = vld [vmem:[#allocation5 + $0x740] ss:$48 sps:$4 sm:$0xff]   ;;  %v26404_v25 = vpop.f32.mrf.mxu1 }
 0x1b2   :  { %3715 = vmatprep.mubr.bf16.mxu1 %v26379_v37  ;;  %v22720_v37 = vld [vmem:[#allocation5 + $0xe4] ss:$48 sps:$4 sm:$0xff]   ;;  %v22751_v49 = vld [vmem:[#allocation5 + $0xb00] ss:$48 sps:$4 sm:$0xff]  }
 0x1b3   :  { %3643 = vmatpush1.bf16.msra.mxu0 %v22694_v62  ;;  %v3291_v30 = vpop.f32.mrf.mxu1 }
 0x1b4   :  { %3686 = vmatpush1.bf16.msra.mxu1 %v22697_v63  ;;  %3644 = vmatprep.subr.bf16.mxu0 %v22702_v0  ;;  %v3292_v55 = vadd.f32 %v3291_v30, %v649_v31  ;;  %v22756_v0 = vld [vmem:[#allocation5 + $0x4a4] ss:$48 sps:$4 sm:$0xff]   ;;  %v22778_v31 = vld [vmem:[#allocation5 + $0x320] ss:$48 sps:$4 sm:$0xff]  }
 0x1b5   :  { %3687 = vmatprep.subr.bf16.mxu1 %v22705_v1  ;;  %v26411_v43 = vpop.f32.mrf.mxu1  ;;  %v22759_v1 = vld [vmem:[#allocation5 + $0xaa4] ss:$48 sps:$4 sm:$0xff]  }
 0x1b6   :  { %v22783_v30 = vld [vmem:[#allocation5 + $0x924] ss:$48 sps:$4 sm:$0xff]  }
 0x1b7   :  { %3645 = vmatpush1.bf16.msra.mxu0 %v22700_v2  ;;  %v22754_v2 = vld [vmem:[#allocation5 + $0x4a0] ss:$48 sps:$4 sm:$0xff]  }
 0x1b8   :  { %3688 = vmatpush1.bf16.msra.mxu1 %v22703_v3  ;;  %3646 = vmatprep.subr.bf16.mxu0 %v22708_v5  ;;  %v22757_v3 = vld [vmem:[#allocation5 + $0xaa0] ss:$48 sps:$4 sm:$0xff]  }
 0x1b9   :  { %3689 = vmatprep.subr.bf16.mxu1 %v22711_v6 }
 0x1bb   :  { %3647 = vmatpush1.bf16.msra.mxu0 %v22706_v53 }
 0x1bc   :  { %3690 = vmatpush1.bf16.msra.mxu1 %v22709_v27  ;;  %3648 = vmatprep.subr.bf16.mxu0 %v22714_v8  ;;  %v22762_v27 = vld [vmem:[#allocation5 + $0x444] ss:$48 sps:$4 sm:$0xff]  }
 0x1bd   :  { %3691 = vmatprep.subr.bf16.mxu1 %v22717_v9  ;;  %v22765_v8 = vld [vmem:[#allocation5 + $0xa44] ss:$48 sps:$4 sm:$0xff]   ;;  %v22760_v9 = vld [vmem:[#allocation5 + $0x440] ss:$48 sps:$4 sm:$0xff]  }
 0x1bf   :  { %3649 = vmatpush1.bf16.msra.mxu0 %v22712_v11  ;;  %v22763_v11 = vld [vmem:[#allocation5 + $0xa40] ss:$48 sps:$4 sm:$0xff]  }
 0x1c0   :  { %3692 = vmatpush1.bf16.msra.mxu1 %v22715_v7  ;;  %3650 = vmatprep.subr.bf16.mxu0 %v22720_v37 }
 0x1c1   :  { %3693 = vmatprep.subr.bf16.mxu1 %v22723_v15 }
 0x1c3   :  { %3651 = vmatpush1.bf16.msra.mxu0 %v22718_v17  ;;  %v22771_v17 = vld [vmem:[#allocation5 + $0x9e4] ss:$48 sps:$4 sm:$0xff]  }
 0x1c4   :  { %3694 = vmatpush1.bf16.msra.mxu1 %v22721_v20  ;;  %3652 = vmatprep.subr.bf16.mxu0 %v22726_v23  ;;  %v22766_v20 = vld [vmem:[#allocation5 + $0x3e0] ss:$48 sps:$4 sm:$0xff]  }
 0x1c5   :  { %3695 = vmatprep.subr.bf16.mxu1 %v22729_v24  ;;  %v22769_v23 = vld [vmem:[#allocation5 + $0x9e0] ss:$48 sps:$4 sm:$0xff]   ;;  %v22774_v24 = vld [vmem:[#allocation5 + $0x384] ss:$48 sps:$4 sm:$0xff]  }
 0x1c7   :  { %3653 = vmatpush1.bf16.msra.mxu0 %v22724_v4  ;;  %v22777_v4 = vld [vmem:[#allocation5 + $0x984] ss:$48 sps:$4 sm:$0xff]  }
 0x1c8   :  { %3696 = vmatpush1.bf16.msra.mxu1 %v22727_v26  ;;  %3654 = vmatprep.subr.bf16.mxu0 %v22732_v28  ;;  %v22772_v26 = vld [vmem:[#allocation5 + $0x380] ss:$48 sps:$4 sm:$0xff]  }
 0x1c9   :  { %3697 = vmatprep.subr.bf16.mxu1 %v22735_v29  ;;  %v22775_v28 = vld [vmem:[#allocation5 + $0x980] ss:$48 sps:$4 sm:$0xff]   ;;  %v22780_v29 = vld [vmem:[#allocation5 + $0x324] ss:$48 sps:$4 sm:$0xff]  }
 0x1cb   :  { %3655 = vmatpush1.bf16.msra.mxu0 %v22730_v32  ;;  %v22781_v32 = vld [vmem:[#allocation5 + $0x920] ss:$48 sps:$4 sm:$0xff]  }
 0x1cc   :  { %3698 = vmatpush1.bf16.msra.mxu1 %v22733_v35  ;;  %3656 = vmatprep.subr.bf16.mxu0 %v22738_v38  ;;  %v22786_v35 = vld [vmem:[#allocation5 + $0xec4] ss:$48 sps:$4 sm:$0xff]   ;;  %v22789_v38 = vld [vmem:[#allocation5 + $0x2cc] ss:$48 sps:$4 sm:$0xff]  }
 0x1cd   :  { %3699 = vmatprep.subr.bf16.mxu1 %v22741_v40  ;;  %v22784_v40 = vld [vmem:[#allocation5 + $0xec0] ss:$48 sps:$4 sm:$0xff]  }
 0x1ce   :  { %v3330_v18 = vpop.f32.mrf.mxu0 }
 0x1cf   :  { %v3373_v48 = vpop.f32.mrf.mxu1  ;;  %v3331_v56 = vadd.f32 %v3330_v18, %v3288_v46  ;;  %3657 = vmatpush2.bf16.msra.mxu0 %v22736_v41  ;;  %v22787_v41 = vld [vmem:[#allocation5 + $0x2c8] ss:$48 sps:$4 sm:$0xff]   ;;  %v26426_v18 = vld [vmem:[%s27319_s1] ss:$20 sps:$4 sm:$0xff]  }
 0x1d0   :  { %3700 = vmatpush2.bf16.msra.mxu1 %v22739_v42  ;;  %v26415_v57 = vpop.f32.mrf.mxu0  ;;  %3658 = vmatprep.subr.bf16.mxu0 %v22744_v44  ;;  %v22792_v42 = vld [vmem:[#allocation5 + $0xe64] ss:$48 sps:$4 sm:$0xff]   ;;  %v22795_v44 = vld [vmem:[#allocation5 + $0x26c] ss:$48 sps:$4 sm:$0xff]   ;;  %v22793_v46 = vld [vmem:[#allocation5 + $0x268] ss:$48 sps:$4 sm:$0xff]  }
 0x1d1   :  { %v26417_v39 = vpop.f32.mrf.mxu1  ;;  %3701 = vmatprep.subr.bf16.mxu1 %v22747_v45  ;;  %v3374_v60 = vadd.f32 %v3373_v48, %v3331_v56  ;;  %v22790_v45 = vld [vmem:[#allocation5 + $0xe60] ss:$48 sps:$4 sm:$0xff]   ;;  %v26432_v48 = vld [vmem:[%s27319_s1 + $0x8] ss:$20 sps:$4 sm:$0xff]  }
 0x1d2   :  { %v3334_v50 = vpop.f32.mrf.mxu0  ;;  %v22799_v56 = vld [vmem:[#allocation5 + $0x208] ss:$48 sps:$4 sm:$0xff]  }
 0x1d3   :  { %v3335_v62 = vadd.f32 %v3334_v50, %v3292_v55  ;;  %3659 = vmatpush2.bf16.msra.mxu0 %v22742_v51  ;;  %v3377_v63 = vpop.f32.mrf.mxu1  ;;  %v3926_v5 = vmul.f32 %v26388_v21, %v3374_v60  ;;  %vm3901_vm2 = vcmp.gt.f32.partialorder %v3374_v60, 0.0  ;;  %v22798_v51 = vld [vmem:[#allocation5 + $0xe04] ss:$48 sps:$4 sm:$0xff]   ;;  %v22796_v55 = vld [vmem:[#allocation5 + $0xe00] ss:$48 sps:$4 sm:$0xff]  }
 0x1d4   :  { %3702 = vmatpush2.bf16.msra.mxu1 %v22745_v54  ;;  %3660 = vmatprep.subr.bf16.mxu0 %v22750_v58  ;;  %v22801_v54 = vld [vmem:[#allocation5 + $0x20c] ss:$48 sps:$4 sm:$0xff]   ;;  %v26007_v58 = vld [vmem:[%s27319_s1 + $0x4] ss:$20 sps:$4 sm:$0xff]  }
 0x1d5   :  { %3703 = vmatprep.subr.bf16.mxu1 %v22753_v59  ;;  %v3378_v6 = vadd.f32 %v3377_v63, %v3335_v62  ;;  %v3950_v7 = vsel %vm3901_vm2, %v3374_v60, %v3926_v5  ;;  %v22804_v59 = vld [vmem:[#allocation5 + $0xda4] ss:$48 sps:$4 sm:$0xff]   ;;  %v22807_v60 = vld [vmem:[#allocation5 + $0x1ac] ss:$48 sps:$4 sm:$0xff]   ;;  %v22808_v63 = vld [vmem:[#allocation5 + $0xd40] ss:$48 sps:$4 sm:$0xff]  }
 0x1d6   :  { %v22810_v50 = vld [vmem:[#allocation5 + $0xd44] ss:$48 sps:$4 sm:$0xff]   ;;  %v22813_v62 = vld [vmem:[#allocation5 + $0x14c] ss:$48 sps:$4 sm:$0xff]   ;;  %v22817_v5 = vld [vmem:[#allocation5 + $0xe8] ss:$48 sps:$4 sm:$0xff]  }
 0x1d7   :  { %3661 = vmatpush2.bf16.msra.mxu0 %v22748_v61  ;;  %vm3913_vm3 = vcmp.gt.f32.partialorder %v3378_v6, 0.0  ;;  %v3938_v53 = vmul.f32 %v26388_v21, %v3378_v6  ;;  %v22802_v61 = vld [vmem:[#allocation5 + $0xda0] ss:$48 sps:$4 sm:$0xff]  }
 0x1d8   :  { %3704 = vmatpush2.bf16.msra.mxu1 %v22751_v49  ;;  %3662 = vmatprep.subr.bf16.mxu0 %v22756_v0  ;;  %v22805_v49 = vld [vmem:[#allocation5 + $0x1a8] ss:$48 sps:$4 sm:$0xff]  }
 0x1d9   :  { %3705 = vmatprep.subr.bf16.mxu1 %v22759_v1  ;;  %v3962_v37 = vsel %vm3913_vm3, %v3378_v6, %v3938_v53  ;;  %v22811_v0 = vld [vmem:[#allocation5 + $0x148] ss:$48 sps:$4 sm:$0xff]   ;;  %v22816_v1 = vld [vmem:[#allocation5 + $0xce4] ss:$48 sps:$4 sm:$0xff]   ;;  %v22825_v53 = vld [vmem:[#allocation5 + $0x8c] ss:$48 sps:$4 sm:$0xff]  }
 0x1da   :  { %v26421_v15 = vpack.c.bf16 %v3962_v37, %v3950_v7  ;;  %v22822_v6 = vld [vmem:[#allocation5 + $0xc84] ss:$48 sps:$4 sm:$0xff]   ;;  %v22826_v7 = vld [vmem:[#allocation5 + $0xc20] ss:$48 sps:$4 sm:$0xff]   ;;  %v22829_v37 = vld [vmem:[#allocation5 + $0x28] ss:$48 sps:$4 sm:$0xff]  }
 0x1db   :  { %3663 = vmatpush2.bf16.msra.mxu0 %v22754_v2  ;;  %v22819_v2 = vld [vmem:[#allocation5 + $0xec] ss:$48 sps:$4 sm:$0xff]  }
 0x1dc   :  { %3706 = vmatpush2.bf16.msra.mxu1 %v22757_v3  ;;  %3664 = vmatprep.subr.bf16.mxu0 %v22762_v27  ;;  %v22814_v3 = vld [vmem:[#allocation5 + $0xce0] ss:$48 sps:$4 sm:$0xff]  }
 0x1dd   :  { %3707 = vmatprep.subr.bf16.mxu1 %v22765_v8  ;;  %v22820_v27 = vld [vmem:[#allocation5 + $0xc80] ss:$48 sps:$4 sm:$0xff]   ;;  %v22823_v8 = vld [vmem:[#allocation5 + $0x88] ss:$48 sps:$4 sm:$0xff]  }
 0x1df   :  { %3665 = vmatpush2.bf16.msra.mxu0 %v22760_v9  ;;  %v22828_v9 = vld [vmem:[#allocation5 + $0xc24] ss:$48 sps:$4 sm:$0xff]  }
 0x1e0   :  { %3708 = vmatpush2.bf16.msra.mxu1 %v22763_v11  ;;  %3666 = vmatprep.subr.bf16.mxu0 %v22768_v16  ;;  %v22831_v11 = vld [vmem:[#allocation5 + $0x2c] ss:$48 sps:$4 sm:$0xff]   ;;  %v26440_v16 = vsub.s32 4, %v26355_v13 }
 0x1e1   :  { %3709 = vmatprep.subr.bf16.mxu1 %v22771_v17  ;;  %v22834_v17 = vld [vmem:[#allocation5 + $0x5cc] ss:$48 sps:$4 sm:$0xff]  }
 0x1e2   :  { %27341 = vst [vmem:[#allocation25_spill] sm:$0xff] %v26440_v16 }
 0x1e3   :  { %3667 = vmatpush2.bf16.msra.mxu0 %v22766_v20  ;;  %v22837_v20 = vld [vmem:[#allocation5 + $0x8cc] ss:$48 sps:$4 sm:$0xff]  }
 0x1e4   :  { %3710 = vmatpush2.bf16.msra.mxu1 %v22769_v23  ;;  %3668 = vmatprep.subr.bf16.mxu0 %v22774_v24  ;;  %v22832_v23 = vld [vmem:[#allocation5 + $0x5c8] ss:$48 sps:$4 sm:$0xff]  }
 0x1e5   :  { %3711 = vmatprep.subr.bf16.mxu1 %v22777_v4  ;;  %v22835_v24 = vld [vmem:[#allocation5 + $0x8c8] ss:$48 sps:$4 sm:$0xff]   ;;  %v22840_v4 = vld [vmem:[#allocation5 + $0x56c] ss:$48 sps:$4 sm:$0xff]  }
 0x1e7   :  { %3669 = vmatpush2.bf16.msra.mxu0 %v22772_v26  ;;  %v22843_v26 = vld [vmem:[#allocation5 + $0x86c] ss:$48 sps:$4 sm:$0xff]  }
 0x1e8   :  { %3712 = vmatpush2.bf16.msra.mxu1 %v22775_v28  ;;  %3670 = vmatprep.subr.bf16.mxu0 %v22780_v29  ;;  %v26442_v28 = vld [vmem:[#allocation6] sm:$0xff] }
 0x1e9   :  { %3713 = vmatprep.subr.bf16.mxu1 %v22783_v30  ;;  %v657_v29 = vrot.slane %v26442_v28, %v26440_v16  ;;  %v26446_v30 = vpop.f32.mrf.mxu0 }
 0x1eb   :  { %3671 = vmatpush2.bf16.msra.mxu0 %v22778_v31  ;;  %v26448_v31 = vpop.f32.mrf.mxu1 }
 0x1ec   :  { %3714 = vmatpush2.bf16.msra.mxu1 %v22781_v32  ;;  %3726 = vmatprep.subr.bf16.mxu0 %v22786_v35  ;;  %v22838_v32 = vld [vmem:[#allocation5 + $0x568] ss:$48 sps:$4 sm:$0xff]  }
 0x1ed   :  { %3769 = vmatprep.subr.bf16.mxu1 %v22789_v38  ;;  %v22841_v35 = vld [vmem:[#allocation5 + $0x868] ss:$48 sps:$4 sm:$0xff]  }
 0x1ee   :  { %3673 = vmatmul.mubr.bf16.vlgmr.msra.gmra.mxu0 %v26426_v18 }
 0x1ef   :  { %3716 = vmatmul.mubr.bf16.vlgmr.msra.gmra.mxu1 %v26432_v48  ;;  %3727 = vmatpush1.bf16.msra.mxu0 %v22784_v40  ;;  %v26453_v40 = vld [vmem:[%s27319_s1 + $0x10] ss:$20 sps:$4 sm:$0xff]  }
 0x1f0   :  { %3770 = vmatpush1.bf16.msra.mxu1 %v22787_v41  ;;  %3728 = vmatprep.subr.bf16.mxu0 %v22792_v42  ;;  %v22846_v42 = vld [vmem:[#allocation5 + $0x50c] ss:$48 sps:$4 sm:$0xff]  }
 0x1f1   :  { %3771 = vmatprep.subr.bf16.mxu1 %v22795_v44  ;;  %3758 = vmatprep.mubr.bf16.mxu0 %v26214_v14  ;;  %v22849_v44 = vld [vmem:[#allocation5 + $0x80c] ss:$48 sps:$4 sm:$0xff]  }
 0x1f2   :  { %3801 = vmatprep.mubr.bf16.mxu1 %v26007_v58 }
 0x1f3   :  { %3729 = vmatpush1.bf16.msra.mxu0 %v22790_v45 }
 0x1f4   :  { %3772 = vmatpush1.bf16.msra.mxu1 %v22793_v46  ;;  %3730 = vmatprep.subr.bf16.mxu0 %v22798_v51 }
 0x1f5   :  { %3773 = vmatprep.subr.bf16.mxu1 %v22801_v54 }
 0x1f7   :  { %3731 = vmatpush1.bf16.msra.mxu0 %v22796_v55  ;;  %v22844_v55 = vld [vmem:[#allocation5 + $0x508] ss:$48 sps:$4 sm:$0xff]  }
 0x1f8   :  { %3774 = vmatpush1.bf16.msra.mxu1 %v22799_v56  ;;  %3732 = vmatprep.subr.bf16.mxu0 %v22804_v59  ;;  %v26010_v56 = vld [vmem:[%s27319_s1 + $0xc] ss:$20 sps:$4 sm:$0xff]   ;;  %s21394_s1 = sld [smem:[#allocation2 + $0x1]] }
 0x1f9   :  { %3775 = vmatprep.subr.bf16.mxu1 %v22807_v60  ;;  %v22847_v60 = vld [vmem:[#allocation5 + $0x808] ss:$48 sps:$4 sm:$0xff]  }
 0x1fb   :  { %3733 = vmatpush1.bf16.msra.mxu0 %v22802_v61 }
 0x1fc   :  { %3776 = vmatpush1.bf16.msra.mxu1 %v22805_v49  ;;  %3734 = vmatprep.subr.bf16.mxu0 %v22810_v50  ;;  %v22852_v49 = vld [vmem:[#allocation5 + $0x4ac] ss:$48 sps:$4 sm:$0xff]  }
 0x1fd   :  { %3777 = vmatprep.subr.bf16.mxu1 %v22813_v62  ;;  %v22855_v50 = vld [vmem:[#allocation5 + $0x7ac] ss:$48 sps:$4 sm:$0xff]  }
 0x1ff   :  { %3735 = vmatpush1.bf16.msra.mxu0 %v22808_v63  ;;  %v22850_v63 = vld [vmem:[#allocation5 + $0x4a8] ss:$48 sps:$4 sm:$0xff]  }
 0x200   :  { %3778 = vmatpush1.bf16.msra.mxu1 %v22811_v0  ;;  %3736 = vmatprep.subr.bf16.mxu0 %v22816_v1  ;;  %v22853_v0 = vld [vmem:[#allocation5 + $0x7a8] ss:$48 sps:$4 sm:$0xff]   ;;  %v22858_v1 = vld [vmem:[#allocation5 + $0x44c] ss:$48 sps:$4 sm:$0xff]  }
 0x201   :  { %3779 = vmatprep.subr.bf16.mxu1 %v22819_v2  ;;  %v22861_v2 = vld [vmem:[#allocation5 + $0x74c] ss:$48 sps:$4 sm:$0xff]  }
 0x203   :  { %3737 = vmatpush1.bf16.msra.mxu0 %v22814_v3  ;;  %v22856_v3 = vld [vmem:[#allocation5 + $0x448] ss:$48 sps:$4 sm:$0xff]  }
 0x204   :  { %3780 = vmatpush1.bf16.msra.mxu1 %v22817_v5  ;;  %3738 = vmatprep.subr.bf16.mxu0 %v22822_v6  ;;  %v22859_v5 = vld [vmem:[#allocation5 + $0x748] ss:$48 sps:$4 sm:$0xff]   ;;  %v22864_v6 = vld [vmem:[#allocation5 + $0x3ec] ss:$48 sps:$4 sm:$0xff]  }
 0x205   :  { %3781 = vmatprep.subr.bf16.mxu1 %v22825_v53  ;;  %v22867_v53 = vld [vmem:[#allocation5 + $0x6ec] ss:$48 sps:$4 sm:$0xff]  }
 0x207   :  { %3739 = vmatpush1.bf16.msra.mxu0 %v22820_v27  ;;  %v22862_v27 = vld [vmem:[#allocation5 + $0x3e8] ss:$48 sps:$4 sm:$0xff]  }
 0x208   :  { %3782 = vmatpush1.bf16.msra.mxu1 %v22823_v8  ;;  %3740 = vmatprep.subr.bf16.mxu0 %v22828_v9  ;;  %v22865_v8 = vld [vmem:[#allocation5 + $0x6e8] ss:$48 sps:$4 sm:$0xff]   ;;  %v22870_v9 = vld [vmem:[#allocation5 + $0x38c] ss:$48 sps:$4 sm:$0xff]  }
 0x209   :  { %3783 = vmatprep.subr.bf16.mxu1 %v22831_v11  ;;  %v22873_v11 = vld [vmem:[#allocation5 + $0x68c] ss:$48 sps:$4 sm:$0xff]  }
 0x20b   :  { %3741 = vmatpush1.bf16.msra.mxu0 %v22826_v7  ;;  %v22868_v7 = vld [vmem:[#allocation5 + $0x388] ss:$48 sps:$4 sm:$0xff]  }
 0x20c   :  { %3784 = vmatpush1.bf16.msra.mxu1 %v22829_v37  ;;  %3812 = vmatprep.subr.bf16.mxu0 %v22837_v20  ;;  %v22871_v37 = vld [vmem:[#allocation5 + $0x688] ss:$48 sps:$4 sm:$0xff]   ;;  %v22879_v20 = vld [vmem:[#allocation5 + $0x62c] ss:$48 sps:$4 sm:$0xff]  }
 0x20d   :  { %3785 = vmatprep.subr.bf16.mxu1 %v22834_v17  ;;  %v22876_v17 = vld [vmem:[#allocation5 + $0x32c] ss:$48 sps:$4 sm:$0xff]  }
 0x20e   :  { %v3416_v38 = vpop.f32.mrf.mxu0  ;;  %3759 = vmatmul.mubr.bf16.vlgmr.msra.gmra.mxu0 %v26453_v40 }
 0x20f   :  { %v3459_v41 = vpop.f32.mrf.mxu1  ;;  %v3417_v45 = vadd.f32 %v3416_v38, %v657_v29  ;;  %3813 = vmatpush1.bf16.msra.mxu0 %v22835_v24  ;;  %3844 = vmatprep.mubr.bf16.mxu0 %v26010_v56  ;;  %v22877_v24 = vld [vmem:[#allocation5 + $0x628] ss:$48 sps:$4 sm:$0xff]   ;;  %v22894_v56 = vld [vmem:[#allocation5 + $0xb0c] ss:$48 sps:$4 sm:$0xff]  }
 0x210   :  { %3786 = vmatpush2.bf16.msra.mxu1 %v22832_v23  ;;  %v26456_v46 = vpop.f32.mrf.mxu0  ;;  %3814 = vmatprep.subr.bf16.mxu0 %v22843_v26  ;;  %v22874_v23 = vld [vmem:[#allocation5 + $0x328] ss:$48 sps:$4 sm:$0xff]   ;;  %v22885_v26 = vld [vmem:[#allocation5 + $0xecc] ss:$48 sps:$4 sm:$0xff]  }
 0x211   :  { %v26458_v51 = vpop.f32.mrf.mxu1  ;;  %3787 = vmatprep.subr.bf16.mxu1 %v22840_v4  ;;  %v26460_v54 = vadd.f32 %v3459_v41, %v3417_v45  ;;  %v22882_v4 = vld [vmem:[#allocation5 + $0xbcc] ss:$48 sps:$4 sm:$0xff]   ;;  %v22889_v45 = vld [vmem:[#allocation5 + $0xe68] ss:$48 sps:$4 sm:$0xff]  }
 0x212   :  { %v3420_v58 = vpop.f32.mrf.mxu0  ;;  %v22891_v41 = vld [vmem:[#allocation5 + $0xe6c] ss:$48 sps:$4 sm:$0xff]  }
 0x213   :  { %v3463_v59 = vpop.f32.mrf.mxu1  ;;  %v3421_v61 = vadd.f32 %v3420_v58, %v657_v29  ;;  %3815 = vmatpush1.bf16.msra.mxu0 %v22841_v35  ;;  %v22880_v29 = vld [vmem:[#allocation5 + $0xbc8] ss:$48 sps:$4 sm:$0xff]   ;;  %v22888_v35 = vld [vmem:[#allocation5 + $0xb6c] ss:$48 sps:$4 sm:$0xff]  }
 0x214   :  { %3788 = vmatpush2.bf16.msra.mxu1 %v22838_v32  ;;  %3816 = vmatprep.subr.bf16.mxu0 %v22849_v44  ;;  %v22883_v32 = vld [vmem:[#allocation5 + $0xec8] ss:$48 sps:$4 sm:$0xff]   ;;  %v26467_v38 = vpop.f32.mrf.mxu0  ;;  %v22897_v58 = vld [vmem:[#allocation5 + $0xe0c] ss:$48 sps:$4 sm:$0xff]  }
 0x215   :  { %3789 = vmatprep.subr.bf16.mxu1 %v22846_v42  ;;  %v26465_v62 = vadd.f32 %v3463_v59, %v3421_v61  ;;  %v22886_v44 = vld [vmem:[#allocation5 + $0xb68] ss:$48 sps:$4 sm:$0xff]  }
 0x216   :  { %v22892_v61 = vld [vmem:[#allocation5 + $0xb08] ss:$48 sps:$4 sm:$0xff]  }
 0x217   :  { %3817 = vmatpush1.bf16.msra.mxu0 %v22847_v60 }
 0x218   :  { %3790 = vmatpush2.bf16.msra.mxu1 %v22844_v55  ;;  %3818 = vmatprep.subr.bf16.mxu0 %v22855_v50 }
 0x219   :  { %3791 = vmatprep.subr.bf16.mxu1 %v22852_v49  ;;  %v22895_v49 = vld [vmem:[#allocation5 + $0xe08] ss:$48 sps:$4 sm:$0xff]  }
 0x21b   :  { %3819 = vmatpush1.bf16.msra.mxu0 %v22853_v0  ;;  %v26477_v0 = vsub.s32 3, %v26355_v13 }
 0x21c   :  { %3792 = vmatpush2.bf16.msra.mxu1 %v22850_v63  ;;  %3820 = vmatprep.subr.bf16.mxu0 %v22861_v2  ;;  %v22903_v63 = vld [vmem:[#allocation5 + $0xdac] ss:$48 sps:$4 sm:$0xff]  }
 0x21d   :  { %3793 = vmatprep.subr.bf16.mxu1 %v22858_v1  ;;  %v26481_v1 = vsub.s32 1, %v26355_v13 }
 0x21f   :  { %3821 = vmatpush1.bf16.msra.mxu0 %v22859_v5  ;;  %v22901_v5 = vld [vmem:[#allocation5 + $0xda8] ss:$48 sps:$4 sm:$0xff]  }
 0x220   :  { %3794 = vmatpush2.bf16.msra.mxu1 %v22856_v3  ;;  %3822 = vmatprep.subr.bf16.mxu0 %v22867_v53  ;;  %v22906_v53 = vld [vmem:[#allocation5 + $0xa4c] ss:$48 sps:$4 sm:$0xff]  }
 0x221   :  { %3795 = vmatprep.subr.bf16.mxu1 %v22864_v6 }
 0x223   :  { %3823 = vmatpush1.bf16.msra.mxu0 %v22865_v8  ;;  %v653_v8 = vrot.slane %v26442_v28, %v26477_v0 }
 0x224   :  { %3796 = vmatpush2.bf16.msra.mxu1 %v22862_v27  ;;  %3824 = vmatprep.subr.bf16.mxu0 %v22873_v11  ;;  %v22909_v27 = vld [vmem:[#allocation5 + $0xd4c] ss:$48 sps:$4 sm:$0xff]   ;;  %v22907_v11 = vld [vmem:[#allocation5 + $0xd48] ss:$48 sps:$4 sm:$0xff]  }
 0x225   :  { %3797 = vmatprep.subr.bf16.mxu1 %v22870_v9  ;;  %v22904_v9 = vld [vmem:[#allocation5 + $0xa48] ss:$48 sps:$4 sm:$0xff]  }
 0x227   :  { %3825 = vmatpush1.bf16.msra.mxu0 %v22871_v37  ;;  %v3294_v37 = vadd.f32 %v26411_v43, %v653_v8 }
 0x228   :  { %3798 = vmatpush2.bf16.msra.mxu1 %v22868_v7  ;;  %3826 = vmatprep.subr.bf16.mxu0 %v22879_v20  ;;  %v645_v7 = vrot.slane %v26442_v28, %v26481_v1  ;;  %v22912_v20 = vld [vmem:[#allocation5 + $0x9ec] ss:$48 sps:$4 sm:$0xff]  }
 0x229   :  { %3799 = vmatprep.subr.bf16.mxu1 %v22876_v17 }
 0x22a   :  { %v3165_v17 = vadd.f32 %v26384_v10, %v645_v7  ;;  %v22921_v10 = vld [vmem:[#allocation5 + $0xc8c] ss:$48 sps:$4 sm:$0xff]  }
 0x22b   :  { %3827 = vmatpush1.bf16.msra.mxu0 %v22877_v24  ;;  %v3290_v24 = vadd.f32 %v26404_v25, %v653_v8  ;;  %v22945_v8 = vld [vmem:[#allocation8 + $0x934] ss:$56 sps:$4 sm:$0xff]  }
 0x22c   :  { %3800 = vmatpush2.bf16.msra.mxu1 %v22874_v23  ;;  %3828 = vmatprep.subr.bf16.mxu0 %v22882_v4  ;;  %v22915_v23 = vld [vmem:[#allocation5 + $0xcec] ss:$48 sps:$4 sm:$0xff]   ;;  %v22910_v4 = vld [vmem:[#allocation5 + $0x9e8] ss:$48 sps:$4 sm:$0xff]   ;;  %v3208_v43 = vadd.f32 %v26402_v12, %v3165_v17 }
 0x22d   :  { %3855 = vmatprep.subr.bf16.mxu1 %v22885_v26  ;;  %v22913_v26 = vld [vmem:[#allocation5 + $0xce8] ss:$48 sps:$4 sm:$0xff]   ;;  %v22924_v12 = vld [vmem:[#allocation5 + $0x92c] ss:$48 sps:$4 sm:$0xff]  }
 0x22e   :  { %v3502_v42 = vpop.f32.mrf.mxu0  ;;  %v22954_v17 = vld [vmem:[#allocation8 + $0x154] ss:$56 sps:$4 sm:$0xff]  }
 0x22f   :  { %3802 = vmatmul.mubr.bf16.vlgmr.msra.gmra.mxu1 %v26426_v18  ;;  %v3503_v55 = vadd.f32 %v3502_v42, %v26460_v54  ;;  %3829 = vmatpush2.bf16.msra.mxu0 %v22880_v29  ;;  %v22900_v54 = vld [vmem:[#allocation5 + $0xaac] ss:$48 sps:$4 sm:$0xff]   ;;  %v3161_v29 = vadd.f32 %v26370_v33, %v645_v7  ;;  %v22916_v42 = vld [vmem:[#allocation5 + $0x988] ss:$48 sps:$4 sm:$0xff]  }
 0x230   :  { %3856 = vmatpush1.bf16.msra.mxu1 %v22883_v32  ;;  %v26471_v59 = vpop.f32.mrf.mxu0  ;;  %3830 = vmatprep.subr.bf16.mxu0 %v22888_v35  ;;  %v3337_v32 = vadd.f32 %v26446_v30, %v3294_v37  ;;  %v22918_v35 = vld [vmem:[#allocation5 + $0x98c] ss:$48 sps:$4 sm:$0xff]   ;;  %v22948_v7 = vld [vmem:[#allocation8 + $0x1c4] ss:$56 sps:$4 sm:$0xff]  }
 0x231   :  { %3857 = vmatprep.subr.bf16.mxu1 %v22891_v41  ;;  %3887 = vmatprep.mubr.bf16.mxu1 %v26214_v14  ;;  %v3928_v50 = vmul.f32 %v26388_v21, %v3503_v55  ;;  %vm3903_vm4 = vcmp.gt.f32.partialorder %v3503_v55, 0.0  ;;  %v3333_v41 = vadd.f32 %v26415_v57, %v3290_v24  ;;  %v3204_v25 = vadd.f32 %v26372_v34, %v3161_v29  ;;  %v22925_v57 = vld [vmem:[#allocation5 + $0xc28] ss:$48 sps:$4 sm:$0xff]   ;;  %v26513_v24 = vpop.f32.mrf.mxu1 }
 0x232   :  { %v3506_v60 = vpop.f32.mrf.mxu0  ;;  %v3380_v33 = vadd.f32 %v26448_v31, %v3337_v32  ;;  %v22933_v31 = vld [vmem:[#allocation8 + $0xa14] ss:$56 sps:$4 sm:$0xff]   ;;  %v22951_v37 = vld [vmem:[#allocation8 + $0x8c4] ss:$56 sps:$4 sm:$0xff]  }
 0x233   :  { %v3507_v18 = vadd.f32 %v3506_v60, %v26465_v62  ;;  %3831 = vmatpush2.bf16.msra.mxu0 %v22886_v44  ;;  %v3952_v2 = vsel %vm3903_vm4, %v3503_v55, %v3928_v50  ;;  %v22898_v62 = vld [vmem:[#allocation5 + $0xaa8] ss:$48 sps:$4 sm:$0xff]   ;;  %v3247_v30 = vadd.f32 %v26390_v22, %v3204_v25  ;;  %v22927_v55 = vld [vmem:[#allocation5 + $0xc2c] ss:$48 sps:$4 sm:$0xff]  }
 0x234   :  { %3858 = vmatpush1.bf16.msra.mxu1 %v22889_v45  ;;  %3832 = vmatprep.subr.bf16.mxu0 %v22894_v56  ;;  %v22919_v44 = vld [vmem:[#allocation5 + $0xc88] ss:$48 sps:$4 sm:$0xff]   ;;  %v3251_v45 = vadd.f32 %v26413_v47, %v3208_v43  ;;  %v3376_v56 = vadd.f32 %v26417_v39, %v3333_v41  ;;  %v3939_v34 = vmul.f32 %v26388_v21, %v3380_v33  ;;  %vm3914_vm7 = vcmp.gt.f32.partialorder %v3380_v33, 0.0  ;;  %v22928_v39 = vld [vmem:[#allocation8 + $0x310] ss:$56 sps:$4 sm:$0xff]  }
 0x235   :  { %3859 = vmatprep.subr.bf16.mxu1 %v22897_v58  ;;  %vm3915_vm5 = vcmp.gt.f32.partialorder %v3507_v18, 0.0  ;;  %v3940_v14 = vmul.f32 %v26388_v21, %v3507_v18  ;;  %v22922_v58 = vld [vmem:[#allocation5 + $0x928] ss:$48 sps:$4 sm:$0xff]   ;;  %v3925_v47 = vmul.f32 %v26388_v21, %v3247_v30  ;;  %vm3900_vm8 = vcmp.gt.f32.partialorder %v3247_v30, 0.0  ;;  %v22931_v50 = vld [vmem:[#allocation8 + $0xa10] ss:$56 sps:$4 sm:$0xff]  }
 0x236   :  { %v3937_v60 = vmul.f32 %v26388_v21, %v3251_v45  ;;  %vm3912_vm6 = vcmp.gt.f32.partialorder %v3251_v45, 0.0  ;;  %v22930_v22 = vld [vmem:[#allocation8 + $0x314] ss:$56 sps:$4 sm:$0xff]   ;;  %vm3902_vm9 = vcmp.gt.f32.partialorder %v3376_v56, 0.0  ;;  %v22963_v29 = vld [vmem:[#allocation8 + $0x7e4] ss:$56 sps:$4 sm:$0xff]  }
 0x237   :  { %v3964_v3 = vsel %vm3915_vm5, %v3507_v18, %v3940_v14  ;;  %3833 = vmatpush2.bf16.msra.mxu0 %v22892_v61  ;;  %v3927_v61 = vmul.f32 %v26388_v21, %v3376_v56  ;;  %v3963_v18 = vsel %vm3914_vm7, %v3380_v33, %v3939_v34  ;;  %v3949_v14 = vsel %vm3900_vm8, %v3247_v30, %v3925_v47  ;;  %v22958_v43 = vld [vmem:[#allocation8 + $0xe0] ss:$56 sps:$4 sm:$0xff]   ;;  %v22969_v41 = vld [vmem:[#allocation8 + $0x774] ss:$56 sps:$4 sm:$0xff]   ;;  %v22967_v25 = vld [vmem:[#allocation8 + $0x770] ss:$56 sps:$4 sm:$0xff]  }
 0x238   :  { %3860 = vmatpush1.bf16.msra.mxu1 %v22895_v49  ;;  %v26483_v6 = vpack.c.bf16 %v3964_v3, %v3952_v2  ;;  %3834 = vmatprep.subr.bf16.mxu0 %v22900_v54  ;;  %v3961_v49 = vsel %vm3912_vm6, %v3251_v45, %v3937_v60  ;;  %v22936_v54 = vld [vmem:[#allocation8 + $0x2a4] ss:$56 sps:$4 sm:$0xff]   ;;  %v27330_v45 = vsub.s32 6, %v26355_v13  ;;  %v22981_v60 = vld [vmem:[#allocation8 + $0xd94] ss:$56 sps:$4 sm:$0xff]  }
 0x239   :  { %3861 = vmatprep.subr.bf16.mxu1 %v22903_v63  ;;  %v22939_v63 = vld [vmem:[#allocation8 + $0x9a4] ss:$56 sps:$4 sm:$0xff]   ;;  %v26505_v2 = vpack.c.bf16 %v3961_v49, %v3949_v14  ;;  %v3951_v3 = vsel %vm3902_vm9, %v3376_v56, %v3927_v61  ;;  %v22970_v56 = vld [vmem:[#allocation8] ss:$56 sps:$4 sm:$0xff]   ;;  %v26521_v61 = vpop.f32.mrf.mxu0 }
 0x23a   :  { %v22972_v33 = vld [vmem:[#allocation8 + $0x4] ss:$56 sps:$4 sm:$0xff]   ;;  %v22985_v14 = vld [vmem:[#allocation8 + $0xd20] ss:$56 sps:$4 sm:$0xff]  }
 0x23b   :  { %3835 = vmatpush2.bf16.msra.mxu0 %v22898_v62  ;;  %v22934_v62 = vld [vmem:[#allocation8 + $0x2a0] ss:$56 sps:$4 sm:$0xff]   ;;  %v22975_v30 = vld [vmem:[#allocation8 + $0x704] ss:$56 sps:$4 sm:$0xff]  }
 0x23c   :  { %3862 = vmatpush1.bf16.msra.mxu1 %v22901_v5  ;;  %3836 = vmatprep.subr.bf16.mxu0 %v22906_v53  ;;  %v26507_v5 = vpack.c.bf16 %v3963_v18, %v3951_v3  ;;  %v22937_v53 = vld [vmem:[#allocation8 + $0x9a0] ss:$56 sps:$4 sm:$0xff]   ;;  %v22987_v49 = vld [vmem:[#allocation8 + $0xd24] ss:$56 sps:$4 sm:$0xff]  }
 0x23d   :  { %3863 = vmatprep.subr.bf16.mxu1 %v22909_v27  ;;  %v22942_v27 = vld [vmem:[#allocation8 + $0x234] ss:$56 sps:$4 sm:$0xff]  }
 0x23f   :  { %3837 = vmatpush2.bf16.msra.mxu0 %v22904_v9  ;;  %v22940_v9 = vld [vmem:[#allocation8 + $0x230] ss:$56 sps:$4 sm:$0xff]  }
 0x240   :  { %3864 = vmatpush1.bf16.msra.mxu1 %v22907_v11  ;;  %3838 = vmatprep.subr.bf16.mxu0 %v22912_v20  ;;  %v22943_v11 = vld [vmem:[#allocation8 + $0x930] ss:$56 sps:$4 sm:$0xff]   ;;  %v22957_v20 = vld [vmem:[#allocation8 + $0x854] ss:$56 sps:$4 sm:$0xff]  }
 0x241   :  { %3865 = vmatprep.subr.bf16.mxu1 %v22915_v23  ;;  %v22952_v23 = vld [vmem:[#allocation8 + $0x150] ss:$56 sps:$4 sm:$0xff]  }
 0x243   :  { %3839 = vmatpush2.bf16.msra.mxu0 %v22910_v4  ;;  %v22955_v4 = vld [vmem:[#allocation8 + $0x850] ss:$56 sps:$4 sm:$0xff]  }
 0x244   :  { %3866 = vmatpush1.bf16.msra.mxu1 %v22913_v26  ;;  %3840 = vmatprep.subr.bf16.mxu0 %v22918_v35  ;;  %v22960_v26 = vld [vmem:[#allocation8 + $0xe4] ss:$56 sps:$4 sm:$0xff]   ;;  %v22961_v35 = vld [vmem:[#allocation8 + $0x7e0] ss:$56 sps:$4 sm:$0xff]  }
 0x245   :  { %3867 = vmatprep.subr.bf16.mxu1 %v22921_v10  ;;  %v22966_v10 = vld [vmem:[#allocation8 + $0x74] ss:$56 sps:$4 sm:$0xff]  }
 0x247   :  { %3841 = vmatpush2.bf16.msra.mxu0 %v22916_v42 }
 0x248   :  { %3868 = vmatpush1.bf16.msra.mxu1 %v22919_v44  ;;  %3842 = vmatprep.subr.bf16.mxu0 %v22924_v12  ;;  %v22964_v44 = vld [vmem:[#allocation8 + $0x70] ss:$56 sps:$4 sm:$0xff]  }
 0x249   :  { %3869 = vmatprep.subr.bf16.mxu1 %v22927_v55  ;;  %v665_v55 = vrot.slane %v26442_v28, %v27330_v45  ;;  %v23917_v45 = vld [vmem:[#allocation8 + $0x174c] ss:$56 sps:$4 sm:$0xff]  }
 0x24b   :  { %3843 = vmatpush2.bf16.msra.mxu0 %v22922_v58  ;;  %v22973_v58 = vld [vmem:[#allocation8 + $0x700] ss:$56 sps:$4 sm:$0xff]  }
 0x24c   :  { %3870 = vmatpush1.bf16.msra.mxu1 %v22925_v57  ;;  %12122 = vmatprep.subr.bf16.mxu0 %v22930_v22  ;;  %v22978_v57 = vld [vmem:[#allocation8 + $0x694] ss:$56 sps:$4 sm:$0xff]   ;;  %v22976_v22 = vld [vmem:[#allocation8 + $0x690] ss:$56 sps:$4 sm:$0xff]  }
 0x24d   :  { %12165 = vmatprep.subr.bf16.mxu1 %v22933_v31  ;;  %v22979_v31 = vld [vmem:[#allocation8 + $0xd90] ss:$56 sps:$4 sm:$0xff]  }
 0x24e   :  { %3845 = vmatmul.mubr.bf16.vlgmr.msra.gmra.mxu0 %v26432_v48  ;;  %v22946_v48 = vld [vmem:[#allocation8 + $0x1c0] ss:$56 sps:$4 sm:$0xff]  }
 0x24f   :  { %3888 = vmatmul.mubr.bf16.vlgmr.msra.gmra.mxu1 %v26453_v40  ;;  %12123 = vmatpush1.bf16.msra.mxu0 %v22928_v39  ;;  %v22949_v40 = vld [vmem:[#allocation8 + $0x8c0] ss:$56 sps:$4 sm:$0xff]   ;;  %v3545_v32 = vpop.f32.mrf.mxu1  ;;  %v22984_v39 = vld [vmem:[#allocation8 + $0x624] ss:$56 sps:$4 sm:$0xff]  }
 0x250   :  { %12154 = vmatprep.mubr.bf16.mxu0 %v26505_v2  ;;  %12166 = vmatpush1.bf16.msra.mxu1 %v22931_v50  ;;  %v3546_v47 = vadd.f32 %v3545_v32, %v665_v55  ;;  %v22997_v32 = vld [vmem:[#allocation8 + $0xc40] ss:$56 sps:$4 sm:$0xff]  }
 0x251   :  { %12197 = vmatprep.mubr.bf16.mxu1 %v26507_v5  ;;  %12124 = vmatprep.subr.bf16.mxu0 %v22936_v54  ;;  %v26515_v42 = vpop.f32.mrf.mxu1 }
 0x252   :  { %12167 = vmatprep.subr.bf16.mxu1 %v22939_v63  ;;  %v22982_v63 = vld [vmem:[#allocation8 + $0x620] ss:$56 sps:$4 sm:$0xff]  }
 0x253   :  { %12125 = vmatpush1.bf16.msra.mxu0 %v22934_v62  ;;  %v3549_v12 = vpop.f32.mrf.mxu1 }
 0x254   :  { %12168 = vmatpush1.bf16.msra.mxu1 %v22937_v53  ;;  %12126 = vmatprep.subr.bf16.mxu0 %v22942_v27  ;;  %v3550_v18 = vadd.f32 %v3549_v12, %v665_v55  ;;  %v22990_v53 = vld [vmem:[#allocation8 + $0x5b4] ss:$56 sps:$4 sm:$0xff]   ;;  %v23000_v55 = vld [vmem:[#allocation8 + $0x4d0] ss:$56 sps:$4 sm:$0xff]  }
 0x255   :  { %12169 = vmatprep.subr.bf16.mxu1 %v22945_v8  ;;  %v3551_v34 = vpop.f32.mrf.mxu1  ;;  %v22993_v27 = vld [vmem:[#allocation8 + $0xcb4] ss:$56 sps:$4 sm:$0xff]  }
 0x257   :  { %12127 = vmatpush1.bf16.msra.mxu0 %v22940_v9 }
 0x258   :  { %12170 = vmatpush1.bf16.msra.mxu1 %v22943_v11  ;;  %12128 = vmatprep.subr.bf16.mxu0 %v22948_v7 }
 0x259   :  { %12171 = vmatprep.subr.bf16.mxu1 %v22951_v37  ;;  %v22988_v37 = vld [vmem:[#allocation8 + $0x5b0] ss:$56 sps:$4 sm:$0xff]  }
 0x25b   :  { %12129 = vmatpush1.bf16.msra.mxu0 %v22946_v48  ;;  %v22991_v48 = vld [vmem:[#allocation8 + $0xcb0] ss:$56 sps:$4 sm:$0xff]  }
 0x25c   :  { %12172 = vmatpush1.bf16.msra.mxu1 %v22949_v40  ;;  %12130 = vmatprep.subr.bf16.mxu0 %v22954_v17  ;;  %v22996_v40 = vld [vmem:[#allocation8 + $0x544] ss:$56 sps:$4 sm:$0xff]  }
 0x25d   :  { %12173 = vmatprep.subr.bf16.mxu1 %v22957_v20  ;;  %v22999_v17 = vld [vmem:[#allocation8 + $0xc44] ss:$56 sps:$4 sm:$0xff]   ;;  %v26528_v20 = vsub.s32 5, %v26355_v13 }
 0x25f   :  { %12131 = vmatpush1.bf16.msra.mxu0 %v22952_v23  ;;  %v27329_v23 = vsub.s32 7, %v26355_v13 }
 0x260   :  { %12174 = vmatpush1.bf16.msra.mxu1 %v22955_v4  ;;  %12132 = vmatprep.subr.bf16.mxu0 %v22960_v26 }
 0x261   :  { %12175 = vmatprep.subr.bf16.mxu1 %v22963_v29  ;;  %v22994_v29 = vld [vmem:[#allocation8 + $0x540] ss:$56 sps:$4 sm:$0xff]  }
 0x263   :  { %12133 = vmatpush1.bf16.msra.mxu0 %v22958_v43 }
 0x264   :  { %12176 = vmatpush1.bf16.msra.mxu1 %v22961_v35  ;;  %12134 = vmatprep.subr.bf16.mxu0 %v22966_v10  ;;  %v23002_v35 = vld [vmem:[#allocation8 + $0x4d4] ss:$56 sps:$4 sm:$0xff]  }
 0x265   :  { %12177 = vmatprep.subr.bf16.mxu1 %v22969_v41  ;;  %v23005_v10 = vld [vmem:[#allocation8 + $0xbd4] ss:$56 sps:$4 sm:$0xff]  }
 0x266   :  { %v26011_v41 = vld [vmem:[#allocation6] sm:$0xff] }
 0x267   :  { %12135 = vmatpush1.bf16.msra.mxu0 %v22964_v44  ;;  %v669_v44 = vrot.slane %v26011_v41, %v27329_v23  ;;  %v23828_v23 = vld [vmem:[#allocation8 + $0x6a8] ss:$56 sps:$4 sm:$0xff]  }
 0x268   :  { %12178 = vmatpush1.bf16.msra.mxu1 %v22967_v25  ;;  %12136 = vmatprep.subr.bf16.mxu0 %v22972_v33 }
 0x269   :  { %12179 = vmatprep.subr.bf16.mxu1 %v22975_v30  ;;  %v661_v30 = vrot.slane %v26011_v41, %v26528_v20  ;;  %v23033_v41 = vld [vmem:[#allocation8 + $0x17a0] ss:$56 sps:$4 sm:$0xff]  }
 0x26b   :  { %12137 = vmatpush1.bf16.msra.mxu0 %v22970_v56  ;;  %v23003_v56 = vld [vmem:[#allocation8 + $0xbd0] ss:$56 sps:$4 sm:$0xff]  }
 0x26c   :  { %12180 = vmatpush1.bf16.msra.mxu1 %v22973_v58  ;;  %12138 = vmatprep.subr.bf16.mxu0 %v22978_v57  ;;  %v3552_v58 = vadd.f32 %v3551_v34, %v669_v44  ;;  %v23008_v57 = vld [vmem:[#allocation8 + $0x464] ss:$56 sps:$4 sm:$0xff]   ;;  %v23017_v34 = vld [vmem:[#allocation8 + $0xaf4] ss:$56 sps:$4 sm:$0xff]  }
 0x26d   :  { %12181 = vmatprep.subr.bf16.mxu1 %v22981_v60  ;;  %v23011_v60 = vld [vmem:[#allocation8 + $0xb64] ss:$56 sps:$4 sm:$0xff]  }
 0x26e   :  { %v3588_v28 = vpop.f32.mrf.mxu0 }
 0x26f   :  { %v3631_v50 = vpop.f32.mrf.mxu1  ;;  %v3589_v54 = vadd.f32 %v3588_v28, %v3546_v47  ;;  %12139 = vmatpush2.bf16.msra.mxu0 %v22976_v22  ;;  %v3423_v47 = vadd.f32 %v26467_v38, %v661_v30  ;;  %v23009_v28 = vld [vmem:[#allocation8 + $0xb60] ss:$56 sps:$4 sm:$0xff]  }
 0x270   :  { %12182 = vmatpush2.bf16.msra.mxu1 %v22979_v31  ;;  %v26523_v3 = vpop.f32.mrf.mxu0  ;;  %12140 = vmatprep.subr.bf16.mxu0 %v22984_v39  ;;  %v3548_v31 = vadd.f32 %v26515_v42, %v669_v44  ;;  %v3419_v39 = vadd.f32 %v26456_v46, %v661_v30  ;;  %v23012_v46 = vld [vmem:[#allocation8 + $0x3f0] ss:$56 sps:$4 sm:$0xff]   ;;  %v23035_v44 = vld [vmem:[#allocation8 + $0x17a4] ss:$56 sps:$4 sm:$0xff]   ;;  %v23041_v30 = vld [vmem:[#allocation8 + $0x1734] ss:$56 sps:$4 sm:$0xff]  }
 0x271   :  { %v26525_v62 = vpop.f32.mrf.mxu1  ;;  %v3632_v8 = vadd.f32 %v3631_v50, %v3589_v54  ;;  %12183 = vmatprep.subr.bf16.mxu1 %v22987_v49  ;;  %v23006_v49 = vld [vmem:[#allocation8 + $0x460] ss:$56 sps:$4 sm:$0xff]   ;;  %v3466_v54 = vadd.f32 %v26513_v24, %v3423_v47 }
 0x272   :  { %v3592_v9 = vpop.f32.mrf.mxu0  ;;  %v3591_v38 = vadd.f32 %v26523_v3, %v3548_v31  ;;  %v23018_v3 = vld [vmem:[#allocation8 + $0x380] ss:$56 sps:$4 sm:$0xff]   ;;  %v23053_v31 = vld [vmem:[#allocation8 + $0x1654] ss:$56 sps:$4 sm:$0xff]  }
 0x273   :  { %v3593_v11 = vadd.f32 %v3592_v9, %v3550_v18  ;;  %12141 = vmatpush2.bf16.msra.mxu0 %v22982_v63  ;;  %v3635_v7 = vpop.f32.mrf.mxu1  ;;  %v3930_v4 = vmul.f32 %v26388_v21, %v3632_v8  ;;  %vm3905_vm10 = vcmp.gt.f32.partialorder %v3632_v8, 0.0  ;;  %v23014_v18 = vld [vmem:[#allocation8 + $0x3f4] ss:$56 sps:$4 sm:$0xff]   ;;  %v3509_v42 = vadd.f32 %v26521_v61, %v3466_v54  ;;  %v23023_v9 = vld [vmem:[#allocation8 + $0xa84] ss:$56 sps:$4 sm:$0xff]  }
 0x274   :  { %12184 = vmatpush2.bf16.msra.mxu1 %v22985_v14  ;;  %12142 = vmatprep.subr.bf16.mxu0 %v22990_v53  ;;  %v3594_v22 = vpop.f32.mrf.mxu0  ;;  %v3462_v14 = vadd.f32 %v26458_v51, %v3419_v39  ;;  %v23015_v53 = vld [vmem:[#allocation8 + $0xaf0] ss:$56 sps:$4 sm:$0xff]   ;;  %v3634_v24 = vadd.f32 %v26525_v62, %v3591_v38  ;;  %v23021_v51 = vld [vmem:[#allocation8 + $0xa80] ss:$56 sps:$4 sm:$0xff]   ;;  %v23062_v54 = vld [vmem:[#allocation8 + $0xe74] ss:$56 sps:$4 sm:$0xff]  }
 0x275   :  { %12185 = vmatprep.subr.bf16.mxu1 %v22993_v27  ;;  %v3636_v26 = vadd.f32 %v3635_v7, %v3593_v11  ;;  %v3954_v25 = vsel %vm3905_vm10, %v3632_v8, %v3930_v4  ;;  %v3595_v50 = vadd.f32 %v3594_v22, %v3552_v58  ;;  %v3637_v63 = vpop.f32.mrf.mxu1  ;;  %v23020_v8 = vld [vmem:[#allocation8 + $0x384] ss:$56 sps:$4 sm:$0xff]   ;;  %v3941_v7 = vmul.f32 %v26388_v21, %v3509_v42  ;;  %v23045_v47 = vld [vmem:[#allocation8 + $0x16c0] ss:$56 sps:$4 sm:$0xff]   ;;  %v23050_v22 = vld [vmem:[#allocation8 + $0xf54] ss:$56 sps:$4 sm:$0xff]  }
 0x276   :  { %v3505_v11 = vadd.f32 %v26471_v59, %v3462_v14  ;;  %vm3916_vm12 = vcmp.gt.f32.partialorder %v3509_v42, 0.0  ;;  %v23024_v59 = vld [vmem:[#allocation8 + $0x1110] ss:$56 sps:$4 sm:$0xff]   ;;  %v3931_v62 = vmul.f32 %v26388_v21, %v3634_v24  ;;  %vm3906_vm15 = vcmp.gt.f32.partialorder %v3634_v24, 0.0  ;;  %v23044_v58 = vld [vmem:[#allocation8 + $0xfc4] ss:$56 sps:$4 sm:$0xff]  }
 0x277   :  { %12143 = vmatpush2.bf16.msra.mxu0 %v22988_v37  ;;  %vm3917_vm11 = vcmp.gt.f32.partialorder %v3636_v26, 0.0  ;;  %v3942_v43 = vmul.f32 %v26388_v21, %v3636_v26  ;;  %v3638_v27 = vadd.f32 %v3637_v63, %v3595_v50  ;;  %v23026_v37 = vld [vmem:[#allocation8 + $0x1114] ss:$56 sps:$4 sm:$0xff]   ;;  %v3965_v4 = vsel %vm3916_vm12, %v3509_v42, %v3941_v7  ;;  %v23048_v39 = vld [vmem:[#allocation8 + $0xf50] ss:$56 sps:$4 sm:$0xff]  }
 0x278   :  { %12186 = vmatpush2.bf16.msra.mxu1 %v22991_v48  ;;  %12144 = vmatprep.subr.bf16.mxu0 %v22996_v40  ;;  %v23029_v48 = vld [vmem:[#allocation8 + $0x1814] ss:$56 sps:$4 sm:$0xff]   ;;  %v3929_v40 = vmul.f32 %v26388_v21, %v3505_v11  ;;  %vm3904_vm14 = vcmp.gt.f32.partialorder %v3505_v11, 0.0  ;;  %v23059_v50 = vld [vmem:[#allocation8 + $0x15e4] ss:$56 sps:$4 sm:$0xff]  }
 0x279   :  { %12187 = vmatprep.subr.bf16.mxu1 %v22999_v17  ;;  %v3966_v33 = vsel %vm3917_vm11, %v3636_v26, %v3942_v43  ;;  %v3943_v61 = vmul.f32 %v26388_v21, %v3638_v27  ;;  %vm3918_vm13 = vcmp.gt.f32.partialorder %v3638_v27, 0.0  ;;  %v23027_v17 = vld [vmem:[#allocation8 + $0x1810] ss:$56 sps:$4 sm:$0xff]   ;;  %v23032_v26 = vld [vmem:[#allocation8 + $0x10a4] ss:$56 sps:$4 sm:$0xff]  }
 0x27a   :  { %v26536_v12 = vpack.c.bf16 %v3966_v33, %v3954_v25  ;;  %v23030_v43 = vld [vmem:[#allocation8 + $0x10a0] ss:$56 sps:$4 sm:$0xff]   ;;  %v23038_v33 = vld [vmem:[#allocation8 + $0x1034] ss:$56 sps:$4 sm:$0xff]   ;;  %v23060_v63 = vld [vmem:[#allocation8 + $0xe70] ss:$56 sps:$4 sm:$0xff]  }
 0x27b   :  { %12145 = vmatpush2.bf16.msra.mxu0 %v22994_v29  ;;  %v3967_v29 = vsel %vm3918_vm13, %v3638_v27, %v3943_v61  ;;  %v23065_v38 = vld [vmem:[#allocation8 + $0x1574] ss:$56 sps:$4 sm:$0xff]   ;;  %v23063_v14 = vld [vmem:[#allocation8 + $0x1570] ss:$56 sps:$4 sm:$0xff]   ;;  %v23068_v42 = vld [vmem:[#allocation8 + $0xe04] ss:$56 sps:$4 sm:$0xff]  }
 0x27c   :  { %12188 = vmatpush2.bf16.msra.mxu1 %v22997_v32  ;;  %12146 = vmatprep.subr.bf16.mxu0 %v23002_v35  ;;  %v3953_v32 = vsel %vm3904_vm14, %v3505_v11, %v3929_v40  ;;  %v23069_v27 = vld [vmem:[#allocation8 + $0x1500] ss:$56 sps:$4 sm:$0xff]   ;;  %v23072_v11 = vld [vmem:[#allocation8 + $0x1490] ss:$56 sps:$4 sm:$0xff]   ;;  %v23080_v7 = vld [vmem:[#allocation8 + $0x1424] ss:$56 sps:$4 sm:$0xff]  }
 0x27d   :  { %12189 = vmatprep.subr.bf16.mxu1 %v23005_v10  ;;  %v26551_v35 = vpack.c.bf16 %v3965_v4, %v3953_v32  ;;  %v3955_v10 = vsel %vm3906_vm15, %v3634_v24, %v3931_v62  ;;  %v23075_v24 = vld [vmem:[#allocation8 + $0x1b90] ss:$56 sps:$4 sm:$0xff]   ;;  %v23081_v61 = vld [vmem:[#allocation8 + $0x1b20] ss:$56 sps:$4 sm:$0xff]   ;;  %v23092_v62 = vld [vmem:[#allocation8 + $0x1344] ss:$56 sps:$4 sm:$0xff]  }
 0x27e   :  { %v26554_v25 = vpack.c.bf16 %v3967_v29, %v3955_v10  ;;  %v23084_v40 = vld [vmem:[#allocation8 + $0x13b0] ss:$56 sps:$4 sm:$0xff]   ;;  %v23095_v4 = vld [vmem:[#allocation8 + $0x1a44] ss:$56 sps:$4 sm:$0xff]   ;;  %v23098_v29 = vld [vmem:[#allocation8 + $0x12d4] ss:$56 sps:$4 sm:$0xff]  }
 0x27f   :  { %12147 = vmatpush2.bf16.msra.mxu0 %v23000_v55  ;;  %v23036_v55 = vld [vmem:[#allocation8 + $0x1030] ss:$56 sps:$4 sm:$0xff]  }
 0x280   :  { %12190 = vmatpush2.bf16.msra.mxu1 %v23003_v56  ;;  %12148 = vmatprep.subr.bf16.mxu0 %v23008_v57  ;;  %v23039_v56 = vld [vmem:[#allocation8 + $0x1730] ss:$56 sps:$4 sm:$0xff]   ;;  %v23047_v57 = vld [vmem:[#allocation8 + $0x16c4] ss:$56 sps:$4 sm:$0xff]  }
 0x281   :  { %12191 = vmatprep.subr.bf16.mxu1 %v23011_v60  ;;  %v23042_v60 = vld [vmem:[#allocation8 + $0xfc0] ss:$56 sps:$4 sm:$0xff]   ;;  %v23096_v32 = vld [vmem:[#allocation8 + $0x12d0] ss:$56 sps:$4 sm:$0xff]  }
 0x282   :  { %v23099_v10 = vld [vmem:[#allocation8 + $0x19d0] ss:$56 sps:$4 sm:$0xff]  }
 0x283   :  { %12149 = vmatpush2.bf16.msra.mxu0 %v23006_v49  ;;  %v23051_v49 = vld [vmem:[#allocation8 + $0x1650] ss:$56 sps:$4 sm:$0xff]  }
 0x284   :  { %12192 = vmatpush2.bf16.msra.mxu1 %v23009_v28  ;;  %12150 = vmatprep.subr.bf16.mxu0 %v23014_v18  ;;  %v23056_v28 = vld [vmem:[#allocation8 + $0xee4] ss:$56 sps:$4 sm:$0xff]   ;;  %v23054_v18 = vld [vmem:[#allocation8 + $0xee0] ss:$56 sps:$4 sm:$0xff]  }
 0x285   :  { %12193 = vmatprep.subr.bf16.mxu1 %v23017_v34  ;;  %v23057_v34 = vld [vmem:[#allocation8 + $0x15e0] ss:$56 sps:$4 sm:$0xff]  }
 0x287   :  { %12151 = vmatpush2.bf16.msra.mxu0 %v23012_v46  ;;  %v23066_v46 = vld [vmem:[#allocation8 + $0xe00] ss:$56 sps:$4 sm:$0xff]  }
 0x288   :  { %12194 = vmatpush2.bf16.msra.mxu1 %v23015_v53  ;;  %12152 = vmatprep.subr.bf16.mxu0 %v23020_v8  ;;  %v23071_v53 = vld [vmem:[#allocation8 + $0x1504] ss:$56 sps:$4 sm:$0xff]   ;;  %v23074_v8 = vld [vmem:[#allocation8 + $0x1494] ss:$56 sps:$4 sm:$0xff]  }
 0x289   :  { %12195 = vmatprep.subr.bf16.mxu1 %v23023_v9  ;;  %v23077_v9 = vld [vmem:[#allocation8 + $0x1b94] ss:$56 sps:$4 sm:$0xff]  }
 0x28b   :  { %12153 = vmatpush2.bf16.msra.mxu0 %v23018_v3  ;;  %v23083_v3 = vld [vmem:[#allocation8 + $0x1b24] ss:$56 sps:$4 sm:$0xff]  }
 0x28c   :  { %12196 = vmatpush2.bf16.msra.mxu1 %v23021_v51  ;;  %12208 = vmatprep.subr.bf16.mxu0 %v23026_v37  ;;  %v23078_v51 = vld [vmem:[#allocation8 + $0x1420] ss:$56 sps:$4 sm:$0xff]   ;;  %v23086_v37 = vld [vmem:[#allocation8 + $0x13b4] ss:$56 sps:$4 sm:$0xff]  }
 0x28d   :  { %12251 = vmatprep.subr.bf16.mxu1 %v23029_v48  ;;  %v23089_v48 = vld [vmem:[#allocation8 + $0x1ab4] ss:$56 sps:$4 sm:$0xff]  }
 0x28e   :  { %12155 = vmatmul.mubr.bf16.vlgmr.msra.gmra.mxu0 %v26396_v36 }
 0x28f   :  { %12198 = vmatmul.mubr.bf16.vlgmr.msra.gmra.mxu1 %v26421_v15  ;;  %12209 = vmatpush1.bf16.msra.mxu0 %v23024_v59  ;;  %v23087_v59 = vld [vmem:[#allocation8 + $0x1ab0] ss:$56 sps:$4 sm:$0xff]  }
 0x290   :  { %12240 = vmatprep.mubr.bf16.mxu0 %v26551_v35  ;;  %12252 = vmatpush1.bf16.msra.mxu1 %v23027_v17  ;;  %v23090_v17 = vld [vmem:[#allocation8 + $0x1340] ss:$56 sps:$4 sm:$0xff]  }
 0x291   :  { %12283 = vmatprep.mubr.bf16.mxu1 %v26554_v25  ;;  %12210 = vmatprep.subr.bf16.mxu0 %v23032_v26  ;;  %v23093_v26 = vld [vmem:[#allocation8 + $0x1a40] ss:$56 sps:$4 sm:$0xff]  }
 0x292   :  { %12253 = vmatprep.subr.bf16.mxu1 %v23035_v44  ;;  %v23102_v44 = vld [vmem:[#allocation8 + $0x1260] ss:$56 sps:$4 sm:$0xff]  }
 0x293   :  { %12211 = vmatpush1.bf16.msra.mxu0 %v23030_v43  ;;  %v23101_v43 = vld [vmem:[#allocation8 + $0x19d4] ss:$56 sps:$4 sm:$0xff]  }
 0x294   :  { %12254 = vmatpush1.bf16.msra.mxu1 %v23033_v41  ;;  %12212 = vmatprep.subr.bf16.mxu0 %v23038_v33  ;;  %v23104_v41 = vld [vmem:[#allocation8 + $0x1264] ss:$56 sps:$4 sm:$0xff]  }
 0x295   :  { %12255 = vmatprep.subr.bf16.mxu1 %v23041_v30  ;;  %v23107_v33 = vld [vmem:[#allocation8 + $0x1964] ss:$56 sps:$4 sm:$0xff]  }
 0x297   :  { %12213 = vmatpush1.bf16.msra.mxu0 %v23036_v55  ;;  %v23105_v55 = vld [vmem:[#allocation8 + $0x1960] ss:$56 sps:$4 sm:$0xff]  }
 0x298   :  { %12256 = vmatpush1.bf16.msra.mxu1 %v23039_v56  ;;  %12214 = vmatprep.subr.bf16.mxu0 %v23044_v58  ;;  %v23110_v56 = vld [vmem:[#allocation8 + $0x11f4] ss:$56 sps:$4 sm:$0xff]   ;;  %v23108_v58 = vld [vmem:[#allocation8 + $0x11f0] ss:$56 sps:$4 sm:$0xff]  }
 0x299   :  { %12257 = vmatprep.subr.bf16.mxu1 %v23047_v57  ;;  %v23113_v57 = vld [vmem:[#allocation8 + $0x18f4] ss:$56 sps:$4 sm:$0xff]  }
 0x29b   :  { %12215 = vmatpush1.bf16.msra.mxu0 %v23042_v60  ;;  %v26561_v60 = vld [vmem:[#allocation6 + $0x8] sm:$0xf] }
 0x29c   :  { %12258 = vmatpush1.bf16.msra.mxu1 %v23045_v47  ;;  %12216 = vmatprep.subr.bf16.mxu0 %v23050_v22 }
 0x29d   :  { %12259 = vmatprep.subr.bf16.mxu1 %v23053_v31  ;;  %v23111_v31 = vld [vmem:[#allocation8 + $0x18f0] ss:$56 sps:$4 sm:$0xff]  }
 0x29f   :  { %12217 = vmatpush1.bf16.msra.mxu0 %v23048_v39  ;;  %v23116_v39 = vld [vmem:[#allocation8 + $0x1184] ss:$56 sps:$4 sm:$0xff]  }
 0x2a0   :  { %12260 = vmatpush1.bf16.msra.mxu1 %v23051_v49  ;;  %12218 = vmatprep.subr.bf16.mxu0 %v23056_v28  ;;  %v23114_v49 = vld [vmem:[#allocation8 + $0x1180] ss:$56 sps:$4 sm:$0xff]   ;;  %v23119_v28 = vld [vmem:[#allocation8 + $0x1884] ss:$56 sps:$4 sm:$0xff]  }
 0x2a1   :  { %12261 = vmatprep.subr.bf16.mxu1 %v23059_v50  ;;  %v677_v50 = vrot.slane %v26561_v60, %v26481_v1 }
 0x2a3   :  { %12219 = vmatpush1.bf16.msra.mxu0 %v23054_v18 }
 0x2a4   :  { %12262 = vmatpush1.bf16.msra.mxu1 %v23057_v34  ;;  %12220 = vmatprep.subr.bf16.mxu0 %v23062_v54  ;;  %v23117_v54 = vld [vmem:[#allocation8 + $0x1880] ss:$56 sps:$4 sm:$0xff]  }
 0x2a5   :  { %12263 = vmatprep.subr.bf16.mxu1 %v23065_v38  ;;  %v23120_v38 = vld [vmem:[#allocation8 + $0x1f10] ss:$56 sps:$4 sm:$0xff]  }
 0x2a7   :  { %12221 = vmatpush1.bf16.msra.mxu0 %v23060_v63  ;;  %v23122_v63 = vld [vmem:[#allocation8 + $0x1f14] ss:$56 sps:$4 sm:$0xff]  }
 0x2a8   :  { %12264 = vmatpush1.bf16.msra.mxu1 %v23063_v14  ;;  %12222 = vmatprep.subr.bf16.mxu0 %v23068_v42  ;;  %v23137_v14 = vld [vmem:[#allocation8 + $0x2614] ss:$56 sps:$4 sm:$0xff]   ;;  %v23125_v42 = vld [vmem:[#allocation8 + $0x1ea4] ss:$56 sps:$4 sm:$0xff]  }
 0x2a9   :  { %12265 = vmatprep.subr.bf16.mxu1 %v23071_v53 }
 0x2ab   :  { %12223 = vmatpush1.bf16.msra.mxu0 %v23066_v46  ;;  %v23135_v46 = vld [vmem:[#allocation8 + $0x2610] ss:$56 sps:$4 sm:$0xff]  }
 0x2ac   :  { %12266 = vmatpush1.bf16.msra.mxu1 %v23069_v27  ;;  %12224 = vmatprep.subr.bf16.mxu0 %v23074_v8 }
 0x2ad   :  { %12267 = vmatprep.subr.bf16.mxu1 %v23077_v9  ;;  %v23143_v9 = vld [vmem:[#allocation8 + $0x25a4] ss:$56 sps:$4 sm:$0xff]  }
 0x2ae   :  { %v26559_v30 = vpop.f32.mrf.mxu0 }
 0x2af   :  { %12225 = vmatpush2.bf16.msra.mxu0 %v23072_v11  ;;  %v26563_v22 = vpop.f32.mrf.mxu1 }
 0x2b0   :  { %12268 = vmatpush2.bf16.msra.mxu1 %v23075_v24  ;;  %12226 = vmatprep.subr.bf16.mxu0 %v23080_v7  ;;  %v3676_v47 = vpop.f32.mrf.mxu0  ;;  %v23123_v24 = vld [vmem:[#allocation8 + $0x1ea0] ss:$56 sps:$4 sm:$0xff]   ;;  %v23128_v7 = vld [vmem:[#allocation8 + $0x1e34] ss:$56 sps:$4 sm:$0xff]  }
 0x2b1   :  { %12269 = vmatprep.subr.bf16.mxu1 %v23083_v3  ;;  %v3719_v34 = vpop.f32.mrf.mxu1  ;;  %v3677_v53 = vadd.f32 %v3676_v47, %v677_v50  ;;  %v23153_v47 = vld [vmem:[#allocation8 + $0x24c0] ss:$56 sps:$4 sm:$0xff]  }
 0x2b2   :  { %v26567_v18 = vpop.f32.mrf.mxu0 }
 0x2b3   :  { %12227 = vmatpush2.bf16.msra.mxu0 %v23078_v51  ;;  %v26569_v8 = vpop.f32.mrf.mxu1  ;;  %v3720_v3 = vadd.f32 %v3719_v34, %v3677_v53  ;;  %v23138_v34 = vld [vmem:[#allocation8 + $0x1ce0] ss:$56 sps:$4 sm:$0xff]  }
 0x2b4   :  { %12270 = vmatpush2.bf16.msra.mxu1 %v23081_v61  ;;  %12228 = vmatprep.subr.bf16.mxu0 %v23086_v37  ;;  %v3680_v27 = vpop.f32.mrf.mxu0  ;;  %v23141_v61 = vld [vmem:[#allocation8 + $0x25a0] ss:$56 sps:$4 sm:$0xff]   ;;  %v23149_v37 = vld [vmem:[#allocation8 + $0x2534] ss:$56 sps:$4 sm:$0xff]  }
 0x2b5   :  { %12271 = vmatprep.subr.bf16.mxu1 %v23089_v48  ;;  %v3681_v51 = vadd.f32 %v3680_v27, %v677_v50  ;;  %v3723_v48 = vpop.f32.mrf.mxu1  ;;  %v23167_v50 = vld [vmem:[#allocation8 + $0x23e4] ss:$56 sps:$4 sm:$0xff]   ;;  %v23150_v53 = vld [vmem:[#allocation8 + $0x1c00] ss:$56 sps:$4 sm:$0xff]  }
 0x2b6   :  { %v23179_v27 = vld [vmem:[#allocation8 + $0x2304] ss:$56 sps:$4 sm:$0xff]  }
 0x2b7   :  { %12229 = vmatpush2.bf16.msra.mxu0 %v23084_v40 }
 0x2b8   :  { %12272 = vmatpush2.bf16.msra.mxu1 %v23087_v59  ;;  %12230 = vmatprep.subr.bf16.mxu0 %v23092_v62 }
 0x2b9   :  { %12273 = vmatprep.subr.bf16.mxu1 %v23095_v4  ;;  %v23131_v4 = vld [vmem:[#allocation8 + $0x1dc4] ss:$56 sps:$4 sm:$0xff]  }
 0x2bb   :  { %12231 = vmatpush2.bf16.msra.mxu0 %v23090_v17  ;;  %v23126_v17 = vld [vmem:[#allocation8 + $0x1e30] ss:$56 sps:$4 sm:$0xff]  }
 0x2bc   :  { %12274 = vmatpush2.bf16.msra.mxu1 %v23093_v26  ;;  %12232 = vmatprep.subr.bf16.mxu0 %v23098_v29  ;;  %v3724_v26 = vadd.f32 %v3723_v48, %v3681_v51  ;;  %v23147_v29 = vld [vmem:[#allocation8 + $0x2530] ss:$56 sps:$4 sm:$0xff]   ;;  %v23164_v51 = vld [vmem:[#allocation8 + $0x2224] ss:$56 sps:$4 sm:$0xff]  }
 0x2bd   :  { %12275 = vmatprep.subr.bf16.mxu1 %v23101_v43  ;;  %v23191_v48 = vld [vmem:[#allocation8 + $0x2924] ss:$56 sps:$4 sm:$0xff]  }
 0x2bf   :  { %12233 = vmatpush2.bf16.msra.mxu0 %v23096_v32  ;;  %v23155_v32 = vld [vmem:[#allocation8 + $0x24c4] ss:$56 sps:$4 sm:$0xff]  }
 0x2c0   :  { %12276 = vmatpush2.bf16.msra.mxu1 %v23099_v10  ;;  %12234 = vmatprep.subr.bf16.mxu0 %v23104_v41 }
 0x2c1   :  { %12277 = vmatprep.subr.bf16.mxu1 %v23107_v33  ;;  %v23129_v33 = vld [vmem:[#allocation8 + $0x1dc0] ss:$56 sps:$4 sm:$0xff]  }
 0x2c3   :  { %12235 = vmatpush2.bf16.msra.mxu0 %v23102_v44 }
 0x2c4   :  { %12278 = vmatpush2.bf16.msra.mxu1 %v23105_v55  ;;  %12236 = vmatprep.subr.bf16.mxu0 %v23110_v56  ;;  %v23134_v55 = vld [vmem:[#allocation8 + $0x1d54] ss:$56 sps:$4 sm:$0xff]  }
 0x2c5   :  { %12279 = vmatprep.subr.bf16.mxu1 %v23113_v57  ;;  %v23132_v57 = vld [vmem:[#allocation8 + $0x1d50] ss:$56 sps:$4 sm:$0xff]  }
 0x2c7   :  { %12237 = vmatpush2.bf16.msra.mxu0 %v23108_v58 }
 0x2c8   :  { %12280 = vmatpush2.bf16.msra.mxu1 %v23111_v31  ;;  %12238 = vmatprep.subr.bf16.mxu0 %v23116_v39  ;;  %v23161_v31 = vld [vmem:[#allocation8 + $0x2454] ss:$56 sps:$4 sm:$0xff]  }
 0x2c9   :  { %12281 = vmatprep.subr.bf16.mxu1 %v23119_v28  ;;  %v23159_v28 = vld [vmem:[#allocation8 + $0x2450] ss:$56 sps:$4 sm:$0xff]  }
 0x2cb   :  { %12239 = vmatpush2.bf16.msra.mxu0 %v23114_v49  ;;  %v23140_v49 = vld [vmem:[#allocation8 + $0x1ce4] ss:$56 sps:$4 sm:$0xff]  }
 0x2cc   :  { %12282 = vmatpush2.bf16.msra.mxu1 %v23117_v54  ;;  %12294 = vmatprep.subr.bf16.mxu0 %v23122_v63  ;;  %v23146_v54 = vld [vmem:[#allocation8 + $0x1c74] ss:$56 sps:$4 sm:$0xff]   ;;  %v23144_v63 = vld [vmem:[#allocation8 + $0x1c70] ss:$56 sps:$4 sm:$0xff]  }
 0x2cd   :  { %12337 = vmatprep.subr.bf16.mxu1 %v23137_v14  ;;  %v23173_v14 = vld [vmem:[#allocation8 + $0x2374] ss:$56 sps:$4 sm:$0xff]  }
 0x2ce   :  { %v26571_v11 = vpop.f32.mrf.mxu0  ;;  %12241 = vmatmul.mubr.bf16.vlgmr.msra.gmra.mxu0 %v26483_v6 }
 0x2cf   :  { %12284 = vmatmul.mubr.bf16.vlgmr.msra.gmra.mxu1 %v26536_v12  ;;  %12295 = vmatpush1.bf16.msra.mxu0 %v23120_v38  ;;  %v23165_v38 = vld [vmem:[#allocation8 + $0x23e0] ss:$56 sps:$4 sm:$0xff]  }
 0x2d0   :  { %v3762_v40 = vpop.f32.mrf.mxu0  ;;  %12296 = vmatprep.subr.bf16.mxu0 %v23125_v42  ;;  %12338 = vmatpush1.bf16.msra.mxu1 %v23135_v46  ;;  %v23152_v42 = vld [vmem:[#allocation8 + $0x1c04] ss:$56 sps:$4 sm:$0xff]   ;;  %v23171_v46 = vld [vmem:[#allocation8 + $0x2370] ss:$56 sps:$4 sm:$0xff]  }
 0x2d1   :  { %v3763_v59 = vadd.f32 %v3762_v40, %v3720_v3  ;;  %12339 = vmatprep.subr.bf16.mxu1 %v23143_v9  ;;  %v23158_v9 = vld [vmem:[#allocation8 + $0x2294] ss:$56 sps:$4 sm:$0xff]  }
 0x2d2   :  { %v26575_v62 = vpop.f32.mrf.mxu0  ;;  %v23185_v3 = vld [vmem:[#allocation8 + $0x2994] ss:$56 sps:$4 sm:$0xff]  }
 0x2d3   :  { %12297 = vmatpush1.bf16.msra.mxu0 %v23123_v24  ;;  %v3933_v10 = vmul.f32 %v26388_v21, %v3763_v59  ;;  %vm3908_vm0 = vcmp.gt.f32.partialorder %v3763_v59, 0.0  ;;  %v23177_v24 = vld [vmem:[#allocation8 + $0x2300] ss:$56 sps:$4 sm:$0xff]   ;;  %v23170_v40 = vld [vmem:[#allocation8 + $0x21b4] ss:$56 sps:$4 sm:$0xff]  }
 0x2d4   :  { %v3766_v43 = vpop.f32.mrf.mxu0  ;;  %12298 = vmatprep.subr.bf16.mxu0 %v23128_v7  ;;  %12340 = vmatpush1.bf16.msra.mxu1 %v23141_v61  ;;  %v23156_v7 = vld [vmem:[#allocation8 + $0x2290] ss:$56 sps:$4 sm:$0xff]  }
 0x2d5   :  { %v3767_v41 = vadd.f32 %v3766_v43, %v3724_v26  ;;  %12341 = vmatprep.subr.bf16.mxu1 %v23149_v37  ;;  %v3957_v56 = vsel %vm3908_vm0, %v3763_v59, %v3933_v10  ;;  %v23183_v61 = vld [vmem:[#allocation8 + $0x2990] ss:$56 sps:$4 sm:$0xff]   ;;  %v23162_v37 = vld [vmem:[#allocation8 + $0x2220] ss:$56 sps:$4 sm:$0xff]   ;;  %v23176_v26 = vld [vmem:[#allocation8 + $0x2144] ss:$56 sps:$4 sm:$0xff]  }
 0x2d6   :  { %v23189_v59 = vld [vmem:[#allocation8 + $0x2920] ss:$56 sps:$4 sm:$0xff]   ;;  %v23203_v43 = vld [vmem:[#allocation8 + $0x2844] ss:$56 sps:$4 sm:$0xff]   ;;  %v23182_v10 = vld [vmem:[#allocation8 + $0x20d4] ss:$56 sps:$4 sm:$0xff]  }
 0x2d7   :  { %vm3920_vm1 = vcmp.gt.f32.partialorder %v3767_v41, 0.0  ;;  %v3945_v44 = vmul.f32 %v26388_v21, %v3767_v41  ;;  %12299 = vmatpush1.bf16.msra.mxu0 %v23126_v17  ;;  %v23168_v17 = vld [vmem:[#allocation8 + $0x21b0] ss:$56 sps:$4 sm:$0xff]  }
 0x2d8   :  { %12300 = vmatprep.subr.bf16.mxu0 %v23131_v4  ;;  %12342 = vmatpush1.bf16.msra.mxu1 %v23147_v29  ;;  %v23197_v4 = vld [vmem:[#allocation8 + $0x28b4] ss:$56 sps:$4 sm:$0xff]   ;;  %v23195_v29 = vld [vmem:[#allocation8 + $0x28b0] ss:$56 sps:$4 sm:$0xff]  }
 0x2d9   :  { %v3969_v58 = vsel %vm3920_vm1, %v3767_v41, %v3945_v44  ;;  %12343 = vmatprep.subr.bf16.mxu1 %v23155_v32  ;;  %v23174_v32 = vld [vmem:[#allocation8 + $0x2140] ss:$56 sps:$4 sm:$0xff]   ;;  %v673_v44 = vrot.slane %v26561_v60, %v26360_v19 }
 0x2da   :  { %v26579_v39 = vpack.c.bf16 %v3969_v58, %v3957_v56  ;;  %v23201_v41 = vld [vmem:[#allocation8 + $0x2840] ss:$56 sps:$4 sm:$0xff]   ;;  %v23188_v58 = vld [vmem:[#allocation8 + $0x2064] ss:$56 sps:$4 sm:$0xff]  }
 0x2db   :  { %12301 = vmatpush1.bf16.msra.mxu0 %v23129_v33  ;;  %v23180_v33 = vld [vmem:[#allocation8 + $0x20d0] ss:$56 sps:$4 sm:$0xff]   ;;  %v3679_v56 = vadd.f32 %v26567_v18, %v673_v44 }
 0x2dc   :  { %12326 = vmatprep.mubr.bf16.mxu0 %v26579_v39  ;;  %12302 = vmatprep.subr.bf16.mxu0 %v23134_v55  ;;  %v23206_v55 = vld [vmem:[#allocation8 + $0x27d4] ss:$56 sps:$4 sm:$0xff]  }
 0x2dd   :  { %12344 = vmatpush1.bf16.msra.mxu1 %v23153_v47  ;;  %v3675_v47 = vadd.f32 %v26559_v30, %v673_v44 }
 0x2de   :  { %12345 = vmatprep.subr.bf16.mxu1 %v23161_v31  ;;  %v23186_v31 = vld [vmem:[#allocation8 + $0x2060] ss:$56 sps:$4 sm:$0xff]  }
 0x2df   :  { %12303 = vmatpush1.bf16.msra.mxu0 %v23132_v57  ;;  %v23204_v57 = vld [vmem:[#allocation8 + $0x27d0] ss:$56 sps:$4 sm:$0xff]  }
 0x2e0   :  { %12304 = vmatprep.subr.bf16.mxu0 %v23140_v49  ;;  %v23212_v49 = vld [vmem:[#allocation8 + $0x2764] ss:$56 sps:$4 sm:$0xff]  }
 0x2e1   :  { %12346 = vmatpush1.bf16.msra.mxu1 %v23159_v28 }
 0x2e2   :  { %12347 = vmatprep.subr.bf16.mxu1 %v23167_v50  ;;  %v3722_v50 = vadd.f32 %v26569_v8, %v3679_v56 }
 0x2e3   :  { %12305 = vmatpush1.bf16.msra.mxu0 %v23138_v34  ;;  %v23194_v34 = vld [vmem:[#allocation8 + $0x1ff4] ss:$56 sps:$4 sm:$0xff]  }
 0x2e4   :  { %12306 = vmatprep.subr.bf16.mxu0 %v23146_v54  ;;  %v23210_v54 = vld [vmem:[#allocation8 + $0x2760] ss:$56 sps:$4 sm:$0xff]   ;;  %v3765_v18 = vadd.f32 %v26575_v62, %v3722_v50 }
 0x2e5   :  { %12348 = vmatpush1.bf16.msra.mxu1 %v23165_v38  ;;  %v23192_v38 = vld [vmem:[#allocation8 + $0x1ff0] ss:$56 sps:$4 sm:$0xff]  }
 0x2e6   :  { %12349 = vmatprep.subr.bf16.mxu1 %v23173_v14  ;;  %v23218_v14 = vld [vmem:[#allocation8 + $0x26f4] ss:$56 sps:$4 sm:$0xff]   ;;  %v3944_v8 = vmul.f32 %v26388_v21, %v3765_v18  ;;  %vm3919_vm2 = vcmp.gt.f32.partialorder %v3765_v18, 0.0 }
 0x2e7   :  { %12307 = vmatpush1.bf16.msra.mxu0 %v23144_v63  ;;  %v3718_v63 = vadd.f32 %v26563_v22, %v3675_v47 }
 0x2e8   :  { %12308 = vmatprep.subr.bf16.mxu0 %v23152_v42 }
 0x2e9   :  { %12350 = vmatpush1.bf16.msra.mxu1 %v23171_v46  ;;  %v3761_v30 = vadd.f32 %v26571_v11, %v3718_v63  ;;  %v23200_v46 = vld [vmem:[#allocation8 + $0x1f84] ss:$56 sps:$4 sm:$0xff]  }
 0x2ea   :  { %12351 = vmatprep.subr.bf16.mxu1 %v23179_v27  ;;  %v23198_v27 = vld [vmem:[#allocation8 + $0x1f80] ss:$56 sps:$4 sm:$0xff]   ;;  %v23209_v11 = vld [vmem:[#allocation8 + $0x31c] ss:$56 sps:$4 sm:$0xff]  }
 0x2eb   :  { %12309 = vmatpush1.bf16.msra.mxu0 %v23150_v53  ;;  %v23216_v53 = vld [vmem:[#allocation8 + $0x26f0] ss:$56 sps:$4 sm:$0xff]   ;;  %v3932_v62 = vmul.f32 %v26388_v21, %v3761_v30  ;;  %vm3907_vm3 = vcmp.gt.f32.partialorder %v3761_v30, 0.0 }
 0x2ec   :  { %12310 = vmatprep.subr.bf16.mxu0 %v23158_v9  ;;  %v23224_v9 = vld [vmem:[#allocation8 + $0x2684] ss:$56 sps:$4 sm:$0xff]  }
 0x2ed   :  { %12352 = vmatpush1.bf16.msra.mxu1 %v23177_v24  ;;  %v681_v24 = vrot.slane %v26561_v60, %v26407_v52 }
 0x2ee   :  { %12353 = vmatprep.subr.bf16.mxu1 %v23185_v3  ;;  %v3968_v3 = vsel %vm3919_vm2, %v3765_v18, %v3944_v8 }
 0x2ef   :  { %12311 = vmatpush2.bf16.msra.mxu0 %v23156_v7  ;;  %v3803_v28 = vpop.f32.mrf.mxu1  ;;  %v23222_v7 = vld [vmem:[#allocation8 + $0x2680] ss:$56 sps:$4 sm:$0xff]  }
 0x2f0   :  { %12312 = vmatprep.subr.bf16.mxu0 %v23164_v51  ;;  %v685_v51 = vrot.slane %v26561_v60, %v26477_v0 }
 0x2f1   :  { %12354 = vmatpush2.bf16.msra.mxu1 %v23183_v61  ;;  %v3805_v42 = vpop.f32.mrf.mxu1  ;;  %v23207_v61 = vld [vmem:[#allocation8 + $0x318] ss:$56 sps:$4 sm:$0xff]  }
 0x2f2   :  { %12355 = vmatprep.subr.bf16.mxu1 %v23191_v48 }
 0x2f3   :  { %12313 = vmatpush2.bf16.msra.mxu0 %v23162_v37  ;;  %v3807_v22 = vpop.f32.mrf.mxu1  ;;  %v23233_v37 = vld [vmem:[#allocation8 + $0xa1c] ss:$56 sps:$4 sm:$0xff]  }
 0x2f4   :  { %12314 = vmatprep.subr.bf16.mxu0 %v23170_v40  ;;  %v23215_v40 = vld [vmem:[#allocation8 + $0x2ac] ss:$56 sps:$4 sm:$0xff]   ;;  %v3808_v60 = vadd.f32 %v3807_v22, %v681_v24  ;;  %v23231_v22 = vld [vmem:[#allocation8 + $0xa18] ss:$56 sps:$4 sm:$0xff]  }
 0x2f5   :  { %12356 = vmatpush2.bf16.msra.mxu1 %v23189_v59  ;;  %v3809_v48 = vpop.f32.mrf.mxu1  ;;  %v3956_v59 = vsel %vm3907_vm3, %v3761_v30, %v3932_v62 }
 0x2f6   :  { %12357 = vmatprep.subr.bf16.mxu1 %v23197_v4  ;;  %v3804_v4 = vadd.f32 %v3803_v28, %v681_v24  ;;  %v23227_v28 = vld [vmem:[#allocation8 + $0x1cc] ss:$56 sps:$4 sm:$0xff]  }
 0x2f7   :  { %12315 = vmatpush2.bf16.msra.mxu0 %v23168_v17  ;;  %v26596_v17 = vpack.c.bf16 %v3968_v3, %v3956_v59  ;;  %v23245_v59 = vld [vmem:[#allocation8 + $0x93c] ss:$56 sps:$4 sm:$0xff]  }
 0x2f8   :  { %12316 = vmatprep.subr.bf16.mxu0 %v23176_v26  ;;  %v3806_v26 = vadd.f32 %v3805_v42, %v685_v51  ;;  %v23225_v42 = vld [vmem:[#allocation8 + $0x1c8] ss:$56 sps:$4 sm:$0xff]  }
 0x2f9   :  { %12358 = vmatpush2.bf16.msra.mxu1 %v23195_v29 }
 0x2fa   :  { %12359 = vmatprep.subr.bf16.mxu1 %v23203_v43  ;;  %v23213_v43 = vld [vmem:[#allocation8 + $0x2a8] ss:$56 sps:$4 sm:$0xff]  }
 0x2fb   :  { %12317 = vmatpush2.bf16.msra.mxu0 %v23174_v32 }
 0x2fc   :  { %12318 = vmatprep.subr.bf16.mxu0 %v23182_v10  ;;  %v23221_v10 = vld [vmem:[#allocation8 + $0x23c] ss:$56 sps:$4 sm:$0xff]  }
 0x2fd   :  { %12360 = vmatpush2.bf16.msra.mxu1 %v23201_v41 }
 0x2fe   :  { %12361 = vmatprep.subr.bf16.mxu1 %v23206_v55  ;;  %v3810_v55 = vadd.f32 %v3809_v48, %v685_v51  ;;  %v23242_v48 = vld [vmem:[#allocation8 + $0x7c] ss:$56 sps:$4 sm:$0xff]  }
 0x2ff   :  { %12319 = vmatpush2.bf16.msra.mxu0 %v23180_v33 }
 0x300   :  { %12320 = vmatprep.subr.bf16.mxu0 %v23188_v58 }
 0x301   :  { %12362 = vmatpush2.bf16.msra.mxu1 %v23204_v57 }
 0x302   :  { %12363 = vmatprep.subr.bf16.mxu1 %v23212_v49  ;;  %v23219_v49 = vld [vmem:[#allocation8 + $0x238] ss:$56 sps:$4 sm:$0xff]  }
 0x303   :  { %12321 = vmatpush2.bf16.msra.mxu0 %v23186_v31 }
 0x304   :  { %12322 = vmatprep.subr.bf16.mxu0 %v23194_v34 }
 0x305   :  { %12364 = vmatpush2.bf16.msra.mxu1 %v23210_v54 }
 0x306   :  { %12365 = vmatprep.subr.bf16.mxu1 %v23218_v14 }
 0x307   :  { %12323 = vmatpush2.bf16.msra.mxu0 %v23192_v38 }
 0x308   :  { %12324 = vmatprep.subr.bf16.mxu0 %v23200_v46 }
 0x309   :  { %12366 = vmatpush2.bf16.msra.mxu1 %v23216_v53  ;;  %v23230_v53 = vld [vmem:[#allocation8 + $0x15c] ss:$56 sps:$4 sm:$0xff]  }
 0x30a   :  { %12367 = vmatprep.subr.bf16.mxu1 %v23224_v9 }
 0x30b   :  { %12325 = vmatpush2.bf16.msra.mxu0 %v23198_v27  ;;  %v23228_v27 = vld [vmem:[#allocation8 + $0x158] ss:$56 sps:$4 sm:$0xff]  }
 0x30c   :  { %12380 = vmatprep.subr.bf16.mxu0 %v23209_v11  ;;  %v23236_v11 = vld [vmem:[#allocation8 + $0xec] ss:$56 sps:$4 sm:$0xff]  }
 0x30d   :  { %12368 = vmatpush2.bf16.msra.mxu1 %v23222_v7  ;;  %v23239_v7 = vld [vmem:[#allocation8 + $0x9ac] ss:$56 sps:$4 sm:$0xff]  }
 0x30e   :  { %v3846_v29 = vpop.f32.mrf.mxu0  ;;  %12327 = vmatmul.mubr.bf16.vlgmr.msra.gmra.mxu0 %v26596_v17  ;;  %12423 = vmatprep.subr.bf16.mxu1 %v23233_v37  ;;  %v23237_v37 = vld [vmem:[#allocation8 + $0x9a8] ss:$56 sps:$4 sm:$0xff]  }
 0x30f   :  { %v3889_v32 = vpop.f32.mrf.mxu1  ;;  %12381 = vmatpush1.bf16.msra.mxu0 %v23207_v61  ;;  %12412 = vmatprep.mubr.bf16.mxu0 %v26505_v2  ;;  %v3847_v41 = vadd.f32 %v3846_v29, %v3804_v4  ;;  %v23243_v4 = vld [vmem:[#allocation8 + $0x938] ss:$56 sps:$4 sm:$0xff]   ;;  %v23246_v29 = vld [vmem:[#allocation8 + $0x8] ss:$56 sps:$4 sm:$0xff]  }
 0x310   :  { %v3848_v44 = vpop.f32.mrf.mxu0  ;;  %12382 = vmatprep.subr.bf16.mxu0 %v23215_v40  ;;  %v23240_v40 = vld [vmem:[#allocation8 + $0x78] ss:$56 sps:$4 sm:$0xff]  }
 0x311   :  { %v3891_v33 = vpop.f32.mrf.mxu1  ;;  %v3849_v56 = vadd.f32 %v3848_v44, %v3806_v26  ;;  %v3890_v50 = vadd.f32 %v3889_v32, %v3847_v41  ;;  %v23248_v26 = vld [vmem:[#allocation8 + $0xc] ss:$56 sps:$4 sm:$0xff]   ;;  %v23257_v41 = vld [vmem:[#allocation8 + $0x85c] ss:$56 sps:$4 sm:$0xff]   ;;  %v23255_v44 = vld [vmem:[#allocation8 + $0x858] ss:$56 sps:$4 sm:$0xff]  }
 0x312   :  { %v3850_v58 = vpop.f32.mrf.mxu0  ;;  %v23251_v32 = vld [vmem:[#allocation8 + $0x8cc] ss:$56 sps:$4 sm:$0xff]  }
 0x313   :  { %v3893_v57 = vpop.f32.mrf.mxu1  ;;  %v3851_v47 = vadd.f32 %v3850_v58, %v3808_v60  ;;  %v3892_v31 = vadd.f32 %v3891_v33, %v3849_v56  ;;  %12383 = vmatpush1.bf16.msra.mxu0 %v23213_v43  ;;  %v3934_v30 = vmul.f32 %v26388_v21, %v3890_v50  ;;  %vm3909_vm6 = vcmp.gt.f32.partialorder %v3890_v50, 0.0  ;;  %v23249_v60 = vld [vmem:[#allocation8 + $0x8c8] ss:$56 sps:$4 sm:$0xff]   ;;  %v23254_v43 = vld [vmem:[#allocation8 + $0x69c] ss:$56 sps:$4 sm:$0xff]  }
 0x314   :  { %v3852_v34 = vpop.f32.mrf.mxu0  ;;  %12384 = vmatprep.subr.bf16.mxu0 %v23221_v10  ;;  %v23252_v10 = vld [vmem:[#allocation8 + $0x698] ss:$56 sps:$4 sm:$0xff]   ;;  %v23260_v33 = vld [vmem:[#allocation8 + $0x62c] ss:$56 sps:$4 sm:$0xff]   ;;  %v23261_v58 = vld [vmem:[#allocation8 + $0x7e8] ss:$56 sps:$4 sm:$0xff]  }
 0x315   :  { %v3895_v54 = vpop.f32.mrf.mxu1  ;;  %v3853_v63 = vadd.f32 %v3852_v34, %v3810_v55  ;;  %v3894_v18 = vadd.f32 %v3893_v57, %v3851_v47  ;;  %v3935_v38 = vmul.f32 %v26388_v21, %v3892_v31  ;;  %vm3910_vm4 = vcmp.gt.f32.partialorder %v3892_v31, 0.0  ;;  %v23258_v55 = vld [vmem:[#allocation8 + $0x628] ss:$56 sps:$4 sm:$0xff]   ;;  %v23263_v56 = vld [vmem:[#allocation8 + $0x7ec] ss:$56 sps:$4 sm:$0xff]  }
 0x316   :  { %v3958_v3 = vsel %vm3909_vm6, %v3890_v50, %v3934_v30  ;;  %v23266_v57 = vld [vmem:[#allocation8 + $0x5bc] ss:$56 sps:$4 sm:$0xff]   ;;  %v23264_v47 = vld [vmem:[#allocation8 + $0x5b8] ss:$56 sps:$4 sm:$0xff]   ;;  %v23270_v50 = vld [vmem:[#allocation8 + $0x548] ss:$56 sps:$4 sm:$0xff]  }
 0x317   :  { %v3896_v14 = vadd.f32 %v3895_v54, %v3853_v63  ;;  %12385 = vmatpush1.bf16.msra.mxu0 %v23219_v49  ;;  %vm3921_vm5 = vcmp.gt.f32.partialorder %v3894_v18, 0.0  ;;  %v3946_v46 = vmul.f32 %v26388_v21, %v3894_v18  ;;  %v3959_v62 = vsel %vm3910_vm4, %v3892_v31, %v3935_v38  ;;  %v23269_v31 = vld [vmem:[#allocation8 + $0x77c] ss:$56 sps:$4 sm:$0xff]   ;;  %v23267_v49 = vld [vmem:[#allocation8 + $0x778] ss:$56 sps:$4 sm:$0xff]  }
 0x318   :  { %12386 = vmatprep.subr.bf16.mxu0 %v23227_v28  ;;  %v23272_v28 = vld [vmem:[#allocation8 + $0x54c] ss:$56 sps:$4 sm:$0xff]   ;;  %v23273_v54 = vld [vmem:[#allocation8 + $0x708] ss:$56 sps:$4 sm:$0xff]   ;;  %v23278_v63 = vld [vmem:[#allocation8 + $0x4dc] ss:$56 sps:$4 sm:$0xff]  }
 0x319   :  { %vm3922_vm7 = vcmp.gt.f32.partialorder %v3896_v14, 0.0  ;;  %v3947_v8 = vmul.f32 %v26388_v21, %v3896_v14  ;;  %v3970_v9 = vsel %vm3921_vm5, %v3894_v18, %v3946_v46  ;;  %v23234_v21 = vld [vmem:[#allocation8 + $0xe8] ss:$56 sps:$4 sm:$0xff]   ;;  %v23275_v34 = vld [vmem:[#allocation8 + $0x70c] ss:$56 sps:$4 sm:$0xff]  }
 0x31a   :  { %v26606_v61 = vpack.c.bf16 %v3970_v9, %v3958_v3  ;;  %v23276_v18 = vld [vmem:[#allocation8 + $0x4d8] ss:$56 sps:$4 sm:$0xff]   ;;  %v23281_v38 = vld [vmem:[#allocation8 + $0xd9c] ss:$56 sps:$4 sm:$0xff]   ;;  %v23282_v30 = vld [vmem:[#allocation8 + $0x468] ss:$56 sps:$4 sm:$0xff]  }
 0x31b   :  { %v3971_v24 = vsel %vm3922_vm7, %v3896_v14, %v3947_v8  ;;  %12387 = vmatpush1.bf16.msra.mxu0 %v23225_v42  ;;  %v23279_v14 = vld [vmem:[#allocation8 + $0xd98] ss:$56 sps:$4 sm:$0xff]   ;;  %v23284_v42 = vld [vmem:[#allocation8 + $0x46c] ss:$56 sps:$4 sm:$0xff]   ;;  %v23290_v8 = vld [vmem:[#allocation8 + $0x3fc] ss:$56 sps:$4 sm:$0xff]  }
 0x31c   :  { %v26604_v51 = vpack.c.bf16 %v3971_v24, %v3959_v62  ;;  %12388 = vmatprep.subr.bf16.mxu0 %v23230_v53  ;;  %v23287_v46 = vld [vmem:[#allocation8 + $0xd2c] ss:$56 sps:$4 sm:$0xff]   ;;  %v23285_v53 = vld [vmem:[#allocation8 + $0xd28] ss:$56 sps:$4 sm:$0xff]   ;;  %v23293_v9 = vld [vmem:[#allocation8 + $0xcbc] ss:$56 sps:$4 sm:$0xff]  }
 0x31d   :  { %v23296_v62 = vld [vmem:[#allocation8 + $0x38c] ss:$56 sps:$4 sm:$0xff]   ;;  %v23294_v24 = vld [vmem:[#allocation8 + $0x388] ss:$56 sps:$4 sm:$0xff]  }
 0x31e   :  { %12369 = vmatprep.mubr.bf16.mxu1 %v26604_v51  ;;  %v5328_v3 = vld [vmem:[#allocation9] sm:$0xff] }
 0x31f   :  { %12370 = vmatmul.mubr.bf16.vlgmr.msra.gmra.mxu1 %v26606_v61  ;;  %12389 = vmatpush1.bf16.msra.mxu0 %v23228_v27  ;;  %v23288_v27 = vld [vmem:[#allocation8 + $0x3f8] ss:$56 sps:$4 sm:$0xff]  }
 0x320   :  { %12424 = vmatpush1.bf16.msra.mxu1 %v23231_v22  ;;  %12455 = vmatprep.mubr.bf16.mxu1 %v26507_v5  ;;  %v23291_v22 = vld [vmem:[#allocation8 + $0xcb8] ss:$56 sps:$4 sm:$0xff]  }
 0x321   :  { %12390 = vmatprep.subr.bf16.mxu0 %v23236_v11  ;;  %12425 = vmatprep.subr.bf16.mxu1 %v23239_v7  ;;  %v23299_v11 = vld [vmem:[#allocation8 + $0xc4c] ss:$56 sps:$4 sm:$0xff]   ;;  %v23297_v7 = vld [vmem:[#allocation8 + $0xc48] ss:$56 sps:$4 sm:$0xff]  }
 0x323   :  { %12391 = vmatpush1.bf16.msra.mxu0 %v23234_v21  ;;  %v23302_v21 = vld [vmem:[#allocation8 + $0xbdc] ss:$56 sps:$4 sm:$0xff]  }
 0x324   :  { %12426 = vmatpush1.bf16.msra.mxu1 %v23237_v37  ;;  %12392 = vmatprep.subr.bf16.mxu0 %v23242_v48  ;;  %v23305_v37 = vld [vmem:[#allocation8 + $0x111c] ss:$56 sps:$4 sm:$0xff]   ;;  %v23303_v48 = vld [vmem:[#allocation8 + $0x1118] ss:$56 sps:$4 sm:$0xff]  }
 0x325   :  { %12427 = vmatprep.subr.bf16.mxu1 %v23245_v59  ;;  %v23311_v59 = vld [vmem:[#allocation8 + $0x10ac] ss:$56 sps:$4 sm:$0xff]  }
 0x327   :  { %12393 = vmatpush1.bf16.msra.mxu0 %v23240_v40  ;;  %v23300_v40 = vld [vmem:[#allocation8 + $0xbd8] ss:$56 sps:$4 sm:$0xff]  }
 0x328   :  { %12428 = vmatpush1.bf16.msra.mxu1 %v23243_v4  ;;  %12394 = vmatprep.subr.bf16.mxu0 %v23248_v26  ;;  %v5335_v4 = vrot.slane %v5328_v3, %v26360_v19  ;;  %v23308_v26 = vld [vmem:[#allocation8 + $0xb6c] ss:$56 sps:$4 sm:$0xff]   ;;  %v23345_v3 = vld [vmem:[#allocation8 + $0x16c8] ss:$56 sps:$4 sm:$0xff]  }
 0x329   :  { %12429 = vmatprep.subr.bf16.mxu1 %v23251_v32  ;;  %v23306_v32 = vld [vmem:[#allocation8 + $0xb68] ss:$56 sps:$4 sm:$0xff]  }
 0x32b   :  { %12395 = vmatpush1.bf16.msra.mxu0 %v23246_v29 }
 0x32c   :  { %12430 = vmatpush1.bf16.msra.mxu1 %v23249_v60  ;;  %12396 = vmatprep.subr.bf16.mxu0 %v23254_v43  ;;  %v23309_v60 = vld [vmem:[#allocation8 + $0x10a8] ss:$56 sps:$4 sm:$0xff]  }
 0x32d   :  { %12431 = vmatprep.subr.bf16.mxu1 %v23257_v41  ;;  %v23314_v41 = vld [vmem:[#allocation8 + $0xafc] ss:$56 sps:$4 sm:$0xff]  }
 0x32f   :  { %12397 = vmatpush2.bf16.msra.mxu0 %v23252_v10 }
 0x330   :  { %12432 = vmatpush1.bf16.msra.mxu1 %v23255_v44  ;;  %12398 = vmatprep.subr.bf16.mxu0 %v23260_v33  ;;  %v23317_v44 = vld [vmem:[#allocation8 + $0x103c] ss:$56 sps:$4 sm:$0xff]  }
 0x331   :  { %12433 = vmatprep.subr.bf16.mxu1 %v23263_v56 }
 0x333   :  { %12399 = vmatpush2.bf16.msra.mxu0 %v23258_v55 }
 0x334   :  { %12434 = vmatpush1.bf16.msra.mxu1 %v23261_v58  ;;  %12400 = vmatprep.subr.bf16.mxu0 %v23266_v57  ;;  %v23312_v57 = vld [vmem:[#allocation8 + $0xaf8] ss:$56 sps:$4 sm:$0xff]  }
 0x335   :  { %12435 = vmatprep.subr.bf16.mxu1 %v23269_v31  ;;  %v23315_v31 = vld [vmem:[#allocation8 + $0x1038] ss:$56 sps:$4 sm:$0xff]  }
 0x337   :  { %12401 = vmatpush2.bf16.msra.mxu0 %v23264_v47 }
 0x338   :  { %12436 = vmatpush1.bf16.msra.mxu1 %v23267_v49  ;;  %12402 = vmatprep.subr.bf16.mxu0 %v23272_v28  ;;  %v23323_v49 = vld [vmem:[#allocation8 + $0xfcc] ss:$56 sps:$4 sm:$0xff]  }
 0x339   :  { %12437 = vmatprep.subr.bf16.mxu1 %v23275_v34  ;;  %v23320_v34 = vld [vmem:[#allocation8 + $0xa8c] ss:$56 sps:$4 sm:$0xff]  }
 0x33b   :  { %12403 = vmatpush2.bf16.msra.mxu0 %v23270_v50 }
 0x33c   :  { %12438 = vmatpush1.bf16.msra.mxu1 %v23273_v54  ;;  %12404 = vmatprep.subr.bf16.mxu0 %v23278_v63  ;;  %v23321_v54 = vld [vmem:[#allocation8 + $0xfc8] ss:$56 sps:$4 sm:$0xff]  }
 0x33d   :  { %12439 = vmatprep.subr.bf16.mxu1 %v23281_v38  ;;  %v23318_v63 = vld [vmem:[#allocation8 + $0xa88] ss:$56 sps:$4 sm:$0xff]   ;;  %v23324_v38 = vld [vmem:[#allocation8 + $0xf58] ss:$56 sps:$4 sm:$0xff]  }
 0x33f   :  { %12405 = vmatpush2.bf16.msra.mxu0 %v23276_v18  ;;  %v23326_v18 = vld [vmem:[#allocation8 + $0xf5c] ss:$56 sps:$4 sm:$0xff]  }
 0x340   :  { %12440 = vmatpush2.bf16.msra.mxu1 %v23279_v14  ;;  %12406 = vmatprep.subr.bf16.mxu0 %v23284_v42  ;;  %v23329_v14 = vld [vmem:[#allocation8 + $0x181c] ss:$56 sps:$4 sm:$0xff]   ;;  %v23327_v42 = vld [vmem:[#allocation8 + $0x1818] ss:$56 sps:$4 sm:$0xff]  }
 0x341   :  { %12441 = vmatprep.subr.bf16.mxu1 %v23287_v46  ;;  %v23335_v46 = vld [vmem:[#allocation8 + $0x17ac] ss:$56 sps:$4 sm:$0xff]  }
 0x343   :  { %12407 = vmatpush2.bf16.msra.mxu0 %v23282_v30  ;;  %v23332_v30 = vld [vmem:[#allocation8 + $0xeec] ss:$56 sps:$4 sm:$0xff]  }
 0x344   :  { %12442 = vmatpush2.bf16.msra.mxu1 %v23285_v53  ;;  %12408 = vmatprep.subr.bf16.mxu0 %v23290_v8  ;;  %v23330_v53 = vld [vmem:[#allocation8 + $0xee8] ss:$56 sps:$4 sm:$0xff]  }
 0x345   :  { %12443 = vmatprep.subr.bf16.mxu1 %v23293_v9  ;;  %v23333_v8 = vld [vmem:[#allocation8 + $0x17a8] ss:$56 sps:$4 sm:$0xff]   ;;  %v23341_v9 = vld [vmem:[#allocation8 + $0x173c] ss:$56 sps:$4 sm:$0xff]  }
 0x347   :  { %12409 = vmatpush2.bf16.msra.mxu0 %v23288_v27  ;;  %v23338_v27 = vld [vmem:[#allocation8 + $0xe7c] ss:$56 sps:$4 sm:$0xff]  }
 0x348   :  { %12444 = vmatpush2.bf16.msra.mxu1 %v23291_v22  ;;  %12410 = vmatprep.subr.bf16.mxu0 %v23296_v62  ;;  %v23336_v22 = vld [vmem:[#allocation8 + $0xe78] ss:$56 sps:$4 sm:$0xff]  }
 0x349   :  { %12445 = vmatprep.subr.bf16.mxu1 %v23299_v11  ;;  %v23339_v62 = vld [vmem:[#allocation8 + $0x1738] ss:$56 sps:$4 sm:$0xff]   ;;  %v23347_v11 = vld [vmem:[#allocation8 + $0x16cc] ss:$56 sps:$4 sm:$0xff]  }
 0x34b   :  { %12411 = vmatpush2.bf16.msra.mxu0 %v23294_v24  ;;  %v23344_v24 = vld [vmem:[#allocation8 + $0xe0c] ss:$56 sps:$4 sm:$0xff]  }
 0x34c   :  { %12446 = vmatpush2.bf16.msra.mxu1 %v23297_v7  ;;  %12466 = vmatprep.subr.bf16.mxu0 %v23305_v37  ;;  %v23342_v7 = vld [vmem:[#allocation8 + $0xe08] ss:$56 sps:$4 sm:$0xff]   ;;  %v23353_v37 = vld [vmem:[#allocation8 + $0x165c] ss:$56 sps:$4 sm:$0xff]  }
 0x34d   :  { %12447 = vmatprep.subr.bf16.mxu1 %v23302_v21  ;;  %v23350_v21 = vld [vmem:[#allocation8 + $0x149c] ss:$56 sps:$4 sm:$0xff]  }
 0x34e   :  { %v12156_v29 = vpop.f32.mrf.mxu0  ;;  %12413 = vmatmul.mubr.bf16.vlgmr.msra.gmra.mxu0 %v26396_v36 }
 0x34f   :  { %v12157_v43 = vadd.f32 %v12156_v29, %v5335_v4  ;;  %v12199_v10 = vpop.f32.mrf.mxu1  ;;  %12467 = vmatpush1.bf16.msra.mxu0 %v23303_v48  ;;  %12498 = vmatprep.mubr.bf16.mxu0 %v26551_v35  ;;  %v23348_v48 = vld [vmem:[#allocation8 + $0x1498] ss:$56 sps:$4 sm:$0xff]   ;;  %v23357_v29 = vld [vmem:[#allocation8 + $0x15e8] ss:$56 sps:$4 sm:$0xff]  }
 0x350   :  { %12448 = vmatpush2.bf16.msra.mxu1 %v23300_v40  ;;  %v26614_v33 = vpop.f32.mrf.mxu0  ;;  %12468 = vmatprep.subr.bf16.mxu0 %v23311_v59  ;;  %v23351_v40 = vld [vmem:[#allocation8 + $0x1658] ss:$56 sps:$4 sm:$0xff]   ;;  %v23356_v59 = vld [vmem:[#allocation8 + $0x142c] ss:$56 sps:$4 sm:$0xff]  }
 0x351   :  { %v26616_v55 = vadd.f32 %v12199_v10, %v12157_v43  ;;  %v26618_v56 = vpop.f32.mrf.mxu1  ;;  %12449 = vmatprep.subr.bf16.mxu1 %v23308_v26  ;;  %v23359_v26 = vld [vmem:[#allocation8 + $0x15ec] ss:$56 sps:$4 sm:$0xff]   ;;  %v23365_v43 = vld [vmem:[#allocation8 + $0x157c] ss:$56 sps:$4 sm:$0xff]   ;;  %v23363_v10 = vld [vmem:[#allocation8 + $0x1578] ss:$56 sps:$4 sm:$0xff]  }
 0x352   :  { %v12160_v58 = vpop.f32.mrf.mxu0 }
 0x353   :  { %v12161_v47 = vadd.f32 %v12160_v58, %v5335_v4  ;;  %12469 = vmatpush1.bf16.msra.mxu0 %v23309_v60  ;;  %v12203_v28 = vpop.f32.mrf.mxu1  ;;  %v23354_v4 = vld [vmem:[#allocation8 + $0x1428] ss:$56 sps:$4 sm:$0xff]   ;;  %v23360_v60 = vld [vmem:[#allocation8 + $0x13b8] ss:$56 sps:$4 sm:$0xff]   ;;  %v23371_v58 = vld [vmem:[#allocation8 + $0x150c] ss:$56 sps:$4 sm:$0xff]  }
 0x354   :  { %12450 = vmatpush2.bf16.msra.mxu1 %v23306_v32  ;;  %12470 = vmatprep.subr.bf16.mxu0 %v23317_v44  ;;  %v23362_v32 = vld [vmem:[#allocation8 + $0x13bc] ss:$56 sps:$4 sm:$0xff]   ;;  %v23366_v44 = vld [vmem:[#allocation8 + $0x1348] ss:$56 sps:$4 sm:$0xff]  }
 0x355   :  { %v26620_v50 = vadd.f32 %v12203_v28, %v12161_v47  ;;  %12451 = vmatprep.subr.bf16.mxu1 %v23314_v41  ;;  %v23368_v41 = vld [vmem:[#allocation8 + $0x134c] ss:$56 sps:$4 sm:$0xff]   ;;  %v23374_v47 = vld [vmem:[#allocation8 + $0x12dc] ss:$56 sps:$4 sm:$0xff]   ;;  %v23375_v28 = vld [vmem:[#allocation8 + $0x1b98] ss:$56 sps:$4 sm:$0xff]  }
 0x357   :  { %12471 = vmatpush1.bf16.msra.mxu0 %v23315_v31  ;;  %v23372_v31 = vld [vmem:[#allocation8 + $0x12d8] ss:$56 sps:$4 sm:$0xff]  }
 0x358   :  { %12452 = vmatpush2.bf16.msra.mxu1 %v23312_v57  ;;  %12472 = vmatprep.subr.bf16.mxu0 %v23323_v49  ;;  %v23369_v57 = vld [vmem:[#allocation8 + $0x1508] ss:$56 sps:$4 sm:$0xff]   ;;  %v23377_v49 = vld [vmem:[#allocation8 + $0x1b9c] ss:$56 sps:$4 sm:$0xff]  }
 0x359   :  { %12453 = vmatprep.subr.bf16.mxu1 %v23320_v34  ;;  %v23380_v34 = vld [vmem:[#allocation8 + $0x126c] ss:$56 sps:$4 sm:$0xff]  }
 0x35b   :  { %12473 = vmatpush1.bf16.msra.mxu0 %v23321_v54  ;;  %v23378_v54 = vld [vmem:[#allocation8 + $0x1268] ss:$56 sps:$4 sm:$0xff]  }
 0x35c   :  { %12454 = vmatpush2.bf16.msra.mxu1 %v23318_v63  ;;  %12474 = vmatprep.subr.bf16.mxu0 %v23326_v18  ;;  %v23383_v63 = vld [vmem:[#allocation8 + $0x1b2c] ss:$56 sps:$4 sm:$0xff]   ;;  %v23381_v18 = vld [vmem:[#allocation8 + $0x1b28] ss:$56 sps:$4 sm:$0xff]  }
 0x35d   :  { %12509 = vmatprep.subr.bf16.mxu1 %v23329_v14  ;;  %v23384_v14 = vld [vmem:[#allocation8 + $0x11f8] ss:$56 sps:$4 sm:$0xff]  }
 0x35f   :  { %12456 = vmatmul.mubr.bf16.vlgmr.msra.gmra.mxu1 %v26421_v15  ;;  %12475 = vmatpush1.bf16.msra.mxu0 %v23324_v38  ;;  %v23386_v38 = vld [vmem:[#allocation8 + $0x11fc] ss:$56 sps:$4 sm:$0xff]  }
 0x360   :  { %12510 = vmatpush1.bf16.msra.mxu1 %v23327_v42  ;;  %12541 = vmatprep.mubr.bf16.mxu1 %v26554_v25  ;;  %v23389_v42 = vld [vmem:[#allocation8 + $0x1abc] ss:$56 sps:$4 sm:$0xff]  }
 0x361   :  { %12476 = vmatprep.subr.bf16.mxu0 %v23332_v30  ;;  %12511 = vmatprep.subr.bf16.mxu1 %v23335_v46  ;;  %v23387_v30 = vld [vmem:[#allocation8 + $0x1ab8] ss:$56 sps:$4 sm:$0xff]   ;;  %v23392_v46 = vld [vmem:[#allocation8 + $0x118c] ss:$56 sps:$4 sm:$0xff]  }
 0x363   :  { %12477 = vmatpush1.bf16.msra.mxu0 %v23330_v53  ;;  %v23390_v53 = vld [vmem:[#allocation8 + $0x1188] ss:$56 sps:$4 sm:$0xff]  }
 0x364   :  { %12512 = vmatpush1.bf16.msra.mxu1 %v23333_v8  ;;  %12478 = vmatprep.subr.bf16.mxu0 %v23338_v27  ;;  %v23395_v8 = vld [vmem:[#allocation8 + $0x1a4c] ss:$56 sps:$4 sm:$0xff]   ;;  %v23393_v27 = vld [vmem:[#allocation8 + $0x1a48] ss:$56 sps:$4 sm:$0xff]  }
 0x365   :  { %12513 = vmatprep.subr.bf16.mxu1 %v23341_v9  ;;  %v23398_v9 = vld [vmem:[#allocation8 + $0x19dc] ss:$56 sps:$4 sm:$0xff]  }
 0x367   :  { %12479 = vmatpush1.bf16.msra.mxu0 %v23336_v22  ;;  %v23401_v22 = vld [vmem:[#allocation8 + $0x1f1c] ss:$56 sps:$4 sm:$0xff]  }
 0x368   :  { %12514 = vmatpush1.bf16.msra.mxu1 %v23339_v62  ;;  %12480 = vmatprep.subr.bf16.mxu0 %v23344_v24  ;;  %v23399_v62 = vld [vmem:[#allocation8 + $0x1f18] ss:$56 sps:$4 sm:$0xff]  }
 0x369   :  { %12515 = vmatprep.subr.bf16.mxu1 %v23347_v11  ;;  %v23396_v24 = vld [vmem:[#allocation8 + $0x19d8] ss:$56 sps:$4 sm:$0xff]   ;;  %v23407_v11 = vld [vmem:[#allocation8 + $0x1eac] ss:$56 sps:$4 sm:$0xff]  }
 0x36b   :  { %12481 = vmatpush1.bf16.msra.mxu0 %v23342_v7  ;;  %v23404_v7 = vld [vmem:[#allocation8 + $0x196c] ss:$56 sps:$4 sm:$0xff]  }
 0x36c   :  { %12516 = vmatpush1.bf16.msra.mxu1 %v23345_v3  ;;  %12482 = vmatprep.subr.bf16.mxu0 %v23350_v21  ;;  %v26624_v3 = vpop.f32.mrf.mxu0  ;;  %v26626_v21 = vpop.f32.mrf.mxu1 }
 0x36d   :  { %12517 = vmatprep.subr.bf16.mxu1 %v23353_v37 }
 0x36f   :  { %12483 = vmatpush2.bf16.msra.mxu0 %v23348_v48  ;;  %v23402_v48 = vld [vmem:[#allocation8 + $0x1968] ss:$56 sps:$4 sm:$0xff]  }
 0x370   :  { %12518 = vmatpush1.bf16.msra.mxu1 %v23351_v40  ;;  %12484 = vmatprep.subr.bf16.mxu0 %v23356_v59  ;;  %v23405_v40 = vld [vmem:[#allocation8 + $0x1ea8] ss:$56 sps:$4 sm:$0xff]  }
 0x371   :  { %12519 = vmatprep.subr.bf16.mxu1 %v23359_v26  ;;  %v23410_v26 = vld [vmem:[#allocation8 + $0x18fc] ss:$56 sps:$4 sm:$0xff]  }
 0x373   :  { %12485 = vmatpush2.bf16.msra.mxu0 %v23354_v4 }
 0x374   :  { %12520 = vmatpush1.bf16.msra.mxu1 %v23357_v29  ;;  %12486 = vmatprep.subr.bf16.mxu0 %v23362_v32  ;;  %v23413_v29 = vld [vmem:[#allocation8 + $0x1e3c] ss:$56 sps:$4 sm:$0xff]  }
 0x375   :  { %12521 = vmatprep.subr.bf16.mxu1 %v23365_v43 }
 0x377   :  { %12487 = vmatpush2.bf16.msra.mxu0 %v23360_v60 }
 0x378   :  { %12522 = vmatpush1.bf16.msra.mxu1 %v23363_v10  ;;  %12488 = vmatprep.subr.bf16.mxu0 %v23368_v41  ;;  %v23408_v41 = vld [vmem:[#allocation8 + $0x18f8] ss:$56 sps:$4 sm:$0xff]  }
 0x379   :  { %12523 = vmatprep.subr.bf16.mxu1 %v23371_v58  ;;  %v23419_v58 = vld [vmem:[#allocation8 + $0x1dcc] ss:$56 sps:$4 sm:$0xff]  }
 0x37b   :  { %12489 = vmatpush2.bf16.msra.mxu0 %v23366_v44 }
 0x37c   :  { %12524 = vmatpush1.bf16.msra.mxu1 %v23369_v57  ;;  %12490 = vmatprep.subr.bf16.mxu0 %v23374_v47 }
 0x37d   :  { %12525 = vmatprep.subr.bf16.mxu1 %v23377_v49  ;;  %v23417_v49 = vld [vmem:[#allocation8 + $0x1dc8] ss:$56 sps:$4 sm:$0xff]  }
 0x37f   :  { %12491 = vmatpush2.bf16.msra.mxu0 %v23372_v31  ;;  %v23416_v31 = vld [vmem:[#allocation8 + $0x188c] ss:$56 sps:$4 sm:$0xff]  }
 0x380   :  { %12526 = vmatpush2.bf16.msra.mxu1 %v23375_v28  ;;  %12492 = vmatprep.subr.bf16.mxu0 %v23380_v34  ;;  %v23414_v28 = vld [vmem:[#allocation8 + $0x1888] ss:$56 sps:$4 sm:$0xff]   ;;  %v23422_v34 = vld [vmem:[#allocation8 + $0x1d5c] ss:$56 sps:$4 sm:$0xff]  }
 0x381   :  { %12527 = vmatprep.subr.bf16.mxu1 %v23383_v63  ;;  %v23425_v63 = vld [vmem:[#allocation8 + $0x261c] ss:$56 sps:$4 sm:$0xff]  }
 0x383   :  { %12493 = vmatpush2.bf16.msra.mxu0 %v23378_v54  ;;  %v23420_v54 = vld [vmem:[#allocation8 + $0x1d58] ss:$56 sps:$4 sm:$0xff]  }
 0x384   :  { %12528 = vmatpush2.bf16.msra.mxu1 %v23381_v18  ;;  %12494 = vmatprep.subr.bf16.mxu0 %v23386_v38  ;;  %v23428_v18 = vld [vmem:[#allocation8 + $0x1cec] ss:$56 sps:$4 sm:$0xff]  }
 0x385   :  { %12529 = vmatprep.subr.bf16.mxu1 %v23389_v42  ;;  %v23431_v38 = vld [vmem:[#allocation8 + $0x25ac] ss:$56 sps:$4 sm:$0xff]   ;;  %v23429_v42 = vld [vmem:[#allocation8 + $0x25a8] ss:$56 sps:$4 sm:$0xff]  }
 0x387   :  { %12495 = vmatpush2.bf16.msra.mxu0 %v23384_v14  ;;  %v23426_v14 = vld [vmem:[#allocation8 + $0x1ce8] ss:$56 sps:$4 sm:$0xff]  }
 0x388   :  { %12530 = vmatpush2.bf16.msra.mxu1 %v23387_v30  ;;  %12496 = vmatprep.subr.bf16.mxu0 %v23392_v46  ;;  %v23434_v30 = vld [vmem:[#allocation8 + $0x1c7c] ss:$56 sps:$4 sm:$0xff]  }
 0x389   :  { %12531 = vmatprep.subr.bf16.mxu1 %v23395_v8  ;;  %v23437_v46 = vld [vmem:[#allocation8 + $0x253c] ss:$56 sps:$4 sm:$0xff]   ;;  %v23435_v8 = vld [vmem:[#allocation8 + $0x2538] ss:$56 sps:$4 sm:$0xff]  }
 0x38b   :  { %12497 = vmatpush2.bf16.msra.mxu0 %v23390_v53  ;;  %v23432_v53 = vld [vmem:[#allocation8 + $0x1c78] ss:$56 sps:$4 sm:$0xff]  }
 0x38c   :  { %12532 = vmatpush2.bf16.msra.mxu1 %v23393_v27  ;;  %12552 = vmatprep.subr.bf16.mxu0 %v23401_v22  ;;  %v23440_v27 = vld [vmem:[#allocation8 + $0x1c0c] ss:$56 sps:$4 sm:$0xff]   ;;  %v23438_v22 = vld [vmem:[#allocation8 + $0x1c08] ss:$56 sps:$4 sm:$0xff]  }
 0x38d   :  { %12533 = vmatprep.subr.bf16.mxu1 %v23398_v9  ;;  %v23443_v9 = vld [vmem:[#allocation8 + $0x24cc] ss:$56 sps:$4 sm:$0xff]  }
 0x38e   :  { %v12242_v37 = vpop.f32.mrf.mxu0  ;;  %12499 = vmatmul.mubr.bf16.vlgmr.msra.gmra.mxu0 %v26483_v6 }
 0x38f   :  { %v12243_v59 = vadd.f32 %v12242_v37, %v26616_v55  ;;  %v12285_v4 = vpop.f32.mrf.mxu1  ;;  %12553 = vmatpush1.bf16.msra.mxu0 %v23399_v62  ;;  %12584 = vmatprep.mubr.bf16.mxu0 %v26579_v39  ;;  %v23411_v55 = vld [vmem:[#allocation8 + $0x1e38] ss:$56 sps:$4 sm:$0xff]   ;;  %v23441_v62 = vld [vmem:[#allocation8 + $0x24c8] ss:$56 sps:$4 sm:$0xff]  }
 0x390   :  { %12534 = vmatpush2.bf16.msra.mxu1 %v23396_v24  ;;  %v26631_v32 = vpop.f32.mrf.mxu0  ;;  %12554 = vmatprep.subr.bf16.mxu0 %v23407_v11  ;;  %v23446_v24 = vld [vmem:[#allocation8 + $0x229c] ss:$56 sps:$4 sm:$0xff]   ;;  %v23444_v11 = vld [vmem:[#allocation8 + $0x2298] ss:$56 sps:$4 sm:$0xff]  }
 0x391   :  { %v26633_v60 = vadd.f32 %v12285_v4, %v12243_v59  ;;  %v26635_v43 = vpop.f32.mrf.mxu1  ;;  %12535 = vmatprep.subr.bf16.mxu1 %v23404_v7  ;;  %v23449_v7 = vld [vmem:[#allocation8 + $0x245c] ss:$56 sps:$4 sm:$0xff]   ;;  %v23447_v37 = vld [vmem:[#allocation8 + $0x2458] ss:$56 sps:$4 sm:$0xff]   ;;  %v23455_v59 = vld [vmem:[#allocation8 + $0x23ec] ss:$56 sps:$4 sm:$0xff]  }
 0x392   :  { %v12246_v10 = vpop.f32.mrf.mxu0  ;;  %v23453_v4 = vld [vmem:[#allocation8 + $0x23e8] ss:$56 sps:$4 sm:$0xff]  }
 0x393   :  { %v12247_v44 = vadd.f32 %v12246_v10, %v26620_v50  ;;  %12555 = vmatpush1.bf16.msra.mxu0 %v23405_v40  ;;  %v12289_v57 = vpop.f32.mrf.mxu1  ;;  %v23423_v50 = vld [vmem:[#allocation8 + $0x2618] ss:$56 sps:$4 sm:$0xff]   ;;  %v23450_v40 = vld [vmem:[#allocation8 + $0x2228] ss:$56 sps:$4 sm:$0xff]   ;;  %v23461_v10 = vld [vmem:[#allocation8 + $0x237c] ss:$56 sps:$4 sm:$0xff]  }
 0x394   :  { %12536 = vmatpush2.bf16.msra.mxu1 %v23402_v48  ;;  %12556 = vmatprep.subr.bf16.mxu0 %v23413_v29  ;;  %v23452_v48 = vld [vmem:[#allocation8 + $0x222c] ss:$56 sps:$4 sm:$0xff]   ;;  %v23456_v29 = vld [vmem:[#allocation8 + $0x21b8] ss:$56 sps:$4 sm:$0xff]  }
 0x395   :  { %v26638_v47 = vadd.f32 %v12289_v57, %v12247_v44  ;;  %12537 = vmatprep.subr.bf16.mxu1 %v23410_v26  ;;  %v23458_v26 = vld [vmem:[#allocation8 + $0x21bc] ss:$56 sps:$4 sm:$0xff]   ;;  %v23464_v44 = vld [vmem:[#allocation8 + $0x214c] ss:$56 sps:$4 sm:$0xff]   ;;  %v23465_v57 = vld [vmem:[#allocation8 + $0x2308] ss:$56 sps:$4 sm:$0xff]  }
 0x397   :  { %12557 = vmatpush1.bf16.msra.mxu0 %v23411_v55  ;;  %v23462_v55 = vld [vmem:[#allocation8 + $0x2148] ss:$56 sps:$4 sm:$0xff]  }
 0x398   :  { %12538 = vmatpush2.bf16.msra.mxu1 %v23408_v41  ;;  %12558 = vmatprep.subr.bf16.mxu0 %v23419_v58  ;;  %v23459_v41 = vld [vmem:[#allocation8 + $0x2378] ss:$56 sps:$4 sm:$0xff]   ;;  %v23467_v58 = vld [vmem:[#allocation8 + $0x230c] ss:$56 sps:$4 sm:$0xff]  }
 0x399   :  { %12539 = vmatprep.subr.bf16.mxu1 %v23416_v31  ;;  %v23470_v31 = vld [vmem:[#allocation8 + $0x20dc] ss:$56 sps:$4 sm:$0xff]  }
 0x39b   :  { %12559 = vmatpush1.bf16.msra.mxu0 %v23417_v49  ;;  %v23468_v49 = vld [vmem:[#allocation8 + $0x20d8] ss:$56 sps:$4 sm:$0xff]  }
 0x39c   :  { %12540 = vmatpush2.bf16.msra.mxu1 %v23414_v28  ;;  %12560 = vmatprep.subr.bf16.mxu0 %v23422_v34  ;;  %v23473_v28 = vld [vmem:[#allocation8 + $0x299c] ss:$56 sps:$4 sm:$0xff]   ;;  %v23471_v34 = vld [vmem:[#allocation8 + $0x2998] ss:$56 sps:$4 sm:$0xff]  }
 0x39d   :  { %12595 = vmatprep.subr.bf16.mxu1 %v23425_v63  ;;  %v23474_v63 = vld [vmem:[#allocation8 + $0x2068] ss:$56 sps:$4 sm:$0xff]  }
 0x39f   :  { %12542 = vmatmul.mubr.bf16.vlgmr.msra.gmra.mxu1 %v26536_v12  ;;  %12561 = vmatpush1.bf16.msra.mxu0 %v23420_v54  ;;  %v23476_v54 = vld [vmem:[#allocation8 + $0x206c] ss:$56 sps:$4 sm:$0xff]  }
 0x3a0   :  { %12596 = vmatpush1.bf16.msra.mxu1 %v23423_v50  ;;  %12627 = vmatprep.mubr.bf16.mxu1 %v26604_v51  ;;  %v23479_v50 = vld [vmem:[#allocation8 + $0x292c] ss:$56 sps:$4 sm:$0xff]  }
 0x3a1   :  { %12562 = vmatprep.subr.bf16.mxu0 %v23428_v18  ;;  %12597 = vmatprep.subr.bf16.mxu1 %v23431_v38  ;;  %v23477_v18 = vld [vmem:[#allocation8 + $0x2928] ss:$56 sps:$4 sm:$0xff]   ;;  %v23482_v38 = vld [vmem:[#allocation8 + $0x1ffc] ss:$56 sps:$4 sm:$0xff]  }
 0x3a3   :  { %12563 = vmatpush1.bf16.msra.mxu0 %v23426_v14  ;;  %v23480_v14 = vld [vmem:[#allocation8 + $0x1ff8] ss:$56 sps:$4 sm:$0xff]  }
 0x3a4   :  { %12598 = vmatpush1.bf16.msra.mxu1 %v23429_v42  ;;  %12564 = vmatprep.subr.bf16.mxu0 %v23434_v30  ;;  %v23485_v42 = vld [vmem:[#allocation8 + $0x28bc] ss:$56 sps:$4 sm:$0xff]   ;;  %v23483_v30 = vld [vmem:[#allocation8 + $0x28b8] ss:$56 sps:$4 sm:$0xff]  }
 0x3a5   :  { %12599 = vmatprep.subr.bf16.mxu1 %v23437_v46  ;;  %v23488_v46 = vld [vmem:[#allocation8 + $0x1f8c] ss:$56 sps:$4 sm:$0xff]  }
 0x3a7   :  { %12565 = vmatpush1.bf16.msra.mxu0 %v23432_v53  ;;  %v23486_v53 = vld [vmem:[#allocation8 + $0x1f88] ss:$56 sps:$4 sm:$0xff]  }
 0x3a8   :  { %12600 = vmatpush1.bf16.msra.mxu1 %v23435_v8  ;;  %12566 = vmatprep.subr.bf16.mxu0 %v23440_v27  ;;  %v23491_v8 = vld [vmem:[#allocation8 + $0x284c] ss:$56 sps:$4 sm:$0xff]   ;;  %v23489_v27 = vld [vmem:[#allocation8 + $0x2848] ss:$56 sps:$4 sm:$0xff]  }
 0x3a9   :  { %12601 = vmatprep.subr.bf16.mxu1 %v23443_v9  ;;  %v23494_v9 = vld [vmem:[#allocation8 + $0x27dc] ss:$56 sps:$4 sm:$0xff]  }
 0x3ab   :  { %12567 = vmatpush1.bf16.msra.mxu0 %v23438_v22  ;;  %v23497_v22 = vld [vmem:[#allocation8 + $0x324] ss:$56 sps:$4 sm:$0xff]  }
 0x3ac   :  { %12602 = vmatpush1.bf16.msra.mxu1 %v23441_v62  ;;  %12568 = vmatprep.subr.bf16.mxu0 %v23446_v24  ;;  %v23495_v62 = vld [vmem:[#allocation8 + $0x320] ss:$56 sps:$4 sm:$0xff]  }
 0x3ad   :  { %12603 = vmatprep.subr.bf16.mxu1 %v23449_v7  ;;  %v23492_v24 = vld [vmem:[#allocation8 + $0x27d8] ss:$56 sps:$4 sm:$0xff]   ;;  %v23500_v7 = vld [vmem:[#allocation8 + $0x276c] ss:$56 sps:$4 sm:$0xff]  }
 0x3af   :  { %12569 = vmatpush2.bf16.msra.mxu0 %v23444_v11  ;;  %v23503_v11 = vld [vmem:[#allocation8 + $0x2b4] ss:$56 sps:$4 sm:$0xff]  }
 0x3b0   :  { %12604 = vmatpush1.bf16.msra.mxu1 %v23447_v37  ;;  %12570 = vmatprep.subr.bf16.mxu0 %v23452_v48  ;;  %v26642_v37 = vpop.f32.mrf.mxu0 }
 0x3b1   :  { %12605 = vmatprep.subr.bf16.mxu1 %v23455_v59  ;;  %v23501_v59 = vld [vmem:[#allocation8 + $0x2b0] ss:$56 sps:$4 sm:$0xff]  }
 0x3b3   :  { %12571 = vmatpush2.bf16.msra.mxu0 %v23450_v40  ;;  %v23498_v40 = vld [vmem:[#allocation8 + $0x2768] ss:$56 sps:$4 sm:$0xff]  }
 0x3b4   :  { %12606 = vmatpush1.bf16.msra.mxu1 %v23453_v4  ;;  %12572 = vmatprep.subr.bf16.mxu0 %v23458_v26  ;;  %v23506_v26 = vld [vmem:[#allocation8 + $0x26fc] ss:$56 sps:$4 sm:$0xff]  }
 0x3b5   :  { %12607 = vmatprep.subr.bf16.mxu1 %v23461_v10 }
 0x3b7   :  { %12573 = vmatpush2.bf16.msra.mxu0 %v23456_v29  ;;  %v23509_v29 = vld [vmem:[#allocation8 + $0x244] ss:$56 sps:$4 sm:$0xff]  }
 0x3b8   :  { %12608 = vmatpush1.bf16.msra.mxu1 %v23459_v41  ;;  %12574 = vmatprep.subr.bf16.mxu0 %v23464_v44  ;;  %v23504_v44 = vld [vmem:[#allocation8 + $0x26f8] ss:$56 sps:$4 sm:$0xff]  }
 0x3b9   :  { %12609 = vmatprep.subr.bf16.mxu1 %v23467_v58  ;;  %v23507_v58 = vld [vmem:[#allocation8 + $0x240] ss:$56 sps:$4 sm:$0xff]  }
 0x3bb   :  { %12575 = vmatpush2.bf16.msra.mxu0 %v23462_v55 }
 0x3bc   :  { %12610 = vmatpush1.bf16.msra.mxu1 %v23465_v57  ;;  %12576 = vmatprep.subr.bf16.mxu0 %v23470_v31  ;;  %v23515_v57 = vld [vmem:[#allocation8 + $0x1d4] ss:$56 sps:$4 sm:$0xff]   ;;  %v23510_v31 = vld [vmem:[#allocation8 + $0x2688] ss:$56 sps:$4 sm:$0xff]  }
 0x3bd   :  { %12611 = vmatprep.subr.bf16.mxu1 %v23473_v28  ;;  %v23518_v28 = vld [vmem:[#allocation8 + $0x164] ss:$56 sps:$4 sm:$0xff]  }
 0x3bf   :  { %12577 = vmatpush2.bf16.msra.mxu0 %v23468_v49  ;;  %v23513_v49 = vld [vmem:[#allocation8 + $0x1d0] ss:$56 sps:$4 sm:$0xff]  }
 0x3c0   :  { %12612 = vmatpush2.bf16.msra.mxu1 %v23471_v34  ;;  %12578 = vmatprep.subr.bf16.mxu0 %v23476_v54  ;;  %v23516_v34 = vld [vmem:[#allocation8 + $0x160] ss:$56 sps:$4 sm:$0xff]   ;;  %v23521_v54 = vld [vmem:[#allocation8 + $0xa24] ss:$56 sps:$4 sm:$0xff]  }
 0x3c1   :  { %12613 = vmatprep.subr.bf16.mxu1 %v23479_v50  ;;  %v23527_v50 = vld [vmem:[#allocation8 + $0x9b4] ss:$56 sps:$4 sm:$0xff]  }
 0x3c3   :  { %12579 = vmatpush2.bf16.msra.mxu0 %v23474_v63  ;;  %v23519_v63 = vld [vmem:[#allocation8 + $0xa20] ss:$56 sps:$4 sm:$0xff]  }
 0x3c4   :  { %12614 = vmatpush2.bf16.msra.mxu1 %v23477_v18  ;;  %12580 = vmatprep.subr.bf16.mxu0 %v23482_v38  ;;  %v26650_v18 = vpop.f32.mrf.mxu1  ;;  %v23522_v38 = vld [vmem:[#allocation8 + $0xf0] ss:$56 sps:$4 sm:$0xff]  }
 0x3c5   :  { %12615 = vmatprep.subr.bf16.mxu1 %v23485_v42 }
 0x3c7   :  { %12581 = vmatpush2.bf16.msra.mxu0 %v23480_v14  ;;  %v23525_v14 = vld [vmem:[#allocation8 + $0x9b0] ss:$56 sps:$4 sm:$0xff]  }
 0x3c8   :  { %12616 = vmatpush2.bf16.msra.mxu1 %v23483_v30  ;;  %12582 = vmatprep.subr.bf16.mxu0 %v23488_v46  ;;  %v23530_v30 = vld [vmem:[#allocation8 + $0x84] ss:$56 sps:$4 sm:$0xff]  }
 0x3c9   :  { %12617 = vmatprep.subr.bf16.mxu1 %v23491_v8  ;;  %v23533_v46 = vld [vmem:[#allocation8 + $0x944] ss:$56 sps:$4 sm:$0xff]   ;;  %v26654_v8 = vstv %s21394_s1 }
 0x3cb   :  { %12583 = vmatpush2.bf16.msra.mxu0 %v23486_v53 }
 0x3cc   :  { %12618 = vmatpush2.bf16.msra.mxu1 %v23489_v27  ;;  %12638 = vmatprep.subr.bf16.mxu0 %v23497_v22  ;;  %v23531_v22 = vld [vmem:[#allocation8 + $0x940] ss:$56 sps:$4 sm:$0xff]  }
 0x3cd   :  { %12619 = vmatprep.subr.bf16.mxu1 %v23494_v9  ;;  %v23528_v9 = vld [vmem:[#allocation8 + $0x80] ss:$56 sps:$4 sm:$0xff]  }
 0x3ce   :  { %v12328_v48 = vpop.f32.mrf.mxu0  ;;  %12585 = vmatmul.mubr.bf16.vlgmr.msra.gmra.mxu0 %v26596_v17 }
 0x3cf   :  { %v12329_v4 = vadd.f32 %v12328_v48, %v26633_v60  ;;  %12639 = vmatpush1.bf16.msra.mxu0 %v23495_v62  ;;  %12670 = vmatprep.mubr.bf16.mxu0 %v26505_v2  ;;  %v23512_v60 = vld [vmem:[#allocation8 + $0x268c] ss:$56 sps:$4 sm:$0xff]  }
 0x3d0   :  { %12620 = vmatpush2.bf16.msra.mxu1 %v23492_v24  ;;  %v26647_v10 = vpop.f32.mrf.mxu0  ;;  %12640 = vmatprep.subr.bf16.mxu0 %v23503_v11  ;;  %v23536_v24 = vld [vmem:[#allocation8 + $0x14] ss:$56 sps:$4 sm:$0xff]  }
 0x3d1   :  { %12621 = vmatprep.subr.bf16.mxu1 %v23500_v7  ;;  %v23539_v11 = vld [vmem:[#allocation8 + $0x8d4] ss:$56 sps:$4 sm:$0xff]  }
 0x3d2   :  { %v12332_v41 = vpop.f32.mrf.mxu0 }
 0x3d3   :  { %v12333_v55 = vadd.f32 %v12332_v41, %v26638_v47  ;;  %12641 = vmatpush1.bf16.msra.mxu0 %v23501_v59  ;;  %v23524_v47 = vld [vmem:[#allocation8 + $0xf4] ss:$56 sps:$4 sm:$0xff]   ;;  %v23534_v59 = vld [vmem:[#allocation8 + $0x10] ss:$56 sps:$4 sm:$0xff]   ;;  %v23542_v41 = vld [vmem:[#allocation8 + $0x6a4] ss:$56 sps:$4 sm:$0xff]  }
 0x3d4   :  { %12622 = vmatpush2.bf16.msra.mxu1 %v23498_v40  ;;  %12642 = vmatprep.subr.bf16.mxu0 %v23509_v29  ;;  %v23537_v29 = vld [vmem:[#allocation8 + $0x8d0] ss:$56 sps:$4 sm:$0xff]  }
 0x3d5   :  { %12623 = vmatprep.subr.bf16.mxu1 %v23506_v26 }
 0x3d7   :  { %12643 = vmatpush1.bf16.msra.mxu0 %v23507_v58  ;;  %v23540_v58 = vld [vmem:[#allocation8 + $0x6a0] ss:$56 sps:$4 sm:$0xff]  }
 0x3d8   :  { %12624 = vmatpush2.bf16.msra.mxu1 %v23504_v44  ;;  %12644 = vmatprep.subr.bf16.mxu0 %v23515_v57  ;;  %v23543_v57 = vld [vmem:[#allocation8 + $0x860] ss:$56 sps:$4 sm:$0xff]  }
 0x3d9   :  { %12625 = vmatprep.subr.bf16.mxu1 %v23512_v60  ;;  %v23548_v60 = vld [vmem:[#allocation8 + $0x634] ss:$56 sps:$4 sm:$0xff]  }
 0x3db   :  { %12645 = vmatpush1.bf16.msra.mxu0 %v23513_v49  ;;  %v23551_v49 = vld [vmem:[#allocation8 + $0x7f4] ss:$56 sps:$4 sm:$0xff]  }
 0x3dc   :  { %12626 = vmatpush2.bf16.msra.mxu1 %v23510_v31  ;;  %12646 = vmatprep.subr.bf16.mxu0 %v23518_v28  ;;  %v23546_v31 = vld [vmem:[#allocation8 + $0x630] ss:$56 sps:$4 sm:$0xff]  }
 0x3dd   :  { %12681 = vmatprep.subr.bf16.mxu1 %v23521_v54  ;;  %v23549_v28 = vld [vmem:[#allocation8 + $0x7f0] ss:$56 sps:$4 sm:$0xff]   ;;  %v23552_v54 = vld [vmem:[#allocation8 + $0x5c0] ss:$56 sps:$4 sm:$0xff]  }
 0x3df   :  { %12628 = vmatmul.mubr.bf16.vlgmr.msra.gmra.mxu1 %v26606_v61  ;;  %v12371_v42 = vpop.f32.mrf.mxu1  ;;  %12647 = vmatpush1.bf16.msra.mxu0 %v23516_v34  ;;  %v23554_v34 = vld [vmem:[#allocation8 + $0x5c4] ss:$56 sps:$4 sm:$0xff]  }
 0x3e0   :  { %v12372_v53 = vadd.f32 %v12371_v42, %v12329_v4  ;;  %12682 = vmatpush1.bf16.msra.mxu1 %v23519_v63  ;;  %12713 = vmatprep.mubr.bf16.mxu1 %v26507_v5  ;;  %v23557_v63 = vld [vmem:[#allocation8 + $0x784] ss:$56 sps:$4 sm:$0xff]   ;;  %v23561_v42 = vld [vmem:[#allocation8 + $0x710] ss:$56 sps:$4 sm:$0xff]  }
 0x3e1   :  { %v26656_v27 = vpop.f32.mrf.mxu1  ;;  %12648 = vmatprep.subr.bf16.mxu0 %v23524_v47  ;;  %12683 = vmatprep.subr.bf16.mxu1 %v23527_v50  ;;  %v23555_v47 = vld [vmem:[#allocation8 + $0x780] ss:$56 sps:$4 sm:$0xff]   ;;  %v23560_v50 = vld [vmem:[#allocation8 + $0x554] ss:$56 sps:$4 sm:$0xff]  }
 0x3e2   :  { %v13958_v7 = vmul.f32 %v26654_v8, %v12372_v53  ;;  %vm13929_vm8 = vcmp.gt.f32.partialorder %v12372_v53, 0.0 }
 0x3e3   :  { %v12375_v62 = vpop.f32.mrf.mxu1  ;;  %12649 = vmatpush1.bf16.msra.mxu0 %v23522_v38  ;;  %v23558_v38 = vld [vmem:[#allocation8 + $0x550] ss:$56 sps:$4 sm:$0xff]  }
 0x3e4   :  { %v12376_v48 = vadd.f32 %v12375_v62, %v12333_v55  ;;  %12684 = vmatpush1.bf16.msra.mxu1 %v23525_v14  ;;  %12650 = vmatprep.subr.bf16.mxu0 %v23530_v30  ;;  %v13986_v4 = vsel %vm13929_vm8, %v12372_v53, %v13958_v7  ;;  %v23545_v55 = vld [vmem:[#allocation8 + $0x864] ss:$56 sps:$4 sm:$0xff]   ;;  %v23563_v14 = vld [vmem:[#allocation8 + $0x714] ss:$56 sps:$4 sm:$0xff]   ;;  %v23570_v62 = vld [vmem:[#allocation8 + $0x470] ss:$56 sps:$4 sm:$0xff]  }
 0x3e5   :  { %12685 = vmatprep.subr.bf16.mxu1 %v23533_v46  ;;  %v23566_v30 = vld [vmem:[#allocation8 + $0x4e4] ss:$56 sps:$4 sm:$0xff]   ;;  %v23564_v46 = vld [vmem:[#allocation8 + $0x4e0] ss:$56 sps:$4 sm:$0xff]  }
 0x3e6   :  { %vm13943_vm9 = vcmp.gt.f32.partialorder %v12376_v48, 0.0  ;;  %v13972_v40 = vmul.f32 %v26654_v8, %v12376_v48  ;;  %v23569_v53 = vld [vmem:[#allocation8 + $0xda4] ss:$56 sps:$4 sm:$0xff]  }
 0x3e7   :  { %12651 = vmatpush1.bf16.msra.mxu0 %v23528_v9  ;;  %v23567_v9 = vld [vmem:[#allocation8 + $0xda0] ss:$56 sps:$4 sm:$0xff]   ;;  %v23578_v7 = vld [vmem:[#allocation8 + $0x404] ss:$56 sps:$4 sm:$0xff]  }
 0x3e8   :  { %v14000_v26 = vsel %vm13943_vm9, %v12376_v48, %v13972_v40  ;;  %12686 = vmatpush1.bf16.msra.mxu1 %v23531_v22  ;;  %12652 = vmatprep.subr.bf16.mxu0 %v23536_v24  ;;  %v23572_v22 = vld [vmem:[#allocation8 + $0x474] ss:$56 sps:$4 sm:$0xff]   ;;  %v23576_v48 = vld [vmem:[#allocation8 + $0x400] ss:$56 sps:$4 sm:$0xff]   ;;  %v23581_v40 = vld [vmem:[#allocation8 + $0xcc4] ss:$56 sps:$4 sm:$0xff]  }
 0x3e9   :  { %v26660_v44 = vpack.c.bf16 %v14000_v26, %v13986_v4  ;;  %12687 = vmatprep.subr.bf16.mxu1 %v23539_v11  ;;  %v23575_v24 = vld [vmem:[#allocation8 + $0xd34] ss:$56 sps:$4 sm:$0xff]   ;;  %v23573_v11 = vld [vmem:[#allocation8 + $0xd30] ss:$56 sps:$4 sm:$0xff]  }
 0x3ea   :  { %v23584_v4 = vld [vmem:[#allocation8 + $0x394] ss:$56 sps:$4 sm:$0xff]   ;;  %v23582_v26 = vld [vmem:[#allocation8 + $0x390] ss:$56 sps:$4 sm:$0xff]  }
 0x3eb   :  { %27342 = vst [vmem:[#allocation26_spill] sm:$0xff] %v26660_v44  ;;  %12653 = vmatpush1.bf16.msra.mxu0 %v23534_v59  ;;  %v23579_v59 = vld [vmem:[#allocation8 + $0xcc0] ss:$56 sps:$4 sm:$0xff]   ;;  %v23923_v44 = vld [vmem:[#allocation8 + $0x16dc] ss:$56 sps:$4 sm:$0xff]  }
 0x3ec   :  { %12688 = vmatpush1.bf16.msra.mxu1 %v23537_v29  ;;  %12654 = vmatprep.subr.bf16.mxu0 %v23542_v41  ;;  %v23587_v29 = vld [vmem:[#allocation8 + $0xc54] ss:$56 sps:$4 sm:$0xff]   ;;  %v23585_v41 = vld [vmem:[#allocation8 + $0xc50] ss:$56 sps:$4 sm:$0xff]  }
 0x3ed   :  { %12689 = vmatprep.subr.bf16.mxu1 %v23545_v55  ;;  %v23593_v55 = vld [vmem:[#allocation8 + $0x1124] ss:$56 sps:$4 sm:$0xff]  }
 0x3ef   :  { %12655 = vmatpush2.bf16.msra.mxu0 %v23540_v58  ;;  %v23590_v58 = vld [vmem:[#allocation8 + $0xbe4] ss:$56 sps:$4 sm:$0xff]  }
 0x3f0   :  { %12690 = vmatpush1.bf16.msra.mxu1 %v23543_v57  ;;  %12656 = vmatprep.subr.bf16.mxu0 %v23548_v60  ;;  %v23591_v57 = vld [vmem:[#allocation8 + $0x1120] ss:$56 sps:$4 sm:$0xff]  }
 0x3f1   :  { %12691 = vmatprep.subr.bf16.mxu1 %v23551_v49  ;;  %v23588_v60 = vld [vmem:[#allocation8 + $0xbe0] ss:$56 sps:$4 sm:$0xff]   ;;  %v23596_v49 = vld [vmem:[#allocation8 + $0xb74] ss:$56 sps:$4 sm:$0xff]  }
 0x3f3   :  { %12657 = vmatpush2.bf16.msra.mxu0 %v23546_v31  ;;  %v23599_v31 = vld [vmem:[#allocation8 + $0x10b4] ss:$56 sps:$4 sm:$0xff]  }
 0x3f4   :  { %12692 = vmatpush1.bf16.msra.mxu1 %v23549_v28  ;;  %12658 = vmatprep.subr.bf16.mxu0 %v23554_v34  ;;  %v23594_v28 = vld [vmem:[#allocation8 + $0xb70] ss:$56 sps:$4 sm:$0xff]  }
 0x3f5   :  { %12693 = vmatprep.subr.bf16.mxu1 %v23557_v63  ;;  %v23597_v34 = vld [vmem:[#allocation8 + $0x10b0] ss:$56 sps:$4 sm:$0xff]   ;;  %v23605_v63 = vld [vmem:[#allocation8 + $0x1044] ss:$56 sps:$4 sm:$0xff]  }
 0x3f7   :  { %12659 = vmatpush2.bf16.msra.mxu0 %v23552_v54  ;;  %v23602_v54 = vld [vmem:[#allocation8 + $0xb04] ss:$56 sps:$4 sm:$0xff]  }
 0x3f8   :  { %12694 = vmatpush1.bf16.msra.mxu1 %v23555_v47  ;;  %12660 = vmatprep.subr.bf16.mxu0 %v23560_v50  ;;  %v23600_v47 = vld [vmem:[#allocation8 + $0xb00] ss:$56 sps:$4 sm:$0xff]  }
 0x3f9   :  { %12695 = vmatprep.subr.bf16.mxu1 %v23563_v14  ;;  %v23603_v50 = vld [vmem:[#allocation8 + $0x1040] ss:$56 sps:$4 sm:$0xff]   ;;  %v26664_v14 = vpop.f32.mrf.mxu0 }
 0x3fb   :  { %12661 = vmatpush2.bf16.msra.mxu0 %v23558_v38  ;;  %v23611_v38 = vld [vmem:[#allocation8 + $0xfd4] ss:$56 sps:$4 sm:$0xff]  }
 0x3fc   :  { %12696 = vmatpush1.bf16.msra.mxu1 %v23561_v42  ;;  %12662 = vmatprep.subr.bf16.mxu0 %v23566_v30  ;;  %v23608_v42 = vld [vmem:[#allocation8 + $0xa94] ss:$56 sps:$4 sm:$0xff]   ;;  %v23609_v30 = vld [vmem:[#allocation8 + $0xfd0] ss:$56 sps:$4 sm:$0xff]  }
 0x3fd   :  { %12697 = vmatprep.subr.bf16.mxu1 %v23569_v53  ;;  %v23606_v53 = vld [vmem:[#allocation8 + $0xa90] ss:$56 sps:$4 sm:$0xff]  }
 0x3ff   :  { %12663 = vmatpush2.bf16.msra.mxu0 %v23564_v46 }
 0x400   :  { %12698 = vmatpush2.bf16.msra.mxu1 %v23567_v9  ;;  %12664 = vmatprep.subr.bf16.mxu0 %v23572_v22  ;;  %v23614_v9 = vld [vmem:[#allocation8 + $0xf64] ss:$56 sps:$4 sm:$0xff]   ;;  %v23612_v22 = vld [vmem:[#allocation8 + $0xf60] ss:$56 sps:$4 sm:$0xff]  }
 0x401   :  { %12699 = vmatprep.subr.bf16.mxu1 %v23575_v24  ;;  %v26012_v24 = vld [vmem:[#allocation9] sm:$0xff] }
 0x403   :  { %12665 = vmatpush2.bf16.msra.mxu0 %v23570_v62  ;;  %v23617_v62 = vld [vmem:[#allocation8 + $0x1824] ss:$56 sps:$4 sm:$0xff]  }
 0x404   :  { %12700 = vmatpush2.bf16.msra.mxu1 %v23573_v11  ;;  %12666 = vmatprep.subr.bf16.mxu0 %v23578_v7  ;;  %v5343_v11 = vrot.slane %v26012_v24, %v26407_v52  ;;  %v23615_v7 = vld [vmem:[#allocation8 + $0x1820] ss:$56 sps:$4 sm:$0xff]   ;;  %v23642_v24 = vld [vmem:[#allocation8 + $0x1430] ss:$56 sps:$4 sm:$0xff]  }
 0x405   :  { %12701 = vmatprep.subr.bf16.mxu1 %v23581_v40  ;;  %v23620_v40 = vld [vmem:[#allocation8 + $0xef4] ss:$56 sps:$4 sm:$0xff]  }
 0x407   :  { %12667 = vmatpush2.bf16.msra.mxu0 %v23576_v48 }
 0x408   :  { %12702 = vmatpush2.bf16.msra.mxu1 %v23579_v59  ;;  %12668 = vmatprep.subr.bf16.mxu0 %v23584_v4  ;;  %v23623_v59 = vld [vmem:[#allocation8 + $0x17b4] ss:$56 sps:$4 sm:$0xff]   ;;  %v26669_v4 = vpop.f32.mrf.mxu1 }
 0x409   :  { %12703 = vmatprep.subr.bf16.mxu1 %v23587_v29  ;;  %v23618_v29 = vld [vmem:[#allocation8 + $0xef0] ss:$56 sps:$4 sm:$0xff]  }
 0x40b   :  { %12669 = vmatpush2.bf16.msra.mxu0 %v23582_v26 }
 0x40c   :  { %12704 = vmatpush2.bf16.msra.mxu1 %v23585_v41  ;;  %12724 = vmatprep.subr.bf16.mxu0 %v23593_v55  ;;  %v23621_v41 = vld [vmem:[#allocation8 + $0x17b0] ss:$56 sps:$4 sm:$0xff]  }
 0x40d   :  { %12705 = vmatprep.subr.bf16.mxu1 %v23590_v58 }
 0x40e   :  { %12671 = vmatmul.mubr.bf16.vlgmr.msra.gmra.mxu0 %v26396_v36  ;;  %v12414_v46 = vpop.f32.mrf.mxu0 }
 0x40f   :  { %12725 = vmatpush1.bf16.msra.mxu0 %v23591_v57  ;;  %12756 = vmatprep.mubr.bf16.mxu0 %v26551_v35  ;;  %v12415_v26 = vadd.f32 %v12414_v46, %v5343_v11  ;;  %v23626_v57 = vld [vmem:[#allocation8 + $0xe84] ss:$56 sps:$4 sm:$0xff]  }
 0x410   :  { %12706 = vmatpush2.bf16.msra.mxu1 %v23588_v60  ;;  %12726 = vmatprep.subr.bf16.mxu0 %v23599_v31  ;;  %v26667_v48 = vpop.f32.mrf.mxu0  ;;  %v23629_v60 = vld [vmem:[#allocation8 + $0x1744] ss:$56 sps:$4 sm:$0xff]  }
 0x411   :  { %12707 = vmatprep.subr.bf16.mxu1 %v23596_v49  ;;  %v23638_v46 = vld [vmem:[#allocation8 + $0x14a4] ss:$56 sps:$4 sm:$0xff]  }
 0x412   :  { %v12418_v58 = vpop.f32.mrf.mxu0 }
 0x413   :  { %12727 = vmatpush1.bf16.msra.mxu0 %v23597_v34  ;;  %v23624_v34 = vld [vmem:[#allocation8 + $0xe80] ss:$56 sps:$4 sm:$0xff]  }
 0x414   :  { %12708 = vmatpush2.bf16.msra.mxu1 %v23594_v28  ;;  %12728 = vmatprep.subr.bf16.mxu0 %v23605_v63  ;;  %v12419_v28 = vadd.f32 %v12418_v58, %v5343_v11  ;;  %v23647_v11 = vld [vmem:[#allocation8 + $0x15f4] ss:$56 sps:$4 sm:$0xff]   ;;  %v23654_v58 = vld [vmem:[#allocation8 + $0x1350] ss:$56 sps:$4 sm:$0xff]  }
 0x415   :  { %12709 = vmatprep.subr.bf16.mxu1 %v23602_v54  ;;  %v23627_v54 = vld [vmem:[#allocation8 + $0x1740] ss:$56 sps:$4 sm:$0xff]  }
 0x417   :  { %12729 = vmatpush1.bf16.msra.mxu0 %v23603_v50  ;;  %v23635_v50 = vld [vmem:[#allocation8 + $0x16d4] ss:$56 sps:$4 sm:$0xff]  }
 0x418   :  { %12710 = vmatpush2.bf16.msra.mxu1 %v23600_v47  ;;  %12730 = vmatprep.subr.bf16.mxu0 %v23611_v38  ;;  %v23632_v47 = vld [vmem:[#allocation8 + $0xe14] ss:$56 sps:$4 sm:$0xff]  }
 0x419   :  { %12711 = vmatprep.subr.bf16.mxu1 %v23608_v42  ;;  %v23630_v42 = vld [vmem:[#allocation8 + $0xe10] ss:$56 sps:$4 sm:$0xff]  }
 0x41b   :  { %12731 = vmatpush1.bf16.msra.mxu0 %v23609_v30  ;;  %v23633_v30 = vld [vmem:[#allocation8 + $0x16d0] ss:$56 sps:$4 sm:$0xff]  }
 0x41c   :  { %12712 = vmatpush2.bf16.msra.mxu1 %v23606_v53  ;;  %12732 = vmatprep.subr.bf16.mxu0 %v23614_v9  ;;  %v23641_v53 = vld [vmem:[#allocation8 + $0x1664] ss:$56 sps:$4 sm:$0xff]   ;;  %v23636_v9 = vld [vmem:[#allocation8 + $0x14a0] ss:$56 sps:$4 sm:$0xff]  }
 0x41d   :  { %12767 = vmatprep.subr.bf16.mxu1 %v23617_v62  ;;  %v23644_v62 = vld [vmem:[#allocation8 + $0x1434] ss:$56 sps:$4 sm:$0xff]  }
 0x41f   :  { %v12457_v55 = vpop.f32.mrf.mxu1  ;;  %12714 = vmatmul.mubr.bf16.vlgmr.msra.gmra.mxu1 %v26421_v15  ;;  %12733 = vmatpush1.bf16.msra.mxu0 %v23612_v22  ;;  %v23639_v22 = vld [vmem:[#allocation8 + $0x1660] ss:$56 sps:$4 sm:$0xff]  }
 0x420   :  { %v26672_v31 = vadd.f32 %v12457_v55, %v12415_v26  ;;  %12768 = vmatpush1.bf16.msra.mxu1 %v23615_v7  ;;  %12799 = vmatprep.mubr.bf16.mxu1 %v26554_v25  ;;  %v23645_v7 = vld [vmem:[#allocation8 + $0x15f0] ss:$56 sps:$4 sm:$0xff]   ;;  %v23653_v26 = vld [vmem:[#allocation8 + $0x1584] ss:$56 sps:$4 sm:$0xff]   ;;  %v23659_v55 = vld [vmem:[#allocation8 + $0x1514] ss:$56 sps:$4 sm:$0xff]  }
 0x421   :  { %v26675_v49 = vpop.f32.mrf.mxu1  ;;  %12734 = vmatprep.subr.bf16.mxu0 %v23620_v40  ;;  %12769 = vmatprep.subr.bf16.mxu1 %v23623_v59  ;;  %v23650_v40 = vld [vmem:[#allocation8 + $0x13c4] ss:$56 sps:$4 sm:$0xff]   ;;  %v23648_v59 = vld [vmem:[#allocation8 + $0x13c0] ss:$56 sps:$4 sm:$0xff]  }
 0x423   :  { %v12461_v63 = vpop.f32.mrf.mxu1  ;;  %12735 = vmatpush1.bf16.msra.mxu0 %v23618_v29  ;;  %v23651_v29 = vld [vmem:[#allocation8 + $0x1580] ss:$56 sps:$4 sm:$0xff]  }
 0x424   :  { %v26677_v38 = vadd.f32 %v12461_v63, %v12419_v28  ;;  %12770 = vmatpush1.bf16.msra.mxu1 %v23621_v41  ;;  %12736 = vmatprep.subr.bf16.mxu0 %v23626_v57  ;;  %v23656_v41 = vld [vmem:[#allocation8 + $0x1354] ss:$56 sps:$4 sm:$0xff]   ;;  %v23657_v57 = vld [vmem:[#allocation8 + $0x1510] ss:$56 sps:$4 sm:$0xff]   ;;  %v23660_v28 = vld [vmem:[#allocation8 + $0x12e0] ss:$56 sps:$4 sm:$0xff]  }
 0x425   :  { %12771 = vmatprep.subr.bf16.mxu1 %v23629_v60  ;;  %v23662_v60 = vld [vmem:[#allocation8 + $0x12e4] ss:$56 sps:$4 sm:$0xff]   ;;  %v23668_v63 = vld [vmem:[#allocation8 + $0x1274] ss:$56 sps:$4 sm:$0xff]  }
 0x427   :  { %12737 = vmatpush1.bf16.msra.mxu0 %v23624_v34  ;;  %v23665_v34 = vld [vmem:[#allocation8 + $0x1ba4] ss:$56 sps:$4 sm:$0xff]  }
 0x428   :  { %12772 = vmatpush1.bf16.msra.mxu1 %v23627_v54  ;;  %12738 = vmatprep.subr.bf16.mxu0 %v23632_v47  ;;  %v23663_v54 = vld [vmem:[#allocation8 + $0x1ba0] ss:$56 sps:$4 sm:$0xff]   ;;  %v23666_v47 = vld [vmem:[#allocation8 + $0x1270] ss:$56 sps:$4 sm:$0xff]  }
 0x429   :  { %12773 = vmatprep.subr.bf16.mxu1 %v23635_v50  ;;  %v23671_v50 = vld [vmem:[#allocation8 + $0x1b34] ss:$56 sps:$4 sm:$0xff]  }
 0x42b   :  { %12739 = vmatpush1.bf16.msra.mxu0 %v23630_v42  ;;  %v23669_v42 = vld [vmem:[#allocation8 + $0x1b30] ss:$56 sps:$4 sm:$0xff]  }
 0x42c   :  { %12774 = vmatpush1.bf16.msra.mxu1 %v23633_v30  ;;  %12740 = vmatprep.subr.bf16.mxu0 %v23638_v46  ;;  %v23674_v30 = vld [vmem:[#allocation8 + $0x1204] ss:$56 sps:$4 sm:$0xff]   ;;  %v23672_v46 = vld [vmem:[#allocation8 + $0x1200] ss:$56 sps:$4 sm:$0xff]  }
 0x42d   :  { %12775 = vmatprep.subr.bf16.mxu1 %v23641_v53  ;;  %v23677_v53 = vld [vmem:[#allocation8 + $0x1ac4] ss:$56 sps:$4 sm:$0xff]  }
 0x42f   :  { %12741 = vmatpush2.bf16.msra.mxu0 %v23636_v9  ;;  %v23675_v9 = vld [vmem:[#allocation8 + $0x1ac0] ss:$56 sps:$4 sm:$0xff]  }
 0x430   :  { %12776 = vmatpush1.bf16.msra.mxu1 %v23639_v22  ;;  %12742 = vmatprep.subr.bf16.mxu0 %v23644_v62  ;;  %v23680_v22 = vld [vmem:[#allocation8 + $0x1194] ss:$56 sps:$4 sm:$0xff]   ;;  %v23678_v62 = vld [vmem:[#allocation8 + $0x1190] ss:$56 sps:$4 sm:$0xff]  }
 0x431   :  { %12777 = vmatprep.subr.bf16.mxu1 %v23647_v11  ;;  %v23681_v11 = vld [vmem:[#allocation8 + $0x1a50] ss:$56 sps:$4 sm:$0xff]  }
 0x433   :  { %12743 = vmatpush2.bf16.msra.mxu0 %v23642_v24  ;;  %v23683_v24 = vld [vmem:[#allocation8 + $0x1a54] ss:$56 sps:$4 sm:$0xff]  }
 0x434   :  { %12778 = vmatpush1.bf16.msra.mxu1 %v23645_v7  ;;  %12744 = vmatprep.subr.bf16.mxu0 %v23650_v40  ;;  %v23686_v7 = vld [vmem:[#allocation8 + $0x19e4] ss:$56 sps:$4 sm:$0xff]  }
 0x435   :  { %12779 = vmatprep.subr.bf16.mxu1 %v23653_v26  ;;  %v23689_v40 = vld [vmem:[#allocation8 + $0x1f24] ss:$56 sps:$4 sm:$0xff]   ;;  %v23684_v26 = vld [vmem:[#allocation8 + $0x19e0] ss:$56 sps:$4 sm:$0xff]  }
 0x437   :  { %12745 = vmatpush2.bf16.msra.mxu0 %v23648_v59  ;;  %v23687_v59 = vld [vmem:[#allocation8 + $0x1f20] ss:$56 sps:$4 sm:$0xff]  }
 0x438   :  { %12780 = vmatpush1.bf16.msra.mxu1 %v23651_v29  ;;  %12746 = vmatprep.subr.bf16.mxu0 %v23656_v41  ;;  %v23695_v29 = vld [vmem:[#allocation8 + $0x1eb4] ss:$56 sps:$4 sm:$0xff]  }
 0x439   :  { %12781 = vmatprep.subr.bf16.mxu1 %v23659_v55  ;;  %v23692_v41 = vld [vmem:[#allocation8 + $0x1974] ss:$56 sps:$4 sm:$0xff]  }
 0x43b   :  { %12747 = vmatpush2.bf16.msra.mxu0 %v23654_v58  ;;  %v26679_v58 = vpop.f32.mrf.mxu0 }
 0x43c   :  { %12782 = vmatpush1.bf16.msra.mxu1 %v23657_v57  ;;  %12748 = vmatprep.subr.bf16.mxu0 %v23662_v60  ;;  %v23690_v57 = vld [vmem:[#allocation8 + $0x1970] ss:$56 sps:$4 sm:$0xff]  }
 0x43d   :  { %12783 = vmatprep.subr.bf16.mxu1 %v23665_v34  ;;  %v23693_v60 = vld [vmem:[#allocation8 + $0x1eb0] ss:$56 sps:$4 sm:$0xff]   ;;  %v23698_v34 = vld [vmem:[#allocation8 + $0x1904] ss:$56 sps:$4 sm:$0xff]  }
 0x43f   :  { %12749 = vmatpush2.bf16.msra.mxu0 %v23660_v28 }
 0x440   :  { %12784 = vmatpush2.bf16.msra.mxu1 %v23663_v54  ;;  %12750 = vmatprep.subr.bf16.mxu0 %v23668_v63  ;;  %v23701_v54 = vld [vmem:[#allocation8 + $0x1e44] ss:$56 sps:$4 sm:$0xff]  }
 0x441   :  { %12785 = vmatprep.subr.bf16.mxu1 %v23671_v50  ;;  %v23696_v50 = vld [vmem:[#allocation8 + $0x1900] ss:$56 sps:$4 sm:$0xff]  }
 0x443   :  { %12751 = vmatpush2.bf16.msra.mxu0 %v23666_v47 }
 0x444   :  { %12786 = vmatpush2.bf16.msra.mxu1 %v23669_v42  ;;  %12752 = vmatprep.subr.bf16.mxu0 %v23674_v30  ;;  %v23699_v30 = vld [vmem:[#allocation8 + $0x1e40] ss:$56 sps:$4 sm:$0xff]  }
 0x445   :  { %12787 = vmatprep.subr.bf16.mxu1 %v23677_v53  ;;  %v23705_v53 = vld [vmem:[#allocation8 + $0x1dd0] ss:$56 sps:$4 sm:$0xff]  }
 0x447   :  { %12753 = vmatpush2.bf16.msra.mxu0 %v23672_v46  ;;  %v23707_v46 = vld [vmem:[#allocation8 + $0x1dd4] ss:$56 sps:$4 sm:$0xff]  }
 0x448   :  { %12788 = vmatpush2.bf16.msra.mxu1 %v23675_v9  ;;  %12754 = vmatprep.subr.bf16.mxu0 %v23680_v22  ;;  %v23702_v9 = vld [vmem:[#allocation8 + $0x1890] ss:$56 sps:$4 sm:$0xff]   ;;  %v23710_v22 = vld [vmem:[#allocation8 + $0x1d64] ss:$56 sps:$4 sm:$0xff]  }
 0x449   :  { %12789 = vmatprep.subr.bf16.mxu1 %v23683_v24  ;;  %v23713_v24 = vld [vmem:[#allocation8 + $0x2624] ss:$56 sps:$4 sm:$0xff]  }
 0x44b   :  { %12755 = vmatpush2.bf16.msra.mxu0 %v23678_v62  ;;  %v23708_v62 = vld [vmem:[#allocation8 + $0x1d60] ss:$56 sps:$4 sm:$0xff]  }
 0x44c   :  { %12790 = vmatpush2.bf16.msra.mxu1 %v23681_v11  ;;  %12810 = vmatprep.subr.bf16.mxu0 %v23689_v40  ;;  %v23711_v11 = vld [vmem:[#allocation8 + $0x2620] ss:$56 sps:$4 sm:$0xff]   ;;  %v26687_v40 = vpop.f32.mrf.mxu1 }
 0x44d   :  { %12791 = vmatprep.subr.bf16.mxu1 %v23686_v7  ;;  %v23716_v7 = vld [vmem:[#allocation8 + $0x1cf4] ss:$56 sps:$4 sm:$0xff]  }
 0x44e   :  { %v12500_v55 = vpop.f32.mrf.mxu0  ;;  %12757 = vmatmul.mubr.bf16.vlgmr.msra.gmra.mxu0 %v26483_v6 }
 0x44f   :  { %v12501_v28 = vadd.f32 %v12500_v55, %v26672_v31  ;;  %12811 = vmatpush1.bf16.msra.mxu0 %v23687_v59  ;;  %12842 = vmatprep.mubr.bf16.mxu0 %v26579_v39  ;;  %v23704_v31 = vld [vmem:[#allocation8 + $0x1894] ss:$56 sps:$4 sm:$0xff]   ;;  %v23714_v59 = vld [vmem:[#allocation8 + $0x1cf0] ss:$56 sps:$4 sm:$0xff]   ;;  %v23725_v55 = vld [vmem:[#allocation8 + $0x2544] ss:$56 sps:$4 sm:$0xff]  }
 0x450   :  { %12792 = vmatpush2.bf16.msra.mxu1 %v23684_v26  ;;  %v26684_v63 = vpop.f32.mrf.mxu0  ;;  %12812 = vmatprep.subr.bf16.mxu0 %v23695_v29  ;;  %v23717_v26 = vld [vmem:[#allocation8 + $0x25b0] ss:$56 sps:$4 sm:$0xff]  }
 0x451   :  { %12793 = vmatprep.subr.bf16.mxu1 %v23692_v41  ;;  %v23722_v41 = vld [vmem:[#allocation8 + $0x1c84] ss:$56 sps:$4 sm:$0xff]  }
 0x452   :  { %v12504_v47 = vpop.f32.mrf.mxu0 }
 0x453   :  { %v12505_v42 = vadd.f32 %v12504_v47, %v26677_v38  ;;  %12813 = vmatpush1.bf16.msra.mxu0 %v23693_v60  ;;  %v23719_v38 = vld [vmem:[#allocation8 + $0x25b4] ss:$56 sps:$4 sm:$0xff]  }
 0x454   :  { %12794 = vmatpush2.bf16.msra.mxu1 %v23690_v57  ;;  %12814 = vmatprep.subr.bf16.mxu0 %v23701_v54  ;;  %v23723_v54 = vld [vmem:[#allocation8 + $0x2540] ss:$56 sps:$4 sm:$0xff]  }
 0x455   :  { %12795 = vmatprep.subr.bf16.mxu1 %v23698_v34  ;;  %v23720_v34 = vld [vmem:[#allocation8 + $0x1c80] ss:$56 sps:$4 sm:$0xff]  }
 0x457   :  { %12815 = vmatpush1.bf16.msra.mxu0 %v23699_v30  ;;  %v23731_v30 = vld [vmem:[#allocation8 + $0x24d4] ss:$56 sps:$4 sm:$0xff]  }
 0x458   :  { %12796 = vmatpush2.bf16.msra.mxu1 %v23696_v50  ;;  %12816 = vmatprep.subr.bf16.mxu0 %v23707_v46  ;;  %v23728_v50 = vld [vmem:[#allocation8 + $0x1c14] ss:$56 sps:$4 sm:$0xff]  }
 0x459   :  { %12797 = vmatprep.subr.bf16.mxu1 %v23704_v31  ;;  %v23729_v31 = vld [vmem:[#allocation8 + $0x24d0] ss:$56 sps:$4 sm:$0xff]  }
 0x45b   :  { %12817 = vmatpush1.bf16.msra.mxu0 %v23705_v53  ;;  %v23734_v53 = vld [vmem:[#allocation8 + $0x22a4] ss:$56 sps:$4 sm:$0xff]  }
 0x45c   :  { %12798 = vmatpush2.bf16.msra.mxu1 %v23702_v9  ;;  %12818 = vmatprep.subr.bf16.mxu0 %v23710_v22  ;;  %v23732_v9 = vld [vmem:[#allocation8 + $0x22a0] ss:$56 sps:$4 sm:$0xff]   ;;  %v23737_v22 = vld [vmem:[#allocation8 + $0x2464] ss:$56 sps:$4 sm:$0xff]  }
 0x45d   :  { %12853 = vmatprep.subr.bf16.mxu1 %v23713_v24  ;;  %v23740_v24 = vld [vmem:[#allocation8 + $0x2234] ss:$56 sps:$4 sm:$0xff]  }
 0x45f   :  { %v12543_v29 = vpop.f32.mrf.mxu1  ;;  %12800 = vmatmul.mubr.bf16.vlgmr.msra.gmra.mxu1 %v26536_v12  ;;  %12819 = vmatpush1.bf16.msra.mxu0 %v23708_v62  ;;  %v23735_v62 = vld [vmem:[#allocation8 + $0x2460] ss:$56 sps:$4 sm:$0xff]  }
 0x460   :  { %v26690_v57 = vadd.f32 %v12543_v29, %v12501_v28  ;;  %12854 = vmatpush1.bf16.msra.mxu1 %v23711_v11  ;;  %12885 = vmatprep.mubr.bf16.mxu1 %v26604_v51  ;;  %v23726_v28 = vld [vmem:[#allocation8 + $0x1c10] ss:$56 sps:$4 sm:$0xff]   ;;  %v23743_v11 = vld [vmem:[#allocation8 + $0x23f4] ss:$56 sps:$4 sm:$0xff]   ;;  %v23747_v29 = vld [vmem:[#allocation8 + $0x2380] ss:$56 sps:$4 sm:$0xff]  }
 0x461   :  { %v26693_v60 = vpop.f32.mrf.mxu1  ;;  %12820 = vmatprep.subr.bf16.mxu0 %v23716_v7  ;;  %12855 = vmatprep.subr.bf16.mxu1 %v23719_v38  ;;  %v23741_v7 = vld [vmem:[#allocation8 + $0x23f0] ss:$56 sps:$4 sm:$0xff]   ;;  %v23746_v38 = vld [vmem:[#allocation8 + $0x21c4] ss:$56 sps:$4 sm:$0xff]  }
 0x463   :  { %v12547_v47 = vpop.f32.mrf.mxu1  ;;  %12821 = vmatpush1.bf16.msra.mxu0 %v23714_v59  ;;  %v23744_v59 = vld [vmem:[#allocation8 + $0x21c0] ss:$56 sps:$4 sm:$0xff]  }
 0x464   :  { %v26695_v46 = vadd.f32 %v12547_v47, %v12505_v42  ;;  %12856 = vmatpush1.bf16.msra.mxu1 %v23717_v26  ;;  %12822 = vmatprep.subr.bf16.mxu0 %v23722_v41  ;;  %v23738_v42 = vld [vmem:[#allocation8 + $0x2230] ss:$56 sps:$4 sm:$0xff]   ;;  %v23749_v26 = vld [vmem:[#allocation8 + $0x2384] ss:$56 sps:$4 sm:$0xff]   ;;  %v23752_v41 = vld [vmem:[#allocation8 + $0x2154] ss:$56 sps:$4 sm:$0xff]  }
 0x465   :  { %12857 = vmatprep.subr.bf16.mxu1 %v23725_v55  ;;  %v23750_v55 = vld [vmem:[#allocation8 + $0x2150] ss:$56 sps:$4 sm:$0xff]   ;;  %v23758_v47 = vld [vmem:[#allocation8 + $0x20e4] ss:$56 sps:$4 sm:$0xff]  }
 0x467   :  { %12823 = vmatpush1.bf16.msra.mxu0 %v23720_v34  ;;  %v23755_v34 = vld [vmem:[#allocation8 + $0x2314] ss:$56 sps:$4 sm:$0xff]  }
 0x468   :  { %12858 = vmatpush1.bf16.msra.mxu1 %v23723_v54  ;;  %12824 = vmatprep.subr.bf16.mxu0 %v23728_v50  ;;  %v23753_v54 = vld [vmem:[#allocation8 + $0x2310] ss:$56 sps:$4 sm:$0xff]   ;;  %v23756_v50 = vld [vmem:[#allocation8 + $0x20e0] ss:$56 sps:$4 sm:$0xff]  }
 0x469   :  { %12859 = vmatprep.subr.bf16.mxu1 %v23731_v30  ;;  %v23761_v30 = vld [vmem:[#allocation8 + $0x29a4] ss:$56 sps:$4 sm:$0xff]  }
 0x46b   :  { %12825 = vmatpush1.bf16.msra.mxu0 %v23726_v28  ;;  %v23759_v28 = vld [vmem:[#allocation8 + $0x29a0] ss:$56 sps:$4 sm:$0xff]  }
 0x46c   :  { %12860 = vmatpush1.bf16.msra.mxu1 %v23729_v31  ;;  %12826 = vmatprep.subr.bf16.mxu0 %v23734_v53  ;;  %v23764_v31 = vld [vmem:[#allocation8 + $0x2074] ss:$56 sps:$4 sm:$0xff]   ;;  %v23762_v53 = vld [vmem:[#allocation8 + $0x2070] ss:$56 sps:$4 sm:$0xff]  }
 0x46d   :  { %12861 = vmatprep.subr.bf16.mxu1 %v23737_v22  ;;  %v23765_v22 = vld [vmem:[#allocation8 + $0x2930] ss:$56 sps:$4 sm:$0xff]  }
 0x46f   :  { %12827 = vmatpush2.bf16.msra.mxu0 %v23732_v9  ;;  %v23767_v9 = vld [vmem:[#allocation8 + $0x2934] ss:$56 sps:$4 sm:$0xff]  }
 0x470   :  { %12862 = vmatpush1.bf16.msra.mxu1 %v23735_v62  ;;  %12828 = vmatprep.subr.bf16.mxu0 %v23740_v24  ;;  %v23770_v62 = vld [vmem:[#allocation8 + $0x2004] ss:$56 sps:$4 sm:$0xff]   ;;  %v23768_v24 = vld [vmem:[#allocation8 + $0x2000] ss:$56 sps:$4 sm:$0xff]  }
 0x471   :  { %12863 = vmatprep.subr.bf16.mxu1 %v23743_v11  ;;  %v23771_v11 = vld [vmem:[#allocation8 + $0x28c0] ss:$56 sps:$4 sm:$0xff]  }
 0x473   :  { %12829 = vmatpush2.bf16.msra.mxu0 %v23738_v42  ;;  %v23773_v42 = vld [vmem:[#allocation8 + $0x28c4] ss:$56 sps:$4 sm:$0xff]  }
 0x474   :  { %12864 = vmatpush1.bf16.msra.mxu1 %v23741_v7  ;;  %12830 = vmatprep.subr.bf16.mxu0 %v23746_v38  ;;  %v23776_v7 = vld [vmem:[#allocation8 + $0x1f94] ss:$56 sps:$4 sm:$0xff]   ;;  %v23774_v38 = vld [vmem:[#allocation8 + $0x1f90] ss:$56 sps:$4 sm:$0xff]  }
 0x475   :  { %12865 = vmatprep.subr.bf16.mxu1 %v23749_v26  ;;  %v23777_v26 = vld [vmem:[#allocation8 + $0x2850] ss:$56 sps:$4 sm:$0xff]  }
 0x477   :  { %12831 = vmatpush2.bf16.msra.mxu0 %v23744_v59  ;;  %v23779_v59 = vld [vmem:[#allocation8 + $0x2854] ss:$56 sps:$4 sm:$0xff]  }
 0x478   :  { %12866 = vmatpush1.bf16.msra.mxu1 %v23747_v29  ;;  %12832 = vmatprep.subr.bf16.mxu0 %v23752_v41  ;;  %v23782_v29 = vld [vmem:[#allocation8 + $0x27e4] ss:$56 sps:$4 sm:$0xff]  }
 0x479   :  { %12867 = vmatprep.subr.bf16.mxu1 %v23755_v34  ;;  %v23785_v41 = vld [vmem:[#allocation8 + $0x32c] ss:$56 sps:$4 sm:$0xff]   ;;  %v23780_v34 = vld [vmem:[#allocation8 + $0x27e0] ss:$56 sps:$4 sm:$0xff]  }
 0x47b   :  { %12833 = vmatpush2.bf16.msra.mxu0 %v23750_v55  ;;  %v23783_v55 = vld [vmem:[#allocation8 + $0x328] ss:$56 sps:$4 sm:$0xff]  }
 0x47c   :  { %12868 = vmatpush1.bf16.msra.mxu1 %v23753_v54  ;;  %12834 = vmatprep.subr.bf16.mxu0 %v23758_v47  ;;  %v23791_v54 = vld [vmem:[#allocation8 + $0x2bc] ss:$56 sps:$4 sm:$0xff]  }
 0x47d   :  { %12869 = vmatprep.subr.bf16.mxu1 %v23761_v30  ;;  %v23788_v47 = vld [vmem:[#allocation8 + $0x2774] ss:$56 sps:$4 sm:$0xff]  }
 0x47f   :  { %12835 = vmatpush2.bf16.msra.mxu0 %v23756_v50  ;;  %v26697_v50 = vpop.f32.mrf.mxu0 }
 0x480   :  { %12870 = vmatpush2.bf16.msra.mxu1 %v23759_v28  ;;  %12836 = vmatprep.subr.bf16.mxu0 %v23764_v31  ;;  %v23786_v28 = vld [vmem:[#allocation8 + $0x2770] ss:$56 sps:$4 sm:$0xff]  }
 0x481   :  { %12871 = vmatprep.subr.bf16.mxu1 %v23767_v9  ;;  %v23789_v31 = vld [vmem:[#allocation8 + $0x2b8] ss:$56 sps:$4 sm:$0xff]   ;;  %v23794_v9 = vld [vmem:[#allocation8 + $0x2704] ss:$56 sps:$4 sm:$0xff]  }
 0x483   :  { %12837 = vmatpush2.bf16.msra.mxu0 %v23762_v53 }
 0x484   :  { %12872 = vmatpush2.bf16.msra.mxu1 %v23765_v22  ;;  %12838 = vmatprep.subr.bf16.mxu0 %v23770_v62  ;;  %v23797_v22 = vld [vmem:[#allocation8 + $0x24c] ss:$56 sps:$4 sm:$0xff]  }
 0x485   :  { %12873 = vmatprep.subr.bf16.mxu1 %v23773_v42  ;;  %v23792_v42 = vld [vmem:[#allocation8 + $0x2700] ss:$56 sps:$4 sm:$0xff]  }
 0x487   :  { %12839 = vmatpush2.bf16.msra.mxu0 %v23768_v24 }
 0x488   :  { %12874 = vmatpush2.bf16.msra.mxu1 %v23771_v11  ;;  %12840 = vmatprep.subr.bf16.mxu0 %v23776_v7  ;;  %v23795_v7 = vld [vmem:[#allocation8 + $0x248] ss:$56 sps:$4 sm:$0xff]  }
 0x489   :  { %12875 = vmatprep.subr.bf16.mxu1 %v23779_v59  ;;  %v23801_v59 = vld [vmem:[#allocation8 + $0x1d8] ss:$56 sps:$4 sm:$0xff]  }
 0x48b   :  { %12841 = vmatpush2.bf16.msra.mxu0 %v23774_v38  ;;  %v23803_v38 = vld [vmem:[#allocation8 + $0x1dc] ss:$56 sps:$4 sm:$0xff]  }
 0x48c   :  { %12876 = vmatpush2.bf16.msra.mxu1 %v23777_v26  ;;  %12896 = vmatprep.subr.bf16.mxu0 %v23785_v41  ;;  %v23798_v26 = vld [vmem:[#allocation8 + $0x2690] ss:$56 sps:$4 sm:$0xff]  }
 0x48d   :  { %12877 = vmatprep.subr.bf16.mxu1 %v23782_v29  ;;  %v23806_v29 = vld [vmem:[#allocation8 + $0x16c] ss:$56 sps:$4 sm:$0xff]   ;;  %v23804_v41 = vld [vmem:[#allocation8 + $0x168] ss:$56 sps:$4 sm:$0xff]  }
 0x48e   :  { %v12586_v30 = vpop.f32.mrf.mxu0  ;;  %12843 = vmatmul.mubr.bf16.vlgmr.msra.gmra.mxu0 %v26596_v17 }
 0x48f   :  { %v12587_v53 = vadd.f32 %v12586_v30, %v26690_v57  ;;  %12897 = vmatpush1.bf16.msra.mxu0 %v23783_v55  ;;  %12928 = vmatprep.mubr.bf16.mxu0 %v26505_v2  ;;  %v23800_v57 = vld [vmem:[#allocation8 + $0x2694] ss:$56 sps:$4 sm:$0xff]   ;;  %v23810_v30 = vld [vmem:[#allocation8 + $0xf8] ss:$56 sps:$4 sm:$0xff]  }
 0x490   :  { %12878 = vmatpush2.bf16.msra.mxu1 %v23780_v34  ;;  %v26702_v62 = vpop.f32.mrf.mxu0  ;;  %12898 = vmatprep.subr.bf16.mxu0 %v23791_v54  ;;  %v23809_v55 = vld [vmem:[#allocation8 + $0xa2c] ss:$56 sps:$4 sm:$0xff]   ;;  %v23807_v34 = vld [vmem:[#allocation8 + $0xa28] ss:$56 sps:$4 sm:$0xff]   ;;  %v23812_v54 = vld [vmem:[#allocation8 + $0xfc] ss:$56 sps:$4 sm:$0xff]  }
 0x491   :  { %12879 = vmatprep.subr.bf16.mxu1 %v23788_v47  ;;  %v26705_v47 = vpop.f32.mrf.mxu1 }
 0x492   :  { %v12590_v24 = vpop.f32.mrf.mxu0 }
 0x493   :  { %v12591_v11 = vadd.f32 %v12590_v24, %v26695_v46  ;;  %12899 = vmatpush1.bf16.msra.mxu0 %v23789_v31  ;;  %v23815_v46 = vld [vmem:[#allocation8 + $0x9bc] ss:$56 sps:$4 sm:$0xff]  }
 0x494   :  { %12880 = vmatpush2.bf16.msra.mxu1 %v23786_v28  ;;  %12900 = vmatprep.subr.bf16.mxu0 %v23797_v22  ;;  %v23813_v28 = vld [vmem:[#allocation8 + $0x9b8] ss:$56 sps:$4 sm:$0xff]   ;;  %v23821_v22 = vld [vmem:[#allocation8 + $0x94c] ss:$56 sps:$4 sm:$0xff]  }
 0x495   :  { %12881 = vmatprep.subr.bf16.mxu1 %v23794_v9  ;;  %v23818_v9 = vld [vmem:[#allocation8 + $0x8c] ss:$56 sps:$4 sm:$0xff]  }
 0x497   :  { %12901 = vmatpush1.bf16.msra.mxu0 %v23795_v7  ;;  %v23816_v7 = vld [vmem:[#allocation8 + $0x88] ss:$56 sps:$4 sm:$0xff]  }
 0x498   :  { %12882 = vmatpush2.bf16.msra.mxu1 %v23792_v42  ;;  %12902 = vmatprep.subr.bf16.mxu0 %v23803_v38  ;;  %v23819_v38 = vld [vmem:[#allocation8 + $0x948] ss:$56 sps:$4 sm:$0xff]  }
 0x499   :  { %12883 = vmatprep.subr.bf16.mxu1 %v23800_v57 }
 0x49b   :  { %12903 = vmatpush1.bf16.msra.mxu0 %v23801_v59  ;;  %v23824_v59 = vld [vmem:[#allocation8 + $0x1c] ss:$56 sps:$4 sm:$0xff]  }
 0x49c   :  { %12884 = vmatpush2.bf16.msra.mxu1 %v23798_v26  ;;  %12904 = vmatprep.subr.bf16.mxu0 %v23806_v29  ;;  %v23827_v26 = vld [vmem:[#allocation8 + $0x8dc] ss:$56 sps:$4 sm:$0xff]  }
 0x49d   :  { %12939 = vmatprep.subr.bf16.mxu1 %v23809_v55 }
 0x49f   :  { %v12629_v31 = vpop.f32.mrf.mxu1  ;;  %12886 = vmatmul.mubr.bf16.vlgmr.msra.gmra.mxu1 %v26606_v61  ;;  %12905 = vmatpush1.bf16.msra.mxu0 %v23804_v41  ;;  %v23822_v41 = vld [vmem:[#allocation8 + $0x18] ss:$56 sps:$4 sm:$0xff]  }
 0x4a0   :  { %v12630_v24 = vadd.f32 %v12629_v31, %v12587_v53  ;;  %12940 = vmatpush1.bf16.msra.mxu1 %v23807_v34  ;;  %12971 = vmatprep.mubr.bf16.mxu1 %v26507_v5 }
 0x4a1   :  { %v26709_v42 = vpop.f32.mrf.mxu1  ;;  %12906 = vmatprep.subr.bf16.mxu0 %v23812_v54  ;;  %12941 = vmatprep.subr.bf16.mxu1 %v23815_v46  ;;  %v23825_v46 = vld [vmem:[#allocation8 + $0x8d8] ss:$56 sps:$4 sm:$0xff]  }
 0x4a2   :  { %v13960_v29 = vmul.f32 %v26654_v8, %v12630_v24  ;;  %vm13931_vm10 = vcmp.gt.f32.partialorder %v12630_v24, 0.0 }
 0x4a3   :  { %v12633_v57 = vpop.f32.mrf.mxu1  ;;  %12907 = vmatpush1.bf16.msra.mxu0 %v23810_v30  ;;  %v23830_v30 = vld [vmem:[#allocation8 + $0x6ac] ss:$56 sps:$4 sm:$0xff]  }
 0x4a4   :  { %v12634_v55 = vadd.f32 %v12633_v57, %v12591_v11  ;;  %12942 = vmatpush1.bf16.msra.mxu1 %v23813_v28  ;;  %12908 = vmatprep.subr.bf16.mxu0 %v23818_v9  ;;  %v13988_v34 = vsel %vm13931_vm10, %v12630_v24, %v13960_v29  ;;  %v23833_v11 = vld [vmem:[#allocation8 + $0x86c] ss:$56 sps:$4 sm:$0xff]   ;;  %v23831_v28 = vld [vmem:[#allocation8 + $0x868] ss:$56 sps:$4 sm:$0xff]   ;;  %v23836_v9 = vld [vmem:[#allocation8 + $0x63c] ss:$56 sps:$4 sm:$0xff]  }
 0x4a5   :  { %12943 = vmatprep.subr.bf16.mxu1 %v23821_v22  ;;  %v23834_v22 = vld [vmem:[#allocation8 + $0x638] ss:$56 sps:$4 sm:$0xff]   ;;  %v23840_v57 = vld [vmem:[#allocation8 + $0x5c8] ss:$56 sps:$4 sm:$0xff]   ;;  %v23848_v29 = vld [vmem:[#allocation8 + $0x55c] ss:$56 sps:$4 sm:$0xff]  }
 0x4a6   :  { %vm13945_vm11 = vcmp.gt.f32.partialorder %v12634_v55, 0.0  ;;  %v13974_v53 = vmul.f32 %v26654_v8, %v12634_v55  ;;  %v23837_v24 = vld [vmem:[#allocation8 + $0x7f8] ss:$56 sps:$4 sm:$0xff]  }
 0x4a7   :  { %12909 = vmatpush1.bf16.msra.mxu0 %v23816_v7  ;;  %v23839_v7 = vld [vmem:[#allocation8 + $0x7fc] ss:$56 sps:$4 sm:$0xff]  }
 0x4a8   :  { %v14002_v54 = vsel %vm13945_vm11, %v12634_v55, %v13974_v53  ;;  %12944 = vmatpush1.bf16.msra.mxu1 %v23819_v38  ;;  %12910 = vmatprep.subr.bf16.mxu0 %v23824_v59  ;;  %v23842_v38 = vld [vmem:[#allocation8 + $0x5cc] ss:$56 sps:$4 sm:$0xff]   ;;  %v23846_v55 = vld [vmem:[#allocation8 + $0x558] ss:$56 sps:$4 sm:$0xff]   ;;  %v23851_v53 = vld [vmem:[#allocation8 + $0x71c] ss:$56 sps:$4 sm:$0xff]  }
 0x4a9   :  { %v26713_v31 = vpack.c.bf16 %v14002_v54, %v13988_v34  ;;  %12945 = vmatprep.subr.bf16.mxu1 %v23827_v26  ;;  %v23845_v59 = vld [vmem:[#allocation8 + $0x78c] ss:$56 sps:$4 sm:$0xff]   ;;  %v23843_v26 = vld [vmem:[#allocation8 + $0x788] ss:$56 sps:$4 sm:$0xff]  }
 0x4aa   :  { %v23852_v34 = vld [vmem:[#allocation8 + $0x4e8] ss:$56 sps:$4 sm:$0xff]   ;;  %v23857_v54 = vld [vmem:[#allocation8 + $0xdac] ss:$56 sps:$4 sm:$0xff]  }
 0x4ab   :  { %27343 = vst [vmem:[#allocation27_spill] sm:$0xff] %v26713_v31  ;;  %12911 = vmatpush1.bf16.msra.mxu0 %v23822_v41  ;;  %v23849_v41 = vld [vmem:[#allocation8 + $0x718] ss:$56 sps:$4 sm:$0xff]   ;;  %v23920_v31 = vld [vmem:[#allocation8 + $0xe1c] ss:$56 sps:$4 sm:$0xff]  }
 0x4ac   :  { %12946 = vmatpush1.bf16.msra.mxu1 %v23825_v46  ;;  %12912 = vmatprep.subr.bf16.mxu0 %v23830_v30  ;;  %v23855_v46 = vld [vmem:[#allocation8 + $0xda8] ss:$56 sps:$4 sm:$0xff]   ;;  %v23860_v30 = vld [vmem:[#allocation8 + $0x47c] ss:$56 sps:$4 sm:$0xff]  }
 0x4ad   :  { %12947 = vmatprep.subr.bf16.mxu1 %v23833_v11  ;;  %v23858_v11 = vld [vmem:[#allocation8 + $0x478] ss:$56 sps:$4 sm:$0xff]  }
 0x4af   :  { %12913 = vmatpush2.bf16.msra.mxu0 %v23828_v23  ;;  %v23854_v23 = vld [vmem:[#allocation8 + $0x4ec] ss:$56 sps:$4 sm:$0xff]  }
 0x4b0   :  { %12948 = vmatpush1.bf16.msra.mxu1 %v23831_v28  ;;  %12914 = vmatprep.subr.bf16.mxu0 %v23836_v9  ;;  %v23863_v28 = vld [vmem:[#allocation8 + $0xd3c] ss:$56 sps:$4 sm:$0xff]   ;;  %v23861_v9 = vld [vmem:[#allocation8 + $0xd38] ss:$56 sps:$4 sm:$0xff]  }
 0x4b1   :  { %12949 = vmatprep.subr.bf16.mxu1 %v23839_v7  ;;  %v23864_v7 = vld [vmem:[#allocation8 + $0x408] ss:$56 sps:$4 sm:$0xff]  }
 0x4b3   :  { %12915 = vmatpush2.bf16.msra.mxu0 %v23834_v22  ;;  %v23866_v22 = vld [vmem:[#allocation8 + $0x40c] ss:$56 sps:$4 sm:$0xff]  }
 0x4b4   :  { %12950 = vmatpush1.bf16.msra.mxu1 %v23837_v24  ;;  %12916 = vmatprep.subr.bf16.mxu0 %v23842_v38  ;;  %v23869_v24 = vld [vmem:[#allocation8 + $0xccc] ss:$56 sps:$4 sm:$0xff]   ;;  %v23867_v38 = vld [vmem:[#allocation8 + $0xcc8] ss:$56 sps:$4 sm:$0xff]  }
 0x4b5   :  { %12951 = vmatprep.subr.bf16.mxu1 %v23845_v59  ;;  %v23870_v59 = vld [vmem:[#allocation8 + $0x398] ss:$56 sps:$4 sm:$0xff]  }
 0x4b7   :  { %12917 = vmatpush2.bf16.msra.mxu0 %v23840_v57  ;;  %v23872_v57 = vld [vmem:[#allocation8 + $0x39c] ss:$56 sps:$4 sm:$0xff]  }
 0x4b8   :  { %12952 = vmatpush1.bf16.msra.mxu1 %v23843_v26  ;;  %12918 = vmatprep.subr.bf16.mxu0 %v23848_v29  ;;  %v23875_v26 = vld [vmem:[#allocation8 + $0xc5c] ss:$56 sps:$4 sm:$0xff]   ;;  %v23873_v29 = vld [vmem:[#allocation8 + $0xc58] ss:$56 sps:$4 sm:$0xff]  }
 0x4b9   :  { %12953 = vmatprep.subr.bf16.mxu1 %v23851_v53  ;;  %v23881_v53 = vld [vmem:[#allocation8 + $0x112c] ss:$56 sps:$4 sm:$0xff]  }
 0x4bb   :  { %12919 = vmatpush2.bf16.msra.mxu0 %v23846_v55  ;;  %v23878_v55 = vld [vmem:[#allocation8 + $0xbec] ss:$56 sps:$4 sm:$0xff]  }
 0x4bc   :  { %12954 = vmatpush1.bf16.msra.mxu1 %v23849_v41  ;;  %12920 = vmatprep.subr.bf16.mxu0 %v23854_v23  ;;  %v23879_v41 = vld [vmem:[#allocation8 + $0x1128] ss:$56 sps:$4 sm:$0xff]  }
 0x4bd   :  { %12955 = vmatprep.subr.bf16.mxu1 %v23857_v54  ;;  %v23876_v23 = vld [vmem:[#allocation8 + $0xbe8] ss:$56 sps:$4 sm:$0xff]   ;;  %v23884_v54 = vld [vmem:[#allocation8 + $0xb7c] ss:$56 sps:$4 sm:$0xff]  }
 0x4bf   :  { %12921 = vmatpush2.bf16.msra.mxu0 %v23852_v34  ;;  %v23887_v34 = vld [vmem:[#allocation8 + $0x10bc] ss:$56 sps:$4 sm:$0xff]  }
 0x4c0   :  { %12956 = vmatpush2.bf16.msra.mxu1 %v23855_v46  ;;  %12922 = vmatprep.subr.bf16.mxu0 %v23860_v30  ;;  %v23882_v46 = vld [vmem:[#allocation8 + $0xb78] ss:$56 sps:$4 sm:$0xff]  }
 0x4c1   :  { %12957 = vmatprep.subr.bf16.mxu1 %v23863_v28  ;;  %v23885_v30 = vld [vmem:[#allocation8 + $0x10b8] ss:$56 sps:$4 sm:$0xff]   ;;  %v23893_v28 = vld [vmem:[#allocation8 + $0x104c] ss:$56 sps:$4 sm:$0xff]  }
 0x4c3   :  { %12923 = vmatpush2.bf16.msra.mxu0 %v23858_v11  ;;  %v23890_v11 = vld [vmem:[#allocation8 + $0xb0c] ss:$56 sps:$4 sm:$0xff]  }
 0x4c4   :  { %12958 = vmatpush2.bf16.msra.mxu1 %v23861_v9  ;;  %12924 = vmatprep.subr.bf16.mxu0 %v23866_v22  ;;  %v23888_v9 = vld [vmem:[#allocation8 + $0xb08] ss:$56 sps:$4 sm:$0xff]  }
 0x4c5   :  { %12959 = vmatprep.subr.bf16.mxu1 %v23869_v24  ;;  %v23891_v22 = vld [vmem:[#allocation8 + $0x1048] ss:$56 sps:$4 sm:$0xff]   ;;  %v26717_v24 = vpop.f32.mrf.mxu0 }
 0x4c7   :  { %12925 = vmatpush2.bf16.msra.mxu0 %v23864_v7  ;;  %v23899_v7 = vld [vmem:[#allocation8 + $0xfdc] ss:$56 sps:$4 sm:$0xff]  }
 0x4c8   :  { %12960 = vmatpush2.bf16.msra.mxu1 %v23867_v38  ;;  %12926 = vmatprep.subr.bf16.mxu0 %v23872_v57  ;;  %v23896_v38 = vld [vmem:[#allocation8 + $0xa9c] ss:$56 sps:$4 sm:$0xff]   ;;  %v23897_v57 = vld [vmem:[#allocation8 + $0xfd8] ss:$56 sps:$4 sm:$0xff]  }
 0x4c9   :  { %12961 = vmatprep.subr.bf16.mxu1 %v23875_v26  ;;  %v23894_v26 = vld [vmem:[#allocation8 + $0xa98] ss:$56 sps:$4 sm:$0xff]  }
 0x4cb   :  { %12927 = vmatpush2.bf16.msra.mxu0 %v23870_v59 }
 0x4cc   :  { %12962 = vmatpush2.bf16.msra.mxu1 %v23873_v29  ;;  %12982 = vmatprep.subr.bf16.mxu0 %v23881_v53  ;;  %v23902_v29 = vld [vmem:[#allocation8 + $0xf6c] ss:$56 sps:$4 sm:$0xff]  }
 0x4cd   :  { %12963 = vmatprep.subr.bf16.mxu1 %v23878_v55  ;;  %v23900_v55 = vld [vmem:[#allocation8 + $0xf68] ss:$56 sps:$4 sm:$0xff]   ;;  %v23905_v53 = vld [vmem:[#allocation8 + $0x182c] ss:$56 sps:$4 sm:$0xff]  }
 0x4ce   :  { %12929 = vmatmul.mubr.bf16.vlgmr.msra.gmra.mxu0 %v26396_v36  ;;  %v12672_v59 = vpop.f32.mrf.mxu0 }
 0x4cf   :  { %12983 = vmatpush1.bf16.msra.mxu0 %v23879_v41  ;;  %13014 = vmatprep.mubr.bf16.mxu0 %v26551_v35  ;;  %v26013_v41 = vld [vmem:[#allocation9] sm:$0xff] }
 0x4d0   :  { %12964 = vmatpush2.bf16.msra.mxu1 %v23876_v23  ;;  %12984 = vmatprep.subr.bf16.mxu0 %v23887_v34  ;;  %v5351_v23 = vrot.slane %v26013_v41, %v26440_v16  ;;  %v23903_v34 = vld [vmem:[#allocation8 + $0x1828] ss:$56 sps:$4 sm:$0xff]   ;;  %v23914_v41 = vld [vmem:[#allocation8 + $0xe8c] ss:$56 sps:$4 sm:$0xff]  }
 0x4d1   :  { %12965 = vmatprep.subr.bf16.mxu1 %v23884_v54  ;;  %v26720_v54 = vpop.f32.mrf.mxu0 }
 0x4d2   :  { %27344 = vst [vmem:[#allocation28_spill] sm:$0xff] %v26720_v54 }
 0x4d3   :  { %12985 = vmatpush1.bf16.msra.mxu0 %v23885_v30  ;;  %v23911_v30 = vld [vmem:[#allocation8 + $0x17bc] ss:$56 sps:$4 sm:$0xff]  }
 0x4d4   :  { %12966 = vmatpush2.bf16.msra.mxu1 %v23882_v46  ;;  %12986 = vmatprep.subr.bf16.mxu0 %v23893_v28  ;;  %v23908_v46 = vld [vmem:[#allocation8 + $0xefc] ss:$56 sps:$4 sm:$0xff]   ;;  %v12673_v28 = vadd.f32 %v12672_v59, %v5351_v23  ;;  %v23912_v59 = vld [vmem:[#allocation8 + $0xe88] ss:$56 sps:$4 sm:$0xff]  }
 0x4d5   :  { %12967 = vmatprep.subr.bf16.mxu1 %v23890_v11  ;;  %v26722_v11 = vpop.f32.mrf.mxu1 }
 0x4d7   :  { %12987 = vmatpush1.bf16.msra.mxu0 %v23891_v22  ;;  %v23909_v22 = vld [vmem:[#allocation8 + $0x17b8] ss:$56 sps:$4 sm:$0xff]  }
 0x4d8   :  { %12968 = vmatpush2.bf16.msra.mxu1 %v23888_v9  ;;  %12988 = vmatprep.subr.bf16.mxu0 %v23899_v7  ;;  %v23906_v9 = vld [vmem:[#allocation8 + $0xef8] ss:$56 sps:$4 sm:$0xff]   ;;  %v12676_v7 = vpop.f32.mrf.mxu0 }
 0x4d9   :  { %12969 = vmatprep.subr.bf16.mxu1 %v23896_v38 }
 0x4db   :  { %12989 = vmatpush1.bf16.msra.mxu0 %v23897_v57 }
 0x4dc   :  { %12970 = vmatpush2.bf16.msra.mxu1 %v23894_v26  ;;  %12990 = vmatprep.subr.bf16.mxu0 %v23902_v29  ;;  %v12677_v26 = vadd.f32 %v12676_v7, %v5351_v23  ;;  %v23915_v29 = vld [vmem:[#allocation8 + $0x1748] ss:$56 sps:$4 sm:$0xff]   ;;  %v23930_v7 = vld [vmem:[#allocation8 + $0x1438] ss:$56 sps:$4 sm:$0xff]  }
 0x4dd   :  { %13025 = vmatprep.subr.bf16.mxu1 %v23905_v53  ;;  %v23924_v23 = vld [vmem:[#allocation8 + $0x14a8] ss:$56 sps:$4 sm:$0xff]  }
 0x4df   :  { %v12715_v38 = vpop.f32.mrf.mxu1  ;;  %12972 = vmatmul.mubr.bf16.vlgmr.msra.gmra.mxu1 %v26421_v15  ;;  %12991 = vmatpush1.bf16.msra.mxu0 %v23900_v55  ;;  %v23918_v55 = vld [vmem:[#allocation8 + $0xe18] ss:$56 sps:$4 sm:$0xff]  }
 0x4e0   :  { %v26725_v16 = vadd.f32 %v12715_v38, %v12673_v28  ;;  %13026 = vmatpush1.bf16.msra.mxu1 %v23903_v34  ;;  %13057 = vmatprep.mubr.bf16.mxu1 %v26554_v25  ;;  %v23921_v34 = vld [vmem:[#allocation8 + $0x16d8] ss:$56 sps:$4 sm:$0xff]   ;;  %v23926_v28 = vld [vmem:[#allocation8 + $0x14ac] ss:$56 sps:$4 sm:$0xff]   ;;  %v23935_v38 = vld [vmem:[#allocation8 + $0x15fc] ss:$56 sps:$4 sm:$0xff]  }
 0x4e1   :  { %v26728_v57 = vpop.f32.mrf.mxu1  ;;  %12992 = vmatprep.subr.bf16.mxu0 %v23908_v46  ;;  %13027 = vmatprep.subr.bf16.mxu1 %v23911_v30  ;;  %v23929_v46 = vld [vmem:[#allocation8 + $0x166c] ss:$56 sps:$4 sm:$0xff]   ;;  %v23927_v30 = vld [vmem:[#allocation8 + $0x1668] ss:$56 sps:$4 sm:$0xff]  }
 0x4e2   :  { %27345 = vst [vmem:[#allocation29_spill] sm:$0xff] %v26728_v57 }
 0x4e3   :  { %v12719_v53 = vpop.f32.mrf.mxu1  ;;  %12993 = vmatpush1.bf16.msra.mxu0 %v23906_v9  ;;  %v23932_v9 = vld [vmem:[#allocation8 + $0x143c] ss:$56 sps:$4 sm:$0xff]  }
 0x4e4   :  { %v26730_v54 = vadd.f32 %v12719_v53, %v12677_v26  ;;  %13028 = vmatpush1.bf16.msra.mxu1 %v23909_v22  ;;  %12994 = vmatprep.subr.bf16.mxu0 %v23914_v41  ;;  %v23938_v22 = vld [vmem:[#allocation8 + $0x13cc] ss:$56 sps:$4 sm:$0xff]   ;;  %v23936_v41 = vld [vmem:[#allocation8 + $0x13c8] ss:$56 sps:$4 sm:$0xff]   ;;  %v23945_v53 = vld [vmem:[#allocation8 + $0x1518] ss:$56 sps:$4 sm:$0xff]  }
 0x4e5   :  { %13029 = vmatprep.subr.bf16.mxu1 %v23917_v45  ;;  %v23933_v45 = vld [vmem:[#allocation8 + $0x15f8] ss:$56 sps:$4 sm:$0xff]   ;;  %v23941_v26 = vld [vmem:[#allocation8 + $0x158c] ss:$56 sps:$4 sm:$0xff]  }
 0x4e7   :  { %12995 = vmatpush1.bf16.msra.mxu0 %v23912_v59  ;;  %v23942_v59 = vld [vmem:[#allocation8 + $0x1358] ss:$56 sps:$4 sm:$0xff]  }
 0x4e8   :  { %13030 = vmatpush1.bf16.msra.mxu1 %v23915_v29  ;;  %12996 = vmatprep.subr.bf16.mxu0 %v23920_v31  ;;  %v23944_v31 = vld [vmem:[#allocation8 + $0x135c] ss:$56 sps:$4 sm:$0xff]  }
 0x4e9   :  { %13031 = vmatprep.subr.bf16.mxu1 %v23923_v44  ;;  %v23939_v44 = vld [vmem:[#allocation8 + $0x1588] ss:$56 sps:$4 sm:$0xff]   ;;  %v23947_v29 = vld [vmem:[#allocation8 + $0x151c] ss:$56 sps:$4 sm:$0xff]  }
 0x4eb   :  { %12997 = vmatpush1.bf16.msra.mxu0 %v23918_v55  ;;  %v23950_v55 = vld [vmem:[#allocation8 + $0x12ec] ss:$56 sps:$4 sm:$0xff]  }
 0x4ec   :  { %13032 = vmatpush1.bf16.msra.mxu1 %v23921_v34  ;;  %12998 = vmatprep.subr.bf16.mxu0 %v23926_v28  ;;  %v23948_v34 = vld [vmem:[#allocation8 + $0x12e8] ss:$56 sps:$4 sm:$0xff]   ;;  %v23953_v28 = vld [vmem:[#allocation8 + $0x1bac] ss:$56 sps:$4 sm:$0xff]  }
 0x4ed   :  { %13033 = vmatprep.subr.bf16.mxu1 %v23929_v46  ;;  %v23951_v46 = vld [vmem:[#allocation8 + $0x1ba8] ss:$56 sps:$4 sm:$0xff]  }
 0x4ef   :  { %12999 = vmatpush2.bf16.msra.mxu0 %v23924_v23  ;;  %v23956_v23 = vld [vmem:[#allocation8 + $0x127c] ss:$56 sps:$4 sm:$0xff]  }
 0x4f0   :  { %13034 = vmatpush1.bf16.msra.mxu1 %v23927_v30  ;;  %13000 = vmatprep.subr.bf16.mxu0 %v23932_v9  ;;  %v23954_v30 = vld [vmem:[#allocation8 + $0x1278] ss:$56 sps:$4 sm:$0xff]   ;;  %v23959_v9 = vld [vmem:[#allocation8 + $0x1b3c] ss:$56 sps:$4 sm:$0xff]  }
 0x4f1   :  { %13035 = vmatprep.subr.bf16.mxu1 %v23935_v38  ;;  %v23962_v38 = vld [vmem:[#allocation8 + $0x120c] ss:$56 sps:$4 sm:$0xff]  }
 0x4f3   :  { %13001 = vmatpush2.bf16.msra.mxu0 %v23930_v7  ;;  %v23957_v7 = vld [vmem:[#allocation8 + $0x1b38] ss:$56 sps:$4 sm:$0xff]  }
 0x4f4   :  { %13036 = vmatpush1.bf16.msra.mxu1 %v23933_v45  ;;  %13002 = vmatprep.subr.bf16.mxu0 %v23938_v22  ;;  %v23960_v45 = vld [vmem:[#allocation8 + $0x1208] ss:$56 sps:$4 sm:$0xff]   ;;  %v23965_v22 = vld [vmem:[#allocation8 + $0x1acc] ss:$56 sps:$4 sm:$0xff]  }
 0x4f5   :  { %13037 = vmatprep.subr.bf16.mxu1 %v23941_v26  ;;  %v23968_v26 = vld [vmem:[#allocation8 + $0x119c] ss:$56 sps:$4 sm:$0xff]  }
 0x4f7   :  { %13003 = vmatpush2.bf16.msra.mxu0 %v23936_v41  ;;  %v23963_v41 = vld [vmem:[#allocation8 + $0x1ac8] ss:$56 sps:$4 sm:$0xff]  }
 0x4f8   :  { %13038 = vmatpush1.bf16.msra.mxu1 %v23939_v44  ;;  %13004 = vmatprep.subr.bf16.mxu0 %v23944_v31  ;;  %v23966_v44 = vld [vmem:[#allocation8 + $0x1198] ss:$56 sps:$4 sm:$0xff]   ;;  %v23971_v31 = vld [vmem:[#allocation8 + $0x1a5c] ss:$56 sps:$4 sm:$0xff]  }
 0x4f9   :  { %13039 = vmatprep.subr.bf16.mxu1 %v23947_v29  ;;  %v23974_v29 = vld [vmem:[#allocation8 + $0x19ec] ss:$56 sps:$4 sm:$0xff]  }
 0x4fb   :  { %13005 = vmatpush2.bf16.msra.mxu0 %v23942_v59  ;;  %v23969_v59 = vld [vmem:[#allocation8 + $0x1a58] ss:$56 sps:$4 sm:$0xff]  }
 0x4fc   :  { %13040 = vmatpush1.bf16.msra.mxu1 %v23945_v53  ;;  %13006 = vmatprep.subr.bf16.mxu0 %v23950_v55  ;;  %v23977_v53 = vld [vmem:[#allocation8 + $0x1f2c] ss:$56 sps:$4 sm:$0xff]   ;;  %v23975_v55 = vld [vmem:[#allocation8 + $0x1f28] ss:$56 sps:$4 sm:$0xff]  }
 0x4fd   :  { %13041 = vmatprep.subr.bf16.mxu1 %v23953_v28  ;;  %v23983_v28 = vld [vmem:[#allocation8 + $0x1ebc] ss:$56 sps:$4 sm:$0xff]  }
 0x4ff   :  { %13007 = vmatpush2.bf16.msra.mxu0 %v23948_v34  ;;  %v23972_v34 = vld [vmem:[#allocation8 + $0x19e8] ss:$56 sps:$4 sm:$0xff]  }
 0x500   :  { %13042 = vmatpush2.bf16.msra.mxu1 %v23951_v46  ;;  %13008 = vmatprep.subr.bf16.mxu0 %v23956_v23  ;;  %v23980_v46 = vld [vmem:[#allocation8 + $0x197c] ss:$56 sps:$4 sm:$0xff]   ;;  %v26732_v23 = vpop.f32.mrf.mxu0 }
 0x501   :  { %13043 = vmatprep.subr.bf16.mxu1 %v23959_v9  ;;  %v23978_v9 = vld [vmem:[#allocation8 + $0x1978] ss:$56 sps:$4 sm:$0xff]  }
 0x503   :  { %13009 = vmatpush2.bf16.msra.mxu0 %v23954_v30 }
 0x504   :  { %13044 = vmatpush2.bf16.msra.mxu1 %v23957_v7  ;;  %13010 = vmatprep.subr.bf16.mxu0 %v23962_v38  ;;  %v23981_v7 = vld [vmem:[#allocation8 + $0x1eb8] ss:$56 sps:$4 sm:$0xff]  }
 0x505   :  { %13045 = vmatprep.subr.bf16.mxu1 %v23965_v22  ;;  %v23989_v22 = vld [vmem:[#allocation8 + $0x1e4c] ss:$56 sps:$4 sm:$0xff]  }
 0x507   :  { %13011 = vmatpush2.bf16.msra.mxu0 %v23960_v45  ;;  %v23986_v45 = vld [vmem:[#allocation8 + $0x190c] ss:$56 sps:$4 sm:$0xff]  }
 0x508   :  { %13046 = vmatpush2.bf16.msra.mxu1 %v23963_v41  ;;  %13012 = vmatprep.subr.bf16.mxu0 %v23968_v26 }
 0x509   :  { %13047 = vmatprep.subr.bf16.mxu1 %v23971_v31 }
 0x50b   :  { %13013 = vmatpush2.bf16.msra.mxu0 %v23966_v44  ;;  %v23984_v44 = vld [vmem:[#allocation8 + $0x1908] ss:$56 sps:$4 sm:$0xff]  }
 0x50c   :  { %13048 = vmatpush2.bf16.msra.mxu1 %v23969_v59  ;;  %13068 = vmatprep.subr.bf16.mxu0 %v23977_v53  ;;  %v23987_v59 = vld [vmem:[#allocation8 + $0x1e48] ss:$56 sps:$4 sm:$0xff]   ;;  %v23993_v53 = vld [vmem:[#allocation8 + $0x1dd8] ss:$56 sps:$4 sm:$0xff]  }
 0x50d   :  { %13049 = vmatprep.subr.bf16.mxu1 %v23974_v29  ;;  %v23995_v29 = vld [vmem:[#allocation8 + $0x1ddc] ss:$56 sps:$4 sm:$0xff]  }
 0x50e   :  { %v12758_v30 = vpop.f32.mrf.mxu0  ;;  %13015 = vmatmul.mubr.bf16.vlgmr.msra.gmra.mxu0 %v26483_v6 }
 0x50f   :  { %v12759_v38 = vadd.f32 %v12758_v30, %v26725_v16  ;;  %13069 = vmatpush1.bf16.msra.mxu0 %v23975_v55  ;;  %13100 = vmatprep.mubr.bf16.mxu0 %v26579_v39  ;;  %v23992_v16 = vld [vmem:[#allocation8 + $0x189c] ss:$56 sps:$4 sm:$0xff]   ;;  %v23990_v55 = vld [vmem:[#allocation8 + $0x1898] ss:$56 sps:$4 sm:$0xff]   ;;  %v23999_v30 = vld [vmem:[#allocation8 + $0x2628] ss:$56 sps:$4 sm:$0xff]  }
 0x510   :  { %13050 = vmatpush2.bf16.msra.mxu1 %v23972_v34  ;;  %v26737_v41 = vpop.f32.mrf.mxu0  ;;  %13070 = vmatprep.subr.bf16.mxu0 %v23983_v28  ;;  %v23998_v34 = vld [vmem:[#allocation8 + $0x1d6c] ss:$56 sps:$4 sm:$0xff]   ;;  %v23996_v28 = vld [vmem:[#allocation8 + $0x1d68] ss:$56 sps:$4 sm:$0xff]  }
 0x511   :  { %27346 = vst [vmem:[#allocation30_spill] sm:$0xff] %v26737_v41  ;;  %13051 = vmatprep.subr.bf16.mxu1 %v23980_v46  ;;  %v24001_v46 = vld [vmem:[#allocation8 + $0x262c] ss:$56 sps:$4 sm:$0xff]   ;;  %v24004_v41 = vld [vmem:[#allocation8 + $0x1cfc] ss:$56 sps:$4 sm:$0xff]  }
 0x512   :  { %v12762_v26 = vpop.f32.mrf.mxu0 }
 0x513   :  { %v12763_v31 = vadd.f32 %v12762_v26, %v26730_v54  ;;  %13071 = vmatpush1.bf16.msra.mxu0 %v23981_v7  ;;  %v24007_v54 = vld [vmem:[#allocation8 + $0x25bc] ss:$56 sps:$4 sm:$0xff]   ;;  %v26740_v7 = vpop.f32.mrf.mxu1  ;;  %v24010_v26 = vld [vmem:[#allocation8 + $0x1c8c] ss:$56 sps:$4 sm:$0xff]  }
 0x514   :  { %13052 = vmatpush2.bf16.msra.mxu1 %v23978_v9  ;;  %13072 = vmatprep.subr.bf16.mxu0 %v23989_v22  ;;  %27347 = vst [vmem:[#allocation31_spill] sm:$0xff] %v26740_v7  ;;  %v24002_v9 = vld [vmem:[#allocation8 + $0x1cf8] ss:$56 sps:$4 sm:$0xff]  }
 0x515   :  { %13053 = vmatprep.subr.bf16.mxu1 %v23986_v45  ;;  %v24005_v45 = vld [vmem:[#allocation8 + $0x25b8] ss:$56 sps:$4 sm:$0xff]  }
 0x517   :  { %13073 = vmatpush1.bf16.msra.mxu0 %v23987_v59 }
 0x518   :  { %13054 = vmatpush2.bf16.msra.mxu1 %v23984_v44  ;;  %13074 = vmatprep.subr.bf16.mxu0 %v23995_v29  ;;  %v24013_v44 = vld [vmem:[#allocation8 + $0x254c] ss:$56 sps:$4 sm:$0xff]  }
 0x519   :  { %13055 = vmatprep.subr.bf16.mxu1 %v23992_v16  ;;  %v24008_v16 = vld [vmem:[#allocation8 + $0x1c88] ss:$56 sps:$4 sm:$0xff]  }
 0x51b   :  { %13075 = vmatpush1.bf16.msra.mxu0 %v23993_v53  ;;  %v24011_v53 = vld [vmem:[#allocation8 + $0x2548] ss:$56 sps:$4 sm:$0xff]  }
 0x51c   :  { %13056 = vmatpush2.bf16.msra.mxu1 %v23990_v55  ;;  %13076 = vmatprep.subr.bf16.mxu0 %v23998_v34  ;;  %v24016_v34 = vld [vmem:[#allocation8 + $0x1c1c] ss:$56 sps:$4 sm:$0xff]  }
 0x51d   :  { %13111 = vmatprep.subr.bf16.mxu1 %v24001_v46  ;;  %v24019_v46 = vld [vmem:[#allocation8 + $0x24dc] ss:$56 sps:$4 sm:$0xff]  }
 0x51f   :  { %v12801_v22 = vpop.f32.mrf.mxu1  ;;  %13058 = vmatmul.mubr.bf16.vlgmr.msra.gmra.mxu1 %v26536_v12  ;;  %13077 = vmatpush1.bf16.msra.mxu0 %v23996_v28  ;;  %v24017_v28 = vld [vmem:[#allocation8 + $0x24d8] ss:$56 sps:$4 sm:$0xff]  }
 0x520   :  { %v26743_v59 = vadd.f32 %v12801_v22, %v12759_v38  ;;  %13112 = vmatpush1.bf16.msra.mxu1 %v23999_v30  ;;  %13143 = vmatprep.mubr.bf16.mxu1 %v26604_v51  ;;  %v24014_v38 = vld [vmem:[#allocation8 + $0x1c18] ss:$56 sps:$4 sm:$0xff]   ;;  %v24022_v30 = vld [vmem:[#allocation8 + $0x22ac] ss:$56 sps:$4 sm:$0xff]   ;;  %v24028_v22 = vld [vmem:[#allocation8 + $0x223c] ss:$56 sps:$4 sm:$0xff]  }
 0x521   :  { %v26746_v29 = vpop.f32.mrf.mxu1  ;;  %13078 = vmatprep.subr.bf16.mxu0 %v24004_v41  ;;  %13113 = vmatprep.subr.bf16.mxu1 %v24007_v54  ;;  %v24020_v41 = vld [vmem:[#allocation8 + $0x22a8] ss:$56 sps:$4 sm:$0xff]   ;;  %v24025_v54 = vld [vmem:[#allocation8 + $0x246c] ss:$56 sps:$4 sm:$0xff]  }
 0x522   :  { %27348 = vst [vmem:[#allocation32_spill] sm:$0xff] %v26746_v29  ;;  %v24091_v29 = vld [vmem:[#allocation8 + $0x1e4] ss:$56 sps:$4 sm:$0xff]  }
 0x523   :  { %v12805_v55 = vpop.f32.mrf.mxu1  ;;  %13079 = vmatpush1.bf16.msra.mxu0 %v24002_v9  ;;  %v24023_v9 = vld [vmem:[#allocation8 + $0x2468] ss:$56 sps:$4 sm:$0xff]  }
 0x524   :  { %v26748_v57 = vadd.f32 %v12805_v55, %v12763_v31  ;;  %13114 = vmatpush1.bf16.msra.mxu1 %v24005_v45  ;;  %13080 = vmatprep.subr.bf16.mxu0 %v24010_v26  ;;  %v24026_v31 = vld [vmem:[#allocation8 + $0x2238] ss:$56 sps:$4 sm:$0xff]   ;;  %v24031_v55 = vld [vmem:[#allocation8 + $0x23fc] ss:$56 sps:$4 sm:$0xff]   ;;  %v24034_v26 = vld [vmem:[#allocation8 + $0x21cc] ss:$56 sps:$4 sm:$0xff]  }
 0x525   :  { %13115 = vmatprep.subr.bf16.mxu1 %v24013_v44  ;;  %v24029_v45 = vld [vmem:[#allocation8 + $0x23f8] ss:$56 sps:$4 sm:$0xff]   ;;  %v24032_v44 = vld [vmem:[#allocation8 + $0x21c8] ss:$56 sps:$4 sm:$0xff]  }
 0x527   :  { %13081 = vmatpush1.bf16.msra.mxu0 %v24008_v16  ;;  %v24037_v16 = vld [vmem:[#allocation8 + $0x238c] ss:$56 sps:$4 sm:$0xff]  }
 0x528   :  { %13116 = vmatpush1.bf16.msra.mxu1 %v24011_v53  ;;  %13082 = vmatprep.subr.bf16.mxu0 %v24016_v34  ;;  %v24035_v53 = vld [vmem:[#allocation8 + $0x2388] ss:$56 sps:$4 sm:$0xff]   ;;  %v24040_v34 = vld [vmem:[#allocation8 + $0x215c] ss:$56 sps:$4 sm:$0xff]  }
 0x529   :  { %13117 = vmatprep.subr.bf16.mxu1 %v24019_v46  ;;  %v24038_v46 = vld [vmem:[#allocation8 + $0x2158] ss:$56 sps:$4 sm:$0xff]  }
 0x52b   :  { %13083 = vmatpush1.bf16.msra.mxu0 %v24014_v38  ;;  %v24043_v38 = vld [vmem:[#allocation8 + $0x231c] ss:$56 sps:$4 sm:$0xff]  }
 0x52c   :  { %13118 = vmatpush1.bf16.msra.mxu1 %v24017_v28  ;;  %13084 = vmatprep.subr.bf16.mxu0 %v24022_v30  ;;  %v24041_v28 = vld [vmem:[#allocation8 + $0x2318] ss:$56 sps:$4 sm:$0xff]   ;;  %v24046_v30 = vld [vmem:[#allocation8 + $0x20ec] ss:$56 sps:$4 sm:$0xff]  }
 0x52d   :  { %13119 = vmatprep.subr.bf16.mxu1 %v24025_v54  ;;  %v24049_v54 = vld [vmem:[#allocation8 + $0x29ac] ss:$56 sps:$4 sm:$0xff]  }
 0x52f   :  { %13085 = vmatpush2.bf16.msra.mxu0 %v24020_v41  ;;  %v24044_v41 = vld [vmem:[#allocation8 + $0x20e8] ss:$56 sps:$4 sm:$0xff]  }
 0x530   :  { %13120 = vmatpush1.bf16.msra.mxu1 %v24023_v9  ;;  %13086 = vmatprep.subr.bf16.mxu0 %v24028_v22  ;;  %v24047_v9 = vld [vmem:[#allocation8 + $0x29a8] ss:$56 sps:$4 sm:$0xff]   ;;  %v24052_v22 = vld [vmem:[#allocation8 + $0x207c] ss:$56 sps:$4 sm:$0xff]  }
 0x531   :  { %13121 = vmatprep.subr.bf16.mxu1 %v24031_v55  ;;  %v24055_v55 = vld [vmem:[#allocation8 + $0x293c] ss:$56 sps:$4 sm:$0xff]  }
 0x533   :  { %13087 = vmatpush2.bf16.msra.mxu0 %v24026_v31  ;;  %v24050_v31 = vld [vmem:[#allocation8 + $0x2078] ss:$56 sps:$4 sm:$0xff]  }
 0x534   :  { %13122 = vmatpush1.bf16.msra.mxu1 %v24029_v45  ;;  %13088 = vmatprep.subr.bf16.mxu0 %v24034_v26  ;;  %v24053_v45 = vld [vmem:[#allocation8 + $0x2938] ss:$56 sps:$4 sm:$0xff]   ;;  %v24058_v26 = vld [vmem:[#allocation8 + $0x200c] ss:$56 sps:$4 sm:$0xff]  }
 0x535   :  { %13123 = vmatprep.subr.bf16.mxu1 %v24037_v16  ;;  %v24061_v16 = vld [vmem:[#allocation8 + $0x28cc] ss:$56 sps:$4 sm:$0xff]  }
 0x537   :  { %13089 = vmatpush2.bf16.msra.mxu0 %v24032_v44  ;;  %v24056_v44 = vld [vmem:[#allocation8 + $0x2008] ss:$56 sps:$4 sm:$0xff]  }
 0x538   :  { %13124 = vmatpush1.bf16.msra.mxu1 %v24035_v53  ;;  %13090 = vmatprep.subr.bf16.mxu0 %v24040_v34  ;;  %v24059_v53 = vld [vmem:[#allocation8 + $0x28c8] ss:$56 sps:$4 sm:$0xff]   ;;  %v24064_v34 = vld [vmem:[#allocation8 + $0x1f9c] ss:$56 sps:$4 sm:$0xff]  }
 0x539   :  { %13125 = vmatprep.subr.bf16.mxu1 %v24043_v38  ;;  %v24067_v38 = vld [vmem:[#allocation8 + $0x285c] ss:$56 sps:$4 sm:$0xff]  }
 0x53b   :  { %13091 = vmatpush2.bf16.msra.mxu0 %v24038_v46  ;;  %v24062_v46 = vld [vmem:[#allocation8 + $0x1f98] ss:$56 sps:$4 sm:$0xff]  }
 0x53c   :  { %13126 = vmatpush1.bf16.msra.mxu1 %v24041_v28  ;;  %13092 = vmatprep.subr.bf16.mxu0 %v24046_v30  ;;  %v24065_v28 = vld [vmem:[#allocation8 + $0x2858] ss:$56 sps:$4 sm:$0xff]   ;;  %v24070_v30 = vld [vmem:[#allocation8 + $0x27ec] ss:$56 sps:$4 sm:$0xff]  }
 0x53d   :  { %13127 = vmatprep.subr.bf16.mxu1 %v24049_v54  ;;  %v24071_v54 = vld [vmem:[#allocation8 + $0x330] ss:$56 sps:$4 sm:$0xff]  }
 0x53f   :  { %13093 = vmatpush2.bf16.msra.mxu0 %v24044_v41  ;;  %v24073_v41 = vld [vmem:[#allocation8 + $0x334] ss:$56 sps:$4 sm:$0xff]  }
 0x540   :  { %13128 = vmatpush2.bf16.msra.mxu1 %v24047_v9  ;;  %13094 = vmatprep.subr.bf16.mxu0 %v24052_v22  ;;  %v24068_v9 = vld [vmem:[#allocation8 + $0x27e8] ss:$56 sps:$4 sm:$0xff]   ;;  %v24079_v22 = vld [vmem:[#allocation8 + $0x2c4] ss:$56 sps:$4 sm:$0xff]  }
 0x541   :  { %13129 = vmatprep.subr.bf16.mxu1 %v24055_v55  ;;  %v24076_v55 = vld [vmem:[#allocation8 + $0x277c] ss:$56 sps:$4 sm:$0xff]  }
 0x543   :  { %13095 = vmatpush2.bf16.msra.mxu0 %v24050_v31  ;;  %v26750_v31 = vpop.f32.mrf.mxu0 }
 0x544   :  { %13130 = vmatpush2.bf16.msra.mxu1 %v24053_v45  ;;  %13096 = vmatprep.subr.bf16.mxu0 %v24058_v26  ;;  %27349 = vst [vmem:[#allocation33_spill] sm:$0xff] %v26750_v31  ;;  %v24074_v26 = vld [vmem:[#allocation8 + $0x2778] ss:$56 sps:$4 sm:$0xff]   ;;  %v24100_v31 = vld [vmem:[#allocation8 + $0x104] ss:$56 sps:$4 sm:$0xff]  }
 0x545   :  { %13131 = vmatprep.subr.bf16.mxu1 %v24061_v16 }
 0x547   :  { %13097 = vmatpush2.bf16.msra.mxu0 %v24056_v44  ;;  %v24077_v44 = vld [vmem:[#allocation8 + $0x2c0] ss:$56 sps:$4 sm:$0xff]  }
 0x548   :  { %13132 = vmatpush2.bf16.msra.mxu1 %v24059_v53  ;;  %13098 = vmatprep.subr.bf16.mxu0 %v24064_v34  ;;  %v24082_v53 = vld [vmem:[#allocation8 + $0x270c] ss:$56 sps:$4 sm:$0xff]  }
 0x549   :  { %13133 = vmatprep.subr.bf16.mxu1 %v24067_v38  ;;  %v24085_v34 = vld [vmem:[#allocation8 + $0x254] ss:$56 sps:$4 sm:$0xff]  }
 0x54b   :  { %13099 = vmatpush2.bf16.msra.mxu0 %v24062_v46 }
 0x54c   :  { %13134 = vmatpush2.bf16.msra.mxu1 %v24065_v28  ;;  %13154 = vmatprep.subr.bf16.mxu0 %v24073_v41  ;;  %v24080_v28 = vld [vmem:[#allocation8 + $0x2708] ss:$56 sps:$4 sm:$0xff]  }
 0x54d   :  { %13135 = vmatprep.subr.bf16.mxu1 %v24070_v30  ;;  %v24083_v41 = vld [vmem:[#allocation8 + $0x250] ss:$56 sps:$4 sm:$0xff]  }
 0x54e   :  { %v12844_v45 = vpop.f32.mrf.mxu0  ;;  %13101 = vmatmul.mubr.bf16.vlgmr.msra.gmra.mxu0 %v26596_v17 }
 0x54f   :  { %v12845_v16 = vadd.f32 %v12844_v45, %v26743_v59  ;;  %13155 = vmatpush1.bf16.msra.mxu0 %v24071_v54  ;;  %13186 = vmatprep.mubr.bf16.mxu0 %v26505_v2  ;;  %v24088_v59 = vld [vmem:[#allocation8 + $0x269c] ss:$56 sps:$4 sm:$0xff]   ;;  %v24089_v54 = vld [vmem:[#allocation8 + $0x1e0] ss:$56 sps:$4 sm:$0xff]  }
 0x550   :  { %13136 = vmatpush2.bf16.msra.mxu1 %v24068_v9  ;;  %v26755_v46 = vpop.f32.mrf.mxu0  ;;  %13156 = vmatprep.subr.bf16.mxu0 %v24079_v22  ;;  %v24086_v45 = vld [vmem:[#allocation8 + $0x2698] ss:$56 sps:$4 sm:$0xff]   ;;  %v24094_v9 = vld [vmem:[#allocation8 + $0x174] ss:$56 sps:$4 sm:$0xff]  }
 0x551   :  { %27350 = vst [vmem:[#allocation34_spill] sm:$0xff] %v26755_v46  ;;  %13137 = vmatprep.subr.bf16.mxu1 %v24076_v55  ;;  %v24092_v22 = vld [vmem:[#allocation8 + $0x170] ss:$56 sps:$4 sm:$0xff]   ;;  %v24097_v55 = vld [vmem:[#allocation8 + $0xa34] ss:$56 sps:$4 sm:$0xff]  }
 0x552   :  { %v12848_v38 = vpop.f32.mrf.mxu0  ;;  %v24095_v46 = vld [vmem:[#allocation8 + $0xa30] ss:$56 sps:$4 sm:$0xff]  }
 0x553   :  { %v12849_v30 = vadd.f32 %v12848_v38, %v26748_v57  ;;  %13157 = vmatpush1.bf16.msra.mxu0 %v24077_v44  ;;  %v24103_v57 = vld [vmem:[#allocation8 + $0x9c4] ss:$56 sps:$4 sm:$0xff]   ;;  %v26758_v44 = vpop.f32.mrf.mxu1  ;;  %v24109_v38 = vld [vmem:[#allocation8 + $0x954] ss:$56 sps:$4 sm:$0xff]  }
 0x554   :  { %13138 = vmatpush2.bf16.msra.mxu1 %v24074_v26  ;;  %13158 = vmatprep.subr.bf16.mxu0 %v24085_v34  ;;  %27351 = vst [vmem:[#allocation35_spill] sm:$0xff] %v26758_v44  ;;  %v24098_v26 = vld [vmem:[#allocation8 + $0x100] ss:$56 sps:$4 sm:$0xff]  }
 0x555   :  { %13139 = vmatprep.subr.bf16.mxu1 %v24082_v53  ;;  %v24101_v53 = vld [vmem:[#allocation8 + $0x9c0] ss:$56 sps:$4 sm:$0xff]  }
 0x557   :  { %13159 = vmatpush1.bf16.msra.mxu0 %v24083_v41 }
 0x558   :  { %13140 = vmatpush2.bf16.msra.mxu1 %v24080_v28  ;;  %13160 = vmatprep.subr.bf16.mxu0 %v24091_v29  ;;  %v24106_v29 = vld [vmem:[#allocation8 + $0x94] ss:$56 sps:$4 sm:$0xff]  }
 0x559   :  { %13141 = vmatprep.subr.bf16.mxu1 %v24088_v59  ;;  %v24104_v59 = vld [vmem:[#allocation8 + $0x90] ss:$56 sps:$4 sm:$0xff]  }
 0x55b   :  { %13161 = vmatpush1.bf16.msra.mxu0 %v24089_v54  ;;  %v24107_v54 = vld [vmem:[#allocation8 + $0x950] ss:$56 sps:$4 sm:$0xff]  }
 0x55c   :  { %13142 = vmatpush2.bf16.msra.mxu1 %v24086_v45  ;;  %13162 = vmatprep.subr.bf16.mxu0 %v24094_v9  ;;  %v24112_v9 = vld [vmem:[#allocation8 + $0x24] ss:$56 sps:$4 sm:$0xff]  }
 0x55d   :  { %13197 = vmatprep.subr.bf16.mxu1 %v24097_v55  ;;  %v24115_v55 = vld [vmem:[#allocation8 + $0x8e4] ss:$56 sps:$4 sm:$0xff]  }
 0x55f   :  { %v12887_v34 = vpop.f32.mrf.mxu1  ;;  %13144 = vmatmul.mubr.bf16.vlgmr.msra.gmra.mxu1 %v26606_v61  ;;  %13163 = vmatpush1.bf16.msra.mxu0 %v24092_v22 }
 0x560   :  { %v12888_v28 = vadd.f32 %v12887_v34, %v12845_v16  ;;  %13198 = vmatpush1.bf16.msra.mxu1 %v24095_v46  ;;  %13229 = vmatprep.mubr.bf16.mxu1 %v26507_v5  ;;  %v24110_v46 = vld [vmem:[#allocation8 + $0x20] ss:$56 sps:$4 sm:$0xff]  }
 0x561   :  { %v26762_v41 = vpop.f32.mrf.mxu1  ;;  %13164 = vmatprep.subr.bf16.mxu0 %v24100_v31  ;;  %13199 = vmatprep.subr.bf16.mxu1 %v24103_v57  ;;  %v24113_v57 = vld [vmem:[#allocation8 + $0x8e0] ss:$56 sps:$4 sm:$0xff]  }
 0x562   :  { %27352 = vst [vmem:[#allocation36_spill] sm:$0xff] %v26762_v41  ;;  %v13962_v44 = vmul.f32 %v26654_v8, %v12888_v28  ;;  %vm13933_vm12 = vcmp.gt.f32.partialorder %v12888_v28, 0.0  ;;  %v24116_v41 = vld [vmem:[#allocation8 + $0x6b0] ss:$56 sps:$4 sm:$0xff]  }
 0x563   :  { %v12891_v45 = vpop.f32.mrf.mxu1  ;;  %13165 = vmatpush1.bf16.msra.mxu0 %v24098_v26  ;;  %v24118_v26 = vld [vmem:[#allocation8 + $0x6b4] ss:$56 sps:$4 sm:$0xff]  }
 0x564   :  { %v12892_v7 = vadd.f32 %v12891_v45, %v12849_v30  ;;  %13200 = vmatpush1.bf16.msra.mxu1 %v24101_v53  ;;  %13166 = vmatprep.subr.bf16.mxu0 %v24106_v29  ;;  %v13990_v31 = vsel %vm13933_vm12, %v12888_v28, %v13962_v44  ;;  %v24121_v30 = vld [vmem:[#allocation8 + $0x874] ss:$56 sps:$4 sm:$0xff]   ;;  %v24119_v53 = vld [vmem:[#allocation8 + $0x870] ss:$56 sps:$4 sm:$0xff]   ;;  %v24124_v29 = vld [vmem:[#allocation8 + $0x644] ss:$56 sps:$4 sm:$0xff]  }
 0x565   :  { %13201 = vmatprep.subr.bf16.mxu1 %v24109_v38  ;;  %v24122_v38 = vld [vmem:[#allocation8 + $0x640] ss:$56 sps:$4 sm:$0xff]   ;;  %v24130_v44 = vld [vmem:[#allocation8 + $0x5d4] ss:$56 sps:$4 sm:$0xff]   ;;  %v24128_v28 = vld [vmem:[#allocation8 + $0x5d0] ss:$56 sps:$4 sm:$0xff]  }
 0x566   :  { %vm13947_vm13 = vcmp.gt.f32.partialorder %v12892_v7, 0.0  ;;  %v13976_v16 = vmul.f32 %v26654_v8, %v12892_v7  ;;  %v24131_v45 = vld [vmem:[#allocation8 + $0x790] ss:$56 sps:$4 sm:$0xff]  }
 0x567   :  { %13167 = vmatpush1.bf16.msra.mxu0 %v24104_v59  ;;  %v24127_v59 = vld [vmem:[#allocation8 + $0x804] ss:$56 sps:$4 sm:$0xff]  }
 0x568   :  { %v14004_v22 = vsel %vm13947_vm13, %v12892_v7, %v13976_v16  ;;  %13202 = vmatpush1.bf16.msra.mxu1 %v24107_v54  ;;  %13168 = vmatprep.subr.bf16.mxu0 %v24112_v9  ;;  %v24125_v7 = vld [vmem:[#allocation8 + $0x800] ss:$56 sps:$4 sm:$0xff]   ;;  %v24133_v54 = vld [vmem:[#allocation8 + $0x794] ss:$56 sps:$4 sm:$0xff]   ;;  %v24136_v9 = vld [vmem:[#allocation8 + $0x564] ss:$56 sps:$4 sm:$0xff]  }
 0x569   :  { %v26766_v34 = vpack.c.bf16 %v14004_v22, %v13990_v31  ;;  %13203 = vmatprep.subr.bf16.mxu1 %v24115_v55  ;;  %v24134_v55 = vld [vmem:[#allocation8 + $0x560] ss:$56 sps:$4 sm:$0xff]   ;;  %v24139_v16 = vld [vmem:[#allocation8 + $0x724] ss:$56 sps:$4 sm:$0xff]   ;;  %v24140_v31 = vld [vmem:[#allocation8 + $0x4f0] ss:$56 sps:$4 sm:$0xff]  }
 0x56a   :  { %v24145_v22 = vld [vmem:[#allocation8 + $0xdb4] ss:$56 sps:$4 sm:$0xff]  }
 0x56b   :  { %27353 = vst [vmem:[#allocation37_spill] sm:$0xff] %v26766_v34  ;;  %13169 = vmatpush1.bf16.msra.mxu0 %v24110_v46  ;;  %v24137_v46 = vld [vmem:[#allocation8 + $0x720] ss:$56 sps:$4 sm:$0xff]  }
 0x56c   :  { %13204 = vmatpush1.bf16.msra.mxu1 %v24113_v57  ;;  %13170 = vmatprep.subr.bf16.mxu0 %v24118_v26  ;;  %v24143_v57 = vld [vmem:[#allocation8 + $0xdb0] ss:$56 sps:$4 sm:$0xff]   ;;  %v24148_v26 = vld [vmem:[#allocation8 + $0x484] ss:$56 sps:$4 sm:$0xff]  }
 0x56d   :  { %13205 = vmatprep.subr.bf16.mxu1 %v24121_v30  ;;  %v24146_v30 = vld [vmem:[#allocation8 + $0x480] ss:$56 sps:$4 sm:$0xff]  }
 0x56f   :  { %13171 = vmatpush2.bf16.msra.mxu0 %v24116_v41  ;;  %v24142_v41 = vld [vmem:[#allocation8 + $0x4f4] ss:$56 sps:$4 sm:$0xff]  }
 0x570   :  { %13206 = vmatpush1.bf16.msra.mxu1 %v24119_v53  ;;  %13172 = vmatprep.subr.bf16.mxu0 %v24124_v29  ;;  %v24151_v53 = vld [vmem:[#allocation8 + $0xd44] ss:$56 sps:$4 sm:$0xff]   ;;  %v24149_v29 = vld [vmem:[#allocation8 + $0xd40] ss:$56 sps:$4 sm:$0xff]  }
 0x571   :  { %13207 = vmatprep.subr.bf16.mxu1 %v24127_v59  ;;  %v24152_v59 = vld [vmem:[#allocation8 + $0x410] ss:$56 sps:$4 sm:$0xff]  }
 0x573   :  { %13173 = vmatpush2.bf16.msra.mxu0 %v24122_v38  ;;  %v24154_v38 = vld [vmem:[#allocation8 + $0x414] ss:$56 sps:$4 sm:$0xff]  }
 0x574   :  { %13208 = vmatpush1.bf16.msra.mxu1 %v24125_v7  ;;  %13174 = vmatprep.subr.bf16.mxu0 %v24130_v44  ;;  %v24157_v7 = vld [vmem:[#allocation8 + $0xcd4] ss:$56 sps:$4 sm:$0xff]   ;;  %v24155_v44 = vld [vmem:[#allocation8 + $0xcd0] ss:$56 sps:$4 sm:$0xff]  }
 0x575   :  { %13209 = vmatprep.subr.bf16.mxu1 %v24133_v54  ;;  %v24158_v54 = vld [vmem:[#allocation8 + $0x3a0] ss:$56 sps:$4 sm:$0xff]  }
 0x577   :  { %13175 = vmatpush2.bf16.msra.mxu0 %v24128_v28  ;;  %v24160_v28 = vld [vmem:[#allocation8 + $0x3a4] ss:$56 sps:$4 sm:$0xff]  }
 0x578   :  { %13210 = vmatpush1.bf16.msra.mxu1 %v24131_v45  ;;  %13176 = vmatprep.subr.bf16.mxu0 %v24136_v9  ;;  %v24163_v45 = vld [vmem:[#allocation8 + $0xc64] ss:$56 sps:$4 sm:$0xff]   ;;  %v24161_v9 = vld [vmem:[#allocation8 + $0xc60] ss:$56 sps:$4 sm:$0xff]  }
 0x579   :  { %13211 = vmatprep.subr.bf16.mxu1 %v24139_v16  ;;  %v24169_v16 = vld [vmem:[#allocation8 + $0x1134] ss:$56 sps:$4 sm:$0xff]  }
 0x57b   :  { %13177 = vmatpush2.bf16.msra.mxu0 %v24134_v55  ;;  %v24166_v55 = vld [vmem:[#allocation8 + $0xbf4] ss:$56 sps:$4 sm:$0xff]  }
 0x57c   :  { %13212 = vmatpush1.bf16.msra.mxu1 %v24137_v46  ;;  %13178 = vmatprep.subr.bf16.mxu0 %v24142_v41  ;;  %v24167_v46 = vld [vmem:[#allocation8 + $0x1130] ss:$56 sps:$4 sm:$0xff]  }
 0x57d   :  { %13213 = vmatprep.subr.bf16.mxu1 %v24145_v22  ;;  %v24164_v41 = vld [vmem:[#allocation8 + $0xbf0] ss:$56 sps:$4 sm:$0xff]   ;;  %v24172_v22 = vld [vmem:[#allocation8 + $0xb84] ss:$56 sps:$4 sm:$0xff]  }
 0x57f   :  { %13179 = vmatpush2.bf16.msra.mxu0 %v24140_v31  ;;  %v24175_v31 = vld [vmem:[#allocation8 + $0x10c4] ss:$56 sps:$4 sm:$0xff]  }
 0x580   :  { %13214 = vmatpush2.bf16.msra.mxu1 %v24143_v57  ;;  %13180 = vmatprep.subr.bf16.mxu0 %v24148_v26  ;;  %v24170_v57 = vld [vmem:[#allocation8 + $0xb80] ss:$56 sps:$4 sm:$0xff]  }
 0x581   :  { %13215 = vmatprep.subr.bf16.mxu1 %v24151_v53  ;;  %v24173_v26 = vld [vmem:[#allocation8 + $0x10c0] ss:$56 sps:$4 sm:$0xff]   ;;  %v24181_v53 = vld [vmem:[#allocation8 + $0x1054] ss:$56 sps:$4 sm:$0xff]  }
 0x583   :  { %13181 = vmatpush2.bf16.msra.mxu0 %v24146_v30  ;;  %v24178_v30 = vld [vmem:[#allocation8 + $0xb14] ss:$56 sps:$4 sm:$0xff]  }
 0x584   :  { %13216 = vmatpush2.bf16.msra.mxu1 %v24149_v29  ;;  %13182 = vmatprep.subr.bf16.mxu0 %v24154_v38  ;;  %v24176_v29 = vld [vmem:[#allocation8 + $0xb10] ss:$56 sps:$4 sm:$0xff]  }
 0x585   :  { %13217 = vmatprep.subr.bf16.mxu1 %v24157_v7  ;;  %v24179_v38 = vld [vmem:[#allocation8 + $0x1050] ss:$56 sps:$4 sm:$0xff]   ;;  %v26770_v7 = vpop.f32.mrf.mxu0 }
 0x586   :  { %27354 = vst [vmem:[#allocation38_spill] sm:$0xff] %v26770_v7 }
 0x587   :  { %13183 = vmatpush2.bf16.msra.mxu0 %v24152_v59  ;;  %v24187_v59 = vld [vmem:[#allocation8 + $0xfe4] ss:$56 sps:$4 sm:$0xff]  }
 0x588   :  { %13218 = vmatpush2.bf16.msra.mxu1 %v24155_v44  ;;  %13184 = vmatprep.subr.bf16.mxu0 %v24160_v28  ;;  %v24184_v44 = vld [vmem:[#allocation8 + $0xaa4] ss:$56 sps:$4 sm:$0xff]   ;;  %v24185_v28 = vld [vmem:[#allocation8 + $0xfe0] ss:$56 sps:$4 sm:$0xff]  }
 0x589   :  { %13219 = vmatprep.subr.bf16.mxu1 %v24163_v45  ;;  %v24182_v45 = vld [vmem:[#allocation8 + $0xaa0] ss:$56 sps:$4 sm:$0xff]  }
 0x58b   :  { %13185 = vmatpush2.bf16.msra.mxu0 %v24158_v54 }
 0x58c   :  { %13220 = vmatpush2.bf16.msra.mxu1 %v24161_v9  ;;  %13240 = vmatprep.subr.bf16.mxu0 %v24169_v16  ;;  %v24190_v9 = vld [vmem:[#allocation8 + $0xf74] ss:$56 sps:$4 sm:$0xff]  }
 0x58d   :  { %13221 = vmatprep.subr.bf16.mxu1 %v24166_v55  ;;  %v24188_v55 = vld [vmem:[#allocation8 + $0xf70] ss:$56 sps:$4 sm:$0xff]   ;;  %v24193_v16 = vld [vmem:[#allocation8 + $0x1834] ss:$56 sps:$4 sm:$0xff]  }
 0x58e   :  { %13187 = vmatmul.mubr.bf16.vlgmr.msra.gmra.mxu0 %v26396_v36  ;;  %v12930_v54 = vpop.f32.mrf.mxu0 }
 0x58f   :  { %13241 = vmatpush1.bf16.msra.mxu0 %v24167_v46  ;;  %13272 = vmatprep.mubr.bf16.mxu0 %v26551_v35  ;;  %v26014_v46 = vld [vmem:[#allocation9] sm:$0xff] }
 0x590   :  { %13222 = vmatpush2.bf16.msra.mxu1 %v24164_v41  ;;  %13242 = vmatprep.subr.bf16.mxu0 %v24175_v31  ;;  %v27355_v41 = vsub.s32 6, %v26355_v13 }
 0x591   :  { %13223 = vmatprep.subr.bf16.mxu1 %v24172_v22  ;;  %v24191_v22 = vld [vmem:[#allocation8 + $0x1830] ss:$56 sps:$4 sm:$0xff]  }
 0x592   :  { %v5359_v31 = vrot.slane %v26014_v46, %v27355_v41  ;;  %v24202_v46 = vld [vmem:[#allocation8 + $0xe94] ss:$56 sps:$4 sm:$0xff]  }
 0x593   :  { %13243 = vmatpush1.bf16.msra.mxu0 %v24173_v26  ;;  %v24196_v26 = vld [vmem:[#allocation8 + $0xf04] ss:$56 sps:$4 sm:$0xff]   ;;  %v24205_v41 = vld [vmem:[#allocation8 + $0x1754] ss:$56 sps:$4 sm:$0xff]  }
 0x594   :  { %13224 = vmatpush2.bf16.msra.mxu1 %v24170_v57  ;;  %13244 = vmatprep.subr.bf16.mxu0 %v24181_v53  ;;  %v26774_v57 = vpop.f32.mrf.mxu0  ;;  %v26776_v53 = vpop.f32.mrf.mxu1 }
 0x595   :  { %13225 = vmatprep.subr.bf16.mxu1 %v24178_v30  ;;  %27356 = vst [vmem:[#allocation39_spill] sm:$0xff] %v26774_v57  ;;  %v24199_v30 = vld [vmem:[#allocation8 + $0x17c4] ss:$56 sps:$4 sm:$0xff]   ;;  %27357 = vst [vmem:[#allocation40_spill] sm:$0xff] %v26776_v53 }
 0x596   :  { %v24208_v57 = vld [vmem:[#allocation8 + $0xe24] ss:$56 sps:$4 sm:$0xff]  }
 0x597   :  { %13245 = vmatpush1.bf16.msra.mxu0 %v24179_v38  ;;  %v24194_v38 = vld [vmem:[#allocation8 + $0xf00] ss:$56 sps:$4 sm:$0xff]   ;;  %v24211_v53 = vld [vmem:[#allocation8 + $0x16e4] ss:$56 sps:$4 sm:$0xff]  }
 0x598   :  { %13226 = vmatpush2.bf16.msra.mxu1 %v24176_v29  ;;  %13246 = vmatprep.subr.bf16.mxu0 %v24187_v59  ;;  %v12931_v29 = vadd.f32 %v12930_v54, %v5359_v31  ;;  %v24197_v59 = vld [vmem:[#allocation8 + $0x17c0] ss:$56 sps:$4 sm:$0xff]   ;;  %v24200_v54 = vld [vmem:[#allocation8 + $0xe90] ss:$56 sps:$4 sm:$0xff]  }
 0x599   :  { %13227 = vmatprep.subr.bf16.mxu1 %v24184_v44  ;;  %v12934_v44 = vpop.f32.mrf.mxu0 }
 0x59b   :  { %13247 = vmatpush1.bf16.msra.mxu0 %v24185_v28 }
 0x59c   :  { %13228 = vmatpush2.bf16.msra.mxu1 %v24182_v45  ;;  %13248 = vmatprep.subr.bf16.mxu0 %v24190_v9  ;;  %v12935_v45 = vadd.f32 %v12934_v44, %v5359_v31  ;;  %v24203_v9 = vld [vmem:[#allocation8 + $0x1750] ss:$56 sps:$4 sm:$0xff]   ;;  %v24223_v44 = vld [vmem:[#allocation8 + $0x1604] ss:$56 sps:$4 sm:$0xff]  }
 0x59d   :  { %13283 = vmatprep.subr.bf16.mxu1 %v24193_v16  ;;  %v24212_v31 = vld [vmem:[#allocation8 + $0x14b0] ss:$56 sps:$4 sm:$0xff]  }
 0x59f   :  { %v12973_v34 = vpop.f32.mrf.mxu1  ;;  %13230 = vmatmul.mubr.bf16.vlgmr.msra.gmra.mxu1 %v26421_v15  ;;  %13249 = vmatpush1.bf16.msra.mxu0 %v24188_v55  ;;  %v24209_v55 = vld [vmem:[#allocation8 + $0x16e0] ss:$56 sps:$4 sm:$0xff]  }
 0x5a0   :  { %v26779_v13 = vadd.f32 %v12973_v34, %v12931_v29  ;;  %13284 = vmatpush1.bf16.msra.mxu1 %v24191_v22  ;;  %13315 = vmatprep.mubr.bf16.mxu1 %v26554_v25  ;;  %v24206_v34 = vld [vmem:[#allocation8 + $0xe20] ss:$56 sps:$4 sm:$0xff]   ;;  %v24214_v22 = vld [vmem:[#allocation8 + $0x14b4] ss:$56 sps:$4 sm:$0xff]   ;;  %v24220_v29 = vld [vmem:[#allocation8 + $0x1444] ss:$56 sps:$4 sm:$0xff]  }
 0x5a1   :  { %v26782_v28 = vpop.f32.mrf.mxu1  ;;  %13250 = vmatprep.subr.bf16.mxu0 %v24196_v26  ;;  %13285 = vmatprep.subr.bf16.mxu1 %v24199_v30  ;;  %v24217_v26 = vld [vmem:[#allocation8 + $0x1674] ss:$56 sps:$4 sm:$0xff]   ;;  %v24215_v30 = vld [vmem:[#allocation8 + $0x1670] ss:$56 sps:$4 sm:$0xff]  }
 0x5a2   :  { %27358 = vst [vmem:[#allocation41_spill] sm:$0xff] %v26782_v28 }
 0x5a3   :  { %v12977_v16 = vpop.f32.mrf.mxu1  ;;  %13251 = vmatpush1.bf16.msra.mxu0 %v24194_v38  ;;  %v24218_v38 = vld [vmem:[#allocation8 + $0x1440] ss:$56 sps:$4 sm:$0xff]  }
 0x5a4   :  { %v26784_v7 = vadd.f32 %v12977_v16, %v12935_v45  ;;  %13286 = vmatpush1.bf16.msra.mxu1 %v24197_v59  ;;  %13252 = vmatprep.subr.bf16.mxu0 %v24202_v46  ;;  %v24221_v59 = vld [vmem:[#allocation8 + $0x1600] ss:$56 sps:$4 sm:$0xff]   ;;  %v24226_v46 = vld [vmem:[#allocation8 + $0x13d4] ss:$56 sps:$4 sm:$0xff]  }
 0x5a5   :  { %13287 = vmatprep.subr.bf16.mxu1 %v24205_v41  ;;  %v24224_v41 = vld [vmem:[#allocation8 + $0x13d0] ss:$56 sps:$4 sm:$0xff]   ;;  %v24229_v45 = vld [vmem:[#allocation8 + $0x1594] ss:$56 sps:$4 sm:$0xff]   ;;  %v24233_v16 = vld [vmem:[#allocation8 + $0x1520] ss:$56 sps:$4 sm:$0xff]  }
 0x5a7   :  { %13253 = vmatpush1.bf16.msra.mxu0 %v24200_v54  ;;  %v24230_v54 = vld [vmem:[#allocation8 + $0x1360] ss:$56 sps:$4 sm:$0xff]  }
 0x5a8   :  { %13288 = vmatpush1.bf16.msra.mxu1 %v24203_v9  ;;  %13254 = vmatprep.subr.bf16.mxu0 %v24208_v57  ;;  %v24227_v57 = vld [vmem:[#allocation8 + $0x1590] ss:$56 sps:$4 sm:$0xff]   ;;  %v24235_v9 = vld [vmem:[#allocation8 + $0x1524] ss:$56 sps:$4 sm:$0xff]  }
 0x5a9   :  { %13289 = vmatprep.subr.bf16.mxu1 %v24211_v53  ;;  %v24232_v53 = vld [vmem:[#allocation8 + $0x1364] ss:$56 sps:$4 sm:$0xff]  }
 0x5ab   :  { %13255 = vmatpush1.bf16.msra.mxu0 %v24206_v34  ;;  %v24238_v34 = vld [vmem:[#allocation8 + $0x12f4] ss:$56 sps:$4 sm:$0xff]  }
 0x5ac   :  { %13290 = vmatpush1.bf16.msra.mxu1 %v24209_v55  ;;  %13256 = vmatprep.subr.bf16.mxu0 %v24214_v22  ;;  %v24236_v55 = vld [vmem:[#allocation8 + $0x12f0] ss:$56 sps:$4 sm:$0xff]   ;;  %v24241_v22 = vld [vmem:[#allocation8 + $0x1bb4] ss:$56 sps:$4 sm:$0xff]  }
 0x5ad   :  { %13291 = vmatprep.subr.bf16.mxu1 %v24217_v26  ;;  %v24239_v26 = vld [vmem:[#allocation8 + $0x1bb0] ss:$56 sps:$4 sm:$0xff]  }
 0x5af   :  { %13257 = vmatpush2.bf16.msra.mxu0 %v24212_v31  ;;  %v24244_v31 = vld [vmem:[#allocation8 + $0x1284] ss:$56 sps:$4 sm:$0xff]  }
 0x5b0   :  { %13292 = vmatpush1.bf16.msra.mxu1 %v24215_v30  ;;  %13258 = vmatprep.subr.bf16.mxu0 %v24220_v29  ;;  %v24247_v30 = vld [vmem:[#allocation8 + $0x1b44] ss:$56 sps:$4 sm:$0xff]   ;;  %v24242_v29 = vld [vmem:[#allocation8 + $0x1280] ss:$56 sps:$4 sm:$0xff]  }
 0x5b1   :  { %13293 = vmatprep.subr.bf16.mxu1 %v24223_v44  ;;  %v24250_v44 = vld [vmem:[#allocation8 + $0x1214] ss:$56 sps:$4 sm:$0xff]  }
 0x5b3   :  { %13259 = vmatpush2.bf16.msra.mxu0 %v24218_v38  ;;  %v24245_v38 = vld [vmem:[#allocation8 + $0x1b40] ss:$56 sps:$4 sm:$0xff]  }
 0x5b4   :  { %13294 = vmatpush1.bf16.msra.mxu1 %v24221_v59  ;;  %13260 = vmatprep.subr.bf16.mxu0 %v24226_v46  ;;  %v24253_v59 = vld [vmem:[#allocation8 + $0x1ad4] ss:$56 sps:$4 sm:$0xff]   ;;  %v24248_v46 = vld [vmem:[#allocation8 + $0x1210] ss:$56 sps:$4 sm:$0xff]  }
 0x5b5   :  { %13295 = vmatprep.subr.bf16.mxu1 %v24229_v45  ;;  %v24256_v45 = vld [vmem:[#allocation8 + $0x11a4] ss:$56 sps:$4 sm:$0xff]  }
 0x5b7   :  { %13261 = vmatpush2.bf16.msra.mxu0 %v24224_v41  ;;  %v24251_v41 = vld [vmem:[#allocation8 + $0x1ad0] ss:$56 sps:$4 sm:$0xff]  }
 0x5b8   :  { %13296 = vmatpush1.bf16.msra.mxu1 %v24227_v57  ;;  %13262 = vmatprep.subr.bf16.mxu0 %v24232_v53  ;;  %v24259_v57 = vld [vmem:[#allocation8 + $0x1a64] ss:$56 sps:$4 sm:$0xff]   ;;  %v24254_v53 = vld [vmem:[#allocation8 + $0x11a0] ss:$56 sps:$4 sm:$0xff]  }
 0x5b9   :  { %13297 = vmatprep.subr.bf16.mxu1 %v24235_v9  ;;  %v24265_v9 = vld [vmem:[#allocation8 + $0x1f34] ss:$56 sps:$4 sm:$0xff]  }
 0x5bb   :  { %13263 = vmatpush2.bf16.msra.mxu0 %v24230_v54  ;;  %v24257_v54 = vld [vmem:[#allocation8 + $0x1a60] ss:$56 sps:$4 sm:$0xff]  }
 0x5bc   :  { %13298 = vmatpush1.bf16.msra.mxu1 %v24233_v16  ;;  %13264 = vmatprep.subr.bf16.mxu0 %v24238_v34  ;;  %v24262_v16 = vld [vmem:[#allocation8 + $0x19f4] ss:$56 sps:$4 sm:$0xff]   ;;  %v24263_v34 = vld [vmem:[#allocation8 + $0x1f30] ss:$56 sps:$4 sm:$0xff]  }
 0x5bd   :  { %13299 = vmatprep.subr.bf16.mxu1 %v24241_v22  ;;  %v24260_v22 = vld [vmem:[#allocation8 + $0x19f0] ss:$56 sps:$4 sm:$0xff]  }
 0x5bf   :  { %13265 = vmatpush2.bf16.msra.mxu0 %v24236_v55  ;;  %v26786_v55 = vpop.f32.mrf.mxu0 }
 0x5c0   :  { %13300 = vmatpush2.bf16.msra.mxu1 %v24239_v26  ;;  %13266 = vmatprep.subr.bf16.mxu0 %v24244_v31  ;;  %v24271_v26 = vld [vmem:[#allocation8 + $0x1ec4] ss:$56 sps:$4 sm:$0xff]  }
 0x5c1   :  { %13301 = vmatprep.subr.bf16.mxu1 %v24247_v30  ;;  %v24268_v31 = vld [vmem:[#allocation8 + $0x1984] ss:$56 sps:$4 sm:$0xff]  }
 0x5c3   :  { %13267 = vmatpush2.bf16.msra.mxu0 %v24242_v29 }
 0x5c4   :  { %13302 = vmatpush2.bf16.msra.mxu1 %v24245_v38  ;;  %13268 = vmatprep.subr.bf16.mxu0 %v24250_v44  ;;  %v24269_v38 = vld [vmem:[#allocation8 + $0x1ec0] ss:$56 sps:$4 sm:$0xff]  }
 0x5c5   :  { %13303 = vmatprep.subr.bf16.mxu1 %v24253_v59  ;;  %v24266_v59 = vld [vmem:[#allocation8 + $0x1980] ss:$56 sps:$4 sm:$0xff]  }
 0x5c7   :  { %13269 = vmatpush2.bf16.msra.mxu0 %v24248_v46  ;;  %v24277_v46 = vld [vmem:[#allocation8 + $0x1e54] ss:$56 sps:$4 sm:$0xff]  }
 0x5c8   :  { %13304 = vmatpush2.bf16.msra.mxu1 %v24251_v41  ;;  %13270 = vmatprep.subr.bf16.mxu0 %v24256_v45  ;;  %v24274_v41 = vld [vmem:[#allocation8 + $0x1914] ss:$56 sps:$4 sm:$0xff]  }
 0x5c9   :  { %13305 = vmatprep.subr.bf16.mxu1 %v24259_v57 }
 0x5cb   :  { %13271 = vmatpush2.bf16.msra.mxu0 %v24254_v53  ;;  %v24275_v53 = vld [vmem:[#allocation8 + $0x1e50] ss:$56 sps:$4 sm:$0xff]  }
 0x5cc   :  { %13306 = vmatpush2.bf16.msra.mxu1 %v24257_v54  ;;  %13326 = vmatprep.subr.bf16.mxu0 %v24265_v9  ;;  %v24272_v54 = vld [vmem:[#allocation8 + $0x1910] ss:$56 sps:$4 sm:$0xff]   ;;  %v24280_v9 = vld [vmem:[#allocation8 + $0x18a4] ss:$56 sps:$4 sm:$0xff]  }
 0x5cd   :  { %13307 = vmatprep.subr.bf16.mxu1 %v24262_v16  ;;  %v24281_v16 = vld [vmem:[#allocation8 + $0x1de0] ss:$56 sps:$4 sm:$0xff]  }
 0x5ce   :  { %v13016_v30 = vpop.f32.mrf.mxu0  ;;  %13273 = vmatmul.mubr.bf16.vlgmr.msra.gmra.mxu0 %v26483_v6 }
 0x5cf   :  { %v13017_v29 = vadd.f32 %v13016_v30, %v26779_v13  ;;  %13327 = vmatpush1.bf16.msra.mxu0 %v24263_v34  ;;  %13358 = vmatprep.mubr.bf16.mxu0 %v26579_v39  ;;  %v24283_v13 = vld [vmem:[#allocation8 + $0x1de4] ss:$56 sps:$4 sm:$0xff]   ;;  %v24278_v34 = vld [vmem:[#allocation8 + $0x18a0] ss:$56 sps:$4 sm:$0xff]   ;;  %v26794_v30 = vpop.f32.mrf.mxu1 }
 0x5d0   :  { %13308 = vmatpush2.bf16.msra.mxu1 %v24260_v22  ;;  %v26791_v44 = vpop.f32.mrf.mxu0  ;;  %13328 = vmatprep.subr.bf16.mxu0 %v24271_v26  ;;  %v24286_v22 = vld [vmem:[#allocation8 + $0x1d74] ss:$56 sps:$4 sm:$0xff]  }
 0x5d1   :  { %27359 = vst [vmem:[#allocation42_spill] sm:$0xff] %v26791_v44  ;;  %13309 = vmatprep.subr.bf16.mxu1 %v24268_v31  ;;  %v24289_v26 = vld [vmem:[#allocation8 + $0x2634] ss:$56 sps:$4 sm:$0xff]   ;;  %v24284_v31 = vld [vmem:[#allocation8 + $0x1d70] ss:$56 sps:$4 sm:$0xff]  }
 0x5d2   :  { %v13020_v45 = vpop.f32.mrf.mxu0  ;;  %v24368_v44 = vld [vmem:[#allocation8 + $0x2710] ss:$56 sps:$4 sm:$0xff]  }
 0x5d3   :  { %v13021_v57 = vadd.f32 %v13020_v45, %v26784_v7  ;;  %13329 = vmatpush1.bf16.msra.mxu0 %v24269_v38  ;;  %v24287_v7 = vld [vmem:[#allocation8 + $0x2630] ss:$56 sps:$4 sm:$0xff]   ;;  %v24292_v38 = vld [vmem:[#allocation8 + $0x1d04] ss:$56 sps:$4 sm:$0xff]  }
 0x5d4   :  { %13310 = vmatpush2.bf16.msra.mxu1 %v24266_v59  ;;  %13330 = vmatprep.subr.bf16.mxu0 %v24277_v46  ;;  %v24295_v59 = vld [vmem:[#allocation8 + $0x25c4] ss:$56 sps:$4 sm:$0xff]  }
 0x5d5   :  { %13311 = vmatprep.subr.bf16.mxu1 %v24274_v41  ;;  %v24290_v41 = vld [vmem:[#allocation8 + $0x1d00] ss:$56 sps:$4 sm:$0xff]  }
 0x5d7   :  { %13331 = vmatpush1.bf16.msra.mxu0 %v24275_v53  ;;  %v24293_v53 = vld [vmem:[#allocation8 + $0x25c0] ss:$56 sps:$4 sm:$0xff]  }
 0x5d8   :  { %13312 = vmatpush2.bf16.msra.mxu1 %v24272_v54  ;;  %13332 = vmatprep.subr.bf16.mxu0 %v24283_v13  ;;  %v24298_v54 = vld [vmem:[#allocation8 + $0x1c94] ss:$56 sps:$4 sm:$0xff]  }
 0x5d9   :  { %13313 = vmatprep.subr.bf16.mxu1 %v24280_v9  ;;  %v24301_v9 = vld [vmem:[#allocation8 + $0x2554] ss:$56 sps:$4 sm:$0xff]  }
 0x5db   :  { %13333 = vmatpush1.bf16.msra.mxu0 %v24281_v16 }
 0x5dc   :  { %13314 = vmatpush2.bf16.msra.mxu1 %v24278_v34  ;;  %13334 = vmatprep.subr.bf16.mxu0 %v24286_v22  ;;  %v24296_v34 = vld [vmem:[#allocation8 + $0x1c90] ss:$56 sps:$4 sm:$0xff]  }
 0x5dd   :  { %13369 = vmatprep.subr.bf16.mxu1 %v24289_v26  ;;  %v24299_v26 = vld [vmem:[#allocation8 + $0x2550] ss:$56 sps:$4 sm:$0xff]  }
 0x5df   :  { %v13059_v46 = vpop.f32.mrf.mxu1  ;;  %13316 = vmatmul.mubr.bf16.vlgmr.msra.gmra.mxu1 %v26536_v12  ;;  %13335 = vmatpush1.bf16.msra.mxu0 %v24284_v31  ;;  %v24307_v31 = vld [vmem:[#allocation8 + $0x24e4] ss:$56 sps:$4 sm:$0xff]  }
 0x5e0   :  { %v26797_v45 = vadd.f32 %v13059_v46, %v13017_v29  ;;  %13370 = vmatpush1.bf16.msra.mxu1 %v24287_v7  ;;  %13401 = vmatprep.mubr.bf16.mxu1 %v26604_v51  ;;  %v24304_v29 = vld [vmem:[#allocation8 + $0x1c24] ss:$56 sps:$4 sm:$0xff]   ;;  %v24302_v7 = vld [vmem:[#allocation8 + $0x1c20] ss:$56 sps:$4 sm:$0xff]  }
 0x5e1   :  { %v26800_v13 = vpop.f32.mrf.mxu1  ;;  %13336 = vmatprep.subr.bf16.mxu0 %v24292_v38  ;;  %13371 = vmatprep.subr.bf16.mxu1 %v24295_v59  ;;  %v24305_v46 = vld [vmem:[#allocation8 + $0x24e0] ss:$56 sps:$4 sm:$0xff]   ;;  %v24313_v38 = vld [vmem:[#allocation8 + $0x2474] ss:$56 sps:$4 sm:$0xff]   ;;  %v24308_v59 = vld [vmem:[#allocation8 + $0x22b0] ss:$56 sps:$4 sm:$0xff]  }
 0x5e2   :  { %27360 = vst [vmem:[#allocation43_spill] sm:$0xff] %v26800_v13  ;;  %v24310_v13 = vld [vmem:[#allocation8 + $0x22b4] ss:$56 sps:$4 sm:$0xff]  }
 0x5e3   :  { %v13063_v16 = vpop.f32.mrf.mxu1  ;;  %13337 = vmatpush1.bf16.msra.mxu0 %v24290_v41  ;;  %v24316_v41 = vld [vmem:[#allocation8 + $0x2244] ss:$56 sps:$4 sm:$0xff]  }
 0x5e4   :  { %v26802_v22 = vadd.f32 %v13063_v16, %v13021_v57  ;;  %13372 = vmatpush1.bf16.msra.mxu1 %v24293_v53  ;;  %13338 = vmatprep.subr.bf16.mxu0 %v24298_v54  ;;  %v24311_v57 = vld [vmem:[#allocation8 + $0x2470] ss:$56 sps:$4 sm:$0xff]   ;;  %v24319_v53 = vld [vmem:[#allocation8 + $0x2404] ss:$56 sps:$4 sm:$0xff]   ;;  %v24314_v54 = vld [vmem:[#allocation8 + $0x2240] ss:$56 sps:$4 sm:$0xff]  }
 0x5e5   :  { %13373 = vmatprep.subr.bf16.mxu1 %v24301_v9  ;;  %v24317_v9 = vld [vmem:[#allocation8 + $0x2400] ss:$56 sps:$4 sm:$0xff]   ;;  %v24322_v16 = vld [vmem:[#allocation8 + $0x21d4] ss:$56 sps:$4 sm:$0xff]  }
 0x5e7   :  { %13339 = vmatpush1.bf16.msra.mxu0 %v24296_v34  ;;  %v24325_v34 = vld [vmem:[#allocation8 + $0x2394] ss:$56 sps:$4 sm:$0xff]  }
 0x5e8   :  { %13374 = vmatpush1.bf16.msra.mxu1 %v24299_v26  ;;  %13340 = vmatprep.subr.bf16.mxu0 %v24304_v29  ;;  %v24320_v26 = vld [vmem:[#allocation8 + $0x21d0] ss:$56 sps:$4 sm:$0xff]  }
 0x5e9   :  { %13375 = vmatprep.subr.bf16.mxu1 %v24307_v31  ;;  %v24323_v29 = vld [vmem:[#allocation8 + $0x2390] ss:$56 sps:$4 sm:$0xff]   ;;  %v24328_v31 = vld [vmem:[#allocation8 + $0x2164] ss:$56 sps:$4 sm:$0xff]  }
 0x5eb   :  { %13341 = vmatpush1.bf16.msra.mxu0 %v24302_v7  ;;  %v24326_v7 = vld [vmem:[#allocation8 + $0x2160] ss:$56 sps:$4 sm:$0xff]  }
 0x5ec   :  { %13376 = vmatpush1.bf16.msra.mxu1 %v24305_v46  ;;  %13342 = vmatprep.subr.bf16.mxu0 %v24310_v13  ;;  %v24331_v13 = vld [vmem:[#allocation8 + $0x2324] ss:$56 sps:$4 sm:$0xff]   ;;  %v24329_v46 = vld [vmem:[#allocation8 + $0x2320] ss:$56 sps:$4 sm:$0xff]  }
 0x5ed   :  { %13377 = vmatprep.subr.bf16.mxu1 %v24313_v38  ;;  %v24334_v38 = vld [vmem:[#allocation8 + $0x20f4] ss:$56 sps:$4 sm:$0xff]  }
 0x5ef   :  { %13343 = vmatpush2.bf16.msra.mxu0 %v24308_v59  ;;  %v24337_v59 = vld [vmem:[#allocation8 + $0x29b4] ss:$56 sps:$4 sm:$0xff]  }
 0x5f0   :  { %13378 = vmatpush1.bf16.msra.mxu1 %v24311_v57  ;;  %13344 = vmatprep.subr.bf16.mxu0 %v24316_v41  ;;  %v24332_v57 = vld [vmem:[#allocation8 + $0x20f0] ss:$56 sps:$4 sm:$0xff]  }
 0x5f1   :  { %13379 = vmatprep.subr.bf16.mxu1 %v24319_v53  ;;  %v24335_v41 = vld [vmem:[#allocation8 + $0x29b0] ss:$56 sps:$4 sm:$0xff]   ;;  %v24340_v53 = vld [vmem:[#allocation8 + $0x2084] ss:$56 sps:$4 sm:$0xff]  }
 0x5f3   :  { %13345 = vmatpush2.bf16.msra.mxu0 %v24314_v54  ;;  %v24343_v54 = vld [vmem:[#allocation8 + $0x2944] ss:$56 sps:$4 sm:$0xff]  }
 0x5f4   :  { %13380 = vmatpush1.bf16.msra.mxu1 %v24317_v9  ;;  %13346 = vmatprep.subr.bf16.mxu0 %v24322_v16  ;;  %v24338_v9 = vld [vmem:[#allocation8 + $0x2080] ss:$56 sps:$4 sm:$0xff]  }
 0x5f5   :  { %13381 = vmatprep.subr.bf16.mxu1 %v24325_v34  ;;  %v24341_v16 = vld [vmem:[#allocation8 + $0x2940] ss:$56 sps:$4 sm:$0xff]   ;;  %v24346_v34 = vld [vmem:[#allocation8 + $0x2014] ss:$56 sps:$4 sm:$0xff]  }
 0x5f7   :  { %13347 = vmatpush2.bf16.msra.mxu0 %v24320_v26  ;;  %v24349_v26 = vld [vmem:[#allocation8 + $0x28d4] ss:$56 sps:$4 sm:$0xff]  }
 0x5f8   :  { %13382 = vmatpush1.bf16.msra.mxu1 %v24323_v29  ;;  %13348 = vmatprep.subr.bf16.mxu0 %v24328_v31  ;;  %v24344_v29 = vld [vmem:[#allocation8 + $0x2010] ss:$56 sps:$4 sm:$0xff]  }
 0x5f9   :  { %13383 = vmatprep.subr.bf16.mxu1 %v24331_v13  ;;  %v24347_v31 = vld [vmem:[#allocation8 + $0x28d0] ss:$56 sps:$4 sm:$0xff]   ;;  %v24352_v13 = vld [vmem:[#allocation8 + $0x1fa4] ss:$56 sps:$4 sm:$0xff]  }
 0x5fb   :  { %13349 = vmatpush2.bf16.msra.mxu0 %v24326_v7  ;;  %v24355_v7 = vld [vmem:[#allocation8 + $0x2864] ss:$56 sps:$4 sm:$0xff]  }
 0x5fc   :  { %13384 = vmatpush1.bf16.msra.mxu1 %v24329_v46  ;;  %13350 = vmatprep.subr.bf16.mxu0 %v24334_v38  ;;  %v24350_v46 = vld [vmem:[#allocation8 + $0x1fa0] ss:$56 sps:$4 sm:$0xff]  }
 0x5fd   :  { %13385 = vmatprep.subr.bf16.mxu1 %v24337_v59  ;;  %v24353_v38 = vld [vmem:[#allocation8 + $0x2860] ss:$56 sps:$4 sm:$0xff]   ;;  %v24361_v59 = vld [vmem:[#allocation8 + $0x33c] ss:$56 sps:$4 sm:$0xff]  }
 0x5ff   :  { %13351 = vmatpush2.bf16.msra.mxu0 %v24332_v57  ;;  %v24358_v57 = vld [vmem:[#allocation8 + $0x27f4] ss:$56 sps:$4 sm:$0xff]  }
 0x600   :  { %13386 = vmatpush2.bf16.msra.mxu1 %v24335_v41  ;;  %13352 = vmatprep.subr.bf16.mxu0 %v24340_v53  ;;  %v24359_v41 = vld [vmem:[#allocation8 + $0x338] ss:$56 sps:$4 sm:$0xff]   ;;  %v26804_v53 = vpop.f32.mrf.mxu0 }
 0x601   :  { %13387 = vmatprep.subr.bf16.mxu1 %v24343_v54  ;;  %27361 = vst [vmem:[#allocation44_spill] sm:$0xff] %v26804_v53  ;;  %v24356_v54 = vld [vmem:[#allocation8 + $0x27f0] ss:$56 sps:$4 sm:$0xff]   ;;  %v24406_v53 = vld [vmem:[#allocation8 + $0x6bc] ss:$56 sps:$4 sm:$0xff]  }
 0x603   :  { %13353 = vmatpush2.bf16.msra.mxu0 %v24338_v9  ;;  %v24367_v9 = vld [vmem:[#allocation8 + $0x2cc] ss:$56 sps:$4 sm:$0xff]  }
 0x604   :  { %13388 = vmatpush2.bf16.msra.mxu1 %v24341_v16  ;;  %13354 = vmatprep.subr.bf16.mxu0 %v24346_v34  ;;  %v24364_v16 = vld [vmem:[#allocation8 + $0x2784] ss:$56 sps:$4 sm:$0xff]  }
 0x605   :  { %13389 = vmatprep.subr.bf16.mxu1 %v24349_v26 }
 0x607   :  { %13355 = vmatpush2.bf16.msra.mxu0 %v24344_v29  ;;  %v24365_v29 = vld [vmem:[#allocation8 + $0x2c8] ss:$56 sps:$4 sm:$0xff]  }
 0x608   :  { %13390 = vmatpush2.bf16.msra.mxu1 %v24347_v31  ;;  %13356 = vmatprep.subr.bf16.mxu0 %v24352_v13  ;;  %v24362_v13 = vld [vmem:[#allocation8 + $0x2780] ss:$56 sps:$4 sm:$0xff]  }
 0x609   :  { %13391 = vmatprep.subr.bf16.mxu1 %v24355_v7  ;;  %v24373_v7 = vld [vmem:[#allocation8 + $0x25c] ss:$56 sps:$4 sm:$0xff]  }
 0x60b   :  { %13357 = vmatpush2.bf16.msra.mxu0 %v24350_v46  ;;  %v24370_v46 = vld [vmem:[#allocation8 + $0x2714] ss:$56 sps:$4 sm:$0xff]  }
 0x60c   :  { %13392 = vmatpush2.bf16.msra.mxu1 %v24353_v38  ;;  %13412 = vmatprep.subr.bf16.mxu0 %v24361_v59 }
 0x60d   :  { %13393 = vmatprep.subr.bf16.mxu1 %v24358_v57  ;;  %v24371_v57 = vld [vmem:[#allocation8 + $0x258] ss:$56 sps:$4 sm:$0xff]  }
 0x60e   :  { %v13102_v34 = vpop.f32.mrf.mxu0  ;;  %13359 = vmatmul.mubr.bf16.vlgmr.msra.gmra.mxu0 %v26596_v17 }
 0x60f   :  { %v13103_v26 = vadd.f32 %v13102_v34, %v26797_v45  ;;  %13413 = vmatpush1.bf16.msra.mxu0 %v24359_v41  ;;  %13444 = vmatprep.mubr.bf16.mxu0 %v26505_v2  ;;  %v24379_v45 = vld [vmem:[#allocation8 + $0x1ec] ss:$56 sps:$4 sm:$0xff]   ;;  %v24374_v34 = vld [vmem:[#allocation8 + $0x26a0] ss:$56 sps:$4 sm:$0xff]  }
 0x610   :  { %13394 = vmatpush2.bf16.msra.mxu1 %v24356_v54  ;;  %v26809_v31 = vpop.f32.mrf.mxu0  ;;  %13414 = vmatprep.subr.bf16.mxu0 %v24367_v9  ;;  %v24376_v41 = vld [vmem:[#allocation8 + $0x26a4] ss:$56 sps:$4 sm:$0xff]   ;;  %v24377_v54 = vld [vmem:[#allocation8 + $0x1e8] ss:$56 sps:$4 sm:$0xff]  }
 0x611   :  { %27362 = vst [vmem:[#allocation45_spill] sm:$0xff] %v26809_v31  ;;  %13395 = vmatprep.subr.bf16.mxu1 %v24364_v16  ;;  %v24382_v9 = vld [vmem:[#allocation8 + $0x17c] ss:$56 sps:$4 sm:$0xff]   ;;  %v24380_v31 = vld [vmem:[#allocation8 + $0x178] ss:$56 sps:$4 sm:$0xff]  }
 0x612   :  { %v13106_v38 = vpop.f32.mrf.mxu0  ;;  %v24385_v16 = vld [vmem:[#allocation8 + $0xa3c] ss:$56 sps:$4 sm:$0xff]  }
 0x613   :  { %v13107_v59 = vadd.f32 %v13106_v38, %v26802_v22  ;;  %13415 = vmatpush1.bf16.msra.mxu0 %v24365_v29  ;;  %v24383_v22 = vld [vmem:[#allocation8 + $0xa38] ss:$56 sps:$4 sm:$0xff]   ;;  %v26812_v29 = vpop.f32.mrf.mxu1 }
 0x614   :  { %13396 = vmatpush2.bf16.msra.mxu1 %v24362_v13  ;;  %13416 = vmatprep.subr.bf16.mxu0 %v24373_v7  ;;  %27363 = vst [vmem:[#allocation46_spill] sm:$0xff] %v26812_v29  ;;  %v24388_v13 = vld [vmem:[#allocation8 + $0x10c] ss:$56 sps:$4 sm:$0xff]  }
 0x615   :  { %13397 = vmatprep.subr.bf16.mxu1 %v24370_v46  ;;  %v24391_v7 = vld [vmem:[#allocation8 + $0x9cc] ss:$56 sps:$4 sm:$0xff]  }
 0x617   :  { %13417 = vmatpush1.bf16.msra.mxu0 %v24371_v57  ;;  %v24389_v57 = vld [vmem:[#allocation8 + $0x9c8] ss:$56 sps:$4 sm:$0xff]  }
 0x618   :  { %13398 = vmatpush2.bf16.msra.mxu1 %v24368_v44  ;;  %13418 = vmatprep.subr.bf16.mxu0 %v24379_v45  ;;  %v24386_v44 = vld [vmem:[#allocation8 + $0x108] ss:$56 sps:$4 sm:$0xff]   ;;  %v24394_v45 = vld [vmem:[#allocation8 + $0x9c] ss:$56 sps:$4 sm:$0xff]  }
 0x619   :  { %13399 = vmatprep.subr.bf16.mxu1 %v24376_v41 }
 0x61b   :  { %13419 = vmatpush1.bf16.msra.mxu0 %v24377_v54  ;;  %v24397_v54 = vld [vmem:[#allocation8 + $0x95c] ss:$56 sps:$4 sm:$0xff]  }
 0x61c   :  { %13400 = vmatpush2.bf16.msra.mxu1 %v24374_v34  ;;  %13420 = vmatprep.subr.bf16.mxu0 %v24382_v9  ;;  %v24392_v9 = vld [vmem:[#allocation8 + $0x98] ss:$56 sps:$4 sm:$0xff]  }
 0x61d   :  { %13455 = vmatprep.subr.bf16.mxu1 %v24385_v16 }
 0x61f   :  { %v13145_v46 = vpop.f32.mrf.mxu1  ;;  %13402 = vmatmul.mubr.bf16.vlgmr.msra.gmra.mxu1 %v26606_v61  ;;  %13421 = vmatpush1.bf16.msra.mxu0 %v24380_v31  ;;  %v24395_v31 = vld [vmem:[#allocation8 + $0x958] ss:$56 sps:$4 sm:$0xff]  }
 0x620   :  { %v13146_v38 = vadd.f32 %v13145_v46, %v13103_v26  ;;  %13456 = vmatpush1.bf16.msra.mxu1 %v24383_v22  ;;  %13487 = vmatprep.mubr.bf16.mxu1 %v26507_v5  ;;  %v24400_v26 = vld [vmem:[#allocation8 + $0x2c] ss:$56 sps:$4 sm:$0xff]  }
 0x621   :  { %v26816_v41 = vpop.f32.mrf.mxu1  ;;  %13422 = vmatprep.subr.bf16.mxu0 %v24388_v13  ;;  %13457 = vmatprep.subr.bf16.mxu1 %v24391_v7  ;;  %v24403_v22 = vld [vmem:[#allocation8 + $0x8ec] ss:$56 sps:$4 sm:$0xff]   ;;  %v24398_v13 = vld [vmem:[#allocation8 + $0x28] ss:$56 sps:$4 sm:$0xff]  }
 0x622   :  { %27364 = vst [vmem:[#allocation47_spill] sm:$0xff] %v26816_v41  ;;  %v13964_v16 = vmul.f32 %v26654_v8, %v13146_v38  ;;  %vm13935_vm14 = vcmp.gt.f32.partialorder %v13146_v38, 0.0 }
 0x623   :  { %v13149_v34 = vpop.f32.mrf.mxu1  ;;  %13423 = vmatpush1.bf16.msra.mxu0 %v24386_v44  ;;  %v24401_v44 = vld [vmem:[#allocation8 + $0x8e8] ss:$56 sps:$4 sm:$0xff]  }
 0x624   :  { %v13150_v29 = vadd.f32 %v13149_v34, %v13107_v59  ;;  %13458 = vmatpush1.bf16.msra.mxu1 %v24389_v57  ;;  %13424 = vmatprep.subr.bf16.mxu0 %v24394_v45  ;;  %v13992_v7 = vsel %vm13935_vm14, %v13146_v38, %v13964_v16  ;;  %v24409_v59 = vld [vmem:[#allocation8 + $0x87c] ss:$56 sps:$4 sm:$0xff]   ;;  %v24404_v57 = vld [vmem:[#allocation8 + $0x6b8] ss:$56 sps:$4 sm:$0xff]   ;;  %v24415_v34 = vld [vmem:[#allocation8 + $0x80c] ss:$56 sps:$4 sm:$0xff]  }
 0x625   :  { %13459 = vmatprep.subr.bf16.mxu1 %v24397_v54  ;;  %v24407_v45 = vld [vmem:[#allocation8 + $0x878] ss:$56 sps:$4 sm:$0xff]   ;;  %v24412_v54 = vld [vmem:[#allocation8 + $0x64c] ss:$56 sps:$4 sm:$0xff]   ;;  %v24418_v38 = vld [vmem:[#allocation8 + $0x5dc] ss:$56 sps:$4 sm:$0xff]  }
 0x626   :  { %vm13949_vm15 = vcmp.gt.f32.partialorder %v13150_v29, 0.0  ;;  %v13978_v46 = vmul.f32 %v26654_v8, %v13150_v29  ;;  %v24421_v16 = vld [vmem:[#allocation8 + $0x79c] ss:$56 sps:$4 sm:$0xff]  }
 0x627   :  { %13425 = vmatpush1.bf16.msra.mxu0 %v24392_v9  ;;  %v24410_v9 = vld [vmem:[#allocation8 + $0x648] ss:$56 sps:$4 sm:$0xff]  }
 0x628   :  { %v14006_v41 = vsel %vm13949_vm15, %v13150_v29, %v13978_v46  ;;  %13460 = vmatpush1.bf16.msra.mxu1 %v24395_v31  ;;  %13426 = vmatprep.subr.bf16.mxu0 %v24400_v26  ;;  %v24413_v29 = vld [vmem:[#allocation8 + $0x808] ss:$56 sps:$4 sm:$0xff]   ;;  %v24419_v31 = vld [vmem:[#allocation8 + $0x798] ss:$56 sps:$4 sm:$0xff]   ;;  %v24424_v26 = vld [vmem:[#allocation8 + $0x56c] ss:$56 sps:$4 sm:$0xff]  }
 0x629   :  { %v26820_v28 = vpack.c.bf16 %v14006_v41, %v13992_v7  ;;  %13461 = vmatprep.subr.bf16.mxu1 %v24403_v22  ;;  %v24416_v41 = vld [vmem:[#allocation8 + $0x5d8] ss:$56 sps:$4 sm:$0xff]   ;;  %v24422_v22 = vld [vmem:[#allocation8 + $0x568] ss:$56 sps:$4 sm:$0xff]   ;;  %v24433_v7 = vld [vmem:[#allocation8 + $0xdbc] ss:$56 sps:$4 sm:$0xff]  }
 0x62a   :  { %v24425_v46 = vld [vmem:[#allocation8 + $0x728] ss:$56 sps:$4 sm:$0xff]  }
 0x62b   :  { %27365 = vst [vmem:[#allocation48_spill] sm:$0xff] %v26820_v28  ;;  %13427 = vmatpush1.bf16.msra.mxu0 %v24398_v13  ;;  %v24430_v13 = vld [vmem:[#allocation8 + $0x4fc] ss:$56 sps:$4 sm:$0xff]  }
 0x62c   :  { %13462 = vmatpush1.bf16.msra.mxu1 %v24401_v44  ;;  %13428 = vmatprep.subr.bf16.mxu0 %v24406_v53  ;;  %v24427_v53 = vld [vmem:[#allocation8 + $0x72c] ss:$56 sps:$4 sm:$0xff]   ;;  %v24428_v44 = vld [vmem:[#allocation8 + $0x4f8] ss:$56 sps:$4 sm:$0xff]  }
 0x62d   :  { %13463 = vmatprep.subr.bf16.mxu1 %v24409_v59  ;;  %v24431_v59 = vld [vmem:[#allocation8 + $0xdb8] ss:$56 sps:$4 sm:$0xff]  }
 0x62f   :  { %13429 = vmatpush2.bf16.msra.mxu0 %v24404_v57  ;;  %v24436_v57 = vld [vmem:[#allocation8 + $0x48c] ss:$56 sps:$4 sm:$0xff]  }
 0x630   :  { %13464 = vmatpush1.bf16.msra.mxu1 %v24407_v45  ;;  %13430 = vmatprep.subr.bf16.mxu0 %v24412_v54  ;;  %v24439_v45 = vld [vmem:[#allocation8 + $0xd4c] ss:$56 sps:$4 sm:$0xff]   ;;  %v24434_v54 = vld [vmem:[#allocation8 + $0x488] ss:$56 sps:$4 sm:$0xff]  }
 0x631   :  { %13465 = vmatprep.subr.bf16.mxu1 %v24415_v34  ;;  %v24437_v34 = vld [vmem:[#allocation8 + $0xd48] ss:$56 sps:$4 sm:$0xff]  }
 0x633   :  { %13431 = vmatpush2.bf16.msra.mxu0 %v24410_v9  ;;  %v24442_v9 = vld [vmem:[#allocation8 + $0x41c] ss:$56 sps:$4 sm:$0xff]  }
 0x634   :  { %13466 = vmatpush1.bf16.msra.mxu1 %v24413_v29  ;;  %13432 = vmatprep.subr.bf16.mxu0 %v24418_v38  ;;  %v24445_v29 = vld [vmem:[#allocation8 + $0xcdc] ss:$56 sps:$4 sm:$0xff]   ;;  %v24440_v38 = vld [vmem:[#allocation8 + $0x418] ss:$56 sps:$4 sm:$0xff]  }
 0x635   :  { %13467 = vmatprep.subr.bf16.mxu1 %v24421_v16  ;;  %v24443_v16 = vld [vmem:[#allocation8 + $0xcd8] ss:$56 sps:$4 sm:$0xff]  }
 0x637   :  { %13433 = vmatpush2.bf16.msra.mxu0 %v24416_v41  ;;  %v24448_v41 = vld [vmem:[#allocation8 + $0x3ac] ss:$56 sps:$4 sm:$0xff]  }
 0x638   :  { %13468 = vmatpush1.bf16.msra.mxu1 %v24419_v31  ;;  %13434 = vmatprep.subr.bf16.mxu0 %v24424_v26  ;;  %v24451_v31 = vld [vmem:[#allocation8 + $0xc6c] ss:$56 sps:$4 sm:$0xff]   ;;  %v24446_v26 = vld [vmem:[#allocation8 + $0x3a8] ss:$56 sps:$4 sm:$0xff]  }
 0x639   :  { %13469 = vmatprep.subr.bf16.mxu1 %v24427_v53  ;;  %v24449_v53 = vld [vmem:[#allocation8 + $0xc68] ss:$56 sps:$4 sm:$0xff]  }
 0x63b   :  { %13435 = vmatpush2.bf16.msra.mxu0 %v24422_v22  ;;  %v24457_v22 = vld [vmem:[#allocation8 + $0x113c] ss:$56 sps:$4 sm:$0xff]  }
 0x63c   :  { %13470 = vmatpush1.bf16.msra.mxu1 %v24425_v46  ;;  %13436 = vmatprep.subr.bf16.mxu0 %v24430_v13  ;;  %v24454_v46 = vld [vmem:[#allocation8 + $0xbfc] ss:$56 sps:$4 sm:$0xff]   ;;  %v24455_v13 = vld [vmem:[#allocation8 + $0x1138] ss:$56 sps:$4 sm:$0xff]  }
 0x63d   :  { %13471 = vmatprep.subr.bf16.mxu1 %v24433_v7  ;;  %v24452_v7 = vld [vmem:[#allocation8 + $0xbf8] ss:$56 sps:$4 sm:$0xff]  }
 0x63f   :  { %13437 = vmatpush2.bf16.msra.mxu0 %v24428_v44  ;;  %v24463_v44 = vld [vmem:[#allocation8 + $0x10cc] ss:$56 sps:$4 sm:$0xff]  }
 0x640   :  { %13472 = vmatpush2.bf16.msra.mxu1 %v24431_v59  ;;  %13438 = vmatprep.subr.bf16.mxu0 %v24436_v57  ;;  %v24460_v59 = vld [vmem:[#allocation8 + $0xb8c] ss:$56 sps:$4 sm:$0xff]   ;;  %v24461_v57 = vld [vmem:[#allocation8 + $0x10c8] ss:$56 sps:$4 sm:$0xff]  }
 0x641   :  { %13473 = vmatprep.subr.bf16.mxu1 %v24439_v45  ;;  %v24458_v45 = vld [vmem:[#allocation8 + $0xb88] ss:$56 sps:$4 sm:$0xff]  }
 0x643   :  { %13439 = vmatpush2.bf16.msra.mxu0 %v24434_v54  ;;  %v24469_v54 = vld [vmem:[#allocation8 + $0x105c] ss:$56 sps:$4 sm:$0xff]  }
 0x644   :  { %13474 = vmatpush2.bf16.msra.mxu1 %v24437_v34  ;;  %13440 = vmatprep.subr.bf16.mxu0 %v24442_v9  ;;  %v24466_v34 = vld [vmem:[#allocation8 + $0xb1c] ss:$56 sps:$4 sm:$0xff]   ;;  %v24467_v9 = vld [vmem:[#allocation8 + $0x1058] ss:$56 sps:$4 sm:$0xff]  }
 0x645   :  { %13475 = vmatprep.subr.bf16.mxu1 %v24445_v29  ;;  %v24464_v29 = vld [vmem:[#allocation8 + $0xb18] ss:$56 sps:$4 sm:$0xff]  }
 0x647   :  { %13441 = vmatpush2.bf16.msra.mxu0 %v24440_v38  ;;  %v24475_v38 = vld [vmem:[#allocation8 + $0xfec] ss:$56 sps:$4 sm:$0xff]  }
 0x648   :  { %13476 = vmatpush2.bf16.msra.mxu1 %v24443_v16  ;;  %13442 = vmatprep.subr.bf16.mxu0 %v24448_v41  ;;  %v26824_v16 = vpop.f32.mrf.mxu0  ;;  %v24472_v41 = vld [vmem:[#allocation8 + $0xaac] ss:$56 sps:$4 sm:$0xff]  }
 0x649   :  { %13477 = vmatprep.subr.bf16.mxu1 %v24451_v31  ;;  %v26826_v31 = vld [vmem:[#allocation9 + $0x8] sm:$0x3f] }
 0x64b   :  { %13443 = vmatpush2.bf16.msra.mxu0 %v24446_v26 }
 0x64c   :  { %13478 = vmatpush2.bf16.msra.mxu1 %v24449_v53  ;;  %13498 = vmatprep.subr.bf16.mxu0 %v24457_v22  ;;  %v24473_v53 = vld [vmem:[#allocation8 + $0xfe8] ss:$56 sps:$4 sm:$0xff]  }
 0x64d   :  { %13479 = vmatprep.subr.bf16.mxu1 %v24454_v46  ;;  %v24470_v22 = vld [vmem:[#allocation8 + $0xaa8] ss:$56 sps:$4 sm:$0xff]   ;;  %v24478_v46 = vld [vmem:[#allocation8 + $0xf7c] ss:$56 sps:$4 sm:$0xff]  }
 0x64e   :  { %13445 = vmatmul.mubr.bf16.vlgmr.msra.gmra.mxu0 %v26396_v36  ;;  %v13188_v26 = vpop.f32.mrf.mxu0 }
 0x64f   :  { %13499 = vmatpush1.bf16.msra.mxu0 %v24455_v13  ;;  %13530 = vmatprep.mubr.bf16.mxu0 %v26551_v35  ;;  %v24481_v13 = vld [vmem:[#allocation8 + $0x183c] ss:$56 sps:$4 sm:$0xff]  }
 0x650   :  { %13480 = vmatpush2.bf16.msra.mxu1 %v24452_v7  ;;  %13500 = vmatprep.subr.bf16.mxu0 %v24463_v44  ;;  %v5367_v7 = vrot.slane %v26826_v31, %v26360_v19  ;;  %v26830_v44 = vpop.f32.mrf.mxu0 }
 0x651   :  { %13481 = vmatprep.subr.bf16.mxu1 %v24460_v59  ;;  %27366 = vst [vmem:[#allocation49_spill] sm:$0xff] %v26830_v44  ;;  %v24476_v59 = vld [vmem:[#allocation8 + $0xf78] ss:$56 sps:$4 sm:$0xff]  }
 0x652   :  { %v24488_v44 = vld [vmem:[#allocation8 + $0xe98] ss:$56 sps:$4 sm:$0xff]  }
 0x653   :  { %13501 = vmatpush1.bf16.msra.mxu0 %v24461_v57  ;;  %v24479_v57 = vld [vmem:[#allocation8 + $0x1838] ss:$56 sps:$4 sm:$0xff]  }
 0x654   :  { %13482 = vmatpush2.bf16.msra.mxu1 %v24458_v45  ;;  %13502 = vmatprep.subr.bf16.mxu0 %v24469_v54  ;;  %v26832_v45 = vpop.f32.mrf.mxu1  ;;  %v24484_v54 = vld [vmem:[#allocation8 + $0xf0c] ss:$56 sps:$4 sm:$0xff]  }
 0x655   :  { %13483 = vmatprep.subr.bf16.mxu1 %v24466_v34  ;;  %27367 = vst [vmem:[#allocation50_spill] sm:$0xff] %v26832_v45  ;;  %v24487_v34 = vld [vmem:[#allocation8 + $0x17cc] ss:$56 sps:$4 sm:$0xff]  }
 0x657   :  { %13503 = vmatpush1.bf16.msra.mxu0 %v24467_v9  ;;  %v13189_v9 = vadd.f32 %v13188_v26, %v5367_v7 }
 0x658   :  { %13484 = vmatpush2.bf16.msra.mxu1 %v24464_v29  ;;  %13504 = vmatprep.subr.bf16.mxu0 %v24475_v38  ;;  %v13192_v29 = vpop.f32.mrf.mxu0 }
 0x659   :  { %13485 = vmatprep.subr.bf16.mxu1 %v24472_v41  ;;  %v24482_v41 = vld [vmem:[#allocation8 + $0xf08] ss:$56 sps:$4 sm:$0xff]   ;;  %v13193_v28 = vadd.f32 %v13192_v29, %v5367_v7  ;;  %v24500_v7 = vld [vmem:[#allocation8 + $0x14b8] ss:$56 sps:$4 sm:$0xff]   ;;  %v24508_v29 = vld [vmem:[#allocation8 + $0x144c] ss:$56 sps:$4 sm:$0xff]  }
 0x65b   :  { %13505 = vmatpush1.bf16.msra.mxu0 %v24473_v53  ;;  %v24485_v53 = vld [vmem:[#allocation8 + $0x17c8] ss:$56 sps:$4 sm:$0xff]  }
 0x65c   :  { %13486 = vmatpush2.bf16.msra.mxu1 %v24470_v22  ;;  %13506 = vmatprep.subr.bf16.mxu0 %v24478_v46  ;;  %v24490_v22 = vld [vmem:[#allocation8 + $0xe9c] ss:$56 sps:$4 sm:$0xff]  }
 0x65d   :  { %13541 = vmatprep.subr.bf16.mxu1 %v24481_v13  ;;  %v24493_v13 = vld [vmem:[#allocation8 + $0x175c] ss:$56 sps:$4 sm:$0xff]  }
 0x65f   :  { %v13231_v38 = vpop.f32.mrf.mxu1  ;;  %13488 = vmatmul.mubr.bf16.vlgmr.msra.gmra.mxu1 %v26421_v15  ;;  %13507 = vmatpush1.bf16.msra.mxu0 %v24476_v59  ;;  %v24491_v59 = vld [vmem:[#allocation8 + $0x1758] ss:$56 sps:$4 sm:$0xff]  }
 0x660   :  { %v26835_v19 = vadd.f32 %v13231_v38, %v13189_v9  ;;  %13542 = vmatpush1.bf16.msra.mxu1 %v24479_v57  ;;  %13573 = vmatprep.mubr.bf16.mxu1 %v26554_v25  ;;  %v24496_v9 = vld [vmem:[#allocation8 + $0xe2c] ss:$56 sps:$4 sm:$0xff]   ;;  %v24494_v38 = vld [vmem:[#allocation8 + $0xe28] ss:$56 sps:$4 sm:$0xff]  }
 0x661   :  { %v26838_v46 = vpop.f32.mrf.mxu1  ;;  %13508 = vmatprep.subr.bf16.mxu0 %v24484_v54  ;;  %13543 = vmatprep.subr.bf16.mxu1 %v24487_v34  ;;  %v24499_v57 = vld [vmem:[#allocation8 + $0x16ec] ss:$56 sps:$4 sm:$0xff]   ;;  %v24502_v54 = vld [vmem:[#allocation8 + $0x14bc] ss:$56 sps:$4 sm:$0xff]  }
 0x662   :  { %27368 = vst [vmem:[#allocation51_spill] sm:$0xff] %v26838_v46  ;;  %v24497_v46 = vld [vmem:[#allocation8 + $0x16e8] ss:$56 sps:$4 sm:$0xff]   ;;  %v24505_v34 = vld [vmem:[#allocation8 + $0x167c] ss:$56 sps:$4 sm:$0xff]  }
 0x663   :  { %v13235_v26 = vpop.f32.mrf.mxu1  ;;  %13509 = vmatpush1.bf16.msra.mxu0 %v24482_v41  ;;  %v24511_v41 = vld [vmem:[#allocation8 + $0x160c] ss:$56 sps:$4 sm:$0xff]  }
 0x664   :  { %v26840_v45 = vadd.f32 %v13235_v26, %v13193_v28  ;;  %13544 = vmatpush1.bf16.msra.mxu1 %v24485_v53  ;;  %13510 = vmatprep.subr.bf16.mxu0 %v24490_v22  ;;  %v24503_v28 = vld [vmem:[#allocation8 + $0x1678] ss:$56 sps:$4 sm:$0xff]   ;;  %v24506_v53 = vld [vmem:[#allocation8 + $0x1448] ss:$56 sps:$4 sm:$0xff]   ;;  %v24514_v22 = vld [vmem:[#allocation8 + $0x13dc] ss:$56 sps:$4 sm:$0xff]  }
 0x665   :  { %13545 = vmatprep.subr.bf16.mxu1 %v24493_v13  ;;  %v24517_v13 = vld [vmem:[#allocation8 + $0x159c] ss:$56 sps:$4 sm:$0xff]   ;;  %v24512_v26 = vld [vmem:[#allocation8 + $0x13d8] ss:$56 sps:$4 sm:$0xff]  }
 0x667   :  { %13511 = vmatpush1.bf16.msra.mxu0 %v24488_v44  ;;  %v24509_v44 = vld [vmem:[#allocation8 + $0x1608] ss:$56 sps:$4 sm:$0xff]  }
 0x668   :  { %13546 = vmatpush1.bf16.msra.mxu1 %v24491_v59  ;;  %13512 = vmatprep.subr.bf16.mxu0 %v24496_v9  ;;  %v24515_v59 = vld [vmem:[#allocation8 + $0x1598] ss:$56 sps:$4 sm:$0xff]   ;;  %v24520_v9 = vld [vmem:[#allocation8 + $0x136c] ss:$56 sps:$4 sm:$0xff]  }
 0x669   :  { %13547 = vmatprep.subr.bf16.mxu1 %v24499_v57  ;;  %v24518_v57 = vld [vmem:[#allocation8 + $0x1368] ss:$56 sps:$4 sm:$0xff]  }
 0x66b   :  { %13513 = vmatpush1.bf16.msra.mxu0 %v24494_v38  ;;  %v24521_v38 = vld [vmem:[#allocation8 + $0x1528] ss:$56 sps:$4 sm:$0xff]  }
 0x66c   :  { %13548 = vmatpush1.bf16.msra.mxu1 %v24497_v46  ;;  %13514 = vmatprep.subr.bf16.mxu0 %v24502_v54  ;;  %v24523_v46 = vld [vmem:[#allocation8 + $0x152c] ss:$56 sps:$4 sm:$0xff]   ;;  %v24526_v54 = vld [vmem:[#allocation8 + $0x12fc] ss:$56 sps:$4 sm:$0xff]  }
 0x66d   :  { %13549 = vmatprep.subr.bf16.mxu1 %v24505_v34  ;;  %v24529_v34 = vld [vmem:[#allocation8 + $0x1bbc] ss:$56 sps:$4 sm:$0xff]  }
 0x66f   :  { %13515 = vmatpush2.bf16.msra.mxu0 %v24500_v7  ;;  %v24524_v7 = vld [vmem:[#allocation8 + $0x12f8] ss:$56 sps:$4 sm:$0xff]  }
 0x670   :  { %13550 = vmatpush1.bf16.msra.mxu1 %v24503_v28  ;;  %13516 = vmatprep.subr.bf16.mxu0 %v24508_v29  ;;  %v24527_v28 = vld [vmem:[#allocation8 + $0x1bb8] ss:$56 sps:$4 sm:$0xff]   ;;  %v24532_v29 = vld [vmem:[#allocation8 + $0x128c] ss:$56 sps:$4 sm:$0xff]  }
 0x671   :  { %13551 = vmatprep.subr.bf16.mxu1 %v24511_v41  ;;  %v24535_v41 = vld [vmem:[#allocation8 + $0x1b4c] ss:$56 sps:$4 sm:$0xff]  }
 0x673   :  { %13517 = vmatpush2.bf16.msra.mxu0 %v24506_v53  ;;  %v24530_v53 = vld [vmem:[#allocation8 + $0x1288] ss:$56 sps:$4 sm:$0xff]  }
 0x674   :  { %13552 = vmatpush1.bf16.msra.mxu1 %v24509_v44  ;;  %13518 = vmatprep.subr.bf16.mxu0 %v24514_v22  ;;  %v24533_v44 = vld [vmem:[#allocation8 + $0x1b48] ss:$56 sps:$4 sm:$0xff]   ;;  %v24538_v22 = vld [vmem:[#allocation8 + $0x121c] ss:$56 sps:$4 sm:$0xff]  }
 0x675   :  { %13553 = vmatprep.subr.bf16.mxu1 %v24517_v13  ;;  %v24541_v13 = vld [vmem:[#allocation8 + $0x1adc] ss:$56 sps:$4 sm:$0xff]  }
 0x677   :  { %13519 = vmatpush2.bf16.msra.mxu0 %v24512_v26  ;;  %v24536_v26 = vld [vmem:[#allocation8 + $0x1218] ss:$56 sps:$4 sm:$0xff]  }
 0x678   :  { %13554 = vmatpush1.bf16.msra.mxu1 %v24515_v59  ;;  %13520 = vmatprep.subr.bf16.mxu0 %v24520_v9  ;;  %v24539_v59 = vld [vmem:[#allocation8 + $0x1ad8] ss:$56 sps:$4 sm:$0xff]   ;;  %v24544_v9 = vld [vmem:[#allocation8 + $0x11ac] ss:$56 sps:$4 sm:$0xff]  }
 0x679   :  { %13555 = vmatprep.subr.bf16.mxu1 %v24523_v46  ;;  %v24547_v46 = vld [vmem:[#allocation8 + $0x1a6c] ss:$56 sps:$4 sm:$0xff]  }
 0x67b   :  { %13521 = vmatpush2.bf16.msra.mxu0 %v24518_v57  ;;  %v24542_v57 = vld [vmem:[#allocation8 + $0x11a8] ss:$56 sps:$4 sm:$0xff]  }
 0x67c   :  { %13556 = vmatpush1.bf16.msra.mxu1 %v24521_v38  ;;  %13522 = vmatprep.subr.bf16.mxu0 %v24526_v54  ;;  %v24545_v38 = vld [vmem:[#allocation8 + $0x1a68] ss:$56 sps:$4 sm:$0xff]   ;;  %v24553_v54 = vld [vmem:[#allocation8 + $0x1f3c] ss:$56 sps:$4 sm:$0xff]  }
 0x67d   :  { %13557 = vmatprep.subr.bf16.mxu1 %v24529_v34  ;;  %v24550_v34 = vld [vmem:[#allocation8 + $0x19fc] ss:$56 sps:$4 sm:$0xff]  }
 0x67f   :  { %13523 = vmatpush2.bf16.msra.mxu0 %v24524_v7  ;;  %v24551_v7 = vld [vmem:[#allocation8 + $0x1f38] ss:$56 sps:$4 sm:$0xff]  }
 0x680   :  { %13558 = vmatpush2.bf16.msra.mxu1 %v24527_v28  ;;  %13524 = vmatprep.subr.bf16.mxu0 %v24532_v29  ;;  %v26842_v28 = vpop.f32.mrf.mxu0  ;;  %v24548_v29 = vld [vmem:[#allocation8 + $0x19f8] ss:$56 sps:$4 sm:$0xff]  }
 0x681   :  { %13559 = vmatprep.subr.bf16.mxu1 %v24535_v41  ;;  %v24559_v41 = vld [vmem:[#allocation8 + $0x1ecc] ss:$56 sps:$4 sm:$0xff]  }
 0x683   :  { %13525 = vmatpush2.bf16.msra.mxu0 %v24530_v53  ;;  %v24556_v53 = vld [vmem:[#allocation8 + $0x198c] ss:$56 sps:$4 sm:$0xff]  }
 0x684   :  { %13560 = vmatpush2.bf16.msra.mxu1 %v24533_v44  ;;  %13526 = vmatprep.subr.bf16.mxu0 %v24538_v22 }
 0x685   :  { %13561 = vmatprep.subr.bf16.mxu1 %v24541_v13  ;;  %v24557_v13 = vld [vmem:[#allocation8 + $0x1ec8] ss:$56 sps:$4 sm:$0xff]  }
 0x687   :  { %13527 = vmatpush2.bf16.msra.mxu0 %v24536_v26 }
 0x688   :  { %13562 = vmatpush2.bf16.msra.mxu1 %v24539_v59  ;;  %13528 = vmatprep.subr.bf16.mxu0 %v24544_v9  ;;  %v24554_v59 = vld [vmem:[#allocation8 + $0x1988] ss:$56 sps:$4 sm:$0xff]   ;;  %v24565_v9 = vld [vmem:[#allocation8 + $0x1e5c] ss:$56 sps:$4 sm:$0xff]  }
 0x689   :  { %13563 = vmatprep.subr.bf16.mxu1 %v24547_v46  ;;  %v24562_v46 = vld [vmem:[#allocation8 + $0x191c] ss:$56 sps:$4 sm:$0xff]  }
 0x68b   :  { %13529 = vmatpush2.bf16.msra.mxu0 %v24542_v57 }
 0x68c   :  { %13564 = vmatpush2.bf16.msra.mxu1 %v24545_v38  ;;  %13584 = vmatprep.subr.bf16.mxu0 %v24553_v54  ;;  %v24563_v54 = vld [vmem:[#allocation8 + $0x1e58] ss:$56 sps:$4 sm:$0xff]  }
 0x68d   :  { %13565 = vmatprep.subr.bf16.mxu1 %v24550_v34  ;;  %v24560_v34 = vld [vmem:[#allocation8 + $0x1918] ss:$56 sps:$4 sm:$0xff]  }
 0x68e   :  { %v13274_v44 = vpop.f32.mrf.mxu0  ;;  %13531 = vmatmul.mubr.bf16.vlgmr.msra.gmra.mxu0 %v26483_v6 }
 0x68f   :  { %v13275_v22 = vadd.f32 %v13274_v44, %v26835_v19  ;;  %13585 = vmatpush1.bf16.msra.mxu0 %v24551_v7  ;;  %13616 = vmatprep.mubr.bf16.mxu0 %v26579_v39  ;;  %v24571_v19 = vld [vmem:[#allocation8 + $0x1dec] ss:$56 sps:$4 sm:$0xff]   ;;  %v24566_v44 = vld [vmem:[#allocation8 + $0x18a8] ss:$56 sps:$4 sm:$0xff]  }
 0x690   :  { %13566 = vmatpush2.bf16.msra.mxu1 %v24548_v29  ;;  %v26847_v26 = vpop.f32.mrf.mxu0  ;;  %13586 = vmatprep.subr.bf16.mxu0 %v24559_v41  ;;  %v24568_v7 = vld [vmem:[#allocation8 + $0x18ac] ss:$56 sps:$4 sm:$0xff]   ;;  %v24569_v29 = vld [vmem:[#allocation8 + $0x1de8] ss:$56 sps:$4 sm:$0xff]   ;;  %v24574_v41 = vld [vmem:[#allocation8 + $0x1d7c] ss:$56 sps:$4 sm:$0xff]  }
 0x691   :  { %27369 = vst [vmem:[#allocation52_spill] sm:$0xff] %v26847_v26  ;;  %13567 = vmatprep.subr.bf16.mxu1 %v24556_v53  ;;  %v24577_v53 = vld [vmem:[#allocation8 + $0x263c] ss:$56 sps:$4 sm:$0xff]   ;;  %v24572_v26 = vld [vmem:[#allocation8 + $0x1d78] ss:$56 sps:$4 sm:$0xff]  }
 0x692   :  { %v13278_v57 = vpop.f32.mrf.mxu0 }
 0x693   :  { %v13279_v38 = vadd.f32 %v13278_v57, %v26840_v45  ;;  %13587 = vmatpush1.bf16.msra.mxu0 %v24557_v13  ;;  %v24575_v45 = vld [vmem:[#allocation8 + $0x2638] ss:$56 sps:$4 sm:$0xff]   ;;  %v26850_v13 = vpop.f32.mrf.mxu1  ;;  %v24578_v57 = vld [vmem:[#allocation8 + $0x1d08] ss:$56 sps:$4 sm:$0xff]  }
 0x694   :  { %13568 = vmatpush2.bf16.msra.mxu1 %v24554_v59  ;;  %13588 = vmatprep.subr.bf16.mxu0 %v24565_v9  ;;  %27370 = vst [vmem:[#allocation53_spill] sm:$0xff] %v26850_v13  ;;  %v24580_v59 = vld [vmem:[#allocation8 + $0x1d0c] ss:$56 sps:$4 sm:$0xff]   ;;  %v24593_v13 = vld [vmem:[#allocation8 + $0x24e8] ss:$56 sps:$4 sm:$0xff]  }
 0x695   :  { %13569 = vmatprep.subr.bf16.mxu1 %v24562_v46  ;;  %v24583_v9 = vld [vmem:[#allocation8 + $0x25cc] ss:$56 sps:$4 sm:$0xff]  }
 0x697   :  { %13589 = vmatpush1.bf16.msra.mxu0 %v24563_v54 }
 0x698   :  { %13570 = vmatpush2.bf16.msra.mxu1 %v24560_v34  ;;  %13590 = vmatprep.subr.bf16.mxu0 %v24571_v19  ;;  %v24581_v34 = vld [vmem:[#allocation8 + $0x25c8] ss:$56 sps:$4 sm:$0xff]   ;;  %v24586_v19 = vld [vmem:[#allocation8 + $0x1c9c] ss:$56 sps:$4 sm:$0xff]  }
 0x699   :  { %13571 = vmatprep.subr.bf16.mxu1 %v24568_v7 }
 0x69b   :  { %13591 = vmatpush1.bf16.msra.mxu0 %v24569_v29  ;;  %v24589_v29 = vld [vmem:[#allocation8 + $0x255c] ss:$56 sps:$4 sm:$0xff]  }
 0x69c   :  { %13572 = vmatpush2.bf16.msra.mxu1 %v24566_v44  ;;  %13592 = vmatprep.subr.bf16.mxu0 %v24574_v41  ;;  %v24584_v41 = vld [vmem:[#allocation8 + $0x1c98] ss:$56 sps:$4 sm:$0xff]  }
 0x69d   :  { %13627 = vmatprep.subr.bf16.mxu1 %v24577_v53 }
 0x69f   :  { %v13317_v46 = vpop.f32.mrf.mxu1  ;;  %13574 = vmatmul.mubr.bf16.vlgmr.msra.gmra.mxu1 %v26536_v12  ;;  %13593 = vmatpush1.bf16.msra.mxu0 %v24572_v26  ;;  %v24587_v26 = vld [vmem:[#allocation8 + $0x2558] ss:$56 sps:$4 sm:$0xff]  }
 0x6a0   :  { %v26853_v54 = vadd.f32 %v13317_v46, %v13275_v22  ;;  %13628 = vmatpush1.bf16.msra.mxu1 %v24575_v45  ;;  %13659 = vmatprep.mubr.bf16.mxu1 %v26604_v51  ;;  %v24592_v22 = vld [vmem:[#allocation8 + $0x1c2c] ss:$56 sps:$4 sm:$0xff]   ;;  %v24590_v46 = vld [vmem:[#allocation8 + $0x1c28] ss:$56 sps:$4 sm:$0xff]  }
 0x6a1   :  { %v26856_v7 = vpop.f32.mrf.mxu1  ;;  %13594 = vmatprep.subr.bf16.mxu0 %v24580_v59  ;;  %13629 = vmatprep.subr.bf16.mxu1 %v24583_v9  ;;  %v24595_v45 = vld [vmem:[#allocation8 + $0x24ec] ss:$56 sps:$4 sm:$0xff]   ;;  %v24601_v59 = vld [vmem:[#allocation8 + $0x247c] ss:$56 sps:$4 sm:$0xff]   ;;  %v24596_v9 = vld [vmem:[#allocation8 + $0x22b8] ss:$56 sps:$4 sm:$0xff]  }
 0x6a2   :  { %27371 = vst [vmem:[#allocation54_spill] sm:$0xff] %v26856_v7  ;;  %v24598_v7 = vld [vmem:[#allocation8 + $0x22bc] ss:$56 sps:$4 sm:$0xff]  }
 0x6a3   :  { %v13321_v44 = vpop.f32.mrf.mxu1  ;;  %13595 = vmatpush1.bf16.msra.mxu0 %v24578_v57  ;;  %v24604_v57 = vld [vmem:[#allocation8 + $0x224c] ss:$56 sps:$4 sm:$0xff]  }
 0x6a4   :  { %v26858_v53 = vadd.f32 %v13321_v44, %v13279_v38  ;;  %13630 = vmatpush1.bf16.msra.mxu1 %v24581_v34  ;;  %13596 = vmatprep.subr.bf16.mxu0 %v24586_v19  ;;  %v24599_v38 = vld [vmem:[#allocation8 + $0x2478] ss:$56 sps:$4 sm:$0xff]   ;;  %v24607_v34 = vld [vmem:[#allocation8 + $0x240c] ss:$56 sps:$4 sm:$0xff]   ;;  %v24602_v19 = vld [vmem:[#allocation8 + $0x2248] ss:$56 sps:$4 sm:$0xff]  }
 0x6a5   :  { %13631 = vmatprep.subr.bf16.mxu1 %v24589_v29  ;;  %v24605_v29 = vld [vmem:[#allocation8 + $0x2408] ss:$56 sps:$4 sm:$0xff]   ;;  %v24610_v44 = vld [vmem:[#allocation8 + $0x21dc] ss:$56 sps:$4 sm:$0xff]  }
 0x6a7   :  { %13597 = vmatpush1.bf16.msra.mxu0 %v24584_v41  ;;  %v24613_v41 = vld [vmem:[#allocation8 + $0x239c] ss:$56 sps:$4 sm:$0xff]  }
 0x6a8   :  { %13632 = vmatpush1.bf16.msra.mxu1 %v24587_v26  ;;  %13598 = vmatprep.subr.bf16.mxu0 %v24592_v22  ;;  %v24608_v26 = vld [vmem:[#allocation8 + $0x21d8] ss:$56 sps:$4 sm:$0xff]  }
 0x6a9   :  { %13633 = vmatprep.subr.bf16.mxu1 %v24595_v45  ;;  %v24611_v22 = vld [vmem:[#allocation8 + $0x2398] ss:$56 sps:$4 sm:$0xff]   ;;  %v24616_v45 = vld [vmem:[#allocation8 + $0x216c] ss:$56 sps:$4 sm:$0xff]  }
 0x6ab   :  { %13599 = vmatpush1.bf16.msra.mxu0 %v24590_v46  ;;  %v24617_v46 = vld [vmem:[#allocation8 + $0x2328] ss:$56 sps:$4 sm:$0xff]  }
 0x6ac   :  { %13634 = vmatpush1.bf16.msra.mxu1 %v24593_v13  ;;  %13600 = vmatprep.subr.bf16.mxu0 %v24598_v7  ;;  %v24619_v13 = vld [vmem:[#allocation8 + $0x232c] ss:$56 sps:$4 sm:$0xff]   ;;  %v24614_v7 = vld [vmem:[#allocation8 + $0x2168] ss:$56 sps:$4 sm:$0xff]  }
 0x6ad   :  { %13635 = vmatprep.subr.bf16.mxu1 %v24601_v59  ;;  %v24622_v59 = vld [vmem:[#allocation8 + $0x20fc] ss:$56 sps:$4 sm:$0xff]  }
 0x6af   :  { %13601 = vmatpush2.bf16.msra.mxu0 %v24596_v9  ;;  %v24625_v9 = vld [vmem:[#allocation8 + $0x29bc] ss:$56 sps:$4 sm:$0xff]  }
 0x6b0   :  { %13636 = vmatpush1.bf16.msra.mxu1 %v24599_v38  ;;  %13602 = vmatprep.subr.bf16.mxu0 %v24604_v57  ;;  %v24620_v38 = vld [vmem:[#allocation8 + $0x20f8] ss:$56 sps:$4 sm:$0xff]  }
 0x6b1   :  { %13637 = vmatprep.subr.bf16.mxu1 %v24607_v34  ;;  %v24623_v57 = vld [vmem:[#allocation8 + $0x29b8] ss:$56 sps:$4 sm:$0xff]   ;;  %v24628_v34 = vld [vmem:[#allocation8 + $0x208c] ss:$56 sps:$4 sm:$0xff]  }
 0x6b3   :  { %13603 = vmatpush2.bf16.msra.mxu0 %v24602_v19  ;;  %v24631_v19 = vld [vmem:[#allocation8 + $0x294c] ss:$56 sps:$4 sm:$0xff]  }
 0x6b4   :  { %13638 = vmatpush1.bf16.msra.mxu1 %v24605_v29  ;;  %13604 = vmatprep.subr.bf16.mxu0 %v24610_v44  ;;  %v24626_v29 = vld [vmem:[#allocation8 + $0x2088] ss:$56 sps:$4 sm:$0xff]  }
 0x6b5   :  { %13639 = vmatprep.subr.bf16.mxu1 %v24613_v41  ;;  %v24629_v44 = vld [vmem:[#allocation8 + $0x2948] ss:$56 sps:$4 sm:$0xff]   ;;  %v24634_v41 = vld [vmem:[#allocation8 + $0x201c] ss:$56 sps:$4 sm:$0xff]  }
 0x6b7   :  { %13605 = vmatpush2.bf16.msra.mxu0 %v24608_v26  ;;  %v24637_v26 = vld [vmem:[#allocation8 + $0x28dc] ss:$56 sps:$4 sm:$0xff]  }
 0x6b8   :  { %13640 = vmatpush1.bf16.msra.mxu1 %v24611_v22  ;;  %13606 = vmatprep.subr.bf16.mxu0 %v24616_v45  ;;  %v24632_v22 = vld [vmem:[#allocation8 + $0x2018] ss:$56 sps:$4 sm:$0xff]  }
 0x6b9   :  { %13641 = vmatprep.subr.bf16.mxu1 %v24619_v13  ;;  %v24635_v45 = vld [vmem:[#allocation8 + $0x28d8] ss:$56 sps:$4 sm:$0xff]   ;;  %v24640_v13 = vld [vmem:[#allocation8 + $0x1fac] ss:$56 sps:$4 sm:$0xff]  }
 0x6bb   :  { %13607 = vmatpush2.bf16.msra.mxu0 %v24614_v7  ;;  %v24643_v7 = vld [vmem:[#allocation8 + $0x286c] ss:$56 sps:$4 sm:$0xff]  }
 0x6bc   :  { %13642 = vmatpush1.bf16.msra.mxu1 %v24617_v46  ;;  %13608 = vmatprep.subr.bf16.mxu0 %v24622_v59  ;;  %v24638_v46 = vld [vmem:[#allocation8 + $0x1fa8] ss:$56 sps:$4 sm:$0xff]  }
 0x6bd   :  { %13643 = vmatprep.subr.bf16.mxu1 %v24625_v9  ;;  %v24641_v59 = vld [vmem:[#allocation8 + $0x2868] ss:$56 sps:$4 sm:$0xff]   ;;  %v24649_v9 = vld [vmem:[#allocation8 + $0x344] ss:$56 sps:$4 sm:$0xff]  }
 0x6bf   :  { %13609 = vmatpush2.bf16.msra.mxu0 %v24620_v38  ;;  %v24646_v38 = vld [vmem:[#allocation8 + $0x27fc] ss:$56 sps:$4 sm:$0xff]  }
 0x6c0   :  { %13644 = vmatpush2.bf16.msra.mxu1 %v24623_v57  ;;  %13610 = vmatprep.subr.bf16.mxu0 %v24628_v34  ;;  %v24647_v57 = vld [vmem:[#allocation8 + $0x340] ss:$56 sps:$4 sm:$0xff]   ;;  %v26860_v34 = vpop.f32.mrf.mxu0 }
 0x6c1   :  { %13645 = vmatprep.subr.bf16.mxu1 %v24631_v19  ;;  %27372 = vst [vmem:[#allocation55_spill] sm:$0xff] %v26860_v34  ;;  %v24644_v19 = vld [vmem:[#allocation8 + $0x27f8] ss:$56 sps:$4 sm:$0xff]  }
 0x6c2   :  { %v24656_v34 = vld [vmem:[#allocation8 + $0x2718] ss:$56 sps:$4 sm:$0xff]  }
 0x6c3   :  { %13611 = vmatpush2.bf16.msra.mxu0 %v24626_v29  ;;  %v24655_v29 = vld [vmem:[#allocation8 + $0x2d4] ss:$56 sps:$4 sm:$0xff]  }
 0x6c4   :  { %13646 = vmatpush2.bf16.msra.mxu1 %v24629_v44  ;;  %13612 = vmatprep.subr.bf16.mxu0 %v24634_v41  ;;  %v24652_v44 = vld [vmem:[#allocation8 + $0x278c] ss:$56 sps:$4 sm:$0xff]  }
 0x6c5   :  { %13647 = vmatprep.subr.bf16.mxu1 %v24637_v26 }
 0x6c7   :  { %13613 = vmatpush2.bf16.msra.mxu0 %v24632_v22  ;;  %v24653_v22 = vld [vmem:[#allocation8 + $0x2d0] ss:$56 sps:$4 sm:$0xff]  }
 0x6c8   :  { %13648 = vmatpush2.bf16.msra.mxu1 %v24635_v45  ;;  %13614 = vmatprep.subr.bf16.mxu0 %v24640_v13  ;;  %v24650_v13 = vld [vmem:[#allocation8 + $0x2788] ss:$56 sps:$4 sm:$0xff]  }
 0x6c9   :  { %13649 = vmatprep.subr.bf16.mxu1 %v24643_v7  ;;  %v24661_v7 = vld [vmem:[#allocation8 + $0x264] ss:$56 sps:$4 sm:$0xff]  }
 0x6cb   :  { %13615 = vmatpush2.bf16.msra.mxu0 %v24638_v46  ;;  %v24658_v46 = vld [vmem:[#allocation8 + $0x271c] ss:$56 sps:$4 sm:$0xff]  }
 0x6cc   :  { %13650 = vmatpush2.bf16.msra.mxu1 %v24641_v59  ;;  %13670 = vmatprep.subr.bf16.mxu0 %v24649_v9 }
 0x6cd   :  { %13651 = vmatprep.subr.bf16.mxu1 %v24646_v38  ;;  %v24659_v38 = vld [vmem:[#allocation8 + $0x260] ss:$56 sps:$4 sm:$0xff]  }
 0x6ce   :  { %v13360_v41 = vpop.f32.mrf.mxu0  ;;  %13617 = vmatmul.mubr.bf16.vlgmr.msra.gmra.mxu0 %v26596_v17 }
 0x6cf   :  { %v13361_v26 = vadd.f32 %v13360_v41, %v26853_v54  ;;  %13671 = vmatpush1.bf16.msra.mxu0 %v24647_v57  ;;  %13702 = vmatprep.mubr.bf16.mxu0 %v26505_v2  ;;  %v24667_v54 = vld [vmem:[#allocation8 + $0x1f4] ss:$56 sps:$4 sm:$0xff]   ;;  %v24665_v57 = vld [vmem:[#allocation8 + $0x1f0] ss:$56 sps:$4 sm:$0xff]   ;;  %v24668_v41 = vld [vmem:[#allocation8 + $0x180] ss:$56 sps:$4 sm:$0xff]  }
 0x6d0   :  { %13652 = vmatpush2.bf16.msra.mxu1 %v24644_v19  ;;  %v26865_v45 = vpop.f32.mrf.mxu0  ;;  %13672 = vmatprep.subr.bf16.mxu0 %v24655_v29  ;;  %v24664_v2 = vld [vmem:[#allocation8 + $0x26ac] ss:$56 sps:$4 sm:$0xff]   ;;  %v24662_v19 = vld [vmem:[#allocation8 + $0x26a8] ss:$56 sps:$4 sm:$0xff]  }
 0x6d1   :  { %27373 = vst [vmem:[#allocation56_spill] sm:$0xff] %v26865_v45  ;;  %13653 = vmatprep.subr.bf16.mxu1 %v24652_v44  ;;  %v24670_v29 = vld [vmem:[#allocation8 + $0x184] ss:$56 sps:$4 sm:$0xff]  }
 0x6d2   :  { %v13364_v59 = vpop.f32.mrf.mxu0  ;;  %v24673_v44 = vld [vmem:[#allocation8 + $0xa44] ss:$56 sps:$4 sm:$0xff]  }
 0x6d3   :  { %v13365_v9 = vadd.f32 %v13364_v59, %v26858_v53  ;;  %13673 = vmatpush1.bf16.msra.mxu0 %v24653_v22  ;;  %v24671_v53 = vld [vmem:[#allocation8 + $0xa40] ss:$56 sps:$4 sm:$0xff]   ;;  %v26868_v22 = vpop.f32.mrf.mxu1 }
 0x6d4   :  { %13654 = vmatpush2.bf16.msra.mxu1 %v24650_v13  ;;  %13674 = vmatprep.subr.bf16.mxu0 %v24661_v7  ;;  %27374 = vst [vmem:[#allocation57_spill] sm:$0xff] %v26868_v22  ;;  %v24676_v13 = vld [vmem:[#allocation8 + $0x114] ss:$56 sps:$4 sm:$0xff]  }
 0x6d5   :  { %13655 = vmatprep.subr.bf16.mxu1 %v24658_v46  ;;  %v24679_v7 = vld [vmem:[#allocation8 + $0x9d4] ss:$56 sps:$4 sm:$0xff]  }
 0x6d7   :  { %13675 = vmatpush1.bf16.msra.mxu0 %v24659_v38  ;;  %v24677_v38 = vld [vmem:[#allocation8 + $0x9d0] ss:$56 sps:$4 sm:$0xff]  }
 0x6d8   :  { %13656 = vmatpush2.bf16.msra.mxu1 %v24656_v34  ;;  %13676 = vmatprep.subr.bf16.mxu0 %v24667_v54  ;;  %v24674_v34 = vld [vmem:[#allocation8 + $0x110] ss:$56 sps:$4 sm:$0xff]   ;;  %v24682_v54 = vld [vmem:[#allocation8 + $0xa4] ss:$56 sps:$4 sm:$0xff]  }
 0x6d9   :  { %13657 = vmatprep.subr.bf16.mxu1 %v24664_v2 }
 0x6db   :  { %13677 = vmatpush1.bf16.msra.mxu0 %v24665_v57  ;;  %v24685_v57 = vld [vmem:[#allocation8 + $0x964] ss:$56 sps:$4 sm:$0xff]  }
 0x6dc   :  { %13658 = vmatpush2.bf16.msra.mxu1 %v24662_v19  ;;  %13678 = vmatprep.subr.bf16.mxu0 %v24670_v29  ;;  %v24680_v29 = vld [vmem:[#allocation8 + $0xa0] ss:$56 sps:$4 sm:$0xff]  }
 0x6dd   :  { %13713 = vmatprep.subr.bf16.mxu1 %v24673_v44 }
 0x6df   :  { %v13403_v46 = vpop.f32.mrf.mxu1  ;;  %13660 = vmatmul.mubr.bf16.vlgmr.msra.gmra.mxu1 %v26606_v61  ;;  %13679 = vmatpush1.bf16.msra.mxu0 %v24668_v41  ;;  %v24683_v41 = vld [vmem:[#allocation8 + $0x960] ss:$56 sps:$4 sm:$0xff]  }
 0x6e0   :  { %v13404_v59 = vadd.f32 %v13403_v46, %v13361_v26  ;;  %13714 = vmatpush1.bf16.msra.mxu1 %v24671_v53  ;;  %13745 = vmatprep.mubr.bf16.mxu1 %v26507_v5  ;;  %v24688_v26 = vld [vmem:[#allocation8 + $0x34] ss:$56 sps:$4 sm:$0xff]  }
 0x6e1   :  { %v26872_v2 = vpop.f32.mrf.mxu1  ;;  %13680 = vmatprep.subr.bf16.mxu0 %v24676_v13  ;;  %13715 = vmatprep.subr.bf16.mxu1 %v24679_v7  ;;  %v24691_v5 = vld [vmem:[#allocation8 + $0x8f4] ss:$56 sps:$4 sm:$0xff]   ;;  %v24686_v13 = vld [vmem:[#allocation8 + $0x30] ss:$56 sps:$4 sm:$0xff]  }
 0x6e2   :  { %27375 = vst [vmem:[#allocation58_spill] sm:$0xff] %v26872_v2  ;;  %v13966_v44 = vmul.f32 %v26654_v8, %v13404_v59  ;;  %vm13937_vm0 = vcmp.gt.f32.partialorder %v13404_v59, 0.0  ;;  %v24694_v2 = vld [vmem:[#allocation8 + $0x6c4] ss:$56 sps:$4 sm:$0xff]  }
 0x6e3   :  { %v13407_v19 = vpop.f32.mrf.mxu1  ;;  %13681 = vmatpush1.bf16.msra.mxu0 %v24674_v34  ;;  %v24689_v34 = vld [vmem:[#allocation8 + $0x8f0] ss:$56 sps:$4 sm:$0xff]  }
 0x6e4   :  { %v13408_v45 = vadd.f32 %v13407_v19, %v13365_v9  ;;  %13716 = vmatpush1.bf16.msra.mxu1 %v24677_v38  ;;  %13682 = vmatprep.subr.bf16.mxu0 %v24682_v54  ;;  %v13994_v7 = vsel %vm13937_vm0, %v13404_v59, %v13966_v44  ;;  %v24697_v9 = vld [vmem:[#allocation8 + $0x884] ss:$56 sps:$4 sm:$0xff]   ;;  %v24692_v38 = vld [vmem:[#allocation8 + $0x6c0] ss:$56 sps:$4 sm:$0xff]   ;;  %v24703_v19 = vld [vmem:[#allocation8 + $0x814] ss:$56 sps:$4 sm:$0xff]  }
 0x6e5   :  { %13717 = vmatprep.subr.bf16.mxu1 %v24685_v57  ;;  %v24695_v54 = vld [vmem:[#allocation8 + $0x880] ss:$56 sps:$4 sm:$0xff]   ;;  %v24700_v57 = vld [vmem:[#allocation8 + $0x654] ss:$56 sps:$4 sm:$0xff]   ;;  %v24706_v59 = vld [vmem:[#allocation8 + $0x5e4] ss:$56 sps:$4 sm:$0xff]  }
 0x6e6   :  { %vm13951_vm1 = vcmp.gt.f32.partialorder %v13408_v45, 0.0  ;;  %v13980_v53 = vmul.f32 %v26654_v8, %v13408_v45  ;;  %v24709_v44 = vld [vmem:[#allocation8 + $0x7a4] ss:$56 sps:$4 sm:$0xff]  }
 0x6e7   :  { %13683 = vmatpush1.bf16.msra.mxu0 %v24680_v29  ;;  %v24698_v29 = vld [vmem:[#allocation8 + $0x650] ss:$56 sps:$4 sm:$0xff]  }
 0x6e8   :  { %v14008_v46 = vsel %vm13951_vm1, %v13408_v45, %v13980_v53  ;;  %13718 = vmatpush1.bf16.msra.mxu1 %v24683_v41  ;;  %13684 = vmatprep.subr.bf16.mxu0 %v24688_v26  ;;  %v24701_v45 = vld [vmem:[#allocation8 + $0x810] ss:$56 sps:$4 sm:$0xff]   ;;  %v24704_v41 = vld [vmem:[#allocation8 + $0x5e0] ss:$56 sps:$4 sm:$0xff]  }
 0x6e9   :  { %v26876_v22 = vpack.c.bf16 %v14008_v46, %v13994_v7  ;;  %13719 = vmatprep.subr.bf16.mxu1 %v24691_v5  ;;  %v24707_v26 = vld [vmem:[#allocation8 + $0x7a0] ss:$56 sps:$4 sm:$0xff]   ;;  %v24712_v5 = vld [vmem:[#allocation8 + $0x574] ss:$56 sps:$4 sm:$0xff]   ;;  %v24710_v53 = vld [vmem:[#allocation8 + $0x570] ss:$56 sps:$4 sm:$0xff]  }
 0x6ea   :  { %v24718_v7 = vld [vmem:[#allocation8 + $0x504] ss:$56 sps:$4 sm:$0xff]  }
 0x6eb   :  { %13685 = vmatpush1.bf16.msra.mxu0 %v24686_v13  ;;  %v24713_v13 = vld [vmem:[#allocation8 + $0x730] ss:$56 sps:$4 sm:$0xff]   ;;  %v24721_v46 = vld [vmem:[#allocation8 + $0xdc4] ss:$56 sps:$4 sm:$0xff]  }
 0x6ec   :  { %13720 = vmatpush1.bf16.msra.mxu1 %v24689_v34  ;;  %13686 = vmatprep.subr.bf16.mxu0 %v24694_v2  ;;  %v24715_v2 = vld [vmem:[#allocation8 + $0x734] ss:$56 sps:$4 sm:$0xff]   ;;  %v24716_v34 = vld [vmem:[#allocation8 + $0x500] ss:$56 sps:$4 sm:$0xff]  }
 0x6ed   :  { %13721 = vmatprep.subr.bf16.mxu1 %v24697_v9  ;;  %v24719_v9 = vld [vmem:[#allocation8 + $0xdc0] ss:$56 sps:$4 sm:$0xff]  }
 0x6ef   :  { %13687 = vmatpush2.bf16.msra.mxu0 %v24692_v38  ;;  %v24724_v38 = vld [vmem:[#allocation8 + $0x494] ss:$56 sps:$4 sm:$0xff]  }
 0x6f0   :  { %13722 = vmatpush1.bf16.msra.mxu1 %v24695_v54  ;;  %13688 = vmatprep.subr.bf16.mxu0 %v24700_v57  ;;  %v24727_v54 = vld [vmem:[#allocation8 + $0xd54] ss:$56 sps:$4 sm:$0xff]   ;;  %v24722_v57 = vld [vmem:[#allocation8 + $0x490] ss:$56 sps:$4 sm:$0xff]  }
 0x6f1   :  { %13723 = vmatprep.subr.bf16.mxu1 %v24703_v19  ;;  %v24725_v19 = vld [vmem:[#allocation8 + $0xd50] ss:$56 sps:$4 sm:$0xff]  }
 0x6f3   :  { %13689 = vmatpush2.bf16.msra.mxu0 %v24698_v29  ;;  %v24730_v29 = vld [vmem:[#allocation8 + $0x424] ss:$56 sps:$4 sm:$0xff]  }
 0x6f4   :  { %13724 = vmatpush1.bf16.msra.mxu1 %v24701_v45  ;;  %13690 = vmatprep.subr.bf16.mxu0 %v24706_v59  ;;  %v24733_v45 = vld [vmem:[#allocation8 + $0xce4] ss:$56 sps:$4 sm:$0xff]   ;;  %v24728_v59 = vld [vmem:[#allocation8 + $0x420] ss:$56 sps:$4 sm:$0xff]  }
 0x6f5   :  { %13725 = vmatprep.subr.bf16.mxu1 %v24709_v44  ;;  %v24731_v44 = vld [vmem:[#allocation8 + $0xce0] ss:$56 sps:$4 sm:$0xff]  }
 0x6f7   :  { %13691 = vmatpush2.bf16.msra.mxu0 %v24704_v41  ;;  %v24736_v41 = vld [vmem:[#allocation8 + $0x3b4] ss:$56 sps:$4 sm:$0xff]  }
 0x6f8   :  { %13726 = vmatpush1.bf16.msra.mxu1 %v24707_v26  ;;  %13692 = vmatprep.subr.bf16.mxu0 %v24712_v5  ;;  %v24739_v26 = vld [vmem:[#allocation8 + $0xc74] ss:$56 sps:$4 sm:$0xff]   ;;  %v24734_v5 = vld [vmem:[#allocation8 + $0x3b0] ss:$56 sps:$4 sm:$0xff]  }
 0x6f9   :  { %13727 = vmatprep.subr.bf16.mxu1 %v24715_v2  ;;  %v24737_v2 = vld [vmem:[#allocation8 + $0xc70] ss:$56 sps:$4 sm:$0xff]  }
 0x6fb   :  { %13693 = vmatpush2.bf16.msra.mxu0 %v24710_v53  ;;  %v24745_v53 = vld [vmem:[#allocation8 + $0x1144] ss:$56 sps:$4 sm:$0xff]  }
 0x6fc   :  { %13728 = vmatpush1.bf16.msra.mxu1 %v24713_v13  ;;  %13694 = vmatprep.subr.bf16.mxu0 %v24718_v7  ;;  %v24742_v13 = vld [vmem:[#allocation8 + $0xc04] ss:$56 sps:$4 sm:$0xff]   ;;  %v24743_v7 = vld [vmem:[#allocation8 + $0x1140] ss:$56 sps:$4 sm:$0xff]  }
 0x6fd   :  { %13729 = vmatprep.subr.bf16.mxu1 %v24721_v46  ;;  %v24740_v46 = vld [vmem:[#allocation8 + $0xc00] ss:$56 sps:$4 sm:$0xff]  }
 0x6ff   :  { %13695 = vmatpush2.bf16.msra.mxu0 %v24716_v34  ;;  %v24751_v34 = vld [vmem:[#allocation8 + $0x10d4] ss:$56 sps:$4 sm:$0xff]  }
 0x700   :  { %13730 = vmatpush2.bf16.msra.mxu1 %v24719_v9  ;;  %13696 = vmatprep.subr.bf16.mxu0 %v24724_v38  ;;  %v24748_v9 = vld [vmem:[#allocation8 + $0xb94] ss:$56 sps:$4 sm:$0xff]   ;;  %v24749_v38 = vld [vmem:[#allocation8 + $0x10d0] ss:$56 sps:$4 sm:$0xff]  }
 0x701   :  { %13731 = vmatprep.subr.bf16.mxu1 %v24727_v54  ;;  %v24746_v54 = vld [vmem:[#allocation8 + $0xb90] ss:$56 sps:$4 sm:$0xff]  }
 0x703   :  { %13697 = vmatpush2.bf16.msra.mxu0 %v24722_v57  ;;  %v24757_v57 = vld [vmem:[#allocation8 + $0x1064] ss:$56 sps:$4 sm:$0xff]  }
 0x704   :  { %13732 = vmatpush2.bf16.msra.mxu1 %v24725_v19  ;;  %13698 = vmatprep.subr.bf16.mxu0 %v24730_v29  ;;  %v24754_v19 = vld [vmem:[#allocation8 + $0xb24] ss:$56 sps:$4 sm:$0xff]   ;;  %v24755_v29 = vld [vmem:[#allocation8 + $0x1060] ss:$56 sps:$4 sm:$0xff]  }
 0x705   :  { %13733 = vmatprep.subr.bf16.mxu1 %v24733_v45  ;;  %v24752_v45 = vld [vmem:[#allocation8 + $0xb20] ss:$56 sps:$4 sm:$0xff]  }
 0x707   :  { %13699 = vmatpush2.bf16.msra.mxu0 %v24728_v59  ;;  %v24763_v59 = vld [vmem:[#allocation8 + $0xff4] ss:$56 sps:$4 sm:$0xff]  }
 0x708   :  { %13734 = vmatpush2.bf16.msra.mxu1 %v24731_v44  ;;  %13700 = vmatprep.subr.bf16.mxu0 %v24736_v41  ;;  %v26880_v44 = vpop.f32.mrf.mxu0 }
 0x709   :  { %13735 = vmatprep.subr.bf16.mxu1 %v24739_v26  ;;  %v24758_v26 = vld [vmem:[#allocation8 + $0xab0] ss:$56 sps:$4 sm:$0xff]  }
 0x70b   :  { %13701 = vmatpush2.bf16.msra.mxu0 %v24734_v5  ;;  %v24766_v5 = vld [vmem:[#allocation8 + $0xf84] ss:$56 sps:$4 sm:$0xff]  }
 0x70c   :  { %13736 = vmatpush2.bf16.msra.mxu1 %v24737_v2  ;;  %13756 = vmatprep.subr.bf16.mxu0 %v24745_v53  ;;  %v24769_v2 = vld [vmem:[#allocation8 + $0x1844] ss:$56 sps:$4 sm:$0xff]   ;;  %v5375_v53 = vrot.slane %v26826_v31, %v26407_v52 }
 0x70d   :  { %13737 = vmatprep.subr.bf16.mxu1 %v24742_v13 }
 0x70e   :  { %13703 = vmatmul.mubr.bf16.vlgmr.msra.gmra.mxu0 %v26396_v36  ;;  %v24760_v36 = vld [vmem:[#allocation8 + $0xab4] ss:$56 sps:$4 sm:$0xff]   ;;  %v13446_v41 = vpop.f32.mrf.mxu0 }
 0x70f   :  { %13757 = vmatpush1.bf16.msra.mxu0 %v24743_v7  ;;  %13788 = vmatprep.mubr.bf16.mxu0 %v26551_v35  ;;  %v24761_v35 = vld [vmem:[#allocation8 + $0xff0] ss:$56 sps:$4 sm:$0xff]   ;;  %v24764_v7 = vld [vmem:[#allocation8 + $0xf80] ss:$56 sps:$4 sm:$0xff]  }
 0x710   :  { %13738 = vmatpush2.bf16.msra.mxu1 %v24740_v46  ;;  %13758 = vmatprep.subr.bf16.mxu0 %v24751_v34  ;;  %v26884_v13 = vpop.f32.mrf.mxu0  ;;  %v24767_v46 = vld [vmem:[#allocation8 + $0x1840] ss:$56 sps:$4 sm:$0xff]   ;;  %v26886_v34 = vpop.f32.mrf.mxu1 }
 0x711   :  { %13739 = vmatprep.subr.bf16.mxu1 %v24748_v9  ;;  %v24772_v9 = vld [vmem:[#allocation8 + $0xf14] ss:$56 sps:$4 sm:$0xff]  }
 0x713   :  { %13759 = vmatpush1.bf16.msra.mxu0 %v24749_v38  ;;  %v24775_v38 = vld [vmem:[#allocation8 + $0x17d4] ss:$56 sps:$4 sm:$0xff]  }
 0x714   :  { %13740 = vmatpush2.bf16.msra.mxu1 %v24746_v54  ;;  %13760 = vmatprep.subr.bf16.mxu0 %v24757_v57  ;;  %v13447_v54 = vadd.f32 %v13446_v41, %v5375_v53  ;;  %v13450_v57 = vpop.f32.mrf.mxu0 }
 0x715   :  { %13741 = vmatprep.subr.bf16.mxu1 %v24754_v19 }
 0x717   :  { %13761 = vmatpush1.bf16.msra.mxu0 %v24755_v29  ;;  %v24770_v29 = vld [vmem:[#allocation8 + $0xf10] ss:$56 sps:$4 sm:$0xff]  }
 0x718   :  { %13742 = vmatpush2.bf16.msra.mxu1 %v24752_v45  ;;  %13762 = vmatprep.subr.bf16.mxu0 %v24763_v59  ;;  %v24773_v45 = vld [vmem:[#allocation8 + $0x17d0] ss:$56 sps:$4 sm:$0xff]   ;;  %v24778_v59 = vld [vmem:[#allocation8 + $0xea4] ss:$56 sps:$4 sm:$0xff]  }
 0x719   :  { %13743 = vmatprep.subr.bf16.mxu1 %v24760_v36 }
 0x71b   :  { %13763 = vmatpush1.bf16.msra.mxu0 %v24761_v35  ;;  %v24781_v35 = vld [vmem:[#allocation8 + $0x1764] ss:$56 sps:$4 sm:$0xff]  }
 0x71c   :  { %13744 = vmatpush2.bf16.msra.mxu1 %v24758_v26  ;;  %13764 = vmatprep.subr.bf16.mxu0 %v24766_v5  ;;  %v13451_v26 = vadd.f32 %v13450_v57, %v5375_v53  ;;  %v24776_v5 = vld [vmem:[#allocation8 + $0xea0] ss:$56 sps:$4 sm:$0xff]  }
 0x71d   :  { %13799 = vmatprep.subr.bf16.mxu1 %v24769_v2  ;;  %v24788_v53 = vld [vmem:[#allocation8 + $0x14c0] ss:$56 sps:$4 sm:$0xff]  }
 0x71e   :  { %v24791_v57 = vld [vmem:[#allocation8 + $0x1680] ss:$56 sps:$4 sm:$0xff]  }
 0x71f   :  { %v13489_v19 = vpop.f32.mrf.mxu1  ;;  %13746 = vmatmul.mubr.bf16.vlgmr.msra.gmra.mxu1 %v26421_v15  ;;  %13765 = vmatpush1.bf16.msra.mxu0 %v24764_v7  ;;  %v24779_v15 = vld [vmem:[#allocation8 + $0x1760] ss:$56 sps:$4 sm:$0xff]   ;;  %v24784_v7 = vld [vmem:[#allocation8 + $0xe34] ss:$56 sps:$4 sm:$0xff]  }
 0x720   :  { %v26889_v31 = vadd.f32 %v13489_v19, %v13447_v54  ;;  %13800 = vmatpush1.bf16.msra.mxu1 %v24767_v46  ;;  %13831 = vmatprep.mubr.bf16.mxu1 %v26554_v25  ;;  %v24787_v46 = vld [vmem:[#allocation8 + $0x16f4] ss:$56 sps:$4 sm:$0xff]   ;;  %v24782_v25 = vld [vmem:[#allocation8 + $0xe30] ss:$56 sps:$4 sm:$0xff]  }
 0x721   :  { %v26892_v36 = vpop.f32.mrf.mxu1  ;;  %13766 = vmatprep.subr.bf16.mxu0 %v24772_v9  ;;  %13801 = vmatprep.subr.bf16.mxu1 %v24775_v38  ;;  %v24785_v54 = vld [vmem:[#allocation8 + $0x16f0] ss:$56 sps:$4 sm:$0xff]   ;;  %v24790_v9 = vld [vmem:[#allocation8 + $0x14c4] ss:$56 sps:$4 sm:$0xff]   ;;  %v24796_v19 = vld [vmem:[#allocation8 + $0x1454] ss:$56 sps:$4 sm:$0xff]  }
 0x722   :  { %v24793_v38 = vld [vmem:[#allocation8 + $0x1684] ss:$56 sps:$4 sm:$0xff]  }
 0x723   :  { %v13493_v41 = vpop.f32.mrf.mxu1  ;;  %13767 = vmatpush1.bf16.msra.mxu0 %v24770_v29  ;;  %v24799_v29 = vld [vmem:[#allocation8 + $0x1614] ss:$56 sps:$4 sm:$0xff]  }
 0x724   :  { %v26894_v2 = vadd.f32 %v13493_v41, %v13451_v26  ;;  %13802 = vmatpush1.bf16.msra.mxu1 %v24773_v45  ;;  %13768 = vmatprep.subr.bf16.mxu0 %v24778_v59  ;;  %v24794_v45 = vld [vmem:[#allocation8 + $0x1450] ss:$56 sps:$4 sm:$0xff]   ;;  %v24805_v26 = vld [vmem:[#allocation8 + $0x15a4] ss:$56 sps:$4 sm:$0xff]   ;;  %v24800_v41 = vld [vmem:[#allocation8 + $0x13e0] ss:$56 sps:$4 sm:$0xff]  }
 0x725   :  { %13803 = vmatprep.subr.bf16.mxu1 %v24781_v35  ;;  %v24797_v59 = vld [vmem:[#allocation8 + $0x1610] ss:$56 sps:$4 sm:$0xff]   ;;  %v24802_v35 = vld [vmem:[#allocation8 + $0x13e4] ss:$56 sps:$4 sm:$0xff]  }
 0x727   :  { %13769 = vmatpush1.bf16.msra.mxu0 %v24776_v5  ;;  %v24803_v5 = vld [vmem:[#allocation8 + $0x15a0] ss:$56 sps:$4 sm:$0xff]  }
 0x728   :  { %13804 = vmatpush1.bf16.msra.mxu1 %v24779_v15  ;;  %13770 = vmatprep.subr.bf16.mxu0 %v24784_v7  ;;  %v24808_v15 = vld [vmem:[#allocation8 + $0x1374] ss:$56 sps:$4 sm:$0xff]  }
 0x729   :  { %13805 = vmatprep.subr.bf16.mxu1 %v24787_v46  ;;  %v24811_v7 = vld [vmem:[#allocation8 + $0x1534] ss:$56 sps:$4 sm:$0xff]   ;;  %v24806_v46 = vld [vmem:[#allocation8 + $0x1370] ss:$56 sps:$4 sm:$0xff]  }
 0x72b   :  { %13771 = vmatpush1.bf16.msra.mxu0 %v24782_v25  ;;  %v24809_v25 = vld [vmem:[#allocation8 + $0x1530] ss:$56 sps:$4 sm:$0xff]  }
 0x72c   :  { %13806 = vmatpush1.bf16.msra.mxu1 %v24785_v54  ;;  %13772 = vmatprep.subr.bf16.mxu0 %v24790_v9  ;;  %v24814_v54 = vld [vmem:[#allocation8 + $0x1304] ss:$56 sps:$4 sm:$0xff]  }
 0x72d   :  { %13807 = vmatprep.subr.bf16.mxu1 %v24793_v38  ;;  %v24817_v9 = vld [vmem:[#allocation8 + $0x1bc4] ss:$56 sps:$4 sm:$0xff]   ;;  %v24812_v38 = vld [vmem:[#allocation8 + $0x1300] ss:$56 sps:$4 sm:$0xff]  }
 0x72f   :  { %13773 = vmatpush2.bf16.msra.mxu0 %v24788_v53  ;;  %v24815_v53 = vld [vmem:[#allocation8 + $0x1bc0] ss:$56 sps:$4 sm:$0xff]  }
 0x730   :  { %13808 = vmatpush1.bf16.msra.mxu1 %v24791_v57  ;;  %13774 = vmatprep.subr.bf16.mxu0 %v24796_v19  ;;  %v24820_v57 = vld [vmem:[#allocation8 + $0x1294] ss:$56 sps:$4 sm:$0xff]  }
 0x731   :  { %13809 = vmatprep.subr.bf16.mxu1 %v24799_v29  ;;  %v24823_v19 = vld [vmem:[#allocation8 + $0x1b54] ss:$56 sps:$4 sm:$0xff]   ;;  %v24818_v29 = vld [vmem:[#allocation8 + $0x1290] ss:$56 sps:$4 sm:$0xff]  }
 0x733   :  { %13775 = vmatpush2.bf16.msra.mxu0 %v24794_v45  ;;  %v24821_v45 = vld [vmem:[#allocation8 + $0x1b50] ss:$56 sps:$4 sm:$0xff]  }
 0x734   :  { %13810 = vmatpush1.bf16.msra.mxu1 %v24797_v59  ;;  %13776 = vmatprep.subr.bf16.mxu0 %v24802_v35  ;;  %v24826_v59 = vld [vmem:[#allocation8 + $0x1224] ss:$56 sps:$4 sm:$0xff]  }
 0x735   :  { %13811 = vmatprep.subr.bf16.mxu1 %v24805_v26  ;;  %v24829_v35 = vld [vmem:[#allocation8 + $0x1ae4] ss:$56 sps:$4 sm:$0xff]   ;;  %v24824_v26 = vld [vmem:[#allocation8 + $0x1220] ss:$56 sps:$4 sm:$0xff]  }
 0x737   :  { %13777 = vmatpush2.bf16.msra.mxu0 %v24800_v41  ;;  %v24827_v41 = vld [vmem:[#allocation8 + $0x1ae0] ss:$56 sps:$4 sm:$0xff]  }
 0x738   :  { %13812 = vmatpush1.bf16.msra.mxu1 %v24803_v5  ;;  %13778 = vmatprep.subr.bf16.mxu0 %v24808_v15  ;;  %v24832_v5 = vld [vmem:[#allocation8 + $0x11b4] ss:$56 sps:$4 sm:$0xff]  }
 0x739   :  { %13813 = vmatprep.subr.bf16.mxu1 %v24811_v7  ;;  %v24835_v15 = vld [vmem:[#allocation8 + $0x1a74] ss:$56 sps:$4 sm:$0xff]   ;;  %v24830_v7 = vld [vmem:[#allocation8 + $0x11b0] ss:$56 sps:$4 sm:$0xff]  }
 0x73b   :  { %13779 = vmatpush2.bf16.msra.mxu0 %v24806_v46  ;;  %v24833_v46 = vld [vmem:[#allocation8 + $0x1a70] ss:$56 sps:$4 sm:$0xff]  }
 0x73c   :  { %13814 = vmatpush1.bf16.msra.mxu1 %v24809_v25  ;;  %13780 = vmatprep.subr.bf16.mxu0 %v24814_v54  ;;  %v24841_v25 = vld [vmem:[#allocation8 + $0x1f44] ss:$56 sps:$4 sm:$0xff]  }
 0x73d   :  { %13815 = vmatprep.subr.bf16.mxu1 %v24817_v9  ;;  %v24838_v54 = vld [vmem:[#allocation8 + $0x1a04] ss:$56 sps:$4 sm:$0xff]   ;;  %v24839_v9 = vld [vmem:[#allocation8 + $0x1f40] ss:$56 sps:$4 sm:$0xff]  }
 0x73f   :  { %13781 = vmatpush2.bf16.msra.mxu0 %v24812_v38  ;;  %v26896_v38 = vpop.f32.mrf.mxu0 }
 0x740   :  { %13816 = vmatpush2.bf16.msra.mxu1 %v24815_v53  ;;  %13782 = vmatprep.subr.bf16.mxu0 %v24820_v57  ;;  %v24836_v53 = vld [vmem:[#allocation8 + $0x1a00] ss:$56 sps:$4 sm:$0xff]   ;;  %v24847_v57 = vld [vmem:[#allocation8 + $0x1ed4] ss:$56 sps:$4 sm:$0xff]  }
 0x741   :  { %13817 = vmatprep.subr.bf16.mxu1 %v24823_v19  ;;  %v24844_v19 = vld [vmem:[#allocation8 + $0x1994] ss:$56 sps:$4 sm:$0xff]  }
 0x743   :  { %13783 = vmatpush2.bf16.msra.mxu0 %v24818_v29 }
 0x744   :  { %13818 = vmatpush2.bf16.msra.mxu1 %v24821_v45  ;;  %13784 = vmatprep.subr.bf16.mxu0 %v24826_v59  ;;  %v24845_v59 = vld [vmem:[#allocation8 + $0x1ed0] ss:$56 sps:$4 sm:$0xff]  }
 0x745   :  { %13819 = vmatprep.subr.bf16.mxu1 %v24829_v35 }
 0x747   :  { %13785 = vmatpush2.bf16.msra.mxu0 %v24824_v26  ;;  %v24842_v26 = vld [vmem:[#allocation8 + $0x1990] ss:$56 sps:$4 sm:$0xff]  }
 0x748   :  { %13820 = vmatpush2.bf16.msra.mxu1 %v24827_v41  ;;  %13786 = vmatprep.subr.bf16.mxu0 %v24832_v5  ;;  %v24853_v41 = vld [vmem:[#allocation8 + $0x1e64] ss:$56 sps:$4 sm:$0xff]  }
 0x749   :  { %13821 = vmatprep.subr.bf16.mxu1 %v24835_v15  ;;  %v24850_v5 = vld [vmem:[#allocation8 + $0x1924] ss:$56 sps:$4 sm:$0xff]  }
 0x74b   :  { %13787 = vmatpush2.bf16.msra.mxu0 %v24830_v7 }
 0x74c   :  { %13822 = vmatpush2.bf16.msra.mxu1 %v24833_v46  ;;  %13842 = vmatprep.subr.bf16.mxu0 %v24841_v25  ;;  %v24851_v46 = vld [vmem:[#allocation8 + $0x1e60] ss:$56 sps:$4 sm:$0xff]   ;;  %v24857_v25 = vld [vmem:[#allocation8 + $0x1df0] ss:$56 sps:$4 sm:$0xff]  }
 0x74d   :  { %13823 = vmatprep.subr.bf16.mxu1 %v24838_v54  ;;  %v24854_v54 = vld [vmem:[#allocation8 + $0x18b0] ss:$56 sps:$4 sm:$0xff]  }
 0x74e   :  { %v13532_v29 = vpop.f32.mrf.mxu0  ;;  %13789 = vmatmul.mubr.bf16.vlgmr.msra.gmra.mxu0 %v26483_v6  ;;  %v24848_v6 = vld [vmem:[#allocation8 + $0x1920] ss:$56 sps:$4 sm:$0xff]  }
 0x74f   :  { %v13533_v45 = vadd.f32 %v13532_v29, %v26889_v31  ;;  %13843 = vmatpush1.bf16.msra.mxu0 %v24839_v9  ;;  %13874 = vmatprep.mubr.bf16.mxu0 %v26579_v39  ;;  %v24859_v31 = vld [vmem:[#allocation8 + $0x1df4] ss:$56 sps:$4 sm:$0xff]   ;;  %v24862_v9 = vld [vmem:[#allocation8 + $0x1d84] ss:$56 sps:$4 sm:$0xff]  }
 0x750   :  { %13824 = vmatpush2.bf16.msra.mxu1 %v24836_v53  ;;  %v26901_v35 = vpop.f32.mrf.mxu0  ;;  %13844 = vmatprep.subr.bf16.mxu0 %v24847_v57  ;;  %v24856_v39 = vld [vmem:[#allocation8 + $0x18b4] ss:$56 sps:$4 sm:$0xff]   ;;  %v24865_v53 = vld [vmem:[#allocation8 + $0x2644] ss:$56 sps:$4 sm:$0xff]   ;;  %v24860_v57 = vld [vmem:[#allocation8 + $0x1d80] ss:$56 sps:$4 sm:$0xff]  }
 0x751   :  { %13825 = vmatprep.subr.bf16.mxu1 %v24844_v19  ;;  %v26904_v19 = vpop.f32.mrf.mxu1  ;;  %v24868_v29 = vld [vmem:[#allocation8 + $0x1d14] ss:$56 sps:$4 sm:$0xff]  }
 0x752   :  { %v13536_v15 = vpop.f32.mrf.mxu0 }
 0x753   :  { %v13537_v7 = vadd.f32 %v13536_v15, %v26894_v2  ;;  %13845 = vmatpush1.bf16.msra.mxu0 %v24845_v59  ;;  %v24863_v2 = vld [vmem:[#allocation8 + $0x2640] ss:$56 sps:$4 sm:$0xff]   ;;  %v24871_v59 = vld [vmem:[#allocation8 + $0x25d4] ss:$56 sps:$4 sm:$0xff]   ;;  %v24869_v15 = vld [vmem:[#allocation8 + $0x25d0] ss:$56 sps:$4 sm:$0xff]  }
 0x754   :  { %13826 = vmatpush2.bf16.msra.mxu1 %v24842_v26  ;;  %13846 = vmatprep.subr.bf16.mxu0 %v24853_v41  ;;  %v24866_v41 = vld [vmem:[#allocation8 + $0x1d10] ss:$56 sps:$4 sm:$0xff]  }
 0x755   :  { %13827 = vmatprep.subr.bf16.mxu1 %v24850_v5 }
 0x757   :  { %13847 = vmatpush1.bf16.msra.mxu0 %v24851_v46  ;;  %v24874_v46 = vld [vmem:[#allocation8 + $0x1ca4] ss:$56 sps:$4 sm:$0xff]  }
 0x758   :  { %13828 = vmatpush2.bf16.msra.mxu1 %v24848_v6  ;;  %13848 = vmatprep.subr.bf16.mxu0 %v24859_v31  ;;  %v24877_v31 = vld [vmem:[#allocation8 + $0x2564] ss:$56 sps:$4 sm:$0xff]  }
 0x759   :  { %13829 = vmatprep.subr.bf16.mxu1 %v24856_v39 }
 0x75b   :  { %13849 = vmatpush1.bf16.msra.mxu0 %v24857_v25  ;;  %v24872_v25 = vld [vmem:[#allocation8 + $0x1ca0] ss:$56 sps:$4 sm:$0xff]  }
 0x75c   :  { %13830 = vmatpush2.bf16.msra.mxu1 %v24854_v54  ;;  %13850 = vmatprep.subr.bf16.mxu0 %v24862_v9  ;;  %v24883_v9 = vld [vmem:[#allocation8 + $0x24f4] ss:$56 sps:$4 sm:$0xff]  }
 0x75d   :  { %13885 = vmatprep.subr.bf16.mxu1 %v24865_v53  ;;  %v24881_v53 = vld [vmem:[#allocation8 + $0x24f0] ss:$56 sps:$4 sm:$0xff]  }
 0x75f   :  { %v13575_v26 = vpop.f32.mrf.mxu1  ;;  %13832 = vmatmul.mubr.bf16.vlgmr.msra.gmra.mxu1 %v26536_v12  ;;  %13851 = vmatpush1.bf16.msra.mxu0 %v24860_v57  ;;  %v24875_v12 = vld [vmem:[#allocation8 + $0x2560] ss:$56 sps:$4 sm:$0xff]   ;;  %v24886_v57 = vld [vmem:[#allocation8 + $0x22c4] ss:$56 sps:$4 sm:$0xff]  }
 0x760   :  { %v26907_v5 = vadd.f32 %v13575_v26, %v13533_v45  ;;  %13886 = vmatpush1.bf16.msra.mxu1 %v24863_v2  ;;  %13917 = vmatprep.mubr.bf16.mxu1 %v26604_v51  ;;  %v24880_v45 = vld [vmem:[#allocation8 + $0x1c34] ss:$56 sps:$4 sm:$0xff]   ;;  %v24878_v51 = vld [vmem:[#allocation8 + $0x1c30] ss:$56 sps:$4 sm:$0xff]   ;;  %v24889_v2 = vld [vmem:[#allocation8 + $0x2484] ss:$56 sps:$4 sm:$0xff]  }
 0x761   :  { %v26910_v6 = vpop.f32.mrf.mxu1  ;;  %13852 = vmatprep.subr.bf16.mxu0 %v24868_v29  ;;  %13887 = vmatprep.subr.bf16.mxu1 %v24871_v59  ;;  %v24884_v29 = vld [vmem:[#allocation8 + $0x22c0] ss:$56 sps:$4 sm:$0xff]   ;;  %v24892_v59 = vld [vmem:[#allocation8 + $0x2254] ss:$56 sps:$4 sm:$0xff]  }
 0x762   :  { %v24895_v26 = vld [vmem:[#allocation8 + $0x2414] ss:$56 sps:$4 sm:$0xff]  }
 0x763   :  { %v13579_v39 = vpop.f32.mrf.mxu1  ;;  %13853 = vmatpush1.bf16.msra.mxu0 %v24866_v41  ;;  %v24890_v41 = vld [vmem:[#allocation8 + $0x2250] ss:$56 sps:$4 sm:$0xff]  }
 0x764   :  { %v26912_v54 = vadd.f32 %v13579_v39, %v13537_v7  ;;  %13888 = vmatpush1.bf16.msra.mxu1 %v24869_v15  ;;  %13854 = vmatprep.subr.bf16.mxu0 %v24874_v46  ;;  %v24887_v7 = vld [vmem:[#allocation8 + $0x2480] ss:$56 sps:$4 sm:$0xff]   ;;  %v24893_v15 = vld [vmem:[#allocation8 + $0x2410] ss:$56 sps:$4 sm:$0xff]   ;;  %v24898_v46 = vld [vmem:[#allocation8 + $0x21e4] ss:$56 sps:$4 sm:$0xff]  }
 0x765   :  { %13889 = vmatprep.subr.bf16.mxu1 %v24877_v31  ;;  %v24901_v31 = vld [vmem:[#allocation8 + $0x23a4] ss:$56 sps:$4 sm:$0xff]  }
 0x766   :  { %v26914_v39 = vld [vmem:[#allocation9] sm:$0xff] }
 0x767   :  { %13855 = vmatpush1.bf16.msra.mxu0 %v24872_v25  ;;  %v5339_v25 = vrot.slane %v26914_v39, %v26481_v1 }
 0x768   :  { %13890 = vmatpush1.bf16.msra.mxu1 %v24875_v12  ;;  %13856 = vmatprep.subr.bf16.mxu0 %v24880_v45  ;;  %v24896_v12 = vld [vmem:[#allocation8 + $0x21e0] ss:$56 sps:$4 sm:$0xff]  }
 0x769   :  { %13891 = vmatprep.subr.bf16.mxu1 %v24883_v9  ;;  %v12163_v45 = vadd.f32 %v26624_v3, %v5339_v25  ;;  %v24899_v9 = vld [vmem:[#allocation8 + $0x23a0] ss:$56 sps:$4 sm:$0xff]  }
 0x76b   :  { %13857 = vmatpush1.bf16.msra.mxu0 %v24878_v51  ;;  %v24904_v51 = vld [vmem:[#allocation8 + $0x2174] ss:$56 sps:$4 sm:$0xff]  }
 0x76c   :  { %13892 = vmatpush1.bf16.msra.mxu1 %v24881_v53  ;;  %13858 = vmatprep.subr.bf16.mxu0 %v24886_v57  ;;  %v24907_v53 = vld [vmem:[#allocation8 + $0x2334] ss:$56 sps:$4 sm:$0xff]   ;;  %v12159_v57 = vadd.f32 %v26614_v33, %v5339_v25  ;;  %v24911_v33 = vld [vmem:[#allocation8 + $0x29c0] ss:$56 sps:$4 sm:$0xff]  }
 0x76d   :  { %13893 = vmatprep.subr.bf16.mxu1 %v24889_v2  ;;  %v24902_v2 = vld [vmem:[#allocation8 + $0x2170] ss:$56 sps:$4 sm:$0xff]  }
 0x76e   :  { %v12202_v3 = vadd.f32 %v26618_v56, %v12159_v57  ;;  %v24920_v57 = vld [vmem:[#allocation8 + $0x2020] ss:$56 sps:$4 sm:$0xff]  }
 0x76f   :  { %13859 = vmatpush2.bf16.msra.mxu0 %v24884_v29  ;;  %v12206_v29 = vadd.f32 %v26626_v21, %v12163_v45  ;;  %v24919_v21 = vld [vmem:[#allocation8 + $0x2954] ss:$56 sps:$4 sm:$0xff]  }
 0x770   :  { %13894 = vmatpush1.bf16.msra.mxu1 %v24887_v7  ;;  %13860 = vmatprep.subr.bf16.mxu0 %v24892_v59  ;;  %v24905_v7 = vld [vmem:[#allocation8 + $0x2330] ss:$56 sps:$4 sm:$0xff]   ;;  %v24910_v59 = vld [vmem:[#allocation8 + $0x2104] ss:$56 sps:$4 sm:$0xff]  }
 0x771   :  { %13895 = vmatprep.subr.bf16.mxu1 %v24895_v26  ;;  %v24913_v26 = vld [vmem:[#allocation8 + $0x29c4] ss:$56 sps:$4 sm:$0xff]  }
 0x773   :  { %13861 = vmatpush2.bf16.msra.mxu0 %v24890_v41  ;;  %v12249_v41 = vadd.f32 %v26642_v37, %v12206_v29  ;;  %v24917_v37 = vld [vmem:[#allocation8 + $0x2950] ss:$56 sps:$4 sm:$0xff]  }
 0x774   :  { %13896 = vmatpush1.bf16.msra.mxu1 %v24893_v15  ;;  %13862 = vmatprep.subr.bf16.mxu0 %v24898_v46  ;;  %v24908_v15 = vld [vmem:[#allocation8 + $0x2100] ss:$56 sps:$4 sm:$0xff]   ;;  %v12245_v46 = vadd.f32 %v26631_v32, %v12202_v3  ;;  %v24925_v32 = vld [vmem:[#allocation8 + $0x28e4] ss:$56 sps:$4 sm:$0xff]  }
 0x775   :  { %13897 = vmatprep.subr.bf16.mxu1 %v24901_v31  ;;  %v24916_v31 = vld [vmem:[#allocation8 + $0x2094] ss:$56 sps:$4 sm:$0xff]   ;;  %v12292_v25 = vadd.f32 %v26650_v18, %v12249_v41  ;;  %v24934_v3 = vld [vmem:[#allocation8 + $0x2804] ss:$56 sps:$4 sm:$0xff]  }
 0x776   :  { %v12288_v45 = vadd.f32 %v26635_v43, %v12245_v46  ;;  %v24928_v43 = vld [vmem:[#allocation8 + $0x1fb4] ss:$56 sps:$4 sm:$0xff]  }
 0x777   :  { %13863 = vmatpush2.bf16.msra.mxu0 %v24896_v12  ;;  %v24914_v12 = vld [vmem:[#allocation8 + $0x2090] ss:$56 sps:$4 sm:$0xff]   ;;  %v12335_v56 = vadd.f32 %v26664_v14, %v12292_v25  ;;  %v24931_v14 = vld [vmem:[#allocation8 + $0x2874] ss:$56 sps:$4 sm:$0xff]  }
 0x778   :  { %13898 = vmatpush1.bf16.msra.mxu1 %v24899_v9  ;;  %13864 = vmatprep.subr.bf16.mxu0 %v24904_v51  ;;  %v24922_v9 = vld [vmem:[#allocation8 + $0x2024] ss:$56 sps:$4 sm:$0xff]   ;;  %v12331_v51 = vadd.f32 %v26647_v10, %v12288_v45  ;;  %v24926_v10 = vld [vmem:[#allocation8 + $0x1fb0] ss:$56 sps:$4 sm:$0xff]  }
 0x779   :  { %13899 = vmatprep.subr.bf16.mxu1 %v24907_v53  ;;  %v12378_v53 = vadd.f32 %v26669_v4, %v12335_v56 }
 0x77a   :  { %v12374_v18 = vadd.f32 %v26656_v27, %v12331_v51  ;;  %v24937_v27 = vld [vmem:[#allocation11 + $0x154] ss:$24 sps:$4 sm:$0xff]   ;;  %v24941_v51 = vld [vmem:[#allocation11 + $0x120] ss:$24 sps:$4 sm:$0xff]  }
 0x77b   :  { %13865 = vmatpush2.bf16.msra.mxu0 %v24902_v2  ;;  %v24923_v2 = vld [vmem:[#allocation8 + $0x28e0] ss:$56 sps:$4 sm:$0xff]   ;;  %v13973_v29 = vmul.f32 %v26654_v8, %v12378_v53  ;;  %vm13944_vm2 = vcmp.gt.f32.partialorder %v12378_v53, 0.0 }
 0x77c   :  { %13900 = vmatpush1.bf16.msra.mxu1 %v24905_v7  ;;  %13866 = vmatprep.subr.bf16.mxu0 %v24910_v59  ;;  %v5347_v7 = vrot.slane %v26914_v39, %v26477_v0  ;;  %v13959_v4 = vmul.f32 %v26654_v8, %v12374_v18  ;;  %v24929_v59 = vld [vmem:[#allocation8 + $0x2870] ss:$56 sps:$4 sm:$0xff]   ;;  %vm13930_vm3 = vcmp.gt.f32.partialorder %v12374_v18, 0.0 }
 0x77d   :  { %13901 = vmatprep.subr.bf16.mxu1 %v24913_v26  ;;  %v14001_v41 = vsel %vm13944_vm2, %v12378_v53, %v13973_v29  ;;  %v24949_v53 = vld [vmem:[#allocation11 + $0xf4] ss:$24 sps:$4 sm:$0xff]   ;;  %v24955_v29 = vld [vmem:[#allocation11 + $0xc4] ss:$24 sps:$4 sm:$0xff]  }
 0x77e   :  { %v12421_v26 = vadd.f32 %v26679_v58, %v5347_v7  ;;  %v13987_v25 = vsel %vm13930_vm3, %v12374_v18, %v13959_v4  ;;  %v24961_v4 = vld [vmem:[#allocation11 + $0x454] ss:$24 sps:$4 sm:$0xff]  }
 0x77f   :  { %13867 = vmatpush2.bf16.msra.mxu0 %v24908_v15  ;;  %v12417_v15 = vadd.f32 %v26667_v48, %v5347_v7  ;;  %v26941_v56 = vpack.c.bf16 %v14001_v41, %v13987_v25  ;;  %v24964_v41 = vld [vmem:[#allocation11 + $0x64] ss:$24 sps:$4 sm:$0xff]  }
 0x780   :  { %13902 = vmatpush2.bf16.msra.mxu1 %v24911_v33  ;;  %13868 = vmatprep.subr.bf16.mxu0 %v24916_v31  ;;  %v12464_v46 = vadd.f32 %v26687_v40, %v12421_v26  ;;  %v24935_v33 = vld [vmem:[#allocation11 + $0x150] ss:$24 sps:$4 sm:$0xff]   ;;  %v26937_v31 = vpop.f32.mrf.mxu0  ;;  %v26958_v26 = vpop.f32.mrf.mxu1 }
 0x781   :  { %13903 = vmatprep.subr.bf16.mxu1 %v24919_v21  ;;  %v24932_v21 = vld [vmem:[#allocation8 + $0x2800] ss:$56 sps:$4 sm:$0xff]   ;;  %v12460_v45 = vadd.f32 %v26675_v49, %v12417_v15  ;;  %v24967_v15 = vld [vmem:[#allocation11 + $0x424] ss:$24 sps:$4 sm:$0xff]  }
 0x782   :  { %v12507_v58 = vadd.f32 %v26697_v50, %v12464_v46  ;;  %v24938_v50 = vld [vmem:[#allocation8 + $0x2790] ss:$56 sps:$4 sm:$0xff]  }
 0x783   :  { %13869 = vmatpush2.bf16.msra.mxu0 %v24914_v12  ;;  %v24943_v12 = vld [vmem:[#allocation11 + $0x124] ss:$24 sps:$4 sm:$0xff]   ;;  %v12503_v40 = vadd.f32 %v26684_v63, %v12460_v45  ;;  %v24946_v63 = vld [vmem:[#allocation8 + $0x2724] ss:$56 sps:$4 sm:$0xff]  }
 0x784   :  { %13904 = vmatpush2.bf16.msra.mxu1 %v24917_v37  ;;  %13870 = vmatprep.subr.bf16.mxu0 %v24922_v9  ;;  %v24940_v37 = vld [vmem:[#allocation8 + $0x2794] ss:$56 sps:$4 sm:$0xff]   ;;  %v12550_v9 = vadd.f32 %v26705_v47, %v12507_v58  ;;  %v24970_v45 = vld [vmem:[#allocation11 + $0x34] ss:$24 sps:$4 sm:$0xff]  }
 0x785   :  { %13905 = vmatprep.subr.bf16.mxu1 %v24925_v32 }
 0x787   :  { %13871 = vmatpush2.bf16.msra.mxu0 %v24920_v57  ;;  %v12546_v57 = vadd.f32 %v26693_v60, %v12503_v40  ;;  %v24952_v60 = vld [vmem:[#allocation8 + $0x26b4] ss:$56 sps:$4 sm:$0xff]  }
 0x788   :  { %13906 = vmatpush2.bf16.msra.mxu1 %v24923_v2  ;;  %13872 = vmatprep.subr.bf16.mxu0 %v24928_v43  ;;  %v24947_v43 = vld [vmem:[#allocation11 + $0xf0] ss:$24 sps:$4 sm:$0xff]  }
 0x789   :  { %13907 = vmatprep.subr.bf16.mxu1 %v24931_v14  ;;  %v12589_v47 = vadd.f32 %v26702_v62, %v12546_v57  ;;  %v24944_v14 = vld [vmem:[#allocation8 + $0x2720] ss:$56 sps:$4 sm:$0xff]   ;;  %v24950_v62 = vld [vmem:[#allocation8 + $0x26b0] ss:$56 sps:$4 sm:$0xff]  }
 0x78a   :  { %v24968_v40 = vld [vmem:[#allocation11 + $0x30] ss:$24 sps:$4 sm:$0xff]   ;;  %v24974_v57 = vld [vmem:[#allocation11] ss:$24 sps:$4 sm:$0xff]  }
 0x78b   :  { %13873 = vmatpush2.bf16.msra.mxu0 %v24926_v10  ;;  %v12632_v7 = vadd.f32 %v26709_v42, %v12589_v47  ;;  %v24953_v10 = vld [vmem:[#allocation11 + $0xc0] ss:$24 sps:$4 sm:$0xff]   ;;  %v24959_v42 = vld [vmem:[#allocation11 + $0x450] ss:$24 sps:$4 sm:$0xff]   ;;  %v24982_v47 = vld [vmem:[#allocation11 + $0x2d4] ss:$24 sps:$4 sm:$0xff]  }
 0x78c   :  { %13908 = vmatpush2.bf16.msra.mxu1 %v24929_v59  ;;  %18092 = vmatprep.subr.bf16.mxu0 %v24937_v27  ;;  %v24956_v59 = vld [vmem:[#allocation11 + $0x90] ss:$24 sps:$4 sm:$0xff]  }
 0x78d   :  { %13909 = vmatprep.subr.bf16.mxu1 %v24934_v3  ;;  %vm13932_vm5 = vcmp.gt.f32.partialorder %v12632_v7, 0.0 }
 0x78e   :  { %v13618_v48 = vpop.f32.mrf.mxu0  ;;  %13875 = vmatmul.mubr.bf16.vlgmr.msra.gmra.mxu0 %v26596_v17  ;;  %v12593_v17 = vadd.f32 %v26717_v24, %v12550_v9 }
 0x78f   :  { %v13619_v32 = vadd.f32 %v13618_v48, %v26907_v5  ;;  %18093 = vmatpush1.bf16.msra.mxu0 %v24935_v33  ;;  %18124 = vmatprep.mubr.bf16.mxu0 %v26941_v56 }
 0x790   :  { %13910 = vmatpush2.bf16.msra.mxu1 %v24932_v21  ;;  %v26948_v49 = vpop.f32.mrf.mxu0  ;;  %18094 = vmatprep.subr.bf16.mxu0 %v24943_v12  ;;  %v12636_v5 = vadd.f32 %v26722_v11, %v12593_v17  ;;  %v24958_v11 = vld [vmem:[#allocation11 + $0x94] ss:$24 sps:$4 sm:$0xff]   ;;  %v24962_v21 = vld [vmem:[#allocation11 + $0x60] ss:$24 sps:$4 sm:$0xff]  }
 0x791   :  { %13911 = vmatprep.subr.bf16.mxu1 %v24940_v37  ;;  %v24965_v12 = vld [vmem:[#allocation11 + $0x420] ss:$24 sps:$4 sm:$0xff]   ;;  %v24973_v37 = vld [vmem:[#allocation11 + $0x3f4] ss:$24 sps:$4 sm:$0xff]  }
 0x792   :  { %v13622_v18 = vpop.f32.mrf.mxu0  ;;  %v13975_v24 = vmul.f32 %v26654_v8, %v12636_v5  ;;  %vm13946_vm4 = vcmp.gt.f32.partialorder %v12636_v5, 0.0 }
 0x793   :  { %v13623_v2 = vadd.f32 %v13622_v18, %v26912_v54  ;;  %18095 = vmatpush1.bf16.msra.mxu0 %v24941_v51  ;;  %v13961_v54 = vmul.f32 %v26654_v8, %v12632_v7  ;;  %v24977_v18 = vld [vmem:[#allocation11 + $0x3c0] ss:$24 sps:$4 sm:$0xff]  }
 0x794   :  { %13912 = vmatpush2.bf16.msra.mxu1 %v24938_v50  ;;  %18096 = vmatprep.subr.bf16.mxu0 %v24949_v53  ;;  %v14003_v27 = vsel %vm13946_vm4, %v12636_v5, %v13975_v24  ;;  %v24979_v50 = vld [vmem:[#allocation11 + $0x3c4] ss:$24 sps:$4 sm:$0xff]   ;;  %v24989_v24 = vld [vmem:[#allocation11 + $0x360] ss:$24 sps:$4 sm:$0xff]  }
 0x795   :  { %13913 = vmatprep.subr.bf16.mxu1 %v24946_v63  ;;  %v13989_v3 = vsel %vm13932_vm5, %v12632_v7, %v13961_v54  ;;  %v24991_v7 = vld [vmem:[#allocation11 + $0x364] ss:$24 sps:$4 sm:$0xff]   ;;  %v24995_v54 = vld [vmem:[#allocation11 + $0x330] ss:$24 sps:$4 sm:$0xff]  }
 0x796   :  { %v26960_v46 = vpack.c.bf16 %v14003_v27, %v13989_v3  ;;  %v5355_v27 = vrot.slane %v26914_v39, %v26528_v20 }
 0x797   :  { %18097 = vmatpush1.bf16.msra.mxu0 %v24947_v43  ;;  %v24980_v43 = vld [vmem:[#allocation11 + $0x2d0] ss:$24 sps:$4 sm:$0xff]  }
 0x798   :  { %13914 = vmatpush2.bf16.msra.mxu1 %v24944_v14  ;;  %18098 = vmatprep.subr.bf16.mxu0 %v24955_v29  ;;  %v24983_v14 = vld [vmem:[#allocation11 + $0x390] ss:$24 sps:$4 sm:$0xff]   ;;  %v24988_v29 = vld [vmem:[#allocation11 + $0x2a4] ss:$24 sps:$4 sm:$0xff]   ;;  %v12679_v3 = vadd.f32 %v26732_v23, %v5355_v27 }
 0x799   :  { %13915 = vmatprep.subr.bf16.mxu1 %v24952_v60  ;;  %v24986_v60 = vld [vmem:[#allocation11 + $0x2a0] ss:$24 sps:$4 sm:$0xff]   ;;  %v25012_v23 = vld [vmem:[#allocation11 + $0x1e4] ss:$24 sps:$4 sm:$0xff]  }
 0x79b   :  { %18099 = vmatpush1.bf16.msra.mxu0 %v24953_v10  ;;  %v24994_v10 = vld [vmem:[#allocation11 + $0x274] ss:$24 sps:$4 sm:$0xff]  }
 0x79c   :  { %13916 = vmatpush2.bf16.msra.mxu1 %v24950_v62  ;;  %18100 = vmatprep.subr.bf16.mxu0 %v24958_v11  ;;  %v24997_v62 = vld [vmem:[#allocation11 + $0x334] ss:$24 sps:$4 sm:$0xff]   ;;  %v24992_v11 = vld [vmem:[#allocation11 + $0x270] ss:$24 sps:$4 sm:$0xff]  }
 0x79d   :  { %18135 = vmatprep.subr.bf16.mxu1 %v24961_v4  ;;  %v25000_v4 = vld [vmem:[#allocation11 + $0x244] ss:$24 sps:$4 sm:$0xff]  }
 0x79f   :  { %v13661_v33 = vpop.f32.mrf.mxu1  ;;  %13918 = vmatmul.mubr.bf16.vlgmr.msra.gmra.mxu1 %v26606_v61  ;;  %18101 = vmatpush1.bf16.msra.mxu0 %v24956_v59  ;;  %v24971_v61 = vld [vmem:[#allocation11 + $0x3f0] ss:$24 sps:$4 sm:$0xff]   ;;  %v25003_v59 = vld [vmem:[#allocation11 + $0x304] ss:$24 sps:$4 sm:$0xff]  }
 0x7a0   :  { %v13662_v25 = vadd.f32 %v13661_v33, %v13619_v32  ;;  %18136 = vmatpush1.bf16.msra.mxu1 %v24959_v42  ;;  %18167 = vmatprep.mubr.bf16.mxu1 %v26960_v46  ;;  %v24976_v32 = vld [vmem:[#allocation11 + $0x4] ss:$24 sps:$4 sm:$0xff]   ;;  %v24998_v42 = vld [vmem:[#allocation11 + $0x240] ss:$24 sps:$4 sm:$0xff]   ;;  %v25009_v33 = vld [vmem:[#allocation11 + $0x5d4] ss:$24 sps:$4 sm:$0xff]  }
 0x7a1   :  { %v26964_v58 = vpop.f32.mrf.mxu1  ;;  %18102 = vmatprep.subr.bf16.mxu0 %v24964_v41  ;;  %18137 = vmatprep.subr.bf16.mxu1 %v24967_v15  ;;  %v25001_v41 = vld [vmem:[#allocation11 + $0x300] ss:$24 sps:$4 sm:$0xff]   ;;  %v25006_v15 = vld [vmem:[#allocation11 + $0x214] ss:$24 sps:$4 sm:$0xff]  }
 0x7a2   :  { %v13968_v9 = vmul.f32 %v26654_v8, %v13662_v25  ;;  %vm13939_vm6 = vcmp.gt.f32.partialorder %v13662_v25, 0.0 }
 0x7a3   :  { %v13665_v48 = vpop.f32.mrf.mxu1  ;;  %18103 = vmatpush1.bf16.msra.mxu0 %v24962_v21  ;;  %v27376_v21 = vld [vmem:[#allocation28_spill] sm:$0xff] }
 0x7a4   :  { %v13666_v51 = vadd.f32 %v13665_v48, %v13623_v2  ;;  %18138 = vmatpush1.bf16.msra.mxu1 %v24965_v12  ;;  %18104 = vmatprep.subr.bf16.mxu0 %v24970_v45  ;;  %v13996_v17 = vsel %vm13939_vm6, %v13662_v25, %v13968_v9  ;;  %v24985_v2 = vld [vmem:[#allocation11 + $0x394] ss:$24 sps:$4 sm:$0xff]   ;;  %v12675_v25 = vadd.f32 %v27376_v21, %v5355_v27  ;;  %v27378_v48 = vld [vmem:[#allocation29_spill] sm:$0xff] }
 0x7a5   :  { %18139 = vmatprep.subr.bf16.mxu1 %v24973_v37  ;;  %v27377_v12 = vld [vmem:[#allocation31_spill] sm:$0xff]  ;;  %v27379_v9 = vld [vmem:[#allocation33_spill] sm:$0xff] }
 0x7a6   :  { %vm13953_vm7 = vcmp.gt.f32.partialorder %v13666_v51, 0.0  ;;  %v13982_v53 = vmul.f32 %v26654_v8, %v13666_v51  ;;  %v12722_v45 = vadd.f32 %v27377_v12, %v12679_v3  ;;  %v25004_v37 = vld [vmem:[#allocation11 + $0x210] ss:$24 sps:$4 sm:$0xff]   ;;  %v25024_v27 = vld [vmem:[#allocation11 + $0x184] ss:$24 sps:$4 sm:$0xff]  }
 0x7a7   :  { %18105 = vmatpush1.bf16.msra.mxu0 %v24968_v40  ;;  %v12718_v40 = vadd.f32 %v27378_v48, %v12675_v25  ;;  %v25022_v21 = vld [vmem:[#allocation11 + $0x180] ss:$24 sps:$4 sm:$0xff]   ;;  %v25030_v48 = vld [vmem:[#allocation11 + $0x514] ss:$24 sps:$4 sm:$0xff]  }
 0x7a8   :  { %v14010_v63 = vsel %vm13953_vm7, %v13666_v51, %v13982_v53  ;;  %18140 = vmatpush1.bf16.msra.mxu1 %v24971_v61  ;;  %18106 = vmatprep.subr.bf16.mxu0 %v24976_v32  ;;  %v12765_v51 = vadd.f32 %v27379_v9, %v12722_v45  ;;  %v25007_v61 = vld [vmem:[#allocation11 + $0x5d0] ss:$24 sps:$4 sm:$0xff]   ;;  %v25015_v32 = vld [vmem:[#allocation11 + $0x5a4] ss:$24 sps:$4 sm:$0xff]   ;;  %v25025_v12 = vld [vmem:[#allocation11 + $0x540] ss:$24 sps:$4 sm:$0xff]  }
 0x7a9   :  { %v26968_v5 = vpack.c.bf16 %v14010_v63, %v13996_v17  ;;  %18141 = vmatprep.subr.bf16.mxu1 %v24979_v50  ;;  %v27380_v50 = vld [vmem:[#allocation30_spill] sm:$0xff]  ;;  %v25033_v45 = vld [vmem:[#allocation11 + $0x754] ss:$24 sps:$4 sm:$0xff]  }
 0x7aa   :  { %v12761_v53 = vadd.f32 %v27380_v50, %v12718_v40  ;;  %v25010_v63 = vld [vmem:[#allocation11 + $0x1e0] ss:$24 sps:$4 sm:$0xff]   ;;  %v27389_v9 = vld [vmem:[#allocation39_spill] sm:$0xff]  ;;  %v25039_v50 = vld [vmem:[#allocation11 + $0x724] ss:$24 sps:$4 sm:$0xff]  }
 0x7ab   :  { %18107 = vmatpush1.bf16.msra.mxu0 %v24974_v57  ;;  %v27381_v57 = vld [vmem:[#allocation35_spill] sm:$0xff] }
 0x7ac   :  { %18142 = vmatpush1.bf16.msra.mxu1 %v24977_v18  ;;  %18108 = vmatprep.subr.bf16.mxu0 %v24982_v47  ;;  %v12808_v17 = vadd.f32 %v27381_v57, %v12765_v51  ;;  %v27382_v18 = vld [vmem:[#allocation32_spill] sm:$0xff] }
 0x7ad   :  { %18143 = vmatprep.subr.bf16.mxu1 %v24985_v2  ;;  %v12804_v47 = vadd.f32 %v27382_v18, %v12761_v53  ;;  %v27383_v2 = vld [vmem:[#allocation38_spill] sm:$0xff]  ;;  %v27390_v53 = vld [vmem:[#allocation41_spill] sm:$0xff] }
 0x7ae   :  { %v25036_v18 = vld [vmem:[#allocation11 + $0x4e4] ss:$24 sps:$4 sm:$0xff]  }
 0x7af   :  { %18109 = vmatpush2.bf16.msra.mxu0 %v24980_v43  ;;  %v12851_v43 = vadd.f32 %v27383_v2, %v12808_v17  ;;  %v27391_v17 = vld [vmem:[#allocation44_spill] sm:$0xff]  ;;  %v27393_v2 = vld [vmem:[#allocation42_spill] sm:$0xff] }
 0x7b0   :  { %18144 = vmatpush1.bf16.msra.mxu1 %v24983_v14  ;;  %18110 = vmatprep.subr.bf16.mxu0 %v24988_v29  ;;  %v25013_v14 = vld [vmem:[#allocation11 + $0x5a0] ss:$24 sps:$4 sm:$0xff]   ;;  %v25018_v29 = vld [vmem:[#allocation11 + $0x1b4] ss:$24 sps:$4 sm:$0xff]  }
 0x7b1   :  { %18145 = vmatprep.subr.bf16.mxu1 %v24991_v7  ;;  %v25021_v7 = vld [vmem:[#allocation11 + $0x574] ss:$24 sps:$4 sm:$0xff]  }
 0x7b3   :  { %18111 = vmatpush2.bf16.msra.mxu0 %v24986_v60  ;;  %v27384_v60 = vld [vmem:[#allocation34_spill] sm:$0xff] }
 0x7b4   :  { %18146 = vmatpush1.bf16.msra.mxu1 %v24989_v24  ;;  %18112 = vmatprep.subr.bf16.mxu0 %v24994_v10  ;;  %v12847_v24 = vadd.f32 %v27384_v60, %v12804_v47  ;;  %v27385_v10 = vld [vmem:[#allocation40_spill] sm:$0xff]  ;;  %v27392_v47 = vld [vmem:[#allocation26_spill] sm:$0xff] }
 0x7b5   :  { %18147 = vmatprep.subr.bf16.mxu1 %v24997_v62  ;;  %v12894_v62 = vadd.f32 %v27385_v10, %v12851_v43  ;;  %v25045_v60 = vld [vmem:[#allocation11 + $0x6f4] ss:$24 sps:$4 sm:$0xff]  }
 0x7b7   :  { %18113 = vmatpush2.bf16.msra.mxu0 %v24992_v11  ;;  %v25016_v11 = vld [vmem:[#allocation11 + $0x1b0] ss:$24 sps:$4 sm:$0xff]   ;;  %v13977_v3 = vmul.f32 %v26654_v8, %v12894_v62  ;;  %vm13948_vm8 = vcmp.gt.f32.partialorder %v12894_v62, 0.0 }
 0x7b8   :  { %18148 = vmatpush1.bf16.msra.mxu1 %v24995_v54  ;;  %18114 = vmatprep.subr.bf16.mxu0 %v25000_v4  ;;  %v27386_v54 = vld [vmem:[#allocation36_spill] sm:$0xff] }
 0x7b9   :  { %18149 = vmatprep.subr.bf16.mxu1 %v25003_v59  ;;  %v12890_v4 = vadd.f32 %v27386_v54, %v12847_v24  ;;  %v25019_v59 = vld [vmem:[#allocation11 + $0x570] ss:$24 sps:$4 sm:$0xff]   ;;  %v14005_v40 = vsel %vm13948_vm8, %v12894_v62, %v13977_v3  ;;  %v27396_v54 = vld [vmem:[#allocation45_spill] sm:$0xff] }
 0x7ba   :  { %v27395_v24 = vld [vmem:[#allocation43_spill] sm:$0xff] }
 0x7bb   :  { %18115 = vmatpush2.bf16.msra.mxu0 %v24998_v42  ;;  %v25027_v42 = vld [vmem:[#allocation11 + $0x544] ss:$24 sps:$4 sm:$0xff]   ;;  %v13963_v25 = vmul.f32 %v26654_v8, %v12890_v4  ;;  %vm13934_vm9 = vcmp.gt.f32.partialorder %v12890_v4, 0.0  ;;  %v25040_v3 = vld [vmem:[#allocation11 + $0x4b0] ss:$24 sps:$4 sm:$0xff]  }
 0x7bc   :  { %18150 = vmatpush1.bf16.msra.mxu1 %v25001_v41  ;;  %18116 = vmatprep.subr.bf16.mxu0 %v25006_v15  ;;  %v27387_v41 = vld [vmem:[#allocation23_spill] sm:$0xff] }
 0x7bd   :  { %18151 = vmatprep.subr.bf16.mxu1 %v25009_v33  ;;  %v27388_v15 = vsub.s32 7, %v27387_v41  ;;  %v25051_v41 = vld [vmem:[#allocation11 + $0x6c4] ss:$24 sps:$4 sm:$0xff]  }
 0x7bf   :  { %18117 = vmatpush2.bf16.msra.mxu0 %v25004_v37  ;;  %v5363_v33 = vrot.slane %v26914_v39, %v27388_v15  ;;  %v25031_v39 = vld [vmem:[#allocation11 + $0x750] ss:$24 sps:$4 sm:$0xff]  }
 0x7c0   :  { %18152 = vmatpush2.bf16.msra.mxu1 %v25007_v61  ;;  %18118 = vmatprep.subr.bf16.mxu0 %v25012_v23  ;;  %v25028_v23 = vld [vmem:[#allocation11 + $0x510] ss:$24 sps:$4 sm:$0xff]  }
 0x7c1   :  { %18153 = vmatprep.subr.bf16.mxu1 %v25015_v32  ;;  %v12937_v37 = vadd.f32 %v26786_v55, %v5363_v33  ;;  %v12933_v51 = vadd.f32 %v27389_v9, %v5363_v33  ;;  %v13991_v32 = vsel %vm13934_vm9, %v12890_v4, %v13963_v25  ;;  %v27398_v15 = vld [vmem:[#allocation47_spill] sm:$0xff] }
 0x7c2   :  { %v26994_v55 = vpack.c.bf16 %v14005_v40, %v13991_v32  ;;  %v25052_v40 = vld [vmem:[#allocation11 + $0x690] ss:$24 sps:$4 sm:$0xff]  }
 0x7c3   :  { %18119 = vmatpush2.bf16.msra.mxu0 %v25010_v63  ;;  %v12980_v61 = vadd.f32 %v26794_v30, %v12937_v37  ;;  %v12976_v57 = vadd.f32 %v27390_v53, %v12933_v51  ;;  %v27394_v30 = vld [vmem:[#allocation46_spill] sm:$0xff]  ;;  %v25055_v51 = vld [vmem:[#allocation11 + $0xa50] ss:$24 sps:$4 sm:$0xff]  }
 0x7c4   :  { %18154 = vmatpush2.bf16.msra.mxu1 %v25013_v14  ;;  %18120 = vmatprep.subr.bf16.mxu0 %v25018_v29  ;;  %v25037_v29 = vld [vmem:[#allocation11 + $0x720] ss:$24 sps:$4 sm:$0xff]  }
 0x7c5   :  { %18155 = vmatprep.subr.bf16.mxu1 %v25021_v7  ;;  %v13023_v63 = vadd.f32 %v27391_v17, %v12980_v61  ;;  %v13019_v43 = vadd.f32 %v27393_v2, %v12976_v57  ;;  %v25034_v7 = vld [vmem:[#allocation11 + $0x4e0] ss:$24 sps:$4 sm:$0xff]   ;;  %v25066_v17 = vld [vmem:[#allocation11 + $0x634] ss:$24 sps:$4 sm:$0xff]   ;;  %v25067_v2 = vld [vmem:[#allocation11 + $0x9f0] ss:$24 sps:$4 sm:$0xff]  }
 0x7c6   :  { %v25058_v53 = vld [vmem:[#allocation11 + $0x660] ss:$24 sps:$4 sm:$0xff]  }
 0x7c7   :  { %18121 = vmatpush2.bf16.msra.mxu0 %v25016_v11  ;;  %v13066_v14 = vadd.f32 %v27394_v30, %v13023_v63  ;;  %v13062_v10 = vadd.f32 %v27395_v24, %v13019_v43  ;;  %v25042_v11 = vld [vmem:[#allocation11 + $0x4b4] ss:$24 sps:$4 sm:$0xff]   ;;  %v25061_v57 = vld [vmem:[#allocation11 + $0xa20] ss:$24 sps:$4 sm:$0xff]   ;;  %v25072_v43 = vld [vmem:[#allocation11 + $0x604] ss:$24 sps:$4 sm:$0xff]  }
 0x7c8   :  { %18156 = vmatpush2.bf16.msra.mxu1 %v25019_v59  ;;  %18122 = vmatprep.subr.bf16.mxu0 %v25024_v27  ;;  %v27397_v59 = vld [vmem:[#allocation50_spill] sm:$0xff]  ;;  %v25069_v63 = vld [vmem:[#allocation11 + $0x9f4] ss:$24 sps:$4 sm:$0xff]   ;;  %v25076_v24 = vld [vmem:[#allocation11 + $0x8d0] ss:$24 sps:$4 sm:$0xff]  }
 0x7c9   :  { %18157 = vmatprep.subr.bf16.mxu1 %v25027_v42  ;;  %v13109_v62 = vadd.f32 %v26824_v16, %v13066_v14  ;;  %v13105_v4 = vadd.f32 %v27396_v54, %v13062_v10  ;;  %v25043_v42 = vld [vmem:[#allocation11 + $0x6f0] ss:$24 sps:$4 sm:$0xff]   ;;  %v25049_v16 = vld [vmem:[#allocation11 + $0x6c0] ss:$24 sps:$4 sm:$0xff]   ;;  %v25075_v30 = vld [vmem:[#allocation11 + $0x9c4] ss:$24 sps:$4 sm:$0xff]  }
 0x7ca   :  { %v25070_v14 = vld [vmem:[#allocation11 + $0x600] ss:$24 sps:$4 sm:$0xff]   ;;  %v25079_v10 = vld [vmem:[#allocation11 + $0x990] ss:$24 sps:$4 sm:$0xff]  }
 0x7cb   :  { %18123 = vmatpush2.bf16.msra.mxu0 %v25022_v21  ;;  %v13152_v27 = vadd.f32 %v27397_v59, %v13109_v62  ;;  %v13148_v33 = vadd.f32 %v27398_v15, %v13105_v4  ;;  %v25048_v21 = vld [vmem:[#allocation11 + $0x484] ss:$24 sps:$4 sm:$0xff]   ;;  %v25082_v54 = vld [vmem:[#allocation11 + $0x8a0] ss:$24 sps:$4 sm:$0xff]   ;;  %v25090_v59 = vld [vmem:[#allocation11 + $0x874] ss:$24 sps:$4 sm:$0xff]  }
 0x7cc   :  { %18158 = vmatpush2.bf16.msra.mxu1 %v25025_v12  ;;  %18178 = vmatprep.subr.bf16.mxu0 %v25033_v45  ;;  %v25046_v12 = vld [vmem:[#allocation11 + $0x480] ss:$24 sps:$4 sm:$0xff]   ;;  %v25054_v45 = vld [vmem:[#allocation11 + $0x694] ss:$24 sps:$4 sm:$0xff]   ;;  %v25084_v62 = vld [vmem:[#allocation11 + $0x8a4] ss:$24 sps:$4 sm:$0xff]  }
 0x7cd   :  { %18159 = vmatprep.subr.bf16.mxu1 %v25030_v48  ;;  %v13979_v25 = vmul.f32 %v26654_v8, %v13152_v27  ;;  %vm13950_vm10 = vcmp.gt.f32.partialorder %v13152_v27, 0.0  ;;  %v13965_v37 = vmul.f32 %v26654_v8, %v13148_v33  ;;  %v25057_v48 = vld [vmem:[#allocation11 + $0xa54] ss:$24 sps:$4 sm:$0xff]   ;;  %vm13936_vm11 = vcmp.gt.f32.partialorder %v13148_v33, 0.0  ;;  %v25085_v4 = vld [vmem:[#allocation11 + $0x960] ss:$24 sps:$4 sm:$0xff]  }
 0x7ce   :  { %18125 = vmatmul.mubr.bf16.vlgmr.msra.gmra.mxu0 %v27392_v47  ;;  %v25099_v15 = vld [vmem:[#allocation11 + $0x904] ss:$24 sps:$4 sm:$0xff]  }
 0x7cf   :  { %18179 = vmatpush1.bf16.msra.mxu0 %v25031_v39  ;;  %18210 = vmatprep.mubr.bf16.mxu0 %v26994_v55  ;;  %v14007_v9 = vsel %vm13950_vm10, %v13152_v27, %v13979_v25  ;;  %v13993_v61 = vsel %vm13936_vm11, %v13148_v33, %v13965_v37  ;;  %v25060_v39 = vld [vmem:[#allocation11 + $0x664] ss:$24 sps:$4 sm:$0xff]   ;;  %v25093_v27 = vld [vmem:[#allocation11 + $0x934] ss:$24 sps:$4 sm:$0xff]   ;;  %v25094_v25 = vld [vmem:[#allocation11 + $0x840] ss:$24 sps:$4 sm:$0xff]  }
 0x7d0   :  { %18160 = vmatpush2.bf16.msra.mxu1 %v25028_v23  ;;  %18180 = vmatprep.subr.bf16.mxu0 %v25039_v50  ;;  %v25063_v23 = vld [vmem:[#allocation11 + $0xa24] ss:$24 sps:$4 sm:$0xff]   ;;  %v27007_v32 = vpack.c.bf16 %v14007_v9, %v13993_v61  ;;  %v27399_v50 = vld [vmem:[#allocation27_spill] sm:$0xff] }
 0x7d1   :  { %18161 = vmatprep.subr.bf16.mxu1 %v25036_v18  ;;  %v25064_v18 = vld [vmem:[#allocation11 + $0x630] ss:$24 sps:$4 sm:$0xff]   ;;  %v27011_v33 = vld [vmem:[#allocation9 + $0x8] sm:$0x3f]  ;;  %v25105_v37 = vld [vmem:[#allocation11 + $0xbd4] ss:$24 sps:$4 sm:$0xff]  }
 0x7d2   :  { %v27401_v9 = vld [vmem:[#allocation53_spill] sm:$0xff]  ;;  %v25100_v61 = vld [vmem:[#allocation11 + $0x810] ss:$24 sps:$4 sm:$0xff]  }
 0x7d3   :  { %18181 = vmatpush1.bf16.msra.mxu0 %v25037_v29  ;;  %v25073_v29 = vld [vmem:[#allocation11 + $0x9c0] ss:$24 sps:$4 sm:$0xff]  }
 0x7d4   :  { %18162 = vmatpush2.bf16.msra.mxu1 %v25034_v7  ;;  %18182 = vmatprep.subr.bf16.mxu0 %v25045_v60  ;;  %v25078_v7 = vld [vmem:[#allocation11 + $0x8d4] ss:$24 sps:$4 sm:$0xff]  }
 0x7d5   :  { %18163 = vmatprep.subr.bf16.mxu1 %v25042_v11  ;;  %v25081_v60 = vld [vmem:[#allocation11 + $0x994] ss:$24 sps:$4 sm:$0xff]   ;;  %v25087_v11 = vld [vmem:[#allocation11 + $0x964] ss:$24 sps:$4 sm:$0xff]  }
 0x7d7   :  { %18183 = vmatpush1.bf16.msra.mxu0 %v25043_v42  ;;  %v25088_v42 = vld [vmem:[#allocation11 + $0x870] ss:$24 sps:$4 sm:$0xff]  }
 0x7d8   :  { %18164 = vmatpush2.bf16.msra.mxu1 %v25040_v3  ;;  %18184 = vmatprep.subr.bf16.mxu0 %v25051_v41  ;;  %v25091_v3 = vld [vmem:[#allocation11 + $0x930] ss:$24 sps:$4 sm:$0xff]   ;;  %v25096_v41 = vld [vmem:[#allocation11 + $0x844] ss:$24 sps:$4 sm:$0xff]  }
 0x7d9   :  { %18165 = vmatprep.subr.bf16.mxu1 %v25048_v21  ;;  %v5371_v21 = vrot.slane %v27011_v33, %v26481_v1 }
 0x7db   :  { %18185 = vmatpush1.bf16.msra.mxu0 %v25049_v16  ;;  %v13195_v16 = vadd.f32 %v26842_v28, %v5371_v21  ;;  %v25108_v28 = vld [vmem:[#allocation11 + $0x7e4] ss:$24 sps:$4 sm:$0xff]  }
 0x7dc   :  { %18166 = vmatpush2.bf16.msra.mxu1 %v25046_v12  ;;  %18186 = vmatprep.subr.bf16.mxu0 %v25054_v45  ;;  %v25097_v12 = vld [vmem:[#allocation11 + $0x900] ss:$24 sps:$4 sm:$0xff]   ;;  %v25102_v45 = vld [vmem:[#allocation11 + $0x814] ss:$24 sps:$4 sm:$0xff]  }
 0x7dd   :  { %18221 = vmatprep.subr.bf16.mxu1 %v25057_v48  ;;  %v27400_v48 = vld [vmem:[#allocation49_spill] sm:$0xff] }
 0x7df   :  { %18168 = vmatmul.mubr.bf16.vlgmr.msra.gmra.mxu1 %v27399_v50  ;;  %18187 = vmatpush1.bf16.msra.mxu0 %v25052_v40  ;;  %v13191_v40 = vadd.f32 %v27400_v48, %v5371_v21  ;;  %v5379_v21 = vrot.slane %v27011_v33, %v26477_v0 }
 0x7e0   :  { %18222 = vmatpush1.bf16.msra.mxu1 %v25055_v51  ;;  %18253 = vmatprep.mubr.bf16.mxu1 %v27007_v32  ;;  %v13238_v51 = vadd.f32 %v27401_v9, %v13195_v16  ;;  %v25121_v16 = vld [vmem:[#allocation11 + $0xb40] ss:$24 sps:$4 sm:$0xff]  }
 0x7e1   :  { %18188 = vmatprep.subr.bf16.mxu0 %v25060_v39  ;;  %18223 = vmatprep.subr.bf16.mxu1 %v25063_v23  ;;  %v27402_v39 = vld [vmem:[#allocation51_spill] sm:$0xff] }
 0x7e2   :  { %v13234_v23 = vadd.f32 %v27402_v39, %v13191_v40  ;;  %v13449_v40 = vadd.f32 %v26884_v13, %v5379_v21 }
 0x7e3   :  { %18189 = vmatpush1.bf16.msra.mxu0 %v25058_v53  ;;  %v27403_v53 = vld [vmem:[#allocation55_spill] sm:$0xff] }
 0x7e4   :  { %18224 = vmatpush1.bf16.msra.mxu1 %v25061_v57  ;;  %18190 = vmatprep.subr.bf16.mxu0 %v25066_v17  ;;  %v13281_v57 = vadd.f32 %v27403_v53, %v13238_v51  ;;  %v25103_v17 = vld [vmem:[#allocation11 + $0xbd0] ss:$24 sps:$4 sm:$0xff]   ;;  %v13492_v53 = vadd.f32 %v26892_v36, %v13449_v40  ;;  %v25130_v36 = vld [vmem:[#allocation11 + $0xae0] ss:$24 sps:$4 sm:$0xff]  }
 0x7e5   :  { %18225 = vmatprep.subr.bf16.mxu1 %v25069_v63  ;;  %v25111_v63 = vld [vmem:[#allocation11 + $0xba4] ss:$24 sps:$4 sm:$0xff]   ;;  %v25127_v51 = vld [vmem:[#allocation11 + $0xd50] ss:$24 sps:$4 sm:$0xff]   ;;  %v25166_v40 = vld [vmem:[#allocation11 + $0xc00] ss:$24 sps:$4 sm:$0xff]  }
 0x7e6   :  { %v13535_v13 = vadd.f32 %v26901_v35, %v13492_v53  ;;  %v25139_v35 = vld [vmem:[#allocation11 + $0xcf0] ss:$24 sps:$4 sm:$0xff]   ;;  %v25180_v53 = vld [vmem:[#allocation11 + $0xea4] ss:$24 sps:$4 sm:$0xff]  }
 0x7e7   :  { %18191 = vmatpush1.bf16.msra.mxu0 %v25064_v18  ;;  %v27404_v18 = vld [vmem:[#allocation52_spill] sm:$0xff] }
 0x7e8   :  { %18226 = vmatpush1.bf16.msra.mxu1 %v25067_v2  ;;  %18192 = vmatprep.subr.bf16.mxu0 %v25072_v43  ;;  %v13277_v2 = vadd.f32 %v27404_v18, %v13234_v23  ;;  %v27405_v43 = vld [vmem:[#allocation57_spill] sm:$0xff] }
 0x7e9   :  { %18227 = vmatprep.subr.bf16.mxu1 %v25075_v30  ;;  %v13324_v30 = vadd.f32 %v27405_v43, %v13281_v57  ;;  %v25135_v23 = vld [vmem:[#allocation11 + $0xd24] ss:$24 sps:$4 sm:$0xff]   ;;  %v25133_v18 = vld [vmem:[#allocation11 + $0xd20] ss:$24 sps:$4 sm:$0xff]   ;;  %v13578_v43 = vadd.f32 %v26910_v6, %v13535_v13  ;;  %v25186_v13 = vld [vmem:[#allocation11 + $0xe74] ss:$24 sps:$4 sm:$0xff]  }
 0x7ea   :  { %v25145_v6 = vld [vmem:[#allocation11 + $0xcc0] ss:$24 sps:$4 sm:$0xff]  }
 0x7eb   :  { %18193 = vmatpush1.bf16.msra.mxu0 %v25070_v14  ;;  %v25106_v14 = vld [vmem:[#allocation11 + $0x7e0] ss:$24 sps:$4 sm:$0xff]  }
 0x7ec   :  { %18228 = vmatpush1.bf16.msra.mxu1 %v25073_v29  ;;  %18194 = vmatprep.subr.bf16.mxu0 %v25078_v7  ;;  %v27406_v29 = vld [vmem:[#allocation54_spill] sm:$0xff] }
 0x7ed   :  { %18229 = vmatprep.subr.bf16.mxu1 %v25081_v60  ;;  %v13320_v7 = vadd.f32 %v27406_v29, %v13277_v2  ;;  %v13367_v60 = vadd.f32 %v26880_v44, %v13324_v30  ;;  %v25123_v44 = vld [vmem:[#allocation11 + $0xb44] ss:$24 sps:$4 sm:$0xff]   ;;  %v13667_v2 = vpop.f32.mrf.mxu1  ;;  %v13621_v29 = vadd.f32 %v26948_v49, %v13578_v43  ;;  %v25150_v49 = vld [vmem:[#allocation11 + $0xc94] ss:$24 sps:$4 sm:$0xff]   ;;  %v25190_v43 = vld [vmem:[#allocation11 + $0xe40] ss:$24 sps:$4 sm:$0xff]  }
 0x7ef   :  { %18195 = vmatpush2.bf16.msra.mxu0 %v25076_v24  ;;  %v25109_v24 = vld [vmem:[#allocation11 + $0xba0] ss:$24 sps:$4 sm:$0xff]  }
 0x7f0   :  { %18230 = vmatpush1.bf16.msra.mxu1 %v25079_v10  ;;  %18196 = vmatprep.subr.bf16.mxu0 %v25084_v62  ;;  %v25114_v10 = vld [vmem:[#allocation11 + $0x7b4] ss:$24 sps:$4 sm:$0xff]  }
 0x7f1   :  { %18231 = vmatprep.subr.bf16.mxu1 %v25087_v11  ;;  %v25117_v62 = vld [vmem:[#allocation11 + $0xb74] ss:$24 sps:$4 sm:$0xff]  }
 0x7f2   :  { %v27407_v11 = vld [vmem:[#allocation56_spill] sm:$0xff] }
 0x7f3   :  { %18197 = vmatpush2.bf16.msra.mxu0 %v25082_v54  ;;  %v13363_v54 = vadd.f32 %v27407_v11, %v13320_v7  ;;  %v25142_v11 = vld [vmem:[#allocation11 + $0xa80] ss:$24 sps:$4 sm:$0xff]  }
 0x7f4   :  { %18232 = vmatpush1.bf16.msra.mxu1 %v25085_v4  ;;  %18198 = vmatprep.subr.bf16.mxu0 %v25090_v59  ;;  %v13410_v4 = vadd.f32 %v26886_v34, %v13367_v60  ;;  %v25112_v59 = vld [vmem:[#allocation11 + $0x7b0] ss:$24 sps:$4 sm:$0xff]   ;;  %v25147_v60 = vld [vmem:[#allocation11 + $0xcc4] ss:$24 sps:$4 sm:$0xff]  }
 0x7f5   :  { %18233 = vmatprep.subr.bf16.mxu1 %v25093_v27  ;;  %v27408_v27 = vld [vmem:[#allocation58_spill] sm:$0xff] }
 0x7f6   :  { %vm13952_vm12 = vcmp.gt.f32.partialorder %v13410_v4, 0.0 }
 0x7f7   :  { %18199 = vmatpush2.bf16.msra.mxu0 %v25088_v42  ;;  %v13406_v42 = vadd.f32 %v27408_v27, %v13363_v54 }
 0x7f8   :  { %18234 = vmatpush1.bf16.msra.mxu1 %v25091_v3  ;;  %18200 = vmatprep.subr.bf16.mxu0 %v25096_v41  ;;  %v25115_v3 = vld [vmem:[#allocation11 + $0xb70] ss:$24 sps:$4 sm:$0xff]   ;;  %v25120_v41 = vld [vmem:[#allocation11 + $0x784] ss:$24 sps:$4 sm:$0xff]  }
 0x7f9   :  { %18235 = vmatprep.subr.bf16.mxu1 %v25099_v15  ;;  %v13981_v15 = vmul.f32 %v26654_v8, %v13410_v4  ;;  %v13967_v34 = vmul.f32 %v26654_v8, %v13406_v42  ;;  %vm13938_vm13 = vcmp.gt.f32.partialorder %v13406_v42, 0.0 }
 0x7fb   :  { %18201 = vmatpush2.bf16.msra.mxu0 %v25094_v25  ;;  %v25118_v25 = vld [vmem:[#allocation11 + $0x780] ss:$24 sps:$4 sm:$0xff]   ;;  %v14009_v48 = vsel %vm13952_vm12, %v13410_v4, %v13981_v15  ;;  %v13995_v39 = vsel %vm13938_vm13, %v13406_v42, %v13967_v34  ;;  %v25153_v4 = vld [vmem:[#allocation11 + $0x1054] ss:$24 sps:$4 sm:$0xff]  }
 0x7fc   :  { %18236 = vmatpush1.bf16.msra.mxu1 %v25097_v12  ;;  %18202 = vmatprep.subr.bf16.mxu0 %v25102_v45  ;;  %v25129_v12 = vld [vmem:[#allocation11 + $0xd54] ss:$24 sps:$4 sm:$0xff]   ;;  %v13453_v45 = vadd.f32 %v26896_v38, %v5379_v21  ;;  %v27036_v38 = vpack.c.bf16 %v14009_v48, %v13995_v39  ;;  %v25154_v21 = vld [vmem:[#allocation11 + $0xc60] ss:$24 sps:$4 sm:$0xff]   ;;  %v25171_v48 = vld [vmem:[#allocation11 + $0xfc4] ss:$24 sps:$4 sm:$0xff]  }
 0x7fd   :  { %18237 = vmatprep.subr.bf16.mxu1 %v25105_v37  ;;  %v25126_v37 = vld [vmem:[#allocation11 + $0xb14] ss:$24 sps:$4 sm:$0xff]   ;;  %v25172_v39 = vld [vmem:[#allocation11 + $0xed0] ss:$24 sps:$4 sm:$0xff]  }
 0x7fe   :  { %v13496_v9 = vadd.f32 %v26904_v19, %v13453_v45  ;;  %v27410_v15 = vld [vmem:[#allocation48_spill] sm:$0xff] }
 0x7ff   :  { %18203 = vmatpush2.bf16.msra.mxu0 %v25100_v61  ;;  %v25124_v61 = vld [vmem:[#allocation11 + $0xb10] ss:$24 sps:$4 sm:$0xff]   ;;  %v25162_v34 = vld [vmem:[#allocation11 + $0xc34] ss:$24 sps:$4 sm:$0xff]  }
 0x800   :  { %18238 = vmatpush2.bf16.msra.mxu1 %v25103_v17  ;;  %18204 = vmatprep.subr.bf16.mxu0 %v25108_v28  ;;  %v13539_v57 = vadd.f32 %v26937_v31, %v13496_v9  ;;  %v25132_v17 = vld [vmem:[#allocation11 + $0xae4] ss:$24 sps:$4 sm:$0xff]   ;;  %v13624_v28 = vpop.f32.mrf.mxu0  ;;  %v25141_v31 = vld [vmem:[#allocation11 + $0xcf4] ss:$24 sps:$4 sm:$0xff]   ;;  %v25163_v45 = vld [vmem:[#allocation11 + $0xff0] ss:$24 sps:$4 sm:$0xff]  }
 0x801   :  { %18239 = vmatprep.subr.bf16.mxu1 %v25111_v63  ;;  %v27409_v63 = vld [vmem:[#allocation37_spill] sm:$0xff] }
 0x802   :  { %v13582_v19 = vadd.f32 %v26958_v26, %v13539_v57  ;;  %v25136_v26 = vld [vmem:[#allocation11 + $0xab0] ss:$24 sps:$4 sm:$0xff]   ;;  %v25169_v9 = vld [vmem:[#allocation11 + $0xfc0] ss:$24 sps:$4 sm:$0xff]   ;;  %v25183_v57 = vld [vmem:[#allocation11 + $0xf64] ss:$24 sps:$4 sm:$0xff]  }
 0x803   :  { %18205 = vmatpush2.bf16.msra.mxu0 %v25106_v14  ;;  %v25138_v14 = vld [vmem:[#allocation11 + $0xab4] ss:$24 sps:$4 sm:$0xff]  }
 0x804   :  { %18240 = vmatpush2.bf16.msra.mxu1 %v25109_v24  ;;  %18206 = vmatprep.subr.bf16.mxu0 %v25114_v10  ;;  %v13625_v30 = vadd.f32 %v13624_v28, %v13582_v19  ;;  %v13664_v24 = vadd.f32 %v26964_v58, %v13621_v29  ;;  %v25144_v10 = vld [vmem:[#allocation11 + $0xa84] ss:$24 sps:$4 sm:$0xff]   ;;  %v25151_v58 = vld [vmem:[#allocation11 + $0x1050] ss:$24 sps:$4 sm:$0xff]   ;;  %v25181_v28 = vld [vmem:[#allocation11 + $0xf60] ss:$24 sps:$4 sm:$0xff]   ;;  %v27051_v29 = vpop.f32.mrf.mxu0 }
 0x805   :  { %18241 = vmatprep.subr.bf16.mxu1 %v25117_v62  ;;  %v25189_v19 = vld [vmem:[#allocation11 + $0xf34] ss:$24 sps:$4 sm:$0xff]  }
 0x806   :  { %v13668_v7 = vadd.f32 %v13667_v2, %v13625_v30  ;;  %v13969_v54 = vmul.f32 %v26654_v8, %v13664_v24  ;;  %vm13940_vm15 = vcmp.gt.f32.partialorder %v13664_v24, 0.0  ;;  %v25187_v2 = vld [vmem:[#allocation11 + $0xf30] ss:$24 sps:$4 sm:$0xff]   ;;  %v25193_v30 = vld [vmem:[#allocation11 + $0xf00] ss:$24 sps:$4 sm:$0xff]  }
 0x807   :  { %18207 = vmatpush2.bf16.msra.mxu0 %v25112_v59  ;;  %v25148_v59 = vld [vmem:[#allocation11 + $0xc90] ss:$24 sps:$4 sm:$0xff]  }
 0x808   :  { %18242 = vmatpush2.bf16.msra.mxu1 %v25115_v3  ;;  %18208 = vmatprep.subr.bf16.mxu0 %v25120_v41  ;;  %v13983_v62 = vmul.f32 %v26654_v8, %v13668_v7  ;;  %vm13954_vm14 = vcmp.gt.f32.partialorder %v13668_v7, 0.0  ;;  %v13997_v42 = vsel %vm13940_vm15, %v13664_v24, %v13969_v54  ;;  %v25156_v3 = vld [vmem:[#allocation11 + $0xc64] ss:$24 sps:$4 sm:$0xff]   ;;  %v27053_v24 = vpop.f32.mrf.mxu0  ;;  %v25213_v54 = vld [vmem:[#allocation11 + $0x1174] ss:$24 sps:$4 sm:$0xff]  }
 0x809   :  { %18243 = vmatprep.subr.bf16.mxu1 %v25123_v44  ;;  %v25159_v41 = vld [vmem:[#allocation11 + $0x1024] ss:$24 sps:$4 sm:$0xff]  }
 0x80a   :  { %v14011_v27 = vsel %vm13954_vm14, %v13668_v7, %v13983_v62  ;;  %v25201_v7 = vld [vmem:[#allocation11 + $0x11d4] ss:$24 sps:$4 sm:$0xff]   ;;  %v25202_v62 = vld [vmem:[#allocation11 + $0xde0] ss:$24 sps:$4 sm:$0xff]  }
 0x80b   :  { %18209 = vmatpush2.bf16.msra.mxu0 %v25118_v25  ;;  %v27047_v44 = vpack.c.bf16 %v14011_v27, %v13997_v42  ;;  %v25157_v25 = vld [vmem:[#allocation11 + $0x1020] ss:$24 sps:$4 sm:$0xff]   ;;  %v25211_v27 = vld [vmem:[#allocation11 + $0x1170] ss:$24 sps:$4 sm:$0xff]  }
 0x80c   :  { %18244 = vmatpush2.bf16.msra.mxu1 %v25121_v16  ;;  %18264 = vmatprep.subr.bf16.mxu0 %v25129_v12  ;;  %v25165_v16 = vld [vmem:[#allocation11 + $0xff4] ss:$24 sps:$4 sm:$0xff]   ;;  %v25160_v12 = vld [vmem:[#allocation11 + $0xc30] ss:$24 sps:$4 sm:$0xff]  }
 0x80d   :  { %18245 = vmatprep.subr.bf16.mxu1 %v25126_v37  ;;  %v25168_v37 = vld [vmem:[#allocation11 + $0xc04] ss:$24 sps:$4 sm:$0xff]  }
 0x80e   :  { %18211 = vmatmul.mubr.bf16.vlgmr.msra.gmra.mxu0 %v27409_v63 }
 0x80f   :  { %18265 = vmatpush1.bf16.msra.mxu0 %v25127_v51  ;;  %18296 = vmatprep.mubr.bf16.mxu0 %v27036_v38  ;;  %v25174_v51 = vld [vmem:[#allocation11 + $0xed4] ss:$24 sps:$4 sm:$0xff]  }
 0x810   :  { %18246 = vmatpush2.bf16.msra.mxu1 %v25124_v61  ;;  %18266 = vmatprep.subr.bf16.mxu0 %v25135_v23  ;;  %v25177_v61 = vld [vmem:[#allocation11 + $0xf94] ss:$24 sps:$4 sm:$0xff]   ;;  %v25175_v23 = vld [vmem:[#allocation11 + $0xf90] ss:$24 sps:$4 sm:$0xff]  }
 0x811   :  { %18247 = vmatprep.subr.bf16.mxu1 %v25132_v17  ;;  %v25178_v17 = vld [vmem:[#allocation11 + $0xea0] ss:$24 sps:$4 sm:$0xff]  }
 0x813   :  { %18267 = vmatpush1.bf16.msra.mxu0 %v25133_v18  ;;  %v25184_v18 = vld [vmem:[#allocation11 + $0xe70] ss:$24 sps:$4 sm:$0xff]  }
 0x814   :  { %18248 = vmatpush2.bf16.msra.mxu1 %v25130_v36  ;;  %18268 = vmatprep.subr.bf16.mxu0 %v25141_v31  ;;  %v25192_v36 = vld [vmem:[#allocation11 + $0xe44] ss:$24 sps:$4 sm:$0xff]  }
 0x815   :  { %18249 = vmatprep.subr.bf16.mxu1 %v25138_v14  ;;  %v25195_v31 = vld [vmem:[#allocation11 + $0xf04] ss:$24 sps:$4 sm:$0xff]   ;;  %v25198_v14 = vld [vmem:[#allocation11 + $0xe14] ss:$24 sps:$4 sm:$0xff]  }
 0x817   :  { %18269 = vmatpush1.bf16.msra.mxu0 %v25139_v35  ;;  %v25196_v35 = vld [vmem:[#allocation11 + $0xe10] ss:$24 sps:$4 sm:$0xff]  }
 0x818   :  { %18250 = vmatpush2.bf16.msra.mxu1 %v25136_v26  ;;  %18270 = vmatprep.subr.bf16.mxu0 %v25147_v60  ;;  %v25199_v26 = vld [vmem:[#allocation11 + $0x11d0] ss:$24 sps:$4 sm:$0xff]   ;;  %v25204_v60 = vld [vmem:[#allocation11 + $0xde4] ss:$24 sps:$4 sm:$0xff]  }
 0x819   :  { %18251 = vmatprep.subr.bf16.mxu1 %v25144_v10  ;;  %v25207_v10 = vld [vmem:[#allocation11 + $0x11a4] ss:$24 sps:$4 sm:$0xff]  }
 0x81b   :  { %18271 = vmatpush1.bf16.msra.mxu0 %v25145_v6  ;;  %v25205_v6 = vld [vmem:[#allocation11 + $0x11a0] ss:$24 sps:$4 sm:$0xff]  }
 0x81c   :  { %18252 = vmatpush2.bf16.msra.mxu1 %v25142_v11  ;;  %18272 = vmatprep.subr.bf16.mxu0 %v25150_v49  ;;  %v25210_v11 = vld [vmem:[#allocation11 + $0xdb4] ss:$24 sps:$4 sm:$0xff]   ;;  %v27055_v49 = vpop.f32.mrf.mxu0 }
 0x81d   :  { %18307 = vmatprep.subr.bf16.mxu1 %v25153_v4  ;;  %v27057_v4 = vpop.f32.mrf.mxu1 }
 0x81e   :  { %v13710_v42 = vpop.f32.mrf.mxu0 }
 0x81f   :  { %18254 = vmatmul.mubr.bf16.vlgmr.msra.gmra.mxu1 %v27410_v15  ;;  %18273 = vmatpush1.bf16.msra.mxu0 %v25148_v59  ;;  %v25208_v59 = vld [vmem:[#allocation11 + $0xdb0] ss:$24 sps:$4 sm:$0xff]  }
 0x820   :  { %18308 = vmatpush1.bf16.msra.mxu1 %v25151_v58  ;;  %18339 = vmatprep.mubr.bf16.mxu1 %v27047_v44  ;;  %v25216_v58 = vld [vmem:[#allocation11 + $0xd84] ss:$24 sps:$4 sm:$0xff]  }
 0x821   :  { %18274 = vmatprep.subr.bf16.mxu0 %v25156_v3  ;;  %18309 = vmatprep.subr.bf16.mxu1 %v25159_v41  ;;  %v25219_v3 = vld [vmem:[#allocation11 + $0x1144] ss:$24 sps:$4 sm:$0xff]   ;;  %v13749_v41 = vpop.f32.mrf.mxu1 }
 0x823   :  { %18275 = vmatpush1.bf16.msra.mxu0 %v25154_v21  ;;  %v27059_v21 = vpop.f32.mrf.mxu0 }
 0x824   :  { %18310 = vmatpush1.bf16.msra.mxu1 %v25157_v25  ;;  %18276 = vmatprep.subr.bf16.mxu0 %v25162_v34  ;;  %v25214_v25 = vld [vmem:[#allocation11 + $0xd80] ss:$24 sps:$4 sm:$0xff]  }
 0x825   :  { %18311 = vmatprep.subr.bf16.mxu1 %v25165_v16  ;;  %v25217_v34 = vld [vmem:[#allocation11 + $0x1140] ss:$24 sps:$4 sm:$0xff]   ;;  %v25225_v16 = vld [vmem:[#allocation11 + $0x1354] ss:$24 sps:$4 sm:$0xff]  }
 0x827   :  { %18277 = vmatpush1.bf16.msra.mxu0 %v25160_v12  ;;  %v25222_v12 = vld [vmem:[#allocation11 + $0x1114] ss:$24 sps:$4 sm:$0xff]  }
 0x828   :  { %18312 = vmatpush1.bf16.msra.mxu1 %v25163_v45  ;;  %18278 = vmatprep.subr.bf16.mxu0 %v25168_v37  ;;  %v27061_v45 = vpop.f32.mrf.mxu1  ;;  %v13792_v37 = vpop.f32.mrf.mxu0 }
 0x829   :  { %18313 = vmatprep.subr.bf16.mxu1 %v25171_v48  ;;  %v25223_v48 = vld [vmem:[#allocation11 + $0x1350] ss:$24 sps:$4 sm:$0xff]  }
 0x82b   :  { %18279 = vmatpush1.bf16.msra.mxu0 %v25166_v40  ;;  %v25220_v40 = vld [vmem:[#allocation11 + $0x1110] ss:$24 sps:$4 sm:$0xff]  }
 0x82c   :  { %18314 = vmatpush1.bf16.msra.mxu1 %v25169_v9  ;;  %18280 = vmatprep.subr.bf16.mxu0 %v25174_v51  ;;  %v25231_v9 = vld [vmem:[#allocation11 + $0x1324] ss:$24 sps:$4 sm:$0xff]  }
 0x82d   :  { %18315 = vmatprep.subr.bf16.mxu1 %v25177_v61  ;;  %v25228_v51 = vld [vmem:[#allocation11 + $0x10e4] ss:$24 sps:$4 sm:$0xff]   ;;  %v13753_v61 = vpop.f32.mrf.mxu1 }
 0x82f   :  { %18281 = vmatpush2.bf16.msra.mxu0 %v25172_v39  ;;  %v27064_v39 = vpop.f32.mrf.mxu0 }
 0x830   :  { %18316 = vmatpush1.bf16.msra.mxu1 %v25175_v23  ;;  %18282 = vmatprep.subr.bf16.mxu0 %v25180_v53  ;;  %v25229_v23 = vld [vmem:[#allocation11 + $0x1320] ss:$24 sps:$4 sm:$0xff]  }
 0x831   :  { %18317 = vmatprep.subr.bf16.mxu1 %v25183_v57  ;;  %v25226_v53 = vld [vmem:[#allocation11 + $0x10e0] ss:$24 sps:$4 sm:$0xff]   ;;  %v25237_v57 = vld [vmem:[#allocation11 + $0x12f4] ss:$24 sps:$4 sm:$0xff]  }
 0x833   :  { %18283 = vmatpush2.bf16.msra.mxu0 %v25178_v17  ;;  %v27066_v17 = vpop.f32.mrf.mxu1 }
 0x834   :  { %18318 = vmatpush1.bf16.msra.mxu1 %v25181_v28  ;;  %18284 = vmatprep.subr.bf16.mxu0 %v25186_v13  ;;  %v25234_v28 = vld [vmem:[#allocation11 + $0x10b4] ss:$24 sps:$4 sm:$0xff]   ;;  %v13796_v13 = vpop.f32.mrf.mxu0 }
 0x835   :  { %18319 = vmatprep.subr.bf16.mxu1 %v25189_v19  ;;  %v25235_v19 = vld [vmem:[#allocation11 + $0x12f0] ss:$24 sps:$4 sm:$0xff]  }
 0x837   :  { %18285 = vmatpush2.bf16.msra.mxu0 %v25184_v18  ;;  %v5387_v18 = vrot.slane %v27011_v33, %v26528_v20 }
 0x838   :  { %18320 = vmatpush1.bf16.msra.mxu1 %v25187_v2  ;;  %18286 = vmatprep.subr.bf16.mxu0 %v25192_v36  ;;  %v25232_v2 = vld [vmem:[#allocation11 + $0x10b0] ss:$24 sps:$4 sm:$0xff]   ;;  %v25243_v36 = vld [vmem:[#allocation11 + $0x12c4] ss:$24 sps:$4 sm:$0xff]  }
 0x839   :  { %18321 = vmatprep.subr.bf16.mxu1 %v25195_v31  ;;  %v13835_v31 = vpop.f32.mrf.mxu1 }
 0x83b   :  { %18287 = vmatpush2.bf16.msra.mxu0 %v25190_v43 }
 0x83c   :  { %18322 = vmatpush1.bf16.msra.mxu1 %v25193_v30  ;;  %18288 = vmatprep.subr.bf16.mxu0 %v25198_v14  ;;  %v25240_v30 = vld [vmem:[#allocation11 + $0x1084] ss:$24 sps:$4 sm:$0xff]   ;;  %v25241_v14 = vld [vmem:[#allocation11 + $0x12c0] ss:$24 sps:$4 sm:$0xff]  }
 0x83d   :  { %18323 = vmatprep.subr.bf16.mxu1 %v25201_v7  ;;  %v13707_v7 = vadd.f32 %v27053_v24, %v5387_v18  ;;  %v25252_v24 = vld [vmem:[#allocation11 + $0x1264] ss:$24 sps:$4 sm:$0xff]  }
 0x83f   :  { %18289 = vmatpush2.bf16.msra.mxu0 %v25196_v35  ;;  %v25238_v35 = vld [vmem:[#allocation11 + $0x1080] ss:$24 sps:$4 sm:$0xff]  }
 0x840   :  { %18324 = vmatpush2.bf16.msra.mxu1 %v25199_v26  ;;  %18290 = vmatprep.subr.bf16.mxu0 %v25204_v60  ;;  %v25246_v26 = vld [vmem:[#allocation11 + $0x1294] ss:$24 sps:$4 sm:$0xff]   ;;  %v27073_v60 = vpop.f32.mrf.mxu1 }
 0x841   :  { %18325 = vmatprep.subr.bf16.mxu1 %v25207_v10 }
 0x843   :  { %18291 = vmatpush2.bf16.msra.mxu0 %v25202_v62  ;;  %v25249_v62 = vld [vmem:[#allocation11 + $0x15c] ss:$24 sps:$4 sm:$0xff]  }
 0x844   :  { %18326 = vmatpush2.bf16.msra.mxu1 %v25205_v6  ;;  %18292 = vmatprep.subr.bf16.mxu0 %v25210_v11  ;;  %v13750_v6 = vadd.f32 %v13749_v41, %v13707_v7  ;;  %v25244_v11 = vld [vmem:[#allocation11 + $0x1290] ss:$24 sps:$4 sm:$0xff]   ;;  %v25250_v41 = vld [vmem:[#allocation11 + $0x1260] ss:$24 sps:$4 sm:$0xff]  }
 0x845   :  { %18327 = vmatprep.subr.bf16.mxu1 %v25213_v54  ;;  %v13711_v54 = vadd.f32 %v13710_v42, %v5387_v18  ;;  %v25264_v18 = vld [vmem:[#allocation11 + $0x1204] ss:$24 sps:$4 sm:$0xff]  }
 0x847   :  { %18293 = vmatpush2.bf16.msra.mxu0 %v25208_v59  ;;  %v13793_v59 = vadd.f32 %v13792_v37, %v13750_v6  ;;  %v25253_v37 = vld [vmem:[#allocation11 + $0x128] ss:$24 sps:$4 sm:$0xff]  }
 0x848   :  { %18328 = vmatpush2.bf16.msra.mxu1 %v25211_v27  ;;  %18294 = vmatprep.subr.bf16.mxu0 %v25216_v58  ;;  %v25247_v27 = vld [vmem:[#allocation11 + $0x158] ss:$24 sps:$4 sm:$0xff]   ;;  %v13839_v58 = vpop.f32.mrf.mxu1 }
 0x849   :  { %18329 = vmatprep.subr.bf16.mxu1 %v25219_v3 }
 0x84b   :  { %18295 = vmatpush2.bf16.msra.mxu0 %v25214_v25  ;;  %v25255_v25 = vld [vmem:[#allocation11 + $0x12c] ss:$24 sps:$4 sm:$0xff]  }
 0x84c   :  { %18330 = vmatpush2.bf16.msra.mxu1 %v25217_v34  ;;  %18350 = vmatprep.subr.bf16.mxu0 %v25225_v16  ;;  %v13754_v34 = vadd.f32 %v13753_v61, %v13711_v54  ;;  %v13836_v16 = vadd.f32 %v13835_v31, %v13793_v59  ;;  %v25268_v54 = vld [vmem:[#allocation11 + $0x14d0] ss:$24 sps:$4 sm:$0xff]  }
 0x84d   :  { %18331 = vmatprep.subr.bf16.mxu1 %v25222_v12  ;;  %v25271_v59 = vld [vmem:[#allocation11 + $0x98] ss:$24 sps:$4 sm:$0xff]  }
 0x84e   :  { %18297 = vmatmul.mubr.bf16.vlgmr.msra.gmra.mxu0 %v26876_v22  ;;  %v27070_v43 = vpop.f32.mrf.mxu0 }
 0x84f   :  { %18351 = vmatpush1.bf16.msra.mxu0 %v25223_v48  ;;  %v13797_v48 = vadd.f32 %v13796_v13, %v13754_v34  ;;  %v25259_v13 = vld [vmem:[#allocation11 + $0xf8] ss:$24 sps:$4 sm:$0xff]   ;;  %v25282_v34 = vld [vmem:[#allocation11 + $0x1474] ss:$24 sps:$4 sm:$0xff]  }
 0x850   :  { %18332 = vmatpush2.bf16.msra.mxu1 %v25220_v40  ;;  %18352 = vmatprep.subr.bf16.mxu0 %v25231_v9  ;;  %v13878_v10 = vpop.f32.mrf.mxu0  ;;  %v25258_v40 = vld [vmem:[#allocation11 + $0x1234] ss:$24 sps:$4 sm:$0xff]  }
 0x851   :  { %18333 = vmatprep.subr.bf16.mxu1 %v25228_v51  ;;  %v13879_v42 = vadd.f32 %v13878_v10, %v13836_v16  ;;  %v13840_v61 = vadd.f32 %v13839_v58, %v13797_v48  ;;  %v25273_v10 = vld [vmem:[#allocation11 + $0x9c] ss:$24 sps:$4 sm:$0xff]   ;;  %v25279_v58 = vld [vmem:[#allocation11 + $0x6c] ss:$24 sps:$4 sm:$0xff]   ;;  %v25283_v48 = vld [vmem:[#allocation11 + $0x38] ss:$24 sps:$4 sm:$0xff]  }
 0x852   :  { %v27075_v3 = vpop.f32.mrf.mxu0  ;;  %v25285_v16 = vld [vmem:[#allocation11 + $0x3c] ss:$24 sps:$4 sm:$0xff]  }
 0x853   :  { %18353 = vmatpush1.bf16.msra.mxu0 %v25229_v23  ;;  %v25261_v23 = vld [vmem:[#allocation11 + $0xfc] ss:$24 sps:$4 sm:$0xff]  }
 0x854   :  { %18334 = vmatpush2.bf16.msra.mxu1 %v25226_v53  ;;  %18354 = vmatprep.subr.bf16.mxu0 %v25237_v57  ;;  %v13882_v9 = vpop.f32.mrf.mxu0 }
 0x855   :  { %18335 = vmatprep.subr.bf16.mxu1 %v25234_v28  ;;  %v25256_v28 = vld [vmem:[#allocation11 + $0x1230] ss:$24 sps:$4 sm:$0xff]  }
 0x857   :  { %18355 = vmatpush1.bf16.msra.mxu0 %v25235_v19  ;;  %v13883_v19 = vadd.f32 %v13882_v9, %v13840_v61  ;;  %v25291_v9 = vld [vmem:[#allocation11 + $0xc] ss:$24 sps:$4 sm:$0xff]   ;;  %v25289_v61 = vld [vmem:[#allocation11 + $0x8] ss:$24 sps:$4 sm:$0xff]  }
 0x858   :  { %18336 = vmatpush2.bf16.msra.mxu1 %v25232_v2  ;;  %18356 = vmatprep.subr.bf16.mxu0 %v25243_v36  ;;  %v25267_v36 = vld [vmem:[#allocation11 + $0xcc] ss:$24 sps:$4 sm:$0xff]  }
 0x859   :  { %18337 = vmatprep.subr.bf16.mxu1 %v25240_v30 }
 0x85b   :  { %18357 = vmatpush1.bf16.msra.mxu0 %v25241_v14  ;;  %v25262_v14 = vld [vmem:[#allocation11 + $0x1200] ss:$24 sps:$4 sm:$0xff]  }
 0x85c   :  { %18338 = vmatpush2.bf16.msra.mxu1 %v25238_v35  ;;  %18358 = vmatprep.subr.bf16.mxu0 %v25246_v26  ;;  %v25265_v35 = vld [vmem:[#allocation11 + $0xc8] ss:$24 sps:$4 sm:$0xff]   ;;  %v25270_v26 = vld [vmem:[#allocation11 + $0x14d4] ss:$24 sps:$4 sm:$0xff]  }
 0x85d   :  { %18393 = vmatprep.subr.bf16.mxu1 %v25249_v62 }
 0x85f   :  { %v27077_v12 = vpop.f32.mrf.mxu1  ;;  %18340 = vmatmul.mubr.bf16.vlgmr.msra.gmra.mxu1 %v26968_v5  ;;  %18359 = vmatpush1.bf16.msra.mxu0 %v25244_v11 }
 0x860   :  { %18394 = vmatpush1.bf16.msra.mxu1 %v25247_v27  ;;  %18425 = vmatprep.mubr.bf16.mxu1 %v26941_v56  ;;  %v25276_v27 = vld [vmem:[#allocation11 + $0x14a4] ss:$24 sps:$4 sm:$0xff]  }
 0x861   :  { %v13921_v51 = vpop.f32.mrf.mxu1  ;;  %18360 = vmatprep.subr.bf16.mxu0 %v25252_v24  ;;  %18395 = vmatprep.subr.bf16.mxu1 %v25255_v25  ;;  %v25274_v24 = vld [vmem:[#allocation11 + $0x14a0] ss:$24 sps:$4 sm:$0xff]  }
 0x862   :  { %v13922_v53 = vadd.f32 %v13921_v51, %v13879_v42  ;;  %v25277_v25 = vld [vmem:[#allocation11 + $0x68] ss:$24 sps:$4 sm:$0xff]   ;;  %v25288_v42 = vld [vmem:[#allocation11 + $0x1444] ss:$24 sps:$4 sm:$0xff]  }
 0x863   :  { %v27081_v57 = vpop.f32.mrf.mxu1  ;;  %18361 = vmatpush1.bf16.msra.mxu0 %v25250_v41  ;;  %v25280_v41 = vld [vmem:[#allocation11 + $0x1470] ss:$24 sps:$4 sm:$0xff]  }
 0x864   :  { %18396 = vmatpush1.bf16.msra.mxu1 %v25253_v37  ;;  %18362 = vmatprep.subr.bf16.mxu0 %v25258_v40  ;;  %v13971_v31 = vmul.f32 %v26654_v8, %v13922_v53  ;;  %vm13942_vm0 = vcmp.gt.f32.partialorder %v13922_v53, 0.0  ;;  %v27411_v37 = vld [vmem:[#allocation25_spill] sm:$0xff] }
 0x865   :  { %v13925_v2 = vpop.f32.mrf.mxu1  ;;  %18397 = vmatprep.subr.bf16.mxu1 %v25261_v23  ;;  %v5383_v40 = vrot.slane %v27011_v33, %v27411_v37  ;;  %v25286_v23 = vld [vmem:[#allocation11 + $0x1440] ss:$24 sps:$4 sm:$0xff]  }
 0x866   :  { %v13926_v30 = vadd.f32 %v13925_v2, %v13883_v19  ;;  %v13999_v62 = vsel %vm13942_vm0, %v13922_v53, %v13971_v31  ;;  %v25294_v53 = vld [vmem:[#allocation11 + $0x1414] ss:$24 sps:$4 sm:$0xff]   ;;  %v25292_v2 = vld [vmem:[#allocation11 + $0x1410] ss:$24 sps:$4 sm:$0xff]  }
 0x867   :  { %18363 = vmatpush1.bf16.msra.mxu0 %v25256_v28  ;;  %v13709_v51 = vadd.f32 %v27055_v49, %v5383_v40  ;;  %v13705_v28 = vadd.f32 %v27051_v29, %v5383_v40  ;;  %v25295_v49 = vld [vmem:[#allocation11 + $0x2d8] ss:$24 sps:$4 sm:$0xff]   ;;  %v25303_v29 = vld [vmem:[#allocation11 + $0x2ac] ss:$24 sps:$4 sm:$0xff]   ;;  %v25330_v40 = vld [vmem:[#allocation11 + $0x1bc] ss:$24 sps:$4 sm:$0xff]  }
 0x868   :  { %vm13956_vm1 = vcmp.gt.f32.partialorder %v13926_v30, 0.0  ;;  %v13985_v7 = vmul.f32 %v26654_v8, %v13926_v30  ;;  %18398 = vmatpush1.bf16.msra.mxu1 %v25259_v13  ;;  %18364 = vmatprep.subr.bf16.mxu0 %v25264_v18  ;;  %v25297_v13 = vld [vmem:[#allocation11 + $0x2dc] ss:$24 sps:$4 sm:$0xff]  }
 0x869   :  { %18399 = vmatprep.subr.bf16.mxu1 %v25267_v36  ;;  %v13752_v19 = vadd.f32 %v27061_v45, %v13709_v51  ;;  %v13748_v18 = vadd.f32 %v27057_v4, %v13705_v28  ;;  %v25300_v36 = vld [vmem:[#allocation11 + $0x13e4] ss:$24 sps:$4 sm:$0xff]   ;;  %v25298_v4 = vld [vmem:[#allocation11 + $0x13e0] ss:$24 sps:$4 sm:$0xff]  }
 0x86a   :  { %v14013_v6 = vsel %vm13956_vm1, %v13926_v30, %v13985_v7  ;;  %v25306_v7 = vld [vmem:[#allocation11 + $0x13b4] ss:$24 sps:$4 sm:$0xff]   ;;  %v25328_v51 = vld [vmem:[#allocation11 + $0x1b8] ss:$24 sps:$4 sm:$0xff]   ;;  %v25334_v28 = vld [vmem:[#allocation11 + $0x188] ss:$24 sps:$4 sm:$0xff]  }
 0x86b   :  { %18365 = vmatpush1.bf16.msra.mxu0 %v25262_v14  ;;  %v27085_v11 = vpack.c.bf16 %v14013_v6, %v13999_v62  ;;  %v13795_v33 = vadd.f32 %v27064_v39, %v13752_v19  ;;  %v13791_v31 = vadd.f32 %v27059_v21, %v13748_v18  ;;  %v25301_v39 = vld [vmem:[#allocation11 + $0x2a8] ss:$24 sps:$4 sm:$0xff]   ;;  %v25309_v21 = vld [vmem:[#allocation11 + $0x27c] ss:$24 sps:$4 sm:$0xff]   ;;  %v25315_v6 = vld [vmem:[#allocation11 + $0x24c] ss:$24 sps:$4 sm:$0xff]  }
 0x86c   :  { %18400 = vmatpush1.bf16.msra.mxu1 %v25265_v35  ;;  %18366 = vmatprep.subr.bf16.mxu0 %v25270_v26  ;;  %v25342_v19 = vld [vmem:[#allocation11 + $0x39c] ss:$24 sps:$4 sm:$0xff]   ;;  %v25340_v18 = vld [vmem:[#allocation11 + $0x398] ss:$24 sps:$4 sm:$0xff]  }
 0x86d   :  { %18382 = vmatprep.mubr.bf16.mxu0 %v27085_v11  ;;  %18401 = vmatprep.subr.bf16.mxu1 %v25273_v10  ;;  %v13838_v30 = vadd.f32 %v27073_v60, %v13795_v33  ;;  %v13834_v45 = vadd.f32 %v27066_v17, %v13791_v31  ;;  %v25304_v10 = vld [vmem:[#allocation11 + $0x13b0] ss:$24 sps:$4 sm:$0xff]  }
 0x86e   :  { %v25307_v17 = vld [vmem:[#allocation11 + $0x278] ss:$24 sps:$4 sm:$0xff]   ;;  %v25349_v31 = vld [vmem:[#allocation11 + $0x728] ss:$24 sps:$4 sm:$0xff]  }
 0x86f   :  { %18367 = vmatpush2.bf16.msra.mxu0 %v25268_v54  ;;  %v13881_v14 = vadd.f32 %v27075_v3, %v13838_v30  ;;  %v13877_v35 = vadd.f32 %v27070_v43, %v13834_v45  ;;  %v25312_v3 = vld [vmem:[#allocation11 + $0x1384] ss:$24 sps:$4 sm:$0xff]   ;;  %v25310_v43 = vld [vmem:[#allocation11 + $0x1380] ss:$24 sps:$4 sm:$0xff]  }
 0x870   :  { %18402 = vmatpush1.bf16.msra.mxu1 %v25271_v59  ;;  %18368 = vmatprep.subr.bf16.mxu0 %v25276_v27  ;;  %v25318_v27 = vld [vmem:[#allocation11 + $0x21c] ss:$24 sps:$4 sm:$0xff]   ;;  %v25343_v33 = vld [vmem:[#allocation11 + $0x758] ss:$24 sps:$4 sm:$0xff]  }
 0x871   :  { %18403 = vmatprep.subr.bf16.mxu1 %v25279_v58  ;;  %v13924_v26 = vadd.f32 %v27081_v57, %v13881_v14  ;;  %v13920_v60 = vadd.f32 %v27077_v12, %v13877_v35  ;;  %v25313_v57 = vld [vmem:[#allocation11 + $0x248] ss:$24 sps:$4 sm:$0xff]   ;;  %v25321_v12 = vld [vmem:[#allocation11 + $0x45c] ss:$24 sps:$4 sm:$0xff]   ;;  %v25352_v45 = vld [vmem:[#allocation11 + $0x338] ss:$24 sps:$4 sm:$0xff]  }
 0x872   :  { %v25354_v30 = vld [vmem:[#allocation11 + $0x33c] ss:$24 sps:$4 sm:$0xff]   ;;  %v25355_v14 = vld [vmem:[#allocation11 + $0x6f8] ss:$24 sps:$4 sm:$0xff]   ;;  %v25361_v35 = vld [vmem:[#allocation11 + $0x6c8] ss:$24 sps:$4 sm:$0xff]  }
 0x873   :  { %18369 = vmatpush2.bf16.msra.mxu0 %v25274_v24  ;;  %v13984_v62 = vmul.f32 %v26654_v8, %v13924_v26  ;;  %vm13955_vm2 = vcmp.gt.f32.partialorder %v13924_v26, 0.0  ;;  %v13970_v54 = vmul.f32 %v26654_v8, %v13920_v60  ;;  %vm13941_vm3 = vcmp.gt.f32.partialorder %v13920_v60, 0.0  ;;  %v25319_v24 = vld [vmem:[#allocation11 + $0x458] ss:$24 sps:$4 sm:$0xff]   ;;  %v25324_v8 = vld [vmem:[#allocation11 + $0x1ec] ss:$24 sps:$4 sm:$0xff]  }
 0x874   :  { %18404 = vmatpush1.bf16.msra.mxu1 %v25277_v25  ;;  %18370 = vmatprep.subr.bf16.mxu0 %v25282_v34  ;;  %v25316_v34 = vld [vmem:[#allocation11 + $0x218] ss:$24 sps:$4 sm:$0xff]  }
 0x875   :  { %18405 = vmatprep.subr.bf16.mxu1 %v25285_v16  ;;  %v14012_v59 = vsel %vm13955_vm2, %v13924_v26, %v13984_v62  ;;  %v13998_v58 = vsel %vm13941_vm3, %v13920_v60, %v13970_v54  ;;  %v25327_v16 = vld [vmem:[#allocation11 + $0x42c] ss:$24 sps:$4 sm:$0xff]   ;;  %v25366_v26 = vld [vmem:[#allocation11 + $0x5dc] ss:$24 sps:$4 sm:$0xff]   ;;  %v25364_v60 = vld [vmem:[#allocation11 + $0x5d8] ss:$24 sps:$4 sm:$0xff]  }
 0x876   :  { %v27104_v25 = vpack.c.bf16 %v14012_v59, %v13998_v58  ;;  %v25370_v62 = vld [vmem:[#allocation11 + $0x5a8] ss:$24 sps:$4 sm:$0xff]   ;;  %v25378_v54 = vld [vmem:[#allocation11 + $0x57c] ss:$24 sps:$4 sm:$0xff]   ;;  %v25384_v59 = vld [vmem:[#allocation11 + $0x54c] ss:$24 sps:$4 sm:$0xff]  }
 0x877   :  { %18371 = vmatpush2.bf16.msra.mxu0 %v25280_v41  ;;  %v25325_v41 = vld [vmem:[#allocation11 + $0x428] ss:$24 sps:$4 sm:$0xff]  }
 0x878   :  { %18406 = vmatpush1.bf16.msra.mxu1 %v25283_v48  ;;  %18372 = vmatprep.subr.bf16.mxu0 %v25288_v42  ;;  %v25322_v48 = vld [vmem:[#allocation11 + $0x1e8] ss:$24 sps:$4 sm:$0xff]   ;;  %v25333_v42 = vld [vmem:[#allocation11 + $0x3fc] ss:$24 sps:$4 sm:$0xff]  }
 0x879   :  { %18407 = vmatprep.subr.bf16.mxu1 %v25291_v9  ;;  %v25331_v9 = vld [vmem:[#allocation11 + $0x3f8] ss:$24 sps:$4 sm:$0xff]   ;;  %v25382_v58 = vld [vmem:[#allocation11 + $0x548] ss:$24 sps:$4 sm:$0xff]  }
 0x87b   :  { %18373 = vmatpush2.bf16.msra.mxu0 %v25286_v23  ;;  %v25339_v23 = vld [vmem:[#allocation11 + $0x3cc] ss:$24 sps:$4 sm:$0xff]  }
 0x87c   :  { %18408 = vmatpush1.bf16.msra.mxu1 %v25289_v61  ;;  %18374 = vmatprep.subr.bf16.mxu0 %v25294_v53  ;;  %v25336_v61 = vld [vmem:[#allocation11 + $0x18c] ss:$24 sps:$4 sm:$0xff]   ;;  %v25337_v53 = vld [vmem:[#allocation11 + $0x3c8] ss:$24 sps:$4 sm:$0xff]  }
 0x87d   :  { %18409 = vmatprep.subr.bf16.mxu1 %v25297_v13  ;;  %v25345_v13 = vld [vmem:[#allocation11 + $0x75c] ss:$24 sps:$4 sm:$0xff]  }
 0x87f   :  { %18375 = vmatpush2.bf16.msra.mxu0 %v25292_v2  ;;  %v25348_v2 = vld [vmem:[#allocation11 + $0x36c] ss:$24 sps:$4 sm:$0xff]  }
 0x880   :  { %18410 = vmatpush2.bf16.msra.mxu1 %v25295_v49  ;;  %18376 = vmatprep.subr.bf16.mxu0 %v25300_v36  ;;  %v25351_v49 = vld [vmem:[#allocation11 + $0x72c] ss:$24 sps:$4 sm:$0xff]   ;;  %v25346_v36 = vld [vmem:[#allocation11 + $0x368] ss:$24 sps:$4 sm:$0xff]  }
 0x881   :  { %18411 = vmatprep.subr.bf16.mxu1 %v25303_v29  ;;  %v25357_v29 = vld [vmem:[#allocation11 + $0x6fc] ss:$24 sps:$4 sm:$0xff]  }
 0x883   :  { %18377 = vmatpush2.bf16.msra.mxu0 %v25298_v4  ;;  %v25360_v4 = vld [vmem:[#allocation11 + $0x30c] ss:$24 sps:$4 sm:$0xff]  }
 0x884   :  { %18412 = vmatpush2.bf16.msra.mxu1 %v25301_v39  ;;  %18378 = vmatprep.subr.bf16.mxu0 %v25306_v7  ;;  %v25363_v39 = vld [vmem:[#allocation11 + $0x6cc] ss:$24 sps:$4 sm:$0xff]   ;;  %v25358_v7 = vld [vmem:[#allocation11 + $0x308] ss:$24 sps:$4 sm:$0xff]  }
 0x885   :  { %18413 = vmatprep.subr.bf16.mxu1 %v25309_v21  ;;  %v25369_v21 = vld [vmem:[#allocation11 + $0x69c] ss:$24 sps:$4 sm:$0xff]  }
 0x887   :  { %18379 = vmatpush2.bf16.msra.mxu0 %v25304_v10  ;;  %v25367_v10 = vld [vmem:[#allocation11 + $0x698] ss:$24 sps:$4 sm:$0xff]  }
 0x888   :  { %18414 = vmatpush2.bf16.msra.mxu1 %v25307_v17  ;;  %18380 = vmatprep.subr.bf16.mxu0 %v25312_v3  ;;  %v25372_v17 = vld [vmem:[#allocation11 + $0x5ac] ss:$24 sps:$4 sm:$0xff]  }
 0x889   :  { %18415 = vmatprep.subr.bf16.mxu1 %v25315_v6  ;;  %v25375_v3 = vld [vmem:[#allocation11 + $0x66c] ss:$24 sps:$4 sm:$0xff]   ;;  %v25373_v6 = vld [vmem:[#allocation11 + $0x668] ss:$24 sps:$4 sm:$0xff]  }
 0x88b   :  { %18381 = vmatpush2.bf16.msra.mxu0 %v25310_v43  ;;  %v25381_v43 = vld [vmem:[#allocation11 + $0x63c] ss:$24 sps:$4 sm:$0xff]  }
 0x88c   :  { %18416 = vmatpush2.bf16.msra.mxu1 %v25313_v57  ;;  %18436 = vmatprep.subr.bf16.mxu0 %v25321_v12  ;;  %v25376_v57 = vld [vmem:[#allocation11 + $0x578] ss:$24 sps:$4 sm:$0xff]  }
 0x88d   :  { %18417 = vmatprep.subr.bf16.mxu1 %v25318_v27  ;;  %v25379_v12 = vld [vmem:[#allocation11 + $0x638] ss:$24 sps:$4 sm:$0xff]   ;;  %v25387_v27 = vld [vmem:[#allocation11 + $0x60c] ss:$24 sps:$4 sm:$0xff]  }
 0x88e   :  { %18383 = vmatmul.mubr.bf16.vlgmr.msra.gmra.mxu0 %v27104_v25 }
 0x88f   :  { %18437 = vmatpush1.bf16.msra.mxu0 %v25319_v24  ;;  %18468 = vmatprep.mubr.bf16.mxu0 %v26960_v46  ;;  %v25385_v24 = vld [vmem:[#allocation11 + $0x608] ss:$24 sps:$4 sm:$0xff]  }
 0x890   :  { %18418 = vmatpush2.bf16.msra.mxu1 %v25316_v34  ;;  %18438 = vmatprep.subr.bf16.mxu0 %v25327_v16  ;;  %v25390_v34 = vld [vmem:[#allocation11 + $0x51c] ss:$24 sps:$4 sm:$0xff]  }
 0x891   :  { %18419 = vmatprep.subr.bf16.mxu1 %v25324_v8  ;;  %v25393_v16 = vld [vmem:[#allocation11 + $0x8dc] ss:$24 sps:$4 sm:$0xff]   ;;  %v25388_v8 = vld [vmem:[#allocation11 + $0x518] ss:$24 sps:$4 sm:$0xff]  }
 0x893   :  { %18439 = vmatpush1.bf16.msra.mxu0 %v25325_v41  ;;  %v25391_v41 = vld [vmem:[#allocation11 + $0x8d8] ss:$24 sps:$4 sm:$0xff]  }
 0x894   :  { %18420 = vmatpush2.bf16.msra.mxu1 %v25322_v48  ;;  %18440 = vmatprep.subr.bf16.mxu0 %v25333_v42  ;;  %v25396_v48 = vld [vmem:[#allocation11 + $0x4ec] ss:$24 sps:$4 sm:$0xff]  }
 0x895   :  { %18421 = vmatprep.subr.bf16.mxu1 %v25330_v40  ;;  %v25399_v42 = vld [vmem:[#allocation11 + $0x8ac] ss:$24 sps:$4 sm:$0xff]   ;;  %v25394_v40 = vld [vmem:[#allocation11 + $0x4e8] ss:$24 sps:$4 sm:$0xff]  }
 0x897   :  { %18441 = vmatpush1.bf16.msra.mxu0 %v25331_v9  ;;  %v25397_v9 = vld [vmem:[#allocation11 + $0x8a8] ss:$24 sps:$4 sm:$0xff]  }
 0x898   :  { %18422 = vmatpush2.bf16.msra.mxu1 %v25328_v51  ;;  %18442 = vmatprep.subr.bf16.mxu0 %v25339_v23  ;;  %v25402_v51 = vld [vmem:[#allocation11 + $0x4bc] ss:$24 sps:$4 sm:$0xff]  }
 0x899   :  { %18423 = vmatprep.subr.bf16.mxu1 %v25336_v61  ;;  %v25405_v23 = vld [vmem:[#allocation11 + $0x87c] ss:$24 sps:$4 sm:$0xff]   ;;  %v25400_v61 = vld [vmem:[#allocation11 + $0x4b8] ss:$24 sps:$4 sm:$0xff]  }
 0x89b   :  { %18443 = vmatpush1.bf16.msra.mxu0 %v25337_v53  ;;  %v25403_v53 = vld [vmem:[#allocation11 + $0x878] ss:$24 sps:$4 sm:$0xff]  }
 0x89c   :  { %18424 = vmatpush2.bf16.msra.mxu1 %v25334_v28  ;;  %18444 = vmatprep.subr.bf16.mxu0 %v25342_v19  ;;  %v25408_v28 = vld [vmem:[#allocation11 + $0x48c] ss:$24 sps:$4 sm:$0xff]  }
 0x89d   :  { %18479 = vmatprep.subr.bf16.mxu1 %v25345_v13  ;;  %v25411_v19 = vld [vmem:[#allocation11 + $0x84c] ss:$24 sps:$4 sm:$0xff]   ;;  %v25406_v13 = vld [vmem:[#allocation11 + $0x488] ss:$24 sps:$4 sm:$0xff]  }
 0x89f   :  { %18426 = vmatmul.mubr.bf16.vlgmr.msra.gmra.mxu1 %v27392_v47  ;;  %18445 = vmatpush1.bf16.msra.mxu0 %v25340_v18  ;;  %v25409_v18 = vld [vmem:[#allocation11 + $0x848] ss:$24 sps:$4 sm:$0xff]  }
 0x8a0   :  { %18480 = vmatpush1.bf16.msra.mxu1 %v25343_v33  ;;  %18511 = vmatprep.mubr.bf16.mxu1 %v26994_v55  ;;  %v25417_v33 = vld [vmem:[#allocation11 + $0xa5c] ss:$24 sps:$4 sm:$0xff]  }
 0x8a1   :  { %18446 = vmatprep.subr.bf16.mxu0 %v25348_v2  ;;  %18481 = vmatprep.subr.bf16.mxu1 %v25351_v49  ;;  %v25414_v2 = vld [vmem:[#allocation11 + $0x81c] ss:$24 sps:$4 sm:$0xff]   ;;  %v25415_v49 = vld [vmem:[#allocation11 + $0xa58] ss:$24 sps:$4 sm:$0xff]  }
 0x8a3   :  { %18447 = vmatpush1.bf16.msra.mxu0 %v25346_v36  ;;  %v25412_v36 = vld [vmem:[#allocation11 + $0x818] ss:$24 sps:$4 sm:$0xff]  }
 0x8a4   :  { %18482 = vmatpush1.bf16.msra.mxu1 %v25349_v31  ;;  %18448 = vmatprep.subr.bf16.mxu0 %v25354_v30  ;;  %v25423_v31 = vld [vmem:[#allocation11 + $0xa2c] ss:$24 sps:$4 sm:$0xff]  }
 0x8a5   :  { %18483 = vmatprep.subr.bf16.mxu1 %v25357_v29  ;;  %v25420_v30 = vld [vmem:[#allocation11 + $0x7ec] ss:$24 sps:$4 sm:$0xff]   ;;  %v25421_v29 = vld [vmem:[#allocation11 + $0xa28] ss:$24 sps:$4 sm:$0xff]  }
 0x8a7   :  { %18449 = vmatpush1.bf16.msra.mxu0 %v25352_v45  ;;  %v25418_v45 = vld [vmem:[#allocation11 + $0x7e8] ss:$24 sps:$4 sm:$0xff]  }
 0x8a8   :  { %18484 = vmatpush1.bf16.msra.mxu1 %v25355_v14  ;;  %18450 = vmatprep.subr.bf16.mxu0 %v25360_v4  ;;  %v25429_v14 = vld [vmem:[#allocation11 + $0x9fc] ss:$24 sps:$4 sm:$0xff]  }
 0x8a9   :  { %18485 = vmatprep.subr.bf16.mxu1 %v25363_v39  ;;  %v25426_v4 = vld [vmem:[#allocation11 + $0x7bc] ss:$24 sps:$4 sm:$0xff]   ;;  %v25427_v39 = vld [vmem:[#allocation11 + $0x9f8] ss:$24 sps:$4 sm:$0xff]  }
 0x8ab   :  { %18451 = vmatpush1.bf16.msra.mxu0 %v25358_v7  ;;  %v25424_v7 = vld [vmem:[#allocation11 + $0x7b8] ss:$24 sps:$4 sm:$0xff]  }
 0x8ac   :  { %18486 = vmatpush1.bf16.msra.mxu1 %v25361_v35  ;;  %18452 = vmatprep.subr.bf16.mxu0 %v25366_v26  ;;  %v25435_v35 = vld [vmem:[#allocation11 + $0x9cc] ss:$24 sps:$4 sm:$0xff]  }
 0x8ad   :  { %18487 = vmatprep.subr.bf16.mxu1 %v25369_v21  ;;  %v25432_v26 = vld [vmem:[#allocation11 + $0x78c] ss:$24 sps:$4 sm:$0xff]   ;;  %v25433_v21 = vld [vmem:[#allocation11 + $0x9c8] ss:$24 sps:$4 sm:$0xff]  }
 0x8af   :  { %18453 = vmatpush2.bf16.msra.mxu0 %v25364_v60  ;;  %v25430_v60 = vld [vmem:[#allocation11 + $0x788] ss:$24 sps:$4 sm:$0xff]  }
 0x8b0   :  { %18488 = vmatpush1.bf16.msra.mxu1 %v25367_v10  ;;  %18454 = vmatprep.subr.bf16.mxu0 %v25372_v17  ;;  %v25438_v10 = vld [vmem:[#allocation11 + $0x99c] ss:$24 sps:$4 sm:$0xff]  }
 0x8b1   :  { %18489 = vmatprep.subr.bf16.mxu1 %v25375_v3  ;;  %v25441_v17 = vld [vmem:[#allocation11 + $0xd5c] ss:$24 sps:$4 sm:$0xff]   ;;  %v25436_v3 = vld [vmem:[#allocation11 + $0x998] ss:$24 sps:$4 sm:$0xff]  }
 0x8b3   :  { %18455 = vmatpush2.bf16.msra.mxu0 %v25370_v62  ;;  %v25439_v62 = vld [vmem:[#allocation11 + $0xd58] ss:$24 sps:$4 sm:$0xff]  }
 0x8b4   :  { %18490 = vmatpush1.bf16.msra.mxu1 %v25373_v6  ;;  %18456 = vmatprep.subr.bf16.mxu0 %v25378_v54  ;;  %v25444_v6 = vld [vmem:[#allocation11 + $0x96c] ss:$24 sps:$4 sm:$0xff]  }
 0x8b5   :  { %18491 = vmatprep.subr.bf16.mxu1 %v25381_v43  ;;  %v25447_v54 = vld [vmem:[#allocation11 + $0xd2c] ss:$24 sps:$4 sm:$0xff]   ;;  %v25442_v43 = vld [vmem:[#allocation11 + $0x968] ss:$24 sps:$4 sm:$0xff]  }
 0x8b7   :  { %18457 = vmatpush2.bf16.msra.mxu0 %v25376_v57  ;;  %v25445_v57 = vld [vmem:[#allocation11 + $0xd28] ss:$24 sps:$4 sm:$0xff]  }
 0x8b8   :  { %18492 = vmatpush1.bf16.msra.mxu1 %v25379_v12  ;;  %18458 = vmatprep.subr.bf16.mxu0 %v25384_v59  ;;  %v25450_v12 = vld [vmem:[#allocation11 + $0x93c] ss:$24 sps:$4 sm:$0xff]  }
 0x8b9   :  { %18493 = vmatprep.subr.bf16.mxu1 %v25387_v27  ;;  %v25453_v59 = vld [vmem:[#allocation11 + $0xcfc] ss:$24 sps:$4 sm:$0xff]   ;;  %v25448_v27 = vld [vmem:[#allocation11 + $0x938] ss:$24 sps:$4 sm:$0xff]  }
 0x8bb   :  { %18459 = vmatpush2.bf16.msra.mxu0 %v25382_v58  ;;  %v25451_v58 = vld [vmem:[#allocation11 + $0xcf8] ss:$24 sps:$4 sm:$0xff]  }
 0x8bc   :  { %18494 = vmatpush1.bf16.msra.mxu1 %v25385_v24  ;;  %18460 = vmatprep.subr.bf16.mxu0 %v25390_v34  ;;  %v25456_v24 = vld [vmem:[#allocation11 + $0x90c] ss:$24 sps:$4 sm:$0xff]  }
 0x8bd   :  { %18495 = vmatprep.subr.bf16.mxu1 %v25393_v16  ;;  %v25459_v34 = vld [vmem:[#allocation11 + $0xccc] ss:$24 sps:$4 sm:$0xff]   ;;  %v25454_v16 = vld [vmem:[#allocation11 + $0x908] ss:$24 sps:$4 sm:$0xff]  }
 0x8bf   :  { %18461 = vmatpush2.bf16.msra.mxu0 %v25388_v8  ;;  %v25457_v8 = vld [vmem:[#allocation11 + $0xcc8] ss:$24 sps:$4 sm:$0xff]  }
 0x8c0   :  { %18496 = vmatpush2.bf16.msra.mxu1 %v25391_v41  ;;  %18462 = vmatprep.subr.bf16.mxu0 %v25396_v48  ;;  %v25462_v41 = vld [vmem:[#allocation11 + $0xbdc] ss:$24 sps:$4 sm:$0xff]  }
 0x8c1   :  { %18497 = vmatprep.subr.bf16.mxu1 %v25399_v42  ;;  %v25465_v48 = vld [vmem:[#allocation11 + $0xc9c] ss:$24 sps:$4 sm:$0xff]   ;;  %v25460_v42 = vld [vmem:[#allocation11 + $0xbd8] ss:$24 sps:$4 sm:$0xff]  }
 0x8c3   :  { %18463 = vmatpush2.bf16.msra.mxu0 %v25394_v40  ;;  %v25463_v40 = vld [vmem:[#allocation11 + $0xc98] ss:$24 sps:$4 sm:$0xff]  }
 0x8c4   :  { %18498 = vmatpush2.bf16.msra.mxu1 %v25397_v9  ;;  %18464 = vmatprep.subr.bf16.mxu0 %v25402_v51  ;;  %v25468_v9 = vld [vmem:[#allocation11 + $0xbac] ss:$24 sps:$4 sm:$0xff]  }
 0x8c5   :  { %18499 = vmatprep.subr.bf16.mxu1 %v25405_v23  ;;  %v25471_v51 = vld [vmem:[#allocation11 + $0xc6c] ss:$24 sps:$4 sm:$0xff]   ;;  %v25466_v23 = vld [vmem:[#allocation11 + $0xba8] ss:$24 sps:$4 sm:$0xff]  }
 0x8c7   :  { %18465 = vmatpush2.bf16.msra.mxu0 %v25400_v61  ;;  %v25469_v61 = vld [vmem:[#allocation11 + $0xc68] ss:$24 sps:$4 sm:$0xff]  }
 0x8c8   :  { %18500 = vmatpush2.bf16.msra.mxu1 %v25403_v53  ;;  %18466 = vmatprep.subr.bf16.mxu0 %v25408_v28  ;;  %v25474_v53 = vld [vmem:[#allocation11 + $0xb7c] ss:$24 sps:$4 sm:$0xff]  }
 0x8c9   :  { %18501 = vmatprep.subr.bf16.mxu1 %v25411_v19  ;;  %v25477_v28 = vld [vmem:[#allocation11 + $0xc3c] ss:$24 sps:$4 sm:$0xff]   ;;  %v25472_v19 = vld [vmem:[#allocation11 + $0xb78] ss:$24 sps:$4 sm:$0xff]  }
 0x8cb   :  { %18467 = vmatpush2.bf16.msra.mxu0 %v25406_v13  ;;  %v25475_v13 = vld [vmem:[#allocation11 + $0xc38] ss:$24 sps:$4 sm:$0xff]  }
 0x8cc   :  { %18502 = vmatpush2.bf16.msra.mxu1 %v25409_v18  ;;  %18522 = vmatprep.subr.bf16.mxu0 %v25417_v33  ;;  %v25480_v18 = vld [vmem:[#allocation11 + $0xb4c] ss:$24 sps:$4 sm:$0xff]  }
 0x8cd   :  { %18503 = vmatprep.subr.bf16.mxu1 %v25414_v2  ;;  %v25483_v33 = vld [vmem:[#allocation11 + $0xc0c] ss:$24 sps:$4 sm:$0xff]   ;;  %v25478_v2 = vld [vmem:[#allocation11 + $0xb48] ss:$24 sps:$4 sm:$0xff]  }
 0x8ce   :  { %18469 = vmatmul.mubr.bf16.vlgmr.msra.gmra.mxu0 %v27399_v50 }
 0x8cf   :  { %18523 = vmatpush1.bf16.msra.mxu0 %v25415_v49  ;;  %18554 = vmatprep.mubr.bf16.mxu0 %v27007_v32  ;;  %v25481_v49 = vld [vmem:[#allocation11 + $0xc08] ss:$24 sps:$4 sm:$0xff]  }
 0x8d0   :  { %18504 = vmatpush2.bf16.msra.mxu1 %v25412_v36  ;;  %18524 = vmatprep.subr.bf16.mxu0 %v25423_v31  ;;  %v25486_v36 = vld [vmem:[#allocation11 + $0xb1c] ss:$24 sps:$4 sm:$0xff]  }
 0x8d1   :  { %18505 = vmatprep.subr.bf16.mxu1 %v25420_v30  ;;  %v25489_v31 = vld [vmem:[#allocation11 + $0xedc] ss:$24 sps:$4 sm:$0xff]   ;;  %v25484_v30 = vld [vmem:[#allocation11 + $0xb18] ss:$24 sps:$4 sm:$0xff]  }
 0x8d3   :  { %18525 = vmatpush1.bf16.msra.mxu0 %v25421_v29  ;;  %v25487_v29 = vld [vmem:[#allocation11 + $0xed8] ss:$24 sps:$4 sm:$0xff]  }
 0x8d4   :  { %18506 = vmatpush2.bf16.msra.mxu1 %v25418_v45  ;;  %18526 = vmatprep.subr.bf16.mxu0 %v25429_v14  ;;  %v25492_v45 = vld [vmem:[#allocation11 + $0xaec] ss:$24 sps:$4 sm:$0xff]  }
 0x8d5   :  { %18507 = vmatprep.subr.bf16.mxu1 %v25426_v4  ;;  %v25495_v14 = vld [vmem:[#allocation11 + $0xeac] ss:$24 sps:$4 sm:$0xff]   ;;  %v25490_v4 = vld [vmem:[#allocation11 + $0xae8] ss:$24 sps:$4 sm:$0xff]  }
 0x8d7   :  { %18527 = vmatpush1.bf16.msra.mxu0 %v25427_v39  ;;  %v25493_v39 = vld [vmem:[#allocation11 + $0xea8] ss:$24 sps:$4 sm:$0xff]  }
 0x8d8   :  { %18508 = vmatpush2.bf16.msra.mxu1 %v25424_v7  ;;  %18528 = vmatprep.subr.bf16.mxu0 %v25435_v35  ;;  %v25498_v7 = vld [vmem:[#allocation11 + $0xabc] ss:$24 sps:$4 sm:$0xff]  }
 0x8d9   :  { %18509 = vmatprep.subr.bf16.mxu1 %v25432_v26  ;;  %v25501_v35 = vld [vmem:[#allocation11 + $0xe7c] ss:$24 sps:$4 sm:$0xff]   ;;  %v25496_v26 = vld [vmem:[#allocation11 + $0xab8] ss:$24 sps:$4 sm:$0xff]  }
 0x8db   :  { %18529 = vmatpush1.bf16.msra.mxu0 %v25433_v21  ;;  %v25499_v21 = vld [vmem:[#allocation11 + $0xe78] ss:$24 sps:$4 sm:$0xff]  }
 0x8dc   :  { %18510 = vmatpush2.bf16.msra.mxu1 %v25430_v60  ;;  %18530 = vmatprep.subr.bf16.mxu0 %v25438_v10  ;;  %v25504_v60 = vld [vmem:[#allocation11 + $0xa8c] ss:$24 sps:$4 sm:$0xff]  }
 0x8dd   :  { %18565 = vmatprep.subr.bf16.mxu1 %v25441_v17  ;;  %v25507_v10 = vld [vmem:[#allocation11 + $0xe4c] ss:$24 sps:$4 sm:$0xff]   ;;  %v25502_v17 = vld [vmem:[#allocation11 + $0xa88] ss:$24 sps:$4 sm:$0xff]  }
 0x8df   :  { %18512 = vmatmul.mubr.bf16.vlgmr.msra.gmra.mxu1 %v27409_v63  ;;  %18531 = vmatpush1.bf16.msra.mxu0 %v25436_v3  ;;  %v25505_v3 = vld [vmem:[#allocation11 + $0xe48] ss:$24 sps:$4 sm:$0xff]  }
 0x8e0   :  { %18566 = vmatpush1.bf16.msra.mxu1 %v25439_v62  ;;  %18597 = vmatprep.mubr.bf16.mxu1 %v27036_v38  ;;  %v25513_v62 = vld [vmem:[#allocation11 + $0x105c] ss:$24 sps:$4 sm:$0xff]  }
 0x8e1   :  { %18532 = vmatprep.subr.bf16.mxu0 %v25444_v6  ;;  %18567 = vmatprep.subr.bf16.mxu1 %v25447_v54  ;;  %v25510_v6 = vld [vmem:[#allocation11 + $0xe1c] ss:$24 sps:$4 sm:$0xff]   ;;  %v25511_v54 = vld [vmem:[#allocation11 + $0x1058] ss:$24 sps:$4 sm:$0xff]  }
 0x8e3   :  { %18533 = vmatpush1.bf16.msra.mxu0 %v25442_v43  ;;  %v25508_v43 = vld [vmem:[#allocation11 + $0xe18] ss:$24 sps:$4 sm:$0xff]  }
 0x8e4   :  { %18568 = vmatpush1.bf16.msra.mxu1 %v25445_v57  ;;  %18534 = vmatprep.subr.bf16.mxu0 %v25450_v12  ;;  %v25519_v57 = vld [vmem:[#allocation11 + $0x102c] ss:$24 sps:$4 sm:$0xff]  }
 0x8e5   :  { %18569 = vmatprep.subr.bf16.mxu1 %v25453_v59  ;;  %v25516_v12 = vld [vmem:[#allocation11 + $0xdec] ss:$24 sps:$4 sm:$0xff]   ;;  %v25517_v59 = vld [vmem:[#allocation11 + $0x1028] ss:$24 sps:$4 sm:$0xff]  }
 0x8e7   :  { %18535 = vmatpush1.bf16.msra.mxu0 %v25448_v27  ;;  %v25514_v27 = vld [vmem:[#allocation11 + $0xde8] ss:$24 sps:$4 sm:$0xff]  }
 0x8e8   :  { %18570 = vmatpush1.bf16.msra.mxu1 %v25451_v58  ;;  %18536 = vmatprep.subr.bf16.mxu0 %v25456_v24  ;;  %v25525_v58 = vld [vmem:[#allocation11 + $0xffc] ss:$24 sps:$4 sm:$0xff]  }
 0x8e9   :  { %18571 = vmatprep.subr.bf16.mxu1 %v25459_v34  ;;  %v25522_v24 = vld [vmem:[#allocation11 + $0xdbc] ss:$24 sps:$4 sm:$0xff]   ;;  %v25523_v34 = vld [vmem:[#allocation11 + $0xff8] ss:$24 sps:$4 sm:$0xff]  }
 0x8eb   :  { %18537 = vmatpush1.bf16.msra.mxu0 %v25454_v16  ;;  %v25520_v16 = vld [vmem:[#allocation11 + $0xdb8] ss:$24 sps:$4 sm:$0xff]  }
 0x8ec   :  { %18572 = vmatpush1.bf16.msra.mxu1 %v25457_v8  ;;  %18538 = vmatprep.subr.bf16.mxu0 %v25462_v41  ;;  %v25531_v8 = vld [vmem:[#allocation11 + $0xfcc] ss:$24 sps:$4 sm:$0xff]  }
 0x8ed   :  { %18573 = vmatprep.subr.bf16.mxu1 %v25465_v48  ;;  %v25528_v41 = vld [vmem:[#allocation11 + $0xd8c] ss:$24 sps:$4 sm:$0xff]   ;;  %v25529_v48 = vld [vmem:[#allocation11 + $0xfc8] ss:$24 sps:$4 sm:$0xff]  }
 0x8ef   :  { %18539 = vmatpush2.bf16.msra.mxu0 %v25460_v42  ;;  %v25526_v42 = vld [vmem:[#allocation11 + $0xd88] ss:$24 sps:$4 sm:$0xff]  }
 0x8f0   :  { %18574 = vmatpush1.bf16.msra.mxu1 %v25463_v40  ;;  %18540 = vmatprep.subr.bf16.mxu0 %v25468_v9  ;;  %v25534_v40 = vld [vmem:[#allocation11 + $0xf9c] ss:$24 sps:$4 sm:$0xff]  }
 0x8f1   :  { %18575 = vmatprep.subr.bf16.mxu1 %v25471_v51  ;;  %v25537_v9 = vld [vmem:[#allocation11 + $0x135c] ss:$24 sps:$4 sm:$0xff]   ;;  %v25532_v51 = vld [vmem:[#allocation11 + $0xf98] ss:$24 sps:$4 sm:$0xff]  }
 0x8f3   :  { %18541 = vmatpush2.bf16.msra.mxu0 %v25466_v23  ;;  %v25535_v23 = vld [vmem:[#allocation11 + $0x1358] ss:$24 sps:$4 sm:$0xff]  }
 0x8f4   :  { %18576 = vmatpush1.bf16.msra.mxu1 %v25469_v61  ;;  %18542 = vmatprep.subr.bf16.mxu0 %v25474_v53  ;;  %v25540_v61 = vld [vmem:[#allocation11 + $0xf6c] ss:$24 sps:$4 sm:$0xff]  }
 0x8f5   :  { %18577 = vmatprep.subr.bf16.mxu1 %v25477_v28  ;;  %v25543_v53 = vld [vmem:[#allocation11 + $0x132c] ss:$24 sps:$4 sm:$0xff]   ;;  %v25538_v28 = vld [vmem:[#allocation11 + $0xf68] ss:$24 sps:$4 sm:$0xff]  }
 0x8f7   :  { %18543 = vmatpush2.bf16.msra.mxu0 %v25472_v19  ;;  %v25541_v19 = vld [vmem:[#allocation11 + $0x1328] ss:$24 sps:$4 sm:$0xff]  }
 0x8f8   :  { %18578 = vmatpush1.bf16.msra.mxu1 %v25475_v13  ;;  %18544 = vmatprep.subr.bf16.mxu0 %v25480_v18  ;;  %v25546_v13 = vld [vmem:[#allocation11 + $0xf3c] ss:$24 sps:$4 sm:$0xff]  }
 0x8f9   :  { %18579 = vmatprep.subr.bf16.mxu1 %v25483_v33  ;;  %v25549_v18 = vld [vmem:[#allocation11 + $0x12fc] ss:$24 sps:$4 sm:$0xff]   ;;  %v25544_v33 = vld [vmem:[#allocation11 + $0xf38] ss:$24 sps:$4 sm:$0xff]  }
 0x8fb   :  { %18545 = vmatpush2.bf16.msra.mxu0 %v25478_v2  ;;  %v25547_v2 = vld [vmem:[#allocation11 + $0x12f8] ss:$24 sps:$4 sm:$0xff]  }
 0x8fc   :  { %18580 = vmatpush1.bf16.msra.mxu1 %v25481_v49  ;;  %18546 = vmatprep.subr.bf16.mxu0 %v25486_v36  ;;  %v25552_v49 = vld [vmem:[#allocation11 + $0xf0c] ss:$24 sps:$4 sm:$0xff]  }
 0x8fd   :  { %18581 = vmatprep.subr.bf16.mxu1 %v25489_v31  ;;  %v25555_v36 = vld [vmem:[#allocation11 + $0x12cc] ss:$24 sps:$4 sm:$0xff]   ;;  %v25550_v31 = vld [vmem:[#allocation11 + $0xf08] ss:$24 sps:$4 sm:$0xff]  }
 0x8ff   :  { %18547 = vmatpush2.bf16.msra.mxu0 %v25484_v30  ;;  %v25553_v30 = vld [vmem:[#allocation11 + $0x12c8] ss:$24 sps:$4 sm:$0xff]  }
 0x900   :  { %18582 = vmatpush2.bf16.msra.mxu1 %v25487_v29  ;;  %18548 = vmatprep.subr.bf16.mxu0 %v25492_v45  ;;  %v25558_v29 = vld [vmem:[#allocation11 + $0x11dc] ss:$24 sps:$4 sm:$0xff]  }
 0x901   :  { %18583 = vmatprep.subr.bf16.mxu1 %v25495_v14  ;;  %v25561_v45 = vld [vmem:[#allocation11 + $0x129c] ss:$24 sps:$4 sm:$0xff]   ;;  %v25556_v14 = vld [vmem:[#allocation11 + $0x11d8] ss:$24 sps:$4 sm:$0xff]  }
 0x903   :  { %18549 = vmatpush2.bf16.msra.mxu0 %v25490_v4  ;;  %v25559_v4 = vld [vmem:[#allocation11 + $0x1298] ss:$24 sps:$4 sm:$0xff]  }
 0x904   :  { %18584 = vmatpush2.bf16.msra.mxu1 %v25493_v39  ;;  %18550 = vmatprep.subr.bf16.mxu0 %v25498_v7  ;;  %v25564_v39 = vld [vmem:[#allocation11 + $0x11ac] ss:$24 sps:$4 sm:$0xff]  }
 0x905   :  { %18585 = vmatprep.subr.bf16.mxu1 %v25501_v35  ;;  %v25567_v7 = vld [vmem:[#allocation11 + $0x126c] ss:$24 sps:$4 sm:$0xff]   ;;  %v25562_v35 = vld [vmem:[#allocation11 + $0x11a8] ss:$24 sps:$4 sm:$0xff]  }
 0x907   :  { %18551 = vmatpush2.bf16.msra.mxu0 %v25496_v26  ;;  %v25565_v26 = vld [vmem:[#allocation11 + $0x1268] ss:$24 sps:$4 sm:$0xff]  }
 0x908   :  { %18586 = vmatpush2.bf16.msra.mxu1 %v25499_v21  ;;  %18552 = vmatprep.subr.bf16.mxu0 %v25504_v60  ;;  %v25570_v21 = vld [vmem:[#allocation11 + $0x117c] ss:$24 sps:$4 sm:$0xff]  }
 0x909   :  { %18587 = vmatprep.subr.bf16.mxu1 %v25507_v10  ;;  %v25573_v60 = vld [vmem:[#allocation11 + $0x123c] ss:$24 sps:$4 sm:$0xff]   ;;  %v25568_v10 = vld [vmem:[#allocation11 + $0x1178] ss:$24 sps:$4 sm:$0xff]  }
 0x90b   :  { %18553 = vmatpush2.bf16.msra.mxu0 %v25502_v17  ;;  %v25571_v17 = vld [vmem:[#allocation11 + $0x1238] ss:$24 sps:$4 sm:$0xff]  }
 0x90c   :  { %18588 = vmatpush2.bf16.msra.mxu1 %v25505_v3  ;;  %18608 = vmatprep.subr.bf16.mxu0 %v25513_v62  ;;  %v25576_v3 = vld [vmem:[#allocation11 + $0x114c] ss:$24 sps:$4 sm:$0xff]  }
 0x90d   :  { %18589 = vmatprep.subr.bf16.mxu1 %v25510_v6  ;;  %v25579_v62 = vld [vmem:[#allocation11 + $0x120c] ss:$24 sps:$4 sm:$0xff]   ;;  %v25574_v6 = vld [vmem:[#allocation11 + $0x1148] ss:$24 sps:$4 sm:$0xff]  }
 0x90e   :  { %18555 = vmatmul.mubr.bf16.vlgmr.msra.gmra.mxu0 %v27410_v15 }
 0x90f   :  { %18609 = vmatpush1.bf16.msra.mxu0 %v25511_v54  ;;  %18640 = vmatprep.mubr.bf16.mxu0 %v27047_v44  ;;  %v25577_v54 = vld [vmem:[#allocation11 + $0x1208] ss:$24 sps:$4 sm:$0xff]  }
 0x910   :  { %18590 = vmatpush2.bf16.msra.mxu1 %v25508_v43  ;;  %18610 = vmatprep.subr.bf16.mxu0 %v25519_v57  ;;  %v25582_v43 = vld [vmem:[#allocation11 + $0x111c] ss:$24 sps:$4 sm:$0xff]  }
 0x911   :  { %18591 = vmatprep.subr.bf16.mxu1 %v25516_v12  ;;  %v25585_v57 = vld [vmem:[#allocation11 + $0x14dc] ss:$24 sps:$4 sm:$0xff]   ;;  %v25580_v12 = vld [vmem:[#allocation11 + $0x1118] ss:$24 sps:$4 sm:$0xff]  }
 0x913   :  { %18611 = vmatpush1.bf16.msra.mxu0 %v25517_v59  ;;  %v25583_v59 = vld [vmem:[#allocation11 + $0x14d8] ss:$24 sps:$4 sm:$0xff]  }
 0x914   :  { %18592 = vmatpush2.bf16.msra.mxu1 %v25514_v27  ;;  %18612 = vmatprep.subr.bf16.mxu0 %v25525_v58  ;;  %v25588_v27 = vld [vmem:[#allocation11 + $0x10ec] ss:$24 sps:$4 sm:$0xff]  }
 0x915   :  { %18593 = vmatprep.subr.bf16.mxu1 %v25522_v24  ;;  %v25591_v58 = vld [vmem:[#allocation11 + $0x14ac] ss:$24 sps:$4 sm:$0xff]   ;;  %v25586_v24 = vld [vmem:[#allocation11 + $0x10e8] ss:$24 sps:$4 sm:$0xff]  }
 0x917   :  { %18613 = vmatpush1.bf16.msra.mxu0 %v25523_v34  ;;  %v25589_v34 = vld [vmem:[#allocation11 + $0x14a8] ss:$24 sps:$4 sm:$0xff]  }
 0x918   :  { %18594 = vmatpush2.bf16.msra.mxu1 %v25520_v16  ;;  %18614 = vmatprep.subr.bf16.mxu0 %v25531_v8  ;;  %v25594_v16 = vld [vmem:[#allocation11 + $0x10bc] ss:$24 sps:$4 sm:$0xff]  }
 0x919   :  { %18595 = vmatprep.subr.bf16.mxu1 %v25528_v41  ;;  %v25597_v8 = vld [vmem:[#allocation11 + $0x147c] ss:$24 sps:$4 sm:$0xff]   ;;  %v25592_v41 = vld [vmem:[#allocation11 + $0x10b8] ss:$24 sps:$4 sm:$0xff]  }
 0x91b   :  { %18615 = vmatpush1.bf16.msra.mxu0 %v25529_v48  ;;  %v25595_v48 = vld [vmem:[#allocation11 + $0x1478] ss:$24 sps:$4 sm:$0xff]  }
 0x91c   :  { %18596 = vmatpush2.bf16.msra.mxu1 %v25526_v42  ;;  %18616 = vmatprep.subr.bf16.mxu0 %v25534_v40  ;;  %v25600_v42 = vld [vmem:[#allocation11 + $0x108c] ss:$24 sps:$4 sm:$0xff]  }
 0x91d   :  { %18651 = vmatprep.subr.bf16.mxu1 %v25537_v9  ;;  %v25603_v40 = vld [vmem:[#allocation11 + $0x144c] ss:$24 sps:$4 sm:$0xff]   ;;  %v25598_v9 = vld [vmem:[#allocation11 + $0x1088] ss:$24 sps:$4 sm:$0xff]  }
 0x91f   :  { %18598 = vmatmul.mubr.bf16.vlgmr.msra.gmra.mxu1 %v26876_v22  ;;  %18617 = vmatpush1.bf16.msra.mxu0 %v25532_v51  ;;  %v25601_v51 = vld [vmem:[#allocation11 + $0x1448] ss:$24 sps:$4 sm:$0xff]  }
 0x920   :  { %18652 = vmatpush1.bf16.msra.mxu1 %v25535_v23  ;;  %18683 = vmatprep.mubr.bf16.mxu1 %v27085_v11  ;;  %v25609_v23 = vld [vmem:[#allocation11 + $0x164] ss:$24 sps:$4 sm:$0xff]  }
 0x921   :  { %18618 = vmatprep.subr.bf16.mxu0 %v25540_v61  ;;  %18653 = vmatprep.subr.bf16.mxu1 %v25543_v53  ;;  %v25606_v61 = vld [vmem:[#allocation11 + $0x141c] ss:$24 sps:$4 sm:$0xff]   ;;  %v25607_v53 = vld [vmem:[#allocation11 + $0x160] ss:$24 sps:$4 sm:$0xff]  }
 0x923   :  { %18619 = vmatpush1.bf16.msra.mxu0 %v25538_v28  ;;  %v25604_v28 = vld [vmem:[#allocation11 + $0x1418] ss:$24 sps:$4 sm:$0xff]  }
 0x924   :  { %18654 = vmatpush1.bf16.msra.mxu1 %v25541_v19  ;;  %18620 = vmatprep.subr.bf16.mxu0 %v25546_v13  ;;  %v25615_v19 = vld [vmem:[#allocation11 + $0x134] ss:$24 sps:$4 sm:$0xff]  }
 0x925   :  { %18655 = vmatprep.subr.bf16.mxu1 %v25549_v18  ;;  %v25612_v13 = vld [vmem:[#allocation11 + $0x13ec] ss:$24 sps:$4 sm:$0xff]   ;;  %v25613_v18 = vld [vmem:[#allocation11 + $0x130] ss:$24 sps:$4 sm:$0xff]  }
 0x927   :  { %18621 = vmatpush1.bf16.msra.mxu0 %v25544_v33  ;;  %v25610_v33 = vld [vmem:[#allocation11 + $0x13e8] ss:$24 sps:$4 sm:$0xff]  }
 0x928   :  { %18656 = vmatpush1.bf16.msra.mxu1 %v25547_v2  ;;  %18622 = vmatprep.subr.bf16.mxu0 %v25552_v49  ;;  %v25621_v2 = vld [vmem:[#allocation11 + $0x104] ss:$24 sps:$4 sm:$0xff]  }
 0x929   :  { %18657 = vmatprep.subr.bf16.mxu1 %v25555_v36  ;;  %v25618_v49 = vld [vmem:[#allocation11 + $0x13bc] ss:$24 sps:$4 sm:$0xff]   ;;  %v25619_v36 = vld [vmem:[#allocation11 + $0x100] ss:$24 sps:$4 sm:$0xff]  }
 0x92b   :  { %18623 = vmatpush1.bf16.msra.mxu0 %v25550_v31  ;;  %v25616_v31 = vld [vmem:[#allocation11 + $0x13b8] ss:$24 sps:$4 sm:$0xff]  }
 0x92c   :  { %18658 = vmatpush1.bf16.msra.mxu1 %v25553_v30  ;;  %18624 = vmatprep.subr.bf16.mxu0 %v25558_v29  ;;  %v25627_v30 = vld [vmem:[#allocation11 + $0xd4] ss:$24 sps:$4 sm:$0xff]  }
 0x92d   :  { %18659 = vmatprep.subr.bf16.mxu1 %v25561_v45  ;;  %v25624_v29 = vld [vmem:[#allocation11 + $0x138c] ss:$24 sps:$4 sm:$0xff]   ;;  %v25625_v45 = vld [vmem:[#allocation11 + $0xd0] ss:$24 sps:$4 sm:$0xff]  }
 0x92f   :  { %18625 = vmatpush2.bf16.msra.mxu0 %v25556_v14  ;;  %v25622_v14 = vld [vmem:[#allocation11 + $0x1388] ss:$24 sps:$4 sm:$0xff]  }
 0x930   :  { %18660 = vmatpush1.bf16.msra.mxu1 %v25559_v4  ;;  %18626 = vmatprep.subr.bf16.mxu0 %v25564_v39  ;;  %v25633_v4 = vld [vmem:[#allocation11 + $0x464] ss:$24 sps:$4 sm:$0xff]   ;;  %v25628_v39 = vld [vmem:[#allocation11 + $0xa0] ss:$24 sps:$4 sm:$0xff]  }
 0x931   :  { %18661 = vmatprep.subr.bf16.mxu1 %v25567_v7  ;;  %v25631_v7 = vld [vmem:[#allocation11 + $0x460] ss:$24 sps:$4 sm:$0xff]  }
 0x933   :  { %18627 = vmatpush2.bf16.msra.mxu0 %v25562_v35  ;;  %v25636_v35 = vld [vmem:[#allocation11 + $0x74] ss:$24 sps:$4 sm:$0xff]  }
 0x934   :  { %18662 = vmatpush1.bf16.msra.mxu1 %v25565_v26  ;;  %18628 = vmatprep.subr.bf16.mxu0 %v25570_v21  ;;  %v25639_v26 = vld [vmem:[#allocation11 + $0x434] ss:$24 sps:$4 sm:$0xff]   ;;  %v25634_v21 = vld [vmem:[#allocation11 + $0x70] ss:$24 sps:$4 sm:$0xff]  }
 0x935   :  { %18663 = vmatprep.subr.bf16.mxu1 %v25573_v60  ;;  %v25637_v60 = vld [vmem:[#allocation11 + $0x430] ss:$24 sps:$4 sm:$0xff]  }
 0x937   :  { %18629 = vmatpush2.bf16.msra.mxu0 %v25568_v10  ;;  %v25642_v10 = vld [vmem:[#allocation11 + $0x44] ss:$24 sps:$4 sm:$0xff]  }
 0x938   :  { %18664 = vmatpush1.bf16.msra.mxu1 %v25571_v17  ;;  %18630 = vmatprep.subr.bf16.mxu0 %v25576_v3  ;;  %v25645_v17 = vld [vmem:[#allocation11 + $0x404] ss:$24 sps:$4 sm:$0xff]   ;;  %v25640_v3 = vld [vmem:[#allocation11 + $0x40] ss:$24 sps:$4 sm:$0xff]  }
 0x939   :  { %18665 = vmatprep.subr.bf16.mxu1 %v25579_v62  ;;  %v25643_v62 = vld [vmem:[#allocation11 + $0x400] ss:$24 sps:$4 sm:$0xff]  }
 0x93b   :  { %18631 = vmatpush2.bf16.msra.mxu0 %v25574_v6  ;;  %v25648_v6 = vld [vmem:[#allocation11 + $0x14] ss:$24 sps:$4 sm:$0xff]  }
 0x93c   :  { %18666 = vmatpush1.bf16.msra.mxu1 %v25577_v54  ;;  %18632 = vmatprep.subr.bf16.mxu0 %v25582_v43  ;;  %v25651_v54 = vld [vmem:[#allocation11 + $0x3d4] ss:$24 sps:$4 sm:$0xff]   ;;  %v25646_v43 = vld [vmem:[#allocation11 + $0x10] ss:$24 sps:$4 sm:$0xff]  }
 0x93d   :  { %18667 = vmatprep.subr.bf16.mxu1 %v25585_v57  ;;  %v25649_v57 = vld [vmem:[#allocation11 + $0x3d0] ss:$24 sps:$4 sm:$0xff]  }
 0x93f   :  { %18633 = vmatpush2.bf16.msra.mxu0 %v25580_v12  ;;  %v25654_v12 = vld [vmem:[#allocation11 + $0x2e4] ss:$24 sps:$4 sm:$0xff]  }
 0x940   :  { %18668 = vmatpush2.bf16.msra.mxu1 %v25583_v59  ;;  %18634 = vmatprep.subr.bf16.mxu0 %v25588_v27  ;;  %v25652_v59 = vld [vmem:[#allocation11 + $0x2e0] ss:$24 sps:$4 sm:$0xff]  }
 0x941   :  { %18669 = vmatprep.subr.bf16.mxu1 %v25591_v58  ;;  %v25655_v27 = vld [vmem:[#allocation11 + $0x3a0] ss:$24 sps:$4 sm:$0xff]   ;;  %v25660_v58 = vld [vmem:[#allocation11 + $0x2b4] ss:$24 sps:$4 sm:$0xff]  }
 0x943   :  { %18635 = vmatpush2.bf16.msra.mxu0 %v25586_v24  ;;  %v25663_v24 = vld [vmem:[#allocation11 + $0x374] ss:$24 sps:$4 sm:$0xff]  }
 0x944   :  { %18670 = vmatpush2.bf16.msra.mxu1 %v25589_v34  ;;  %18636 = vmatprep.subr.bf16.mxu0 %v25594_v16  ;;  %v25658_v34 = vld [vmem:[#allocation11 + $0x2b0] ss:$24 sps:$4 sm:$0xff]  }
 0x945   :  { %18671 = vmatprep.subr.bf16.mxu1 %v25597_v8  ;;  %v25661_v16 = vld [vmem:[#allocation11 + $0x370] ss:$24 sps:$4 sm:$0xff]   ;;  %v25666_v8 = vld [vmem:[#allocation11 + $0x284] ss:$24 sps:$4 sm:$0xff]  }
 0x947   :  { %18637 = vmatpush2.bf16.msra.mxu0 %v25592_v41  ;;  %v25669_v41 = vld [vmem:[#allocation11 + $0x344] ss:$24 sps:$4 sm:$0xff]  }
 0x948   :  { %18672 = vmatpush2.bf16.msra.mxu1 %v25595_v48  ;;  %18638 = vmatprep.subr.bf16.mxu0 %v25600_v42  ;;  %v25664_v48 = vld [vmem:[#allocation11 + $0x280] ss:$24 sps:$4 sm:$0xff]  }
 0x949   :  { %18673 = vmatprep.subr.bf16.mxu1 %v25603_v40  ;;  %v25667_v42 = vld [vmem:[#allocation11 + $0x340] ss:$24 sps:$4 sm:$0xff]   ;;  %v25672_v40 = vld [vmem:[#allocation11 + $0x254] ss:$24 sps:$4 sm:$0xff]  }
 0x94b   :  { %18639 = vmatpush2.bf16.msra.mxu0 %v25598_v9  ;;  %v25675_v9 = vld [vmem:[#allocation11 + $0x314] ss:$24 sps:$4 sm:$0xff]  }
 0x94c   :  { %18674 = vmatpush2.bf16.msra.mxu1 %v25601_v51  ;;  %18694 = vmatprep.subr.bf16.mxu0 %v25609_v23  ;;  %v25670_v51 = vld [vmem:[#allocation11 + $0x250] ss:$24 sps:$4 sm:$0xff]  }
 0x94d   :  { %18675 = vmatprep.subr.bf16.mxu1 %v25606_v61  ;;  %v25673_v23 = vld [vmem:[#allocation11 + $0x310] ss:$24 sps:$4 sm:$0xff]   ;;  %v25678_v61 = vld [vmem:[#allocation11 + $0x224] ss:$24 sps:$4 sm:$0xff]  }
 0x94e   :  { %18641 = vmatmul.mubr.bf16.vlgmr.msra.gmra.mxu0 %v26968_v5 }
 0x94f   :  { %18695 = vmatpush1.bf16.msra.mxu0 %v25607_v53  ;;  %18726 = vmatprep.mubr.bf16.mxu0 %v26941_v56  ;;  %v25630_v56 = vld [vmem:[#allocation11 + $0xa4] ss:$24 sps:$4 sm:$0xff]  }
 0x950   :  { %18676 = vmatpush2.bf16.msra.mxu1 %v25604_v28  ;;  %18696 = vmatprep.subr.bf16.mxu0 %v25615_v19  ;;  %v25681_v53 = vld [vmem:[#allocation11 + $0x5e4] ss:$24 sps:$4 sm:$0xff]   ;;  %v25676_v28 = vld [vmem:[#allocation11 + $0x220] ss:$24 sps:$4 sm:$0xff]  }
 0x951   :  { %18677 = vmatprep.subr.bf16.mxu1 %v25612_v13  ;;  %v25679_v19 = vld [vmem:[#allocation11 + $0x5e0] ss:$24 sps:$4 sm:$0xff]   ;;  %v25684_v13 = vld [vmem:[#allocation11 + $0x1f4] ss:$24 sps:$4 sm:$0xff]  }
 0x953   :  { %18697 = vmatpush1.bf16.msra.mxu0 %v25613_v18  ;;  %v25687_v18 = vld [vmem:[#allocation11 + $0x5b4] ss:$24 sps:$4 sm:$0xff]  }
 0x954   :  { %18678 = vmatpush2.bf16.msra.mxu1 %v25610_v33  ;;  %18698 = vmatprep.subr.bf16.mxu0 %v25621_v2  ;;  %v25682_v33 = vld [vmem:[#allocation11 + $0x1f0] ss:$24 sps:$4 sm:$0xff]  }
 0x955   :  { %18679 = vmatprep.subr.bf16.mxu1 %v25618_v49  ;;  %v25685_v2 = vld [vmem:[#allocation11 + $0x5b0] ss:$24 sps:$4 sm:$0xff]   ;;  %v25690_v49 = vld [vmem:[#allocation11 + $0x1c4] ss:$24 sps:$4 sm:$0xff]  }
 0x957   :  { %18699 = vmatpush1.bf16.msra.mxu0 %v25619_v36  ;;  %v25693_v36 = vld [vmem:[#allocation11 + $0x584] ss:$24 sps:$4 sm:$0xff]  }
 0x958   :  { %18680 = vmatpush2.bf16.msra.mxu1 %v25616_v31  ;;  %18700 = vmatprep.subr.bf16.mxu0 %v25627_v30  ;;  %v25688_v31 = vld [vmem:[#allocation11 + $0x1c0] ss:$24 sps:$4 sm:$0xff]  }
 0x959   :  { %18681 = vmatprep.subr.bf16.mxu1 %v25624_v29  ;;  %v25691_v30 = vld [vmem:[#allocation11 + $0x580] ss:$24 sps:$4 sm:$0xff]   ;;  %v25696_v29 = vld [vmem:[#allocation11 + $0x194] ss:$24 sps:$4 sm:$0xff]  }
 0x95b   :  { %18701 = vmatpush1.bf16.msra.mxu0 %v25625_v45  ;;  %v25699_v45 = vld [vmem:[#allocation11 + $0x554] ss:$24 sps:$4 sm:$0xff]  }
 0x95c   :  { %18682 = vmatpush2.bf16.msra.mxu1 %v25622_v14  ;;  %18702 = vmatprep.subr.bf16.mxu0 %v25630_v56  ;;  %v25694_v14 = vld [vmem:[#allocation11 + $0x190] ss:$24 sps:$4 sm:$0xff]  }
 0x95d   :  { %18737 = vmatprep.subr.bf16.mxu1 %v25633_v4  ;;  %v25697_v56 = vld [vmem:[#allocation11 + $0x550] ss:$24 sps:$4 sm:$0xff]   ;;  %v25705_v4 = vld [vmem:[#allocation11 + $0x764] ss:$24 sps:$4 sm:$0xff]  }
 0x95f   :  { %18684 = vmatmul.mubr.bf16.vlgmr.msra.gmra.mxu1 %v27104_v25  ;;  %18703 = vmatpush1.bf16.msra.mxu0 %v25628_v39  ;;  %v25702_v39 = vld [vmem:[#allocation11 + $0x524] ss:$24 sps:$4 sm:$0xff]  }
 0x960   :  { %18738 = vmatpush1.bf16.msra.mxu1 %v25631_v7  ;;  %18769 = vmatprep.mubr.bf16.mxu1 %v26960_v46  ;;  %v25657_v46 = vld [vmem:[#allocation11 + $0x3a4] ss:$24 sps:$4 sm:$0xff]   ;;  %v25703_v7 = vld [vmem:[#allocation11 + $0x760] ss:$24 sps:$4 sm:$0xff]  }
 0x961   :  { %18704 = vmatprep.subr.bf16.mxu0 %v25636_v35  ;;  %18739 = vmatprep.subr.bf16.mxu1 %v25639_v26  ;;  %v25700_v35 = vld [vmem:[#allocation11 + $0x520] ss:$24 sps:$4 sm:$0xff]   ;;  %v25711_v26 = vld [vmem:[#allocation11 + $0x734] ss:$24 sps:$4 sm:$0xff]  }
 0x963   :  { %18705 = vmatpush1.bf16.msra.mxu0 %v25634_v21  ;;  %v25708_v21 = vld [vmem:[#allocation11 + $0x4f4] ss:$24 sps:$4 sm:$0xff]  }
 0x964   :  { %18740 = vmatpush1.bf16.msra.mxu1 %v25637_v60  ;;  %18706 = vmatprep.subr.bf16.mxu0 %v25642_v10  ;;  %v25709_v60 = vld [vmem:[#allocation11 + $0x730] ss:$24 sps:$4 sm:$0xff]  }
 0x965   :  { %18741 = vmatprep.subr.bf16.mxu1 %v25645_v17  ;;  %v25706_v10 = vld [vmem:[#allocation11 + $0x4f0] ss:$24 sps:$4 sm:$0xff]   ;;  %v25717_v17 = vld [vmem:[#allocation11 + $0x704] ss:$24 sps:$4 sm:$0xff]  }
 0x967   :  { %18707 = vmatpush1.bf16.msra.mxu0 %v25640_v3  ;;  %v25714_v3 = vld [vmem:[#allocation11 + $0x4c4] ss:$24 sps:$4 sm:$0xff]  }
 0x968   :  { %18742 = vmatpush1.bf16.msra.mxu1 %v25643_v62  ;;  %18708 = vmatprep.subr.bf16.mxu0 %v25648_v6  ;;  %v25715_v62 = vld [vmem:[#allocation11 + $0x700] ss:$24 sps:$4 sm:$0xff]  }
 0x969   :  { %18743 = vmatprep.subr.bf16.mxu1 %v25651_v54  ;;  %v25712_v6 = vld [vmem:[#allocation11 + $0x4c0] ss:$24 sps:$4 sm:$0xff]   ;;  %v25723_v54 = vld [vmem:[#allocation11 + $0x6d4] ss:$24 sps:$4 sm:$0xff]  }
 0x96b   :  { %18709 = vmatpush1.bf16.msra.mxu0 %v25646_v43  ;;  %v25720_v43 = vld [vmem:[#allocation11 + $0x494] ss:$24 sps:$4 sm:$0xff]  }
 0x96c   :  { %18744 = vmatpush1.bf16.msra.mxu1 %v25649_v57  ;;  %18710 = vmatprep.subr.bf16.mxu0 %v25654_v12  ;;  %v25718_v57 = vld [vmem:[#allocation11 + $0x490] ss:$24 sps:$4 sm:$0xff]   ;;  %v25729_v12 = vld [vmem:[#allocation11 + $0xa64] ss:$24 sps:$4 sm:$0xff]  }
 0x96d   :  { %18745 = vmatprep.subr.bf16.mxu1 %v25657_v46  ;;  %v25724_v46 = vld [vmem:[#allocation11 + $0x6a0] ss:$24 sps:$4 sm:$0xff]  }
 0x96f   :  { %18711 = vmatpush2.bf16.msra.mxu0 %v25652_v59  ;;  %v25727_v59 = vld [vmem:[#allocation11 + $0xa60] ss:$24 sps:$4 sm:$0xff]  }
 0x970   :  { %18746 = vmatpush1.bf16.msra.mxu1 %v25655_v27  ;;  %18712 = vmatprep.subr.bf16.mxu0 %v25660_v58  ;;  %v25732_v27 = vld [vmem:[#allocation11 + $0x674] ss:$24 sps:$4 sm:$0xff]  }
 0x971   :  { %18747 = vmatprep.subr.bf16.mxu1 %v25663_v24  ;;  %v25735_v58 = vld [vmem:[#allocation11 + $0xa34] ss:$24 sps:$4 sm:$0xff]   ;;  %v25730_v24 = vld [vmem:[#allocation11 + $0x670] ss:$24 sps:$4 sm:$0xff]  }
 0x973   :  { %18713 = vmatpush2.bf16.msra.mxu0 %v25658_v34  ;;  %v25733_v34 = vld [vmem:[#allocation11 + $0xa30] ss:$24 sps:$4 sm:$0xff]  }
 0x974   :  { %18748 = vmatpush1.bf16.msra.mxu1 %v25661_v16  ;;  %18714 = vmatprep.subr.bf16.mxu0 %v25666_v8  ;;  %v25738_v16 = vld [vmem:[#allocation11 + $0x644] ss:$24 sps:$4 sm:$0xff]  }
 0x975   :  { %18749 = vmatprep.subr.bf16.mxu1 %v25669_v41  ;;  %v25741_v8 = vld [vmem:[#allocation11 + $0xa04] ss:$24 sps:$4 sm:$0xff]   ;;  %v25736_v41 = vld [vmem:[#allocation11 + $0x640] ss:$24 sps:$4 sm:$0xff]  }
 0x977   :  { %18715 = vmatpush2.bf16.msra.mxu0 %v25664_v48  ;;  %v25739_v48 = vld [vmem:[#allocation11 + $0xa00] ss:$24 sps:$4 sm:$0xff]  }
 0x978   :  { %18750 = vmatpush1.bf16.msra.mxu1 %v25667_v42  ;;  %18716 = vmatprep.subr.bf16.mxu0 %v25672_v40  ;;  %v25744_v42 = vld [vmem:[#allocation11 + $0x614] ss:$24 sps:$4 sm:$0xff]  }
 0x979   :  { %18751 = vmatprep.subr.bf16.mxu1 %v25675_v9  ;;  %v25747_v40 = vld [vmem:[#allocation11 + $0x9d4] ss:$24 sps:$4 sm:$0xff]   ;;  %v25745_v9 = vld [vmem:[#allocation11 + $0x9d0] ss:$24 sps:$4 sm:$0xff]  }
 0x97b   :  { %18717 = vmatpush2.bf16.msra.mxu0 %v25670_v51  ;;  %v25750_v51 = vld [vmem:[#allocation11 + $0x8e4] ss:$24 sps:$4 sm:$0xff]  }
 0x97c   :  { %18752 = vmatpush1.bf16.msra.mxu1 %v25673_v23  ;;  %18718 = vmatprep.subr.bf16.mxu0 %v25678_v61  ;;  %v25748_v23 = vld [vmem:[#allocation11 + $0x8e0] ss:$24 sps:$4 sm:$0xff]  }
 0x97d   :  { %18753 = vmatprep.subr.bf16.mxu1 %v25681_v53  ;;  %v25751_v61 = vld [vmem:[#allocation11 + $0x9a0] ss:$24 sps:$4 sm:$0xff]   ;;  %v25756_v53 = vld [vmem:[#allocation11 + $0x8b4] ss:$24 sps:$4 sm:$0xff]  }
 0x97f   :  { %18719 = vmatpush2.bf16.msra.mxu0 %v25676_v28  ;;  %v25759_v28 = vld [vmem:[#allocation11 + $0x974] ss:$24 sps:$4 sm:$0xff]  }
 0x980   :  { %18754 = vmatpush2.bf16.msra.mxu1 %v25679_v19  ;;  %18720 = vmatprep.subr.bf16.mxu0 %v25684_v13  ;;  %v25754_v19 = vld [vmem:[#allocation11 + $0x8b0] ss:$24 sps:$4 sm:$0xff]  }
 0x981   :  { %18755 = vmatprep.subr.bf16.mxu1 %v25687_v18  ;;  %v25757_v13 = vld [vmem:[#allocation11 + $0x970] ss:$24 sps:$4 sm:$0xff]   ;;  %v25762_v18 = vld [vmem:[#allocation11 + $0x884] ss:$24 sps:$4 sm:$0xff]  }
 0x983   :  { %18721 = vmatpush2.bf16.msra.mxu0 %v25682_v33  ;;  %v25765_v33 = vld [vmem:[#allocation11 + $0x944] ss:$24 sps:$4 sm:$0xff]  }
 0x984   :  { %18756 = vmatpush2.bf16.msra.mxu1 %v25685_v2  ;;  %18722 = vmatprep.subr.bf16.mxu0 %v25690_v49  ;;  %v25760_v2 = vld [vmem:[#allocation11 + $0x880] ss:$24 sps:$4 sm:$0xff]  }
 0x985   :  { %18757 = vmatprep.subr.bf16.mxu1 %v25693_v36  ;;  %v25763_v49 = vld [vmem:[#allocation11 + $0x940] ss:$24 sps:$4 sm:$0xff]   ;;  %v25768_v36 = vld [vmem:[#allocation11 + $0x854] ss:$24 sps:$4 sm:$0xff]  }
 0x987   :  { %18723 = vmatpush2.bf16.msra.mxu0 %v25688_v31  ;;  %v25771_v31 = vld [vmem:[#allocation11 + $0x914] ss:$24 sps:$4 sm:$0xff]  }
 0x988   :  { %18758 = vmatpush2.bf16.msra.mxu1 %v25691_v30  ;;  %18724 = vmatprep.subr.bf16.mxu0 %v25696_v29  ;;  %v25766_v30 = vld [vmem:[#allocation11 + $0x850] ss:$24 sps:$4 sm:$0xff]  }
 0x989   :  { %18759 = vmatprep.subr.bf16.mxu1 %v25699_v45  ;;  %v25769_v29 = vld [vmem:[#allocation11 + $0x910] ss:$24 sps:$4 sm:$0xff]   ;;  %v25774_v45 = vld [vmem:[#allocation11 + $0x824] ss:$24 sps:$4 sm:$0xff]  }
 0x98b   :  { %18725 = vmatpush2.bf16.msra.mxu0 %v25694_v14  ;;  %v25777_v14 = vld [vmem:[#allocation11 + $0xbe4] ss:$24 sps:$4 sm:$0xff]  }
 0x98c   :  { %18760 = vmatpush2.bf16.msra.mxu1 %v25697_v56  ;;  %18780 = vmatprep.subr.bf16.mxu0 %v25705_v4  ;;  %v25772_v56 = vld [vmem:[#allocation11 + $0x820] ss:$24 sps:$4 sm:$0xff]  }
 0x98d   :  { %18761 = vmatprep.subr.bf16.mxu1 %v25702_v39  ;;  %v25775_v4 = vld [vmem:[#allocation11 + $0xbe0] ss:$24 sps:$4 sm:$0xff]   ;;  %v25780_v39 = vld [vmem:[#allocation11 + $0x7f4] ss:$24 sps:$4 sm:$0xff]  }
 0x98e   :  { %18727 = vmatmul.mubr.bf16.vlgmr.msra.gmra.mxu0 %v27392_v47  ;;  %v25721_v47 = vld [vmem:[#allocation11 + $0x6d0] ss:$24 sps:$4 sm:$0xff]  }
 0x98f   :  { %18781 = vmatpush1.bf16.msra.mxu0 %v25703_v7  ;;  %18812 = vmatprep.mubr.bf16.mxu0 %v26994_v55  ;;  %v25726_v55 = vld [vmem:[#allocation11 + $0x6a4] ss:$24 sps:$4 sm:$0xff]   ;;  %v25783_v7 = vld [vmem:[#allocation11 + $0xbb4] ss:$24 sps:$4 sm:$0xff]  }
 0x990   :  { %18762 = vmatpush2.bf16.msra.mxu1 %v25700_v35  ;;  %18782 = vmatprep.subr.bf16.mxu0 %v25711_v26  ;;  %v25778_v35 = vld [vmem:[#allocation11 + $0x7f0] ss:$24 sps:$4 sm:$0xff]  }
 0x991   :  { %18763 = vmatprep.subr.bf16.mxu1 %v25708_v21  ;;  %v25781_v26 = vld [vmem:[#allocation11 + $0xbb0] ss:$24 sps:$4 sm:$0xff]   ;;  %v25786_v21 = vld [vmem:[#allocation11 + $0x7c4] ss:$24 sps:$4 sm:$0xff]  }
 0x993   :  { %18783 = vmatpush1.bf16.msra.mxu0 %v25709_v60  ;;  %v25789_v60 = vld [vmem:[#allocation11 + $0xb84] ss:$24 sps:$4 sm:$0xff]  }
 0x994   :  { %18764 = vmatpush2.bf16.msra.mxu1 %v25706_v10  ;;  %18784 = vmatprep.subr.bf16.mxu0 %v25717_v17  ;;  %v25784_v10 = vld [vmem:[#allocation11 + $0x7c0] ss:$24 sps:$4 sm:$0xff]  }
 0x995   :  { %18765 = vmatprep.subr.bf16.mxu1 %v25714_v3  ;;  %v25787_v17 = vld [vmem:[#allocation11 + $0xb80] ss:$24 sps:$4 sm:$0xff]   ;;  %v25792_v3 = vld [vmem:[#allocation11 + $0x794] ss:$24 sps:$4 sm:$0xff]  }
 0x997   :  { %18785 = vmatpush1.bf16.msra.mxu0 %v25715_v62  ;;  %v25795_v62 = vld [vmem:[#allocation11 + $0xb54] ss:$24 sps:$4 sm:$0xff]  }
 0x998   :  { %18766 = vmatpush2.bf16.msra.mxu1 %v25712_v6  ;;  %18786 = vmatprep.subr.bf16.mxu0 %v25723_v54  ;;  %v25790_v6 = vld [vmem:[#allocation11 + $0x790] ss:$24 sps:$4 sm:$0xff]  }
 0x999   :  { %18767 = vmatprep.subr.bf16.mxu1 %v25720_v43  ;;  %v25793_v54 = vld [vmem:[#allocation11 + $0xb50] ss:$24 sps:$4 sm:$0xff]   ;;  %v25801_v43 = vld [vmem:[#allocation11 + $0xd64] ss:$24 sps:$4 sm:$0xff]  }
 0x99b   :  { %18787 = vmatpush1.bf16.msra.mxu0 %v25721_v47  ;;  %v25798_v47 = vld [vmem:[#allocation11 + $0xb24] ss:$24 sps:$4 sm:$0xff]  }
 0x99c   :  { %18768 = vmatpush2.bf16.msra.mxu1 %v25718_v57  ;;  %18788 = vmatprep.subr.bf16.mxu0 %v25726_v55  ;;  %v25799_v57 = vld [vmem:[#allocation11 + $0xd60] ss:$24 sps:$4 sm:$0xff]  }
 0x99d   :  { %18823 = vmatprep.subr.bf16.mxu1 %v25729_v12  ;;  %v25796_v55 = vld [vmem:[#allocation11 + $0xb20] ss:$24 sps:$4 sm:$0xff]   ;;  %v25807_v12 = vld [vmem:[#allocation11 + $0xd34] ss:$24 sps:$4 sm:$0xff]  }
 0x99f   :  { %18770 = vmatmul.mubr.bf16.vlgmr.msra.gmra.mxu1 %v27399_v50  ;;  %18789 = vmatpush1.bf16.msra.mxu0 %v25724_v46  ;;  %v25742_v50 = vld [vmem:[#allocation11 + $0x610] ss:$24 sps:$4 sm:$0xff]   ;;  %v25804_v46 = vld [vmem:[#allocation11 + $0xaf4] ss:$24 sps:$4 sm:$0xff]  }
 0x9a0   :  { %18824 = vmatpush1.bf16.msra.mxu1 %v25727_v59  ;;  %18855 = vmatprep.mubr.bf16.mxu1 %v27007_v32  ;;  %v25753_v32 = vld [vmem:[#allocation11 + $0x9a4] ss:$24 sps:$4 sm:$0xff]   ;;  %v27126_v59 = vpop.f32.mrf.mxu0 }
 0x9a1   :  { %18790 = vmatprep.subr.bf16.mxu0 %v25732_v27  ;;  %18825 = vmatprep.subr.bf16.mxu1 %v25735_v58  ;;  %v25805_v27 = vld [vmem:[#allocation11 + $0xd30] ss:$24 sps:$4 sm:$0xff]   ;;  %v27130_v58 = vpop.f32.mrf.mxu1 }
 0x9a3   :  { %18791 = vmatpush1.bf16.msra.mxu0 %v25730_v24  ;;  %v25802_v24 = vld [vmem:[#allocation11 + $0xaf0] ss:$24 sps:$4 sm:$0xff]  }
 0x9a4   :  { %18826 = vmatpush1.bf16.msra.mxu1 %v25733_v34  ;;  %18792 = vmatprep.subr.bf16.mxu0 %v25738_v16  ;;  %v25813_v34 = vld [vmem:[#allocation11 + $0xd04] ss:$24 sps:$4 sm:$0xff]  }
 0x9a5   :  { %18827 = vmatprep.subr.bf16.mxu1 %v25741_v8  ;;  %v25810_v16 = vld [vmem:[#allocation11 + $0xac4] ss:$24 sps:$4 sm:$0xff]   ;;  %v27132_v8 = vpop.f32.mrf.mxu0 }
 0x9a7   :  { %18793 = vmatpush1.bf16.msra.mxu0 %v25736_v41  ;;  %v25811_v41 = vld [vmem:[#allocation11 + $0xd00] ss:$24 sps:$4 sm:$0xff]  }
 0x9a8   :  { %18828 = vmatpush1.bf16.msra.mxu1 %v25739_v48  ;;  %18794 = vmatprep.subr.bf16.mxu0 %v25744_v42  ;;  %v27134_v48 = vpop.f32.mrf.mxu1  ;;  %v25819_v42 = vld [vmem:[#allocation11 + $0xcd4] ss:$24 sps:$4 sm:$0xff]  }
 0x9a9   :  { %18829 = vmatprep.subr.bf16.mxu1 %v25747_v40  ;;  %v27136_v40 = vpop.f32.mrf.mxu0 }
 0x9ab   :  { %18795 = vmatpush1.bf16.msra.mxu0 %v25742_v50  ;;  %v25817_v50 = vld [vmem:[#allocation11 + $0xcd0] ss:$24 sps:$4 sm:$0xff]  }
 0x9ac   :  { %18830 = vmatpush1.bf16.msra.mxu1 %v25745_v9  ;;  %18796 = vmatprep.subr.bf16.mxu0 %v25750_v51  ;;  %v27138_v9 = vpop.f32.mrf.mxu1  ;;  %v25814_v51 = vld [vmem:[#allocation11 + $0xa90] ss:$24 sps:$4 sm:$0xff]  }
 0x9ad   :  { %18831 = vmatprep.subr.bf16.mxu1 %v25753_v32  ;;  %v25822_v32 = vld [vmem:[#allocation11 + $0xca4] ss:$24 sps:$4 sm:$0xff]  }
 0x9af   :  { %18797 = vmatpush2.bf16.msra.mxu0 %v25748_v23  ;;  %v25825_v23 = vld [vmem:[#allocation11 + $0x1064] ss:$24 sps:$4 sm:$0xff]  }
 0x9b0   :  { %18832 = vmatpush1.bf16.msra.mxu1 %v25751_v61  ;;  %18798 = vmatprep.subr.bf16.mxu0 %v25756_v53  ;;  %v27140_v61 = vpop.f32.mrf.mxu0  ;;  %v25820_v53 = vld [vmem:[#allocation11 + $0xca0] ss:$24 sps:$4 sm:$0xff]  }
 0x9b1   :  { %18833 = vmatprep.subr.bf16.mxu1 %v25759_v28  ;;  %v27142_v28 = vpop.f32.mrf.mxu1 }
 0x9b3   :  { %18799 = vmatpush2.bf16.msra.mxu0 %v25754_v19  ;;  %v27144_v19 = vpop.f32.mrf.mxu0 }
 0x9b4   :  { %18834 = vmatpush1.bf16.msra.mxu1 %v25757_v13  ;;  %18800 = vmatprep.subr.bf16.mxu0 %v25762_v18  ;;  %v25823_v13 = vld [vmem:[#allocation11 + $0x1060] ss:$24 sps:$4 sm:$0xff]   ;;  %v25828_v18 = vld [vmem:[#allocation11 + $0xc74] ss:$24 sps:$4 sm:$0xff]  }
 0x9b5   :  { %18835 = vmatprep.subr.bf16.mxu1 %v25765_v33  ;;  %v25831_v33 = vld [vmem:[#allocation11 + $0x1034] ss:$24 sps:$4 sm:$0xff]  }
 0x9b7   :  { %18801 = vmatpush2.bf16.msra.mxu0 %v25760_v2  ;;  %v27146_v2 = vpop.f32.mrf.mxu1 }
 0x9b8   :  { %18836 = vmatpush1.bf16.msra.mxu1 %v25763_v49  ;;  %18802 = vmatprep.subr.bf16.mxu0 %v25768_v36  ;;  %v25826_v49 = vld [vmem:[#allocation11 + $0xc70] ss:$24 sps:$4 sm:$0xff]   ;;  %v27149_v36 = vpop.f32.mrf.mxu0 }
 0x9b9   :  { %18837 = vmatprep.subr.bf16.mxu1 %v25771_v31  ;;  %v25829_v31 = vld [vmem:[#allocation11 + $0x1030] ss:$24 sps:$4 sm:$0xff]  }
 0x9bb   :  { %18803 = vmatpush2.bf16.msra.mxu0 %v25766_v30  ;;  %v25834_v30 = vld [vmem:[#allocation11 + $0xc44] ss:$24 sps:$4 sm:$0xff]  }
 0x9bc   :  { %18838 = vmatpush1.bf16.msra.mxu1 %v25769_v29  ;;  %18804 = vmatprep.subr.bf16.mxu0 %v25774_v45  ;;  %v25837_v29 = vld [vmem:[#allocation11 + $0x1004] ss:$24 sps:$4 sm:$0xff]   ;;  %v27152_v45 = vpop.f32.mrf.mxu1 }
 0x9bd   :  { %18839 = vmatprep.subr.bf16.mxu1 %v25777_v14  ;;  %v25832_v14 = vld [vmem:[#allocation11 + $0xc40] ss:$24 sps:$4 sm:$0xff]  }
 0x9bf   :  { %18805 = vmatpush2.bf16.msra.mxu0 %v25772_v56  ;;  %v27154_v56 = vpop.f32.mrf.mxu0 }
 0x9c0   :  { %18840 = vmatpush2.bf16.msra.mxu1 %v25775_v4  ;;  %18806 = vmatprep.subr.bf16.mxu0 %v25780_v39  ;;  %v25840_v4 = vld [vmem:[#allocation11 + $0xc14] ss:$24 sps:$4 sm:$0xff]  }
 0x9c1   :  { %18841 = vmatprep.subr.bf16.mxu1 %v25783_v7  ;;  %v25843_v39 = vld [vmem:[#allocation11 + $0xfd4] ss:$24 sps:$4 sm:$0xff]   ;;  %v27156_v7 = vpop.f32.mrf.mxu1 }
 0x9c3   :  { %18807 = vmatpush2.bf16.msra.mxu0 %v25778_v35  ;;  %v27158_v35 = vpop.f32.mrf.mxu0 }
 0x9c4   :  { %18842 = vmatpush2.bf16.msra.mxu1 %v25781_v26  ;;  %18808 = vmatprep.subr.bf16.mxu0 %v25786_v21  ;;  %v25841_v26 = vld [vmem:[#allocation11 + $0xfd0] ss:$24 sps:$4 sm:$0xff]   ;;  %v25846_v21 = vld [vmem:[#allocation11 + $0xee4] ss:$24 sps:$4 sm:$0xff]  }
 0x9c5   :  { %18843 = vmatprep.subr.bf16.mxu1 %v25789_v60  ;;  %v25849_v60 = vld [vmem:[#allocation11 + $0xfa4] ss:$24 sps:$4 sm:$0xff]  }
 0x9c7   :  { %18809 = vmatpush2.bf16.msra.mxu0 %v25784_v10  ;;  %v27160_v10 = vpop.f32.mrf.mxu1 }
 0x9c8   :  { %18844 = vmatpush2.bf16.msra.mxu1 %v25787_v17  ;;  %18810 = vmatprep.subr.bf16.mxu0 %v25792_v3  ;;  %v27162_v17 = vpop.f32.mrf.mxu0  ;;  %v25844_v3 = vld [vmem:[#allocation11 + $0xee0] ss:$24 sps:$4 sm:$0xff]  }
 0x9c9   :  { %18845 = vmatprep.subr.bf16.mxu1 %v25795_v62  ;;  %v27164_v62 = vpop.f32.mrf.mxu1 }
 0x9cb   :  { %18811 = vmatpush2.bf16.msra.mxu0 %v25790_v6  ;;  %v25847_v6 = vld [vmem:[#allocation11 + $0xfa0] ss:$24 sps:$4 sm:$0xff]  }
 0x9cc   :  { %18846 = vmatpush2.bf16.msra.mxu1 %v25793_v54  ;;  %18866 = vmatprep.subr.bf16.mxu0 %v25801_v43  ;;  %v25852_v54 = vld [vmem:[#allocation11 + $0xeb4] ss:$24 sps:$4 sm:$0xff]  }
 0x9cd   :  { %18847 = vmatprep.subr.bf16.mxu1 %v25798_v47  ;;  %v25855_v43 = vld [vmem:[#allocation11 + $0xf74] ss:$24 sps:$4 sm:$0xff]   ;;  %v27166_v47 = vpop.f32.mrf.mxu0 }
 0x9ce   :  { %18813 = vmatmul.mubr.bf16.vlgmr.msra.gmra.mxu0 %v27409_v63  ;;  %v25808_v63 = vld [vmem:[#allocation11 + $0xac0] ss:$24 sps:$4 sm:$0xff]  }
 0x9cf   :  { %18867 = vmatpush1.bf16.msra.mxu0 %v25799_v57  ;;  %18898 = vmatprep.mubr.bf16.mxu0 %v27036_v38  ;;  %v25816_v38 = vld [vmem:[#allocation11 + $0xa94] ss:$24 sps:$4 sm:$0xff]   ;;  %v25850_v57 = vld [vmem:[#allocation11 + $0xeb0] ss:$24 sps:$4 sm:$0xff]  }
 0x9d0   :  { %18848 = vmatpush2.bf16.msra.mxu1 %v25796_v55  ;;  %18868 = vmatprep.subr.bf16.mxu0 %v25807_v12  ;;  %v27168_v55 = vpop.f32.mrf.mxu1  ;;  %v25853_v12 = vld [vmem:[#allocation11 + $0xf70] ss:$24 sps:$4 sm:$0xff]  }
 0x9d1   :  { %18849 = vmatprep.subr.bf16.mxu1 %v25804_v46  ;;  %v25858_v46 = vld [vmem:[#allocation11 + $0xe84] ss:$24 sps:$4 sm:$0xff]  }
 0x9d3   :  { %18869 = vmatpush1.bf16.msra.mxu0 %v25805_v27  ;;  %v25861_v27 = vld [vmem:[#allocation11 + $0xf44] ss:$24 sps:$4 sm:$0xff]  }
 0x9d4   :  { %18850 = vmatpush2.bf16.msra.mxu1 %v25802_v24  ;;  %18870 = vmatprep.subr.bf16.mxu0 %v25813_v34  ;;  %v27170_v24 = vpop.f32.mrf.mxu0  ;;  %v25856_v34 = vld [vmem:[#allocation11 + $0xe80] ss:$24 sps:$4 sm:$0xff]  }
 0x9d5   :  { %18851 = vmatprep.subr.bf16.mxu1 %v25810_v16  ;;  %v27172_v16 = vpop.f32.mrf.mxu1 }
 0x9d7   :  { %18871 = vmatpush1.bf16.msra.mxu0 %v25811_v41  ;;  %v25859_v41 = vld [vmem:[#allocation11 + $0xf40] ss:$24 sps:$4 sm:$0xff]  }
 0x9d8   :  { %18852 = vmatpush2.bf16.msra.mxu1 %v25808_v63  ;;  %18872 = vmatprep.subr.bf16.mxu0 %v25819_v42  ;;  %v25864_v63 = vld [vmem:[#allocation11 + $0xe54] ss:$24 sps:$4 sm:$0xff]  }
 0x9d9   :  { %18853 = vmatprep.subr.bf16.mxu1 %v25816_v38  ;;  %v25867_v42 = vld [vmem:[#allocation11 + $0xf14] ss:$24 sps:$4 sm:$0xff]   ;;  %v27174_v38 = vpop.f32.mrf.mxu0 }
 0x9db   :  { %18873 = vmatpush1.bf16.msra.mxu0 %v25817_v50  ;;  %v25862_v50 = vld [vmem:[#allocation11 + $0xe50] ss:$24 sps:$4 sm:$0xff]  }
 0x9dc   :  { %18854 = vmatpush2.bf16.msra.mxu1 %v25814_v51  ;;  %18874 = vmatprep.subr.bf16.mxu0 %v25822_v32  ;;  %v27176_v51 = vpop.f32.mrf.mxu1  ;;  %v27178_v32 = vpop.f32.mrf.mxu0 }
 0x9dd   :  { %18909 = vmatprep.subr.bf16.mxu1 %v25825_v23  ;;  %v25865_v23 = vld [vmem:[#allocation11 + $0xf10] ss:$24 sps:$4 sm:$0xff]  }
 0x9df   :  { %18856 = vmatmul.mubr.bf16.vlgmr.msra.gmra.mxu1 %v27410_v15  ;;  %18875 = vmatpush1.bf16.msra.mxu0 %v25820_v53  ;;  %v25835_v15 = vld [vmem:[#allocation11 + $0x1000] ss:$24 sps:$4 sm:$0xff]   ;;  %v25870_v53 = vld [vmem:[#allocation11 + $0xe24] ss:$24 sps:$4 sm:$0xff]  }
 0x9e0   :  { %18910 = vmatpush1.bf16.msra.mxu1 %v25823_v13  ;;  %18941 = vmatprep.mubr.bf16.mxu1 %v27047_v44  ;;  %v25838_v44 = vld [vmem:[#allocation11 + $0xc10] ss:$24 sps:$4 sm:$0xff]   ;;  %v25873_v13 = vld [vmem:[#allocation11 + $0x11e4] ss:$24 sps:$4 sm:$0xff]  }
 0x9e1   :  { %18876 = vmatprep.subr.bf16.mxu0 %v25828_v18  ;;  %18911 = vmatprep.subr.bf16.mxu1 %v25831_v33  ;;  %v27180_v18 = vpop.f32.mrf.mxu1  ;;  %v25868_v33 = vld [vmem:[#allocation11 + $0xe20] ss:$24 sps:$4 sm:$0xff]  }
 0x9e3   :  { %18877 = vmatpush1.bf16.msra.mxu0 %v25826_v49  ;;  %v27182_v49 = vpop.f32.mrf.mxu0 }
 0x9e4   :  { %18912 = vmatpush1.bf16.msra.mxu1 %v25829_v31  ;;  %18878 = vmatprep.subr.bf16.mxu0 %v25834_v30  ;;  %v25871_v31 = vld [vmem:[#allocation11 + $0x11e0] ss:$24 sps:$4 sm:$0xff]   ;;  %v25876_v30 = vld [vmem:[#allocation11 + $0xdf4] ss:$24 sps:$4 sm:$0xff]  }
 0x9e5   :  { %18913 = vmatprep.subr.bf16.mxu1 %v25837_v29  ;;  %v25879_v29 = vld [vmem:[#allocation11 + $0x11b4] ss:$24 sps:$4 sm:$0xff]  }
 0x9e7   :  { %18879 = vmatpush1.bf16.msra.mxu0 %v25832_v14  ;;  %v27184_v14 = vpop.f32.mrf.mxu1 }
 0x9e8   :  { %18914 = vmatpush1.bf16.msra.mxu1 %v25835_v15  ;;  %18880 = vmatprep.subr.bf16.mxu0 %v25840_v4  ;;  %v25874_v15 = vld [vmem:[#allocation11 + $0xdf0] ss:$24 sps:$4 sm:$0xff]   ;;  %v27186_v4 = vpop.f32.mrf.mxu0 }
 0x9e9   :  { %18915 = vmatprep.subr.bf16.mxu1 %v25843_v39  ;;  %v25877_v39 = vld [vmem:[#allocation11 + $0x11b0] ss:$24 sps:$4 sm:$0xff]  }
 0x9eb   :  { %18881 = vmatpush1.bf16.msra.mxu0 %v25838_v44  ;;  %v25882_v44 = vld [vmem:[#allocation11 + $0xdc4] ss:$24 sps:$4 sm:$0xff]  }
 0x9ec   :  { %18916 = vmatpush1.bf16.msra.mxu1 %v25841_v26  ;;  %18882 = vmatprep.subr.bf16.mxu0 %v25846_v21  ;;  %v25885_v26 = vld [vmem:[#allocation11 + $0x1184] ss:$24 sps:$4 sm:$0xff]   ;;  %v27188_v21 = vpop.f32.mrf.mxu1 }
 0x9ed   :  { %18917 = vmatprep.subr.bf16.mxu1 %v25849_v60  ;;  %v25880_v60 = vld [vmem:[#allocation11 + $0xdc0] ss:$24 sps:$4 sm:$0xff]  }
 0x9ef   :  { %18883 = vmatpush2.bf16.msra.mxu0 %v25844_v3  ;;  %v27190_v3 = vld [vmem:[#allocation12] sm:$0x3f] }
 0x9f0   :  { %18918 = vmatpush1.bf16.msra.mxu1 %v25847_v6  ;;  %18884 = vmatprep.subr.bf16.mxu0 %v25852_v54  ;;  %v18390_v6 = vpop.f32.mrf.mxu0  ;;  %v25883_v54 = vld [vmem:[#allocation11 + $0x1180] ss:$24 sps:$4 sm:$0xff]  }
 0x9f1   :  { %18919 = vmatprep.subr.bf16.mxu1 %v25855_v43  ;;  %v25888_v43 = vld [vmem:[#allocation11 + $0xd94] ss:$24 sps:$4 sm:$0xff]  }
 0x9f3   :  { %18885 = vmatpush2.bf16.msra.mxu0 %v25850_v57  ;;  %v14709_v57 = vrot.slane %v27190_v3, %v26481_v1 }
 0x9f4   :  { %18920 = vmatpush1.bf16.msra.mxu1 %v25853_v12  ;;  %18886 = vmatprep.subr.bf16.mxu0 %v25858_v46  ;;  %v25891_v12 = vld [vmem:[#allocation11 + $0x1154] ss:$24 sps:$4 sm:$0xff]   ;;  %v27194_v46 = vpop.f32.mrf.mxu1 }
 0x9f5   :  { %18921 = vmatprep.subr.bf16.mxu1 %v25861_v27  ;;  %v27196_v27 = vpop.f32.mrf.mxu0 }
 0x9f7   :  { %18887 = vmatpush2.bf16.msra.mxu0 %v25856_v34  ;;  %v18133_v34 = vadd.f32 %v27140_v61, %v14709_v57 }
 0x9f8   :  { %18922 = vmatpush1.bf16.msra.mxu1 %v25859_v41  ;;  %18888 = vmatprep.subr.bf16.mxu0 %v25864_v63  ;;  %v25886_v41 = vld [vmem:[#allocation11 + $0xd90] ss:$24 sps:$4 sm:$0xff]   ;;  %v27199_v63 = vpop.f32.mrf.mxu1 }
 0x9f9   :  { %18923 = vmatprep.subr.bf16.mxu1 %v25867_v42  ;;  %v25889_v42 = vld [vmem:[#allocation11 + $0x1150] ss:$24 sps:$4 sm:$0xff]   ;;  %v18176_v1 = vadd.f32 %v27142_v28, %v18133_v34 }
 0x9fb   :  { %18889 = vmatpush2.bf16.msra.mxu0 %v25862_v50  ;;  %v25897_v50 = vld [vmem:[#allocation11 + $0x1364] ss:$24 sps:$4 sm:$0xff]   ;;  %v18219_v61 = vadd.f32 %v27158_v35, %v18176_v1 }
 0x9fc   :  { %18924 = vmatpush1.bf16.msra.mxu1 %v25865_v23  ;;  %18890 = vmatprep.subr.bf16.mxu0 %v25870_v53  ;;  %v18129_v23 = vadd.f32 %v27132_v8, %v14709_v57  ;;  %v25894_v53 = vld [vmem:[#allocation11 + $0x1124] ss:$24 sps:$4 sm:$0xff]  }
 0x9fd   :  { %18925 = vmatprep.subr.bf16.mxu1 %v25873_v13  ;;  %v27203_v13 = vpop.f32.mrf.mxu0  ;;  %v18262_v28 = vadd.f32 %v27160_v10, %v18219_v61  ;;  %v25909_v10 = vld [vmem:[#allocation11 + $0x1304] ss:$24 sps:$4 sm:$0xff]  }
 0x9ff   :  { %18891 = vmatpush2.bf16.msra.mxu0 %v25868_v33  ;;  %v18172_v33 = vadd.f32 %v27134_v48, %v18129_v23  ;;  %v18305_v35 = vadd.f32 %v27174_v38, %v18262_v28  ;;  %v25920_v28 = vld [vmem:[#allocation14 + $0x38] sm:$0xff]  }
 0xa00   :  { %18926 = vmatpush2.bf16.msra.mxu1 %v25871_v31  ;;  %18892 = vmatprep.subr.bf16.mxu0 %v25876_v30  ;;  %v25895_v31 = vld [vmem:[#allocation11 + $0x1360] ss:$24 sps:$4 sm:$0xff]   ;;  %v27207_v30 = vpop.f32.mrf.mxu1 }
 0xa01   :  { %18927 = vmatprep.subr.bf16.mxu1 %v25879_v29  ;;  %v25892_v29 = vld [vmem:[#allocation11 + $0x1120] ss:$24 sps:$4 sm:$0xff]   ;;  %v18215_v8 = vadd.f32 %v27149_v36, %v18172_v33  ;;  %v25898_v36 = vld [vmem:[#allocation11 + $0x10f0] ss:$24 sps:$4 sm:$0xff]   ;;  %v25918_v33 = vld [vmem:[#allocation11 + $0x12a4] ss:$24 sps:$4 sm:$0xff]  }
 0xa03   :  { %18893 = vmatpush2.bf16.msra.mxu0 %v25874_v15  ;;  %v25903_v15 = vld [vmem:[#allocation11 + $0x1334] ss:$24 sps:$4 sm:$0xff]   ;;  %v18258_v48 = vadd.f32 %v27152_v45, %v18215_v8 }
 0xa04   :  { %18928 = vmatpush2.bf16.msra.mxu1 %v25877_v39  ;;  %18894 = vmatprep.subr.bf16.mxu0 %v25882_v44  ;;  %v25900_v39 = vld [vmem:[#allocation11 + $0x10f4] ss:$24 sps:$4 sm:$0xff]   ;;  %v27213_v44 = vpop.f32.mrf.mxu0 }
 0xa05   :  { %18929 = vmatprep.subr.bf16.mxu1 %v25885_v26  ;;  %v25901_v26 = vld [vmem:[#allocation11 + $0x1330] ss:$24 sps:$4 sm:$0xff]  }
 0xa06   :  { %v27223_v45 = vpop.f32.mrf.mxu0 }
 0xa07   :  { %18895 = vmatpush2.bf16.msra.mxu0 %v25880_v60  ;;  %v27219_v60 = vpop.f32.mrf.mxu1 }
 0xa08   :  { %18930 = vmatpush2.bf16.msra.mxu1 %v25883_v54  ;;  %18896 = vmatprep.subr.bf16.mxu0 %v25888_v43  ;;  %v18301_v54 = vadd.f32 %v27166_v47, %v18258_v48  ;;  %v18348_v43 = vadd.f32 %v27176_v51, %v18305_v35  ;;  %v27228_v34 = vpop.f32.mrf.mxu0  ;;  %v25915_v47 = vld [vmem:[#allocation11 + $0x12d4] ss:$24 sps:$4 sm:$0xff]  }
 0xa09   :  { %18931 = vmatprep.subr.bf16.mxu1 %v25891_v12  ;;  %v27226_v12 = vpop.f32.mrf.mxu1  ;;  %v25923_v48 = vld [vmem:[#allocation11 + $0x1274] ss:$24 sps:$4 sm:$0xff]  }
 0xa0a   :  { %v18344_v38 = vadd.f32 %v27168_v55, %v18301_v54  ;;  %v18391_v57 = vadd.f32 %v18390_v6, %v18348_v43  ;;  %v25913_v6 = vld [vmem:[#allocation11 + $0x12d0] ss:$24 sps:$4 sm:$0xff]   ;;  %v27237_v1 = vpop.f32.mrf.mxu0  ;;  %v25924_v35 = vld [vmem:[#allocation14 + $0x70] sm:$0xff]  }
 0xa0b   :  { %18897 = vmatpush2.bf16.msra.mxu0 %v25886_v41  ;;  %v25904_v41 = vld [vmem:[#allocation11 + $0x10c0] ss:$24 sps:$4 sm:$0xff]   ;;  %v27234_v23 = vpop.f32.mrf.mxu1 }
 0xa0c   :  { %18932 = vmatpush2.bf16.msra.mxu1 %v25889_v42  ;;  %18952 = vmatprep.subr.bf16.mxu0 %v25897_v50  ;;  %v18387_v51 = vadd.f32 %v27182_v49, %v18344_v38  ;;  %v25912_v42 = vld [vmem:[#allocation11 + $0x1094] ss:$24 sps:$4 sm:$0xff]   ;;  %v27232_v50 = vstv %s27211_s7  ;;  %vm19003_vm4 = vcmp.gt.f32.partialorder %v18391_v57, 0.0  ;;  %v25919_v49 = vld [vmem:[#allocation14 + $0x78] sm:$0xff]   ;;  %v27242_v8 = vpop.f32.mrf.mxu0 }
 0xa0d   :  { %18933 = vmatprep.subr.bf16.mxu1 %v25894_v53  ;;  %v19016_v55 = vmul.f32 %v27232_v50, %v18391_v57  ;;  %v25910_v53 = vld [vmem:[#allocation11 + $0x1090] ss:$24 sps:$4 sm:$0xff]   ;;  %v25925_v43 = vld [vmem:[#allocation14 + $0x30] sm:$0xff]  }
 0xa0e   :  { %18899 = vmatmul.mubr.bf16.vlgmr.msra.gmra.mxu0 %v26876_v22  ;;  %v25906_v22 = vld [vmem:[#allocation11 + $0x10c4] ss:$24 sps:$4 sm:$0xff]   ;;  %v19010_v61 = vmul.f32 %v27232_v50, %v18387_v51  ;;  %vm18997_vm5 = vcmp.gt.f32.partialorder %v18387_v51, 0.0  ;;  %v18562_v54 = vpop.f32.mrf.mxu0  ;;  %v25929_v38 = vld [vmem:[#allocation14 + $0x68] sm:$0xff]  }
 0xa0f   :  { %18953 = vmatpush1.bf16.msra.mxu0 %v25895_v31  ;;  %18984 = vmatprep.mubr.bf16.mxu0 %v27085_v11  ;;  %v25907_v11 = vld [vmem:[#allocation11 + $0x1300] ss:$24 sps:$4 sm:$0xff]   ;;  %v27240_v31 = vpop.f32.mrf.mxu1 }
 0xa10   :  { %18934 = vmatpush2.bf16.msra.mxu1 %v25892_v29  ;;  %18954 = vmatprep.subr.bf16.mxu0 %v25903_v15  ;;  %v25916_v29 = vld [vmem:[#allocation11 + $0x12a0] ss:$24 sps:$4 sm:$0xff]   ;;  %v19028_v15 = vsel %vm19003_vm4, %v18391_v57, %v19016_v55  ;;  %v25933_v55 = vld [vmem:[#allocation11 + $0x1214] ss:$24 sps:$4 sm:$0xff]  }
 0xa11   :  { %18935 = vmatprep.subr.bf16.mxu1 %v25900_v39  ;;  %v19022_v39 = vsel %vm18997_vm5, %v18387_v51, %v19010_v61 }
 0xa13   :  { %18955 = vmatpush1.bf16.msra.mxu0 %v25901_v26  ;;  %v27244_v26 = vpop.f32.mrf.mxu1 }
 0xa14   :  { %18936 = vmatpush2.bf16.msra.mxu1 %v25898_v36  ;;  %18956 = vmatprep.subr.bf16.mxu0 %v25909_v10  ;;  %v19034_v36 = vpack.c.bf16 %v19028_v15, %v19022_v39  ;;  %v25921_v10 = vld [vmem:[#allocation11 + $0x1270] ss:$24 sps:$4 sm:$0xff]  }
 0xa15   :  { %18937 = vmatprep.subr.bf16.mxu1 %v25906_v22  ;;  %v25928_v22 = vld [vmem:[#allocation11 + $0x1244] ss:$24 sps:$4 sm:$0xff]   ;;  %v18605_v57 = vpop.f32.mrf.mxu1 }
 0xa17   :  { %18957 = vmatpush1.bf16.msra.mxu0 %v25907_v11  ;;  %v27247_v11 = vpop.f32.mrf.mxu0 }
 0xa18   :  { %18938 = vmatpush2.bf16.msra.mxu1 %v25904_v41  ;;  %18958 = vmatprep.subr.bf16.mxu0 %v25915_v47  ;;  %v25926_v41 = vld [vmem:[#allocation11 + $0x1240] ss:$24 sps:$4 sm:$0xff]   ;;  %v27412_v47 = vld [vmem:[#allocation24_spill] sm:$0xff] }
 0xa19   :  { %18939 = vmatprep.subr.bf16.mxu1 %v25912_v42  ;;  %v14705_v51 = vrot.slane %v27190_v3, %v27412_v47  ;;  %v18644_v61 = vpop.f32.mrf.mxu0 }
 0xa1b   :  { %18959 = vmatpush1.bf16.msra.mxu0 %v25913_v6  ;;  %v14717_v6 = vrot.slane %v27190_v3, %v26477_v0  ;;  %v18127_v15 = vadd.f32 %v27126_v59, %v14705_v51 }
 0xa1c   :  { %18940 = vmatpush2.bf16.msra.mxu1 %v25910_v53  ;;  %18960 = vmatprep.subr.bf16.mxu0 %v25918_v33  ;;  %v25934_v53 = vld [vmem:[#allocation14 + $0x60] sm:$0xff]   ;;  %v18131_v33 = vadd.f32 %v27136_v40, %v14705_v51  ;;  %v25939_v40 = vld [vmem:[#allocation14 + $0x58] sm:$0xff]   ;;  %v25944_v51 = vld [vmem:[#allocation14 + $0x50] sm:$0xff]  }
 0xa1d   :  { %22117 = vmatprep.subr.bf16.mxu1 %v25919_v49  ;;  %v18434_v49 = vadd.f32 %v27194_v46, %v14717_v6  ;;  %v18430_v0 = vadd.f32 %v27184_v14, %v14717_v6 }
 0xa1f   :  { %18942 = vmatmul.mubr.bf16.vlgmr.msra.gmra.mxu1 %v26968_v5  ;;  %18961 = vmatpush1.bf16.msra.mxu0 %v25916_v29  ;;  %v27251_v42 = vpop.f32.mrf.mxu1  ;;  %v25930_v5 = vld [vmem:[#allocation14 + $0x28] sm:$0xff]   ;;  %v18473_v59 = vadd.f32 %v27203_v13, %v18430_v0 }
 0xa20   :  { %22118 = vmatpush3.bf16.msra.mxu1 %v25920_v28  ;;  %19462 = vmatprep.mubr.bf16.mxu1 %v19034_v36  ;;  %v25931_v29 = vld [vmem:[#allocation11 + $0x1210] ss:$24 sps:$4 sm:$0xff]   ;;  %v18174_v28 = vadd.f32 %v27138_v9, %v18131_v33  ;;  %v18477_v36 = vadd.f32 %v27223_v45, %v18434_v49  ;;  %v25940_v45 = vld [vmem:[#allocation14 + $0x18] sm:$0xff]  }
 0xa21   :  { %18962 = vmatprep.subr.bf16.mxu0 %v25923_v48  ;;  %22119 = vmatprep.subr.bf16.mxu1 %v25924_v35  ;;  %v18687_v39 = vpop.f32.mrf.mxu1  ;;  %v25935_v48 = vld [vmem:[#allocation14 + $0x20] sm:$0xff]  }
 0xa22   :  { %v25938_v35 = vld [vmem:[#allocation11 + $0x14e4] ss:$24 sps:$4 sm:$0xff]   ;;  %v18217_v46 = vadd.f32 %v27154_v56, %v18174_v28  ;;  %v18520_v9 = vadd.f32 %v27226_v12, %v18477_v36  ;;  %v18516_v56 = vadd.f32 %v27207_v30, %v18473_v59  ;;  %v25950_v28 = vld [vmem:[#allocation14 + $0x8] sm:$0xff]  }
 0xa23   :  { %18963 = vmatpush1.bf16.msra.mxu0 %v25921_v10  ;;  %v18170_v10 = vadd.f32 %v27130_v58, %v18127_v15  ;;  %v25943_v58 = vld [vmem:[#allocation11 + $0x14b4] ss:$24 sps:$4 sm:$0xff]   ;;  %v25958_v36 = vld [vmem:[#allocation11 + $0x1424] ss:$24 sps:$4 sm:$0xff]  }
 0xa24   :  { %22120 = vmatpush3.bf16.msra.mxu1 %v25925_v43  ;;  %18964 = vmatprep.subr.bf16.mxu0 %v25928_v22  ;;  %v27263_v43 = vpop.f32.mrf.mxu0  ;;  %v25936_v22 = vld [vmem:[#allocation11 + $0x14e0] ss:$24 sps:$4 sm:$0xff]   ;;  %v18260_v14 = vadd.f32 %v27156_v7, %v18217_v46  ;;  %v18563_v47 = vadd.f32 %v18562_v54, %v18520_v9  ;;  %v25941_v7 = vld [vmem:[#allocation11 + $0x14b0] ss:$24 sps:$4 sm:$0xff]   ;;  %v25948_v54 = vld [vmem:[#allocation11 + $0x1484] ss:$24 sps:$4 sm:$0xff]  }
 0xa25   :  { %22121 = vmatprep.subr.bf16.mxu1 %v25929_v38  ;;  %v18213_v38 = vadd.f32 %v27144_v19, %v18170_v10  ;;  %v18559_v19 = vadd.f32 %v27237_v1, %v18516_v56  ;;  %v25945_v30 = vld [vmem:[#allocation14 + $0x10] sm:$0xff]  }
 0xa26   :  { %v18303_v12 = vadd.f32 %v27170_v24, %v18260_v14  ;;  %v25949_v24 = vld [vmem:[#allocation14 + $0x48] sm:$0xff]   ;;  %v25956_v46 = vld [vmem:[#allocation11 + $0x1420] ss:$24 sps:$4 sm:$0xff]  }
 0xa27   :  { %18965 = vmatpush1.bf16.msra.mxu0 %v25926_v41  ;;  %v27269_v41 = vpop.f32.mrf.mxu1  ;;  %v18256_v13 = vadd.f32 %v27146_v2, %v18213_v38  ;;  %v18602_v49 = vadd.f32 %v27240_v31, %v18559_v19  ;;  %v25954_v31 = vld [vmem:[#allocation14 + $0x40] sm:$0xff]   ;;  %v14713_v19 = vrot.slane %v27190_v3, %v26407_v52 }
 0xa28   :  { %22122 = vmatpush3.bf16.msra.mxu1 %v25930_v5  ;;  %18966 = vmatprep.subr.bf16.mxu0 %v25933_v55  ;;  %v18648_v5 = vpop.f32.mrf.mxu0  ;;  %v18606_v55 = vadd.f32 %v18605_v57, %v18563_v47  ;;  %v25961_v47 = vld [vmem:[#allocation11 + $0x13f0] ss:$24 sps:$4 sm:$0xff]  }
 0xa29   :  { %22123 = vmatprep.subr.bf16.mxu1 %v25934_v53  ;;  %v18299_v6 = vadd.f32 %v27162_v17, %v18256_v13  ;;  %v18346_v53 = vadd.f32 %v27172_v16, %v18303_v12  ;;  %v18691_v33 = vpop.f32.mrf.mxu1  ;;  %v18645_v57 = vadd.f32 %v18644_v61, %v18602_v49  ;;  %v25946_v17 = vld [vmem:[#allocation11 + $0x1480] ss:$24 sps:$4 sm:$0xff]   ;;  %v25968_v13 = vld [vmem:[#allocation11 + $0x13c4] ss:$24 sps:$4 sm:$0xff]   ;;  %v25969_v12 = vld [vmem:[#allocation14 + $0xe8] sm:$0xff]  }
 0xa2a   :  { %v18649_v2 = vadd.f32 %v18648_v5, %v18606_v55  ;;  %v25966_v5 = vld [vmem:[#allocation11 + $0x13c0] ss:$24 sps:$4 sm:$0xff]   ;;  %v25970_v55 = vld [vmem:[#allocation14 + $0xa8] sm:$0xff]   ;;  %v25975_v49 = vld [vmem:[#allocation14 + $0xa0] sm:$0xff]  }
 0xa2b   :  { %18967 = vmatpush1.bf16.msra.mxu0 %v25931_v29  ;;  %v18342_v29 = vadd.f32 %v27164_v62, %v18299_v6  ;;  %v18389_v1 = vadd.f32 %v27186_v4, %v18346_v53  ;;  %v25951_v4 = vld [vmem:[#allocation11 + $0x1450] ss:$24 sps:$4 sm:$0xff]   ;;  %v18432_v53 = vadd.f32 %v27188_v21, %v14713_v19 }
 0xa2c   :  { %22124 = vmatpush3.bf16.msra.mxu1 %v25935_v48  ;;  %18968 = vmatprep.subr.bf16.mxu0 %v25938_v35  ;;  %v18692_v15 = vadd.f32 %v18691_v33, %v18649_v2  ;;  %v25953_v48 = vld [vmem:[#allocation11 + $0x1454] ss:$24 sps:$4 sm:$0xff]   ;;  %v18688_v35 = vadd.f32 %v18687_v39, %v18645_v57  ;;  %v25959_v39 = vld [vmem:[#allocation14 + $0xf8] sm:$0xff]   ;;  %v25971_v33 = vld [vmem:[#allocation11 + $0x1390] ss:$24 sps:$4 sm:$0xff]  }
 0xa2d   :  { %22125 = vmatprep.subr.bf16.mxu1 %v25939_v40  ;;  %v18385_v16 = vadd.f32 %v27178_v32, %v18342_v29  ;;  %v19015_v0 = vmul.f32 %v27232_v50, %v18389_v1  ;;  %vm19002_vm6 = vcmp.gt.f32.partialorder %v18389_v1, 0.0  ;;  %v25955_v32 = vld [vmem:[#allocation14] sm:$0xff]   ;;  %v25976_v2 = vld [vmem:[#allocation14 + $0xd8] sm:$0xff]  }
 0xa2e   :  { %v19018_v62 = vmul.f32 %v27232_v50, %v18692_v15  ;;  %vm19005_vm7 = vcmp.gt.f32.partialorder %v18692_v15, 0.0  ;;  %v19012_v40 = vmul.f32 %v27232_v50, %v18688_v35  ;;  %vm18999_vm9 = vcmp.gt.f32.partialorder %v18688_v35, 0.0  ;;  %v25974_v6 = vld [vmem:[#allocation14 + $0xe0] sm:$0xff]  }
 0xa2f   :  { %18969 = vmatpush2.bf16.msra.mxu0 %v25936_v22  ;;  %v19009_v61 = vmul.f32 %v27232_v50, %v18385_v16  ;;  %vm18996_vm8 = vcmp.gt.f32.partialorder %v18385_v16, 0.0  ;;  %v19027_v10 = vsel %vm19002_vm6, %v18389_v1, %v19015_v0  ;;  %v25960_v22 = vld [vmem:[#allocation14 + $0xb8] sm:$0xff]   ;;  %v25988_v0 = vld [vmem:[#allocation14 + $0x168] sm:$0xff]  }
 0xa30   :  { %22126 = vmatpush3.bf16.msra.mxu1 %v25940_v45  ;;  %18970 = vmatprep.subr.bf16.mxu0 %v25943_v58  ;;  %v19030_v59 = vsel %vm19005_vm7, %v18692_v15, %v19018_v62  ;;  %v19024_v14 = vsel %vm18999_vm9, %v18688_v35, %v19012_v40  ;;  %v25963_v45 = vld [vmem:[#allocation11 + $0x13f4] ss:$24 sps:$4 sm:$0xff]   ;;  %v25977_v1 = vld [vmem:[#allocation14 + $0x98] sm:$0xff]  }
 0xa31   :  { %22127 = vmatprep.subr.bf16.mxu1 %v25944_v51  ;;  %v19021_v9 = vsel %vm18996_vm8, %v18385_v16, %v19009_v61  ;;  %v25964_v58 = vld [vmem:[#allocation14 + $0xf0] sm:$0xff]   ;;  %v19036_v56 = vpack.c.bf16 %v19030_v59, %v19024_v14  ;;  %v25989_v62 = vld [vmem:[#allocation14 + $0x128] sm:$0xff]   ;;  %v25991_v61 = vld [vmem:[#allocation14 + $0x120] sm:$0xff]  }
 0xa32   :  { %v19033_v38 = vpack.c.bf16 %v19027_v10, %v19021_v9  ;;  %v25965_v51 = vld [vmem:[#allocation14 + $0xb0] sm:$0xff]   ;;  %v25996_v10 = vld [vmem:[#allocation14 + $0x148] sm:$0xff]   ;;  %v25998_v59 = vld [vmem:[#allocation14 + $0x140] sm:$0xff]  }
 0xa33   :  { %18971 = vmatpush2.bf16.msra.mxu0 %v25941_v7  ;;  %v25973_v7 = vld [vmem:[#allocation11 + $0x1394] ss:$24 sps:$4 sm:$0xff]  }
 0xa34   :  { %22128 = vmatpush3.bf16.msra.mxu1 %v25945_v30  ;;  %18972 = vmatprep.subr.bf16.mxu0 %v25948_v54  ;;  %v18428_v30 = vadd.f32 %v27180_v18, %v14713_v19  ;;  %v18475_v54 = vadd.f32 %v27213_v44, %v18432_v53  ;;  %v25978_v18 = vld [vmem:[#allocation14 + $0xd0] sm:$0xff]   ;;  %v25999_v9 = vld [vmem:[#allocation14 + $0x100] sm:$0xff]  }
 0xa35   :  { %22129 = vmatprep.subr.bf16.mxu1 %v25949_v24  ;;  %v25986_v35 = vld [vmem:[#allocation14 + $0x170] sm:$0xff]  }
 0xa36   :  { %v18471_v52 = vadd.f32 %v27196_v27, %v18428_v30  ;;  %v18518_v24 = vadd.f32 %v27219_v60, %v18475_v54  ;;  %v25979_v60 = vld [vmem:[#allocation14 + $0x90] sm:$0xff]   ;;  %v14721_v30 = vrot.slane %v27190_v3, %v27411_v37 }
 0xa37   :  { %18973 = vmatpush2.bf16.msra.mxu0 %v25946_v17  ;;  %v25994_v40 = vld [vmem:[#allocation14 + $0x150] sm:$0xff]  }
 0xa38   :  { %22130 = vmatpush3.bf16.msra.mxu1 %v25950_v28  ;;  %18974 = vmatprep.subr.bf16.mxu0 %v25953_v48  ;;  %v18514_v29 = vadd.f32 %v27199_v63, %v18471_v52  ;;  %v18561_v21 = vadd.f32 %v27242_v8, %v18518_v24  ;;  %v25980_v63 = vld [vmem:[#allocation14 + $0xc8] sm:$0xff]  }
 0xa39   :  { %22131 = vmatprep.subr.bf16.mxu1 %v25954_v31  ;;  %v25987_v31 = vld [vmem:[#allocation14 + $0x130] sm:$0xff]  }
 0xa3a   :  { %v18557_v44 = vadd.f32 %v27228_v34, %v18514_v29  ;;  %v18604_v57 = vadd.f32 %v27244_v26, %v18561_v21  ;;  %v25981_v34 = vld [vmem:[#allocation14 + $0x88] sm:$0xff]   ;;  %v25982_v26 = vld [vmem:[#allocation14 + $0xc0] sm:$0xff]  }
 0xa3b   :  { %18975 = vmatpush2.bf16.msra.mxu0 %v25951_v4  ;;  %v25990_v4 = vld [vmem:[#allocation14 + $0x160] sm:$0xff]  }
 0xa3c   :  { %22132 = vmatpush3.bf16.msra.mxu1 %v25955_v32  ;;  %18976 = vmatprep.subr.bf16.mxu0 %v25958_v36  ;;  %v18600_v15 = vadd.f32 %v27234_v23, %v18557_v44  ;;  %v18647_v27 = vadd.f32 %v27263_v43, %v18604_v57  ;;  %v25983_v43 = vld [vmem:[#allocation14 + $0x80] sm:$0xff]   ;;  %v25992_v32 = vld [vmem:[#allocation14 + $0x158] sm:$0xff]  }
 0xa3d   :  { %22139 = vmatprep.subr.bf16.mxu1 %v25959_v39  ;;  %v25993_v36 = vld [vmem:[#allocation14 + $0x118] sm:$0xff]   ;;  %v25995_v39 = vld [vmem:[#allocation14 + $0x110] sm:$0xff]  }
 0xa3e   :  { %v18643_v8 = vadd.f32 %v27247_v11, %v18600_v15  ;;  %v18690_v17 = vadd.f32 %v27269_v41, %v18647_v27  ;;  %v25984_v41 = vld [vmem:[#allocation14 + $0x178] sm:$0xff]  }
 0xa3f   :  { %19463 = vmatmul.mubr.bf16.vlgmr.msra.gmra.mxu1 %v19033_v38  ;;  %18977 = vmatpush2.bf16.msra.mxu0 %v25956_v46  ;;  %v25997_v46 = vld [vmem:[#allocation14 + $0x108] sm:$0xff]  }
 0xa40   :  { %22140 = vmatpush3.bf16.msra.mxu1 %v25960_v22  ;;  %19503 = vmatprep.mubr.bf16.mxu1 %v19036_v56  ;;  %v18686_v16 = vadd.f32 %v27251_v42, %v18643_v8  ;;  %vm19004_vm10 = vcmp.gt.f32.partialorder %v18690_v17, 0.0  ;;  %v25985_v42 = vld [vmem:[#allocation14 + $0x138] sm:$0xff]  }
 0xa41   :  { %18978 = vmatprep.subr.bf16.mxu0 %v25963_v45  ;;  %22141 = vmatprep.subr.bf16.mxu1 %v25964_v58 }
 0xa42   :  { %v19011_v23 = vmul.f32 %v27232_v50, %v18686_v16  ;;  %vm18998_vm11 = vcmp.gt.f32.partialorder %v18686_v16, 0.0 }
 0xa43   :  { %18979 = vmatpush2.bf16.msra.mxu0 %v25961_v47 }
 0xa44   :  { %22142 = vmatpush3.bf16.msra.mxu1 %v25965_v51  ;;  %18980 = vmatprep.subr.bf16.mxu0 %v25968_v13  ;;  %v19023_v48 = vsel %vm18998_vm11, %v18686_v16, %v19011_v23 }
 0xa45   :  { %22143 = vmatprep.subr.bf16.mxu1 %v25969_v12 }
 0xa47   :  { %18981 = vmatpush2.bf16.msra.mxu0 %v25966_v5 }
 0xa48   :  { %22144 = vmatpush3.bf16.msra.mxu1 %v25970_v55  ;;  %18982 = vmatprep.subr.bf16.mxu0 %v25973_v7 }
 0xa49   :  { %22145 = vmatprep.subr.bf16.mxu1 %v25974_v6 }
 0xa4b   :  { %18983 = vmatpush2.bf16.msra.mxu0 %v25971_v33  ;;  %v14725_v33 = vrot.slane %v27190_v3, %v26528_v20 }
 0xa4c   :  { %22146 = vmatpush3.bf16.msra.mxu1 %v25975_v49  ;;  %22161 = vmatprep.subr.bf16.mxu0 %v25984_v41 }
 0xa4d   :  { %22147 = vmatprep.subr.bf16.mxu1 %v25976_v2 }
 0xa4e   :  { %18985 = vmatmul.mubr.bf16.vlgmr.msra.gmra.mxu0 %v27104_v25  ;;  %v19017_v25 = vmul.f32 %v27232_v50, %v18690_v17  ;;  %v18728_v22 = vpop.f32.mrf.mxu0 }
 0xa4f   :  { %22162 = vmatpush3.bf16.msra.mxu0 %v25985_v42  ;;  %v18729_v24 = vadd.f32 %v18728_v22, %v14721_v30 }
 0xa50   :  { %22148 = vmatpush3.bf16.msra.mxu1 %v25977_v1  ;;  %v19029_v28 = vsel %vm19004_vm10, %v18690_v17, %v19017_v25  ;;  %22163 = vmatprep.subr.bf16.mxu0 %v25986_v35  ;;  %v18730_v38 = vpop.f32.mrf.mxu0 }
 0xa51   :  { %22149 = vmatprep.subr.bf16.mxu1 %v25978_v18  ;;  %v19035_v11 = vpack.c.bf16 %v19029_v28, %v19023_v48  ;;  %v18731_v52 = vadd.f32 %v18730_v38, %v14725_v33 }
 0xa52   :  { %v18732_v45 = vpop.f32.mrf.mxu0 }
 0xa53   :  { %22164 = vmatpush3.bf16.msra.mxu0 %v25987_v31  ;;  %v18733_v29 = vadd.f32 %v18732_v45, %v14721_v30 }
 0xa54   :  { %22150 = vmatpush3.bf16.msra.mxu1 %v25979_v60  ;;  %22165 = vmatprep.subr.bf16.mxu0 %v25988_v0  ;;  %v18734_v56 = vpop.f32.mrf.mxu0 }
 0xa55   :  { %22151 = vmatprep.subr.bf16.mxu1 %v25980_v63  ;;  %v18735_v57 = vadd.f32 %v18734_v56, %v14725_v33 }
 0xa57   :  { %22166 = vmatpush3.bf16.msra.mxu0 %v25989_v62 }
 0xa58   :  { %22152 = vmatpush3.bf16.msra.mxu1 %v25981_v34  ;;  %22167 = vmatprep.subr.bf16.mxu0 %v25990_v4 }
 0xa59   :  { %22153 = vmatprep.subr.bf16.mxu1 %v25982_v26 }
 0xa5b   :  { %22168 = vmatpush3.bf16.msra.mxu0 %v25991_v61 }
 0xa5c   :  { %22154 = vmatpush3.bf16.msra.mxu1 %v25983_v43  ;;  %22169 = vmatprep.subr.bf16.mxu0 %v25992_v32 }
 0xa5f   :  { %19504 = vmatmul.mubr.bf16.vlgmr.msra.gmra.mxu1 %v19035_v11  ;;  %22170 = vmatpush3.bf16.msra.mxu0 %v25993_v36  ;;  %v18771_v14 = vpop.f32.mrf.mxu1 }
 0xa60   :  { %22171 = vmatprep.subr.bf16.mxu0 %v25994_v40  ;;  %v18772_v1 = vadd.f32 %v18771_v14, %v18729_v24 }
 0xa61   :  { %v18773_v58 = vpop.f32.mrf.mxu1 }
 0xa62   :  { %v18774_v21 = vadd.f32 %v18773_v58, %v18731_v52 }
 0xa63   :  { %22172 = vmatpush3.bf16.msra.mxu0 %v25995_v39  ;;  %v18775_v47 = vpop.f32.mrf.mxu1 }
 0xa64   :  { %22173 = vmatprep.subr.bf16.mxu0 %v25996_v10  ;;  %v18776_v15 = vadd.f32 %v18775_v47, %v18733_v29 }
 0xa65   :  { %v18777_v13 = vpop.f32.mrf.mxu1 }
 0xa66   :  { %v18778_v63 = vadd.f32 %v18777_v13, %v18735_v57 }
 0xa67   :  { %22174 = vmatpush3.bf16.msra.mxu0 %v25997_v46 }
 0xa68   :  { %22175 = vmatprep.subr.bf16.mxu0 %v25998_v59 }
 0xa6b   :  { %22176 = vmatpush3.bf16.msra.mxu0 %v25999_v9 }
 0xa8e   :  { %v18814_v51 = vpop.f32.mrf.mxu0 }
 0xa8f   :  { %v18815_v60 = vadd.f32 %v18814_v51, %v18772_v1 }
 0xa90   :  { %v18816_v12 = vpop.f32.mrf.mxu0 }
 0xa91   :  { %v18817_v27 = vadd.f32 %v18816_v12, %v18774_v21 }
 0xa92   :  { %v18818_v19 = vpop.f32.mrf.mxu0 }
 0xa93   :  { %v18819_v8 = vadd.f32 %v18818_v19, %v18776_v15 }
 0xa94   :  { %v18820_v7 = vpop.f32.mrf.mxu0 }
 0xa95   :  { %v18821_v3 = vadd.f32 %v18820_v7, %v18778_v63  ;;  %v22068_v7 = vld [vmem:[#allocation15] ss:$0 sm:$0xff] }
 0xa9f   :  { %v18857_v5 = vpop.f32.mrf.mxu1 }
 0xaa0   :  { %v18858_v17 = vadd.f32 %v18857_v5, %v18815_v60 }
 0xaa1   :  { %v18859_v55 = vpop.f32.mrf.mxu1 }
 0xaa2   :  { %v18860_v20 = vadd.f32 %v18859_v55, %v18817_v27 }
 0xaa3   :  { %v18861_v6 = vpop.f32.mrf.mxu1 }
 0xaa4   :  { %v18862_v34 = vadd.f32 %v18861_v6, %v18819_v8 }
 0xaa5   :  { %v18863_v54 = vpop.f32.mrf.mxu1 }
 0xaa6   :  { %v18864_v43 = vadd.f32 %v18863_v54, %v18821_v3 }
 0xace   :  { %v18900_v53 = vpop.f32.mrf.mxu0 }
 0xacf   :  { %v18901_v25 = vadd.f32 %v18900_v53, %v18858_v17 }
 0xad0   :  { %v18902_v49 = vpop.f32.mrf.mxu0 }
 0xad1   :  { %v18903_v26 = vadd.f32 %v18902_v49, %v18860_v20 }
 0xad2   :  { %v18904_v18 = vpop.f32.mrf.mxu0 }
 0xad3   :  { %v18905_v28 = vadd.f32 %v18904_v18, %v18862_v34 }
 0xad4   :  { %v18906_v16 = vpop.f32.mrf.mxu0 }
 0xad5   :  { %v18907_v35 = vadd.f32 %v18906_v16, %v18864_v43 }
 0xadf   :  { %v18943_v2 = vpop.f32.mrf.mxu1 }
 0xae0   :  { %v18944_v11 = vadd.f32 %v18943_v2, %v18901_v25 }
 0xae1   :  { %v18945_v44 = vpop.f32.mrf.mxu1 }
 0xae2   :  { %v18946_v48 = vadd.f32 %v18945_v44, %v18903_v26 }
 0xae3   :  { %v18947_v37 = vpop.f32.mrf.mxu1 }
 0xae4   :  { %v18948_v31 = vadd.f32 %v18947_v37, %v18905_v28 }
 0xae5   :  { %v18949_v41 = vpop.f32.mrf.mxu1 }
 0xae6   :  { %v18950_v61 = vadd.f32 %v18949_v41, %v18907_v35 }
 0xaff   :  { %v22133_v56 = vpop.f32.mrf.mxu1 }
 0xb01   :  { %v22134_v47 = vpop.f32.mrf.mxu1 }
 0xb02   :  { %v22135_v55 = vadd.f32 %v22134_v47, %v22133_v56 }
 0xb03   :  { %v22136_v51 = vpop.f32.mrf.mxu1 }
 0xb04   :  { %v19465_v33 = vadd.f32 %v22135_v55, %v22068_v7 }
 0xb05   :  { %v22137_v13 = vpop.f32.mrf.mxu1 }
 0xb06   :  { %v22138_v30 = vadd.f32 %v22137_v13, %v22136_v51 }
 0xb08   :  { %v19468_v29 = vadd.f32 %v22138_v30, %v22068_v7 }
 0xb0e   :  { %v18986_v23 = vpop.f32.mrf.mxu0 }
 0xb0f   :  { %v18987_v62 = vadd.f32 %v18986_v23, %v18944_v11 }
 0xb10   :  { %v18988_v42 = vpop.f32.mrf.mxu0 }
 0xb11   :  { %v18989_v0 = vadd.f32 %v18988_v42, %v18946_v48  ;;  %v19013_v46 = vmul.f32 %v27232_v50, %v18987_v62  ;;  %vm19000_vm14 = vcmp.gt.f32.partialorder %v18987_v62, 0.0 }
 0xb12   :  { %v18990_v4 = vpop.f32.mrf.mxu0 }
 0xb13   :  { %v18991_v32 = vadd.f32 %v18990_v4, %v18948_v31  ;;  %v19014_v40 = vmul.f32 %v27232_v50, %v18989_v0  ;;  %vm19001_vm13 = vcmp.gt.f32.partialorder %v18989_v0, 0.0  ;;  %v19025_v14 = vsel %vm19000_vm14, %v18987_v62, %v19013_v46 }
 0xb14   :  { %v18992_v36 = vpop.f32.mrf.mxu0 }
 0xb15   :  { %vm19006_vm12 = vcmp.gt.f32.partialorder %v18991_v32, 0.0  ;;  %v19019_v39 = vmul.f32 %v27232_v50, %v18991_v32  ;;  %v18993_v10 = vadd.f32 %v18992_v36, %v18950_v61  ;;  %v19026_v22 = vsel %vm19001_vm13, %v18989_v0, %v19014_v40 }
 0xb17   :  { %vm19007_vm15 = vcmp.gt.f32.partialorder %v18993_v10, 0.0  ;;  %v19020_v59 = vmul.f32 %v27232_v50, %v18993_v10  ;;  %v19031_v9 = vsel %vm19006_vm12, %v18991_v32, %v19019_v39 }
 0xb18   :  { %v19037_v58 = vpack.c.bf16 %v19031_v9, %v19025_v14 }
 0xb19   :  { %v19032_v38 = vsel %vm19007_vm15, %v18993_v10, %v19020_v59 }
 0xb1a   :  { %v19038_v45 = vpack.c.bf16 %v19032_v38, %v19026_v22 }
 0xb1c   :  { %19544 = vmatprep.mubr.bf16.mxu0 %v19038_v45 }
 0xb1d   :  { %19545 = vmatmul.mubr.bf16.vlgmr.msra.gmra.mxu0 %v19037_v58 }
 0xb1f   :  { %v22155_v12 = vpop.f32.mrf.mxu1 }
 0xb21   :  { %v22156_v5 = vpop.f32.mrf.mxu1 }
 0xb22   :  { %v22157_v6 = vadd.f32 %v22156_v5, %v22155_v12 }
 0xb23   :  { %v22158_v19 = vpop.f32.mrf.mxu1 }
 0xb24   :  { %v19506_v49 = vadd.f32 %v22157_v6, %v19465_v33 }
 0xb25   :  { %v22159_v53 = vpop.f32.mrf.mxu1 }
 0xb26   :  { %v22160_v2 = vadd.f32 %v22159_v53, %v22158_v19 }
 0xb28   :  { %v19509_v18 = vadd.f32 %v22160_v2, %v19468_v29 }
 0xbdd   :  { %v22177_v50 = vpop.f32.mrf.mxu0 }
 0xbdf   :  { %v22178_v54 = vpop.f32.mrf.mxu0 }
 0xbe0   :  { %v22179_v52 = vadd.f32 %v22178_v54, %v22177_v50 }
 0xbe1   :  { %v22180_v24 = vpop.f32.mrf.mxu0 }
 0xbe2   :  { %v19547_v21 = vadd.f32 %v22179_v52, %v19506_v49 }
 0xbe3   :  { %v22181_v1 = vpop.f32.mrf.mxu0 }
 0xbe4   :  { %19553 = vst [vmem:[%s27328_s10] sm:$0xff] %v19547_v21  ;;  %v22182_v44 = vadd.f32 %v22181_v1, %v22180_v24 }
 0xbe6   :  { %v19550_v57 = vadd.f32 %v22182_v44, %v19509_v18 }
 0xbe8   :  { %19554 = vst [vmem:[%s27328_s10 + $0x8] sm:$0xff] %v19550_v57 }
 0xbe9   :  { %19559 = vsyncpa [#allocation3], 1 }
 0xbea   :  { %19560 = vsyncpa [#allocation7], 1 }
 0xbeb   :  { %19561 = vsyncpa [#allocation10], 1 }
 0xbec   :  { %19562 = vsyncpa [#allocation13], 1 }
 0xbed   :  { %19563 = vsyncpa [#allocation16], 1 }
 0xbee   :  { %19564 = vsyncpa [#allocation4], 1 }

</bundles_post_ra>
